<compile_context>
chip_gen: v7x
topology: tpu7x:2x2x1
jax: 0.10.0
libtpu: 0.0.40
codegen_flags: <defaults>
</compile_context>

<pallas_src>
import functools

import jax
import jax.numpy as jnp
from jax.experimental import pallas as pl
from jax.experimental.pallas import tpu as pltpu

BN_EPS = 1e-5


def _round_up(x, m):
    return ((x + m - 1) // m) * m


# --------------------------------------------------------------------------------------
# Pallas kernels
# --------------------------------------------------------------------------------------

def _mm_kernel_nores(relu, x_ref, w_ref, b_ref, o_ref):
    # (tm, K) bf16 @ (K, C) bf16 on the MXU with f32 accumulation, + bias (+ ReLU).
    y = jnp.dot(x_ref[...], w_ref[...], preferred_element_type=jnp.float32)
    y = y + b_ref[...]
    if relu:
        y = jnp.maximum(y, 0.0)
    o_ref[...] = y.astype(o_ref.dtype)


def _mm_kernel_res(relu_before_add, relu_after_add, x_ref, w_ref, b_ref, r_ref, o_ref):
    # Same matmul epilogue but with a fused residual / skip add.
    y = jnp.dot(x_ref[...], w_ref[...], preferred_element_type=jnp.float32)
    y = y + b_ref[...]
    if relu_before_add:
        y = jnp.maximum(y, 0.0)
    y = y + r_ref[...].astype(jnp.float32)
    if relu_after_add:
        y = jnp.maximum(y, 0.0)
    o_ref[...] = y.astype(o_ref.dtype)


def matmul_bias_act(x, w, bias, *, relu=False, residual=None, relu_before_add=False,
                    out_dtype=jnp.bfloat16, tm=256):
    """y = epilogue((x @ w) + bias).  x:(M,K)  w:(K,C)  bias:(C,)  residual:(M,C) or None.

    Operands are cast to bf16 (weights already carry the folded BN scale); accumulation is
    f32 on the MXU.  Tiled over M so the pipeline double-buffers and megacore can shard.
    """
    M, K = x.shape
    Kw, C = w.shape
    assert K == Kw

    Mp8 = _round_up(M, 8)
    tm = min(tm, Mp8)
    # Ensure >= 2 grid steps when cheap so v7x megacore has something to split.
    if Mp8 <= tm and Mp8 >= 16 and Mp8 % 16 == 0:
        tm = Mp8 // 2
    Mp = _round_up(M, tm)

    x = x.astype(jnp.bfloat16)
    if Mp != M:
        x = jnp.pad(x, ((0, Mp - M), (0, 0)))
    w = w.astype(jnp.bfloat16)
    b2 = bias.reshape(1, C).astype(jnp.float32)

    in_specs = [
        pl.BlockSpec((tm, K), lambda i: (i, 0)),
        pl.BlockSpec((K, C), lambda i: (0, 0)),
        pl.BlockSpec((1, C), lambda i: (0, 0)),
    ]
    args = [x, w, b2]

    if residual is not None:
        r = residual.astype(jnp.bfloat16)
        if Mp != M:
            r = jnp.pad(r, ((0, Mp - M), (0, 0)))
        in_specs.append(pl.BlockSpec((tm, C), lambda i: (i, 0)))
        args.append(r)
        kernel = functools.partial(_mm_kernel_res, relu_before_add, relu)
    else:
        kernel = functools.partial(_mm_kernel_nores, relu)

    out = pl.pallas_call(
        kernel,
        out_shape=jax.ShapeDtypeStruct((Mp, C), out_dtype),
        grid=(Mp // tm,),
        in_specs=in_specs,
        out_specs=pl.BlockSpec((tm, C), lambda i: (i, 0)),
        compiler_params=pltpu.CompilerParams(dimension_semantics=("parallel",)),
    )(*args)
    return out[:M] if Mp != M else out


def _max9_kernel(*refs):
    # Elementwise max over 9 shifted views of the pool window.
    o_ref = refs[-1]
    y = refs[0][...]
    for r in refs[1:-1]:
        y = jnp.maximum(y, r[...])
    o_ref[...] = y


def maxpool_3x3_s2_p1(x, tm=512):
    """MaxPool2d(kernel=3, stride=2, padding=1) on NHWC, tiled over flattened output rows."""
    N, H, W, C = x.shape
    neg = float(jnp.finfo(x.dtype).min)
    xp = jnp.pad(x, ((0, 0), (1, 1), (1, 1), (0, 0)), constant_values=neg)
    Ho = (H + 2 - 3) // 2 + 1
    Wo = (W + 2 - 3) // 2 + 1
    M = N * Ho * Wo

    views = []
    for i in range(3):
        for j in range(3):
            views.append(xp[:, i:i + 2 * Ho:2, j:j + 2 * Wo:2, :].reshape(M, C))

    tm = min(tm, _round_up(M, 8))
    Mp = _round_up(M, tm)
    if Mp != M:
        views = [jnp.pad(v, ((0, Mp - M), (0, 0)), constant_values=neg) for v in views]

    out = pl.pallas_call(
        _max9_kernel,
        out_shape=jax.ShapeDtypeStruct((Mp, C), x.dtype),
        grid=(Mp // tm,),
        in_specs=[pl.BlockSpec((tm, C), lambda i: (i, 0)) for _ in range(9)],
        out_specs=pl.BlockSpec((tm, C), lambda i: (i, 0)),
        compiler_params=pltpu.CompilerParams(dimension_semantics=("parallel",)),
    )(*views)
    out = out[:M] if Mp != M else out
    return out.reshape(N, Ho, Wo, C)


# --------------------------------------------------------------------------------------
# Conv / deconv layers (bf16 im2col glue + fused Pallas matmul)
# --------------------------------------------------------------------------------------

def _im2col(x, kh, kw, stride, pad):
    # TODO(synk): fuse the patch gather into the matmul kernel (grid over taps with an
    # accumulator scratch) to avoid materializing the kh*kw-expanded bf16 patch matrix.
    N, H, W, C = x.shape
    xp = jnp.pad(x, ((0, 0), (pad, pad), (pad, pad), (0, 0)))
    Ho = (H + 2 * pad - kh) // stride + 1
    Wo = (W + 2 * pad - kw) // stride + 1
    cols = []
    for i in range(kh):
        for j in range(kw):
            cols.append(xp[:, i:i + stride * Ho:stride, j:j + stride * Wo:stride, :])
    patches = jnp.concatenate(cols, axis=-1)  # (N, Ho, Wo, kh*kw*C) in bf16
    return patches.reshape(N * Ho * Wo, kh * kw * C), Ho, Wo


def conv_bn_act(x, p, stride, pad, relu=True, residual=None, relu_before_add=False):
    """Conv2d + BatchNorm2d (+ ReLU) (+ fused residual add).

    BN scale is folded into the weight matrix; BN shift + conv bias become the kernel bias.
    `residual` (NHWC, same shape as the output) is added inside the matmul epilogue;
    `relu_before_add` selects ReLU-then-add (decoder skip) vs add-then-ReLU (ResBlock).
    """
    w = p["w"]  # torch layout (Cout, Cin, kh, kw)
    cout, cin, kh, kw = w.shape
    N = x.shape[0]

    if kh == 1 and kw == 1 and stride == 1 and pad == 0:
        Ho, Wo = x.shape[1], x.shape[2]
        patches = x.reshape(N * Ho * Wo, cin)
    else:
        patches, Ho, Wo = _im2col(x, kh, kw, stride, pad)

    wmat = jnp.transpose(w, (2, 3, 1, 0)).reshape(kh * kw * cin, cout)
    scale = p["gamma"] / jnp.sqrt(p["var"] + BN_EPS)
    bias = (p["b"] - p["mean"]) * scale + p["beta"]
    wmat = wmat * scale[None, :]  # fold BN scale into the weights (host/trace time)

    res_m = residual.reshape(N * Ho * Wo, cout) if residual is not None else None
    y = matmul_bias_act(patches, wmat, bias, relu=relu, residual=res_m,
                        relu_before_add=relu_before_add)
    return y.reshape(N, Ho, Wo, cout)


def conv_plain(x, p, stride, pad):
    """Plain Conv2d (bias, no BN, no activation) — used for the final classifier conv."""
    w = p["w"]
    cout, cin, kh, kw = w.shape
    N = x.shape[0]
    patches, Ho, Wo = _im2col(x, kh, kw, stride, pad)
    wmat = jnp.transpose(w, (2, 3, 1, 0)).reshape(kh * kw * cin, cout)
    y = matmul_bias_act(patches, wmat, p["b"], relu=False, out_dtype=jnp.float32)
    return y.reshape(N, Ho, Wo, cout)


def deconv_bn_act(x, p, relu=True):
    """ConvTranspose2d(k=2, s=2, p=0) + BatchNorm2d (+ ReLU).
    Each output 2x2 block is W^T applied to one input pixel -> a single fused matmul."""
    w = p["w"]  # torch layout (Cin, Cout, 2, 2)
    cin, cout = w.shape[0], w.shape[1]
    N, H, W, C = x.shape
    xm = x.reshape(N * H * W, C)
    wmat = jnp.transpose(w, (0, 2, 3, 1)).reshape(cin, 4 * cout)  # cols ordered (di,dj,co)
    scale = p["gamma"] / jnp.sqrt(p["var"] + BN_EPS)
    bias = (p["b"] - p["mean"]) * scale + p["beta"]
    wmat = wmat * jnp.tile(scale, 4)[None, :]
    y = matmul_bias_act(xm, wmat, jnp.tile(bias, 4), relu=relu)
    y = y.reshape(N, H, W, 2, 2, cout)
    y = jnp.transpose(y, (0, 1, 3, 2, 4, 5)).reshape(N, 2 * H, 2 * W, cout)
    return y


# --------------------------------------------------------------------------------------
# LinkNet blocks (residual / skip adds fused into the last conv of each block)
# --------------------------------------------------------------------------------------

def res_block(x, p):
    out = conv_bn_act(x, p["cbr"], stride=1, pad=1, relu=True)
    # second conv: BN, then += x, then ReLU — all fused into one matmul epilogue
    return conv_bn_act(out, p["cb"], stride=1, pad=1, relu=True,
                       residual=x, relu_before_add=False)


def res_down_block(x, p, stride):
    residual = conv_bn_act(x, p["down"], stride=stride, pad=1, relu=True)
    out = conv_bn_act(x, p["cbr"], stride=stride, pad=1, relu=True)
    return conv_bn_act(out, p["cb"], stride=1, pad=1, relu=True,
                       residual=residual, relu_before_add=False)


def linknet_up(x, p, skip=None):
    x = conv_bn_act(x, p["cbr1"], stride=1, pad=0, relu=True)
    x = deconv_bn_act(x, p["dcbr2"], relu=True)
    if skip is None:
        return conv_bn_act(x, p["cbr3"], stride=1, pad=0, relu=True)
    # decoder skip: ReLU(conv+BN) + skip, no ReLU after the add — fused in the epilogue
    return conv_bn_act(x, p["cbr3"], stride=1, pad=0, relu=False,
                       residual=skip, relu_before_add=True)


def linknet_forward(x_nchw, P):
    x = jnp.transpose(x_nchw, (0, 2, 3, 1)).astype(jnp.bfloat16)  # NCHW -> NHWC, bf16
    x = conv_bn_act(x, P["firstconv"], stride=2, pad=3, relu=True)
    x = maxpool_3x3_s2_p1(x)

    e1 = res_block(res_block(x, P["enc1_0"]), P["enc1_1"])
    e2 = res_block(res_down_block(e1, P["enc2_0"], 2), P["enc2_1"])
    e3 = res_block(res_down_block(e2, P["enc3_0"], 2), P["enc3_1"])
    e4 = res_block(res_down_block(e3, P["enc4_0"], 2), P["enc4_1"])

    d4 = linknet_up(e4, P["dec4"], skip=e3)
    d3 = linknet_up(d4, P["dec3"], skip=e2)
    d2 = linknet_up(d3, P["dec2"], skip=e1)
    d1 = linknet_up(d2, P["dec1"])

    f1 = deconv_bn_act(d1, P["finaldeconv1"], relu=True)
    f2 = conv_bn_act(f1, P["finalconv2"], stride=1, pad=1, relu=True)
    f3 = conv_plain(f2, P["finalconv3"], stride=1, pad=1)
    return jnp.transpose(f3, (0, 3, 1, 2)).astype(jnp.float32)  # NHWC -> NCHW


# --------------------------------------------------------------------------------------
# Deterministic parameter initialization (shapes from the module's __init__)
# --------------------------------------------------------------------------------------

def init_params(key):
    ks = iter(jax.random.split(key, 256))
    nxt = lambda: next(ks)

    def bn(c):
        return dict(
            gamma=1.0 + 0.1 * jax.random.normal(nxt(), (c,), jnp.float32),
            beta=0.1 * jax.random.normal(nxt(), (c,), jnp.float32),
            mean=jnp.zeros((c,), jnp.float32),
            var=jnp.ones((c,), jnp.float32),
        )

    def cbr(cin, cout, k):  # Conv2d + BN params (also used for CB)
        fan = cin * k * k
        d = dict(
            w=jax.random.normal(nxt(), (cout, cin, k, k), jnp.float32) / jnp.sqrt(fan),
            b=0.1 * jax.random.normal(nxt(), (cout,), jnp.float32),
        )
        d.update(bn(cout))
        return d

    def dcbr(cin, cout):  # ConvTranspose2d(k=2,s=2) + BN params
        d = dict(
            w=jax.random.normal(nxt(), (cin, cout, 2, 2), jnp.float32) / jnp.sqrt(cin * 4),
            b=0.1 * jax.random.normal(nxt(), (cout,), jnp.float32),
        )
        d.update(bn(cout))
        return d

    def conv_only(cin, cout, k):
        fan = cin * k * k
        return dict(
            w=jax.random.normal(nxt(), (cout, cin, k, k), jnp.float32) / jnp.sqrt(fan),
            b=0.1 * jax.random.normal(nxt(), (cout,), jnp.float32),
        )

    P = {}
    P["firstconv"] = cbr(3, 16, 7)
    P["enc1_0"] = dict(cbr=cbr(16, 16, 3), cb=cbr(16, 16, 3))
    P["enc1_1"] = dict(cbr=cbr(16, 16, 3), cb=cbr(16, 16, 3))
    P["enc2_0"] = dict(cbr=cbr(16, 32, 3), cb=cbr(32, 32, 3), down=cbr(16, 32, 3))
    P["enc2_1"] = dict(cbr=cbr(32, 32, 3), cb=cbr(32, 32, 3))
    P["enc3_0"] = dict(cbr=cbr(32, 64, 3), cb=cbr(64, 64, 3), down=cbr(32, 64, 3))
    P["enc3_1"] = dict(cbr=cbr(64, 64, 3), cb=cbr(64, 64, 3))
    P["enc4_0"] = dict(cbr=cbr(64, 128, 3), cb=cbr(128, 128, 3), down=cbr(64, 128, 3))
    P["enc4_1"] = dict(cbr=cbr(128, 128, 3), cb=cbr(128, 128, 3))
    P["dec4"] = dict(cbr1=cbr(128, 32, 1), dcbr2=dcbr(32, 32), cbr3=cbr(32, 64, 1))
    P["dec3"] = dict(cbr1=cbr(64, 16, 1), dcbr2=dcbr(16, 16), cbr3=cbr(16, 32, 1))
    P["dec2"] = dict(cbr1=cbr(32, 8, 1), dcbr2=dcbr(8, 8), cbr3=cbr(8, 16, 1))
    P["dec1"] = dict(cbr1=cbr(16, 8, 1), dcbr2=dcbr(8, 8), cbr3=cbr(8, 16, 1))
    P["finaldeconv1"] = dcbr(16, 8)
    P["finalconv2"] = cbr(8, 8, 3)
    P["finalconv3"] = conv_only(8, 2, 3)
    return P


if __name__ == "__main__":
    key = jax.random.PRNGKey(0)
    kx, kp = jax.random.split(key)
    params = init_params(kp)
    # Spatial size must be divisible by 32 so decoder skip-adds match encoder shapes.
    x = jax.random.normal(kx, (2, 3, 32, 32), jnp.float32)
    fwd = jax.jit(lambda inp: linknet_forward(inp, params))
    out = fwd(x)
    out = jax.block_until_ready(out)
    assert out.shape == (2, 2, 32, 32), out.shape
    assert bool(jnp.all(jnp.isfinite(out)))
    print("KERNEL_OK")
</pallas_src>

<mosaic_0001>
module attributes {stable_mosaic.version = 11 : i64} {
  func.func @_mm_kernel_nores(%arg0: i32, %arg1: memref<256x147xbf16, #tpu.memory_space<vmem>>, %arg2: memref<147x16xbf16, #tpu.memory_space<vmem>>, %arg3: memref<1x16xf32, #tpu.memory_space<vmem>>, %arg4: memref<256x16xbf16, #tpu.memory_space<vmem>>) attributes {dimension_semantics = [#tpu.dimension_semantics<parallel>], iteration_bounds = array<i64: 2>, scalar_prefetch = 0 : i64, scratch_operands = 0 : i64, tpu.core_type = #tpu.core_type<tc>, window_params = [{transform_indices = @transform_0, window_bounds = array<i64: 256, 147>}, {pipeline_mode = #tpu.pipeline_mode<synchronous>, transform_indices = @transform_1, window_bounds = array<i64: 147, 16>}, {pipeline_mode = #tpu.pipeline_mode<synchronous>, transform_indices = @transform_2, window_bounds = array<i64: 1, 16>}, {transform_indices = @transform_3, window_bounds = array<i64: 256, 16>}]} {
    %c0 = arith.constant 0 : index
    %c0_0 = arith.constant 0 : index
    %0 = vector.load %arg1[%c0, %c0_0] : memref<256x147xbf16, #tpu.memory_space<vmem>>, vector<256x147xbf16>
    %c0_1 = arith.constant 0 : index
    %c0_2 = arith.constant 0 : index
    %1 = vector.load %arg2[%c0_1, %c0_2] : memref<147x16xbf16, #tpu.memory_space<vmem>>, vector<147x16xbf16>
    %cst = arith.constant dense<0.000000e+00> : vector<256x16xf32>
    %2 = tpu.matmul %0, %1, %cst {dimension_numbers = #tpu.dot_dimension_numbers<[1], [0], [0], [1], [0, 0, 1, 1], [], []>} : vector<256x147xbf16>, vector<147x16xbf16>, vector<256x16xf32> -> vector<256x16xf32>
    %c0_3 = arith.constant 0 : index
    %c0_4 = arith.constant 0 : index
    %3 = vector.load %arg3[%c0_3, %c0_4] : memref<1x16xf32, #tpu.memory_space<vmem>>, vector<1x16xf32>
    %4 = vector.broadcast %3 : vector<1x16xf32> to vector<256x16xf32>
    %5 = arith.addf %2, %4 : vector<256x16xf32>
    %cst_5 = arith.constant 0.000000e+00 : f32
    %6 = vector.broadcast %cst_5 : f32 to vector<256x16xf32>
    %7 = arith.maximumf %5, %6 : vector<256x16xf32>
    %8 = arith.truncf %7 : vector<256x16xf32> to vector<256x16xbf16>
    %c0_6 = arith.constant 0 : index
    %c0_7 = arith.constant 0 : index
    %9 = vector.load %arg4[%c0_6, %c0_7] : memref<256x16xbf16, #tpu.memory_space<vmem>>, vector<256x16xbf16>
    tpu.vector_store %arg4[%c0_6, %c0_7], %8 {strides = array<i32>} : memref<256x16xbf16, #tpu.memory_space<vmem>>, vector<256x16xbf16>,
    return
  }
  func.func @transform_0(%arg0: i32) -> (i32, i32) {
    %c0_i32 = arith.constant 0 : i32
    %c0_i32_0 = arith.constant 0 : i32
    return %arg0, %c0_i32 : i32, i32
  }
  func.func @transform_1(%arg0: i32) -> (i32, i32) {
    %c0_i32 = arith.constant 0 : i32
    %c0_i32_0 = arith.constant 0 : i32
    %c0_i32_1 = arith.constant 0 : i32
    return %c0_i32, %c0_i32_0 : i32, i32
  }
  func.func @transform_2(%arg0: i32) -> (i32, i32) {
    %c0_i32 = arith.constant 0 : i32
    %c0_i32_0 = arith.constant 0 : i32
    %c0_i32_1 = arith.constant 0 : i32
    return %c0_i32, %c0_i32_0 : i32, i32
  }
  func.func @transform_3(%arg0: i32) -> (i32, i32) {
    %c0_i32 = arith.constant 0 : i32
    %c0_i32_0 = arith.constant 0 : i32
    return %arg0, %c0_i32 : i32, i32
  }
}

module attributes {stable_mosaic.version = 11 : i64} {
  func.func @_max9_kernel(%arg0: i32, %arg1: memref<128x16xbf16, #tpu.memory_space<vmem>>, %arg2: memref<128x16xbf16, #tpu.memory_space<vmem>>, %arg3: memref<128x16xbf16, #tpu.memory_space<vmem>>, %arg4: memref<128x16xbf16, #tpu.memory_space<vmem>>, %arg5: memref<128x16xbf16, #tpu.memory_space<vmem>>, %arg6: memref<128x16xbf16, #tpu.memory_space<vmem>>, %arg7: memref<128x16xbf16, #tpu.memory_space<vmem>>, %arg8: memref<128x16xbf16, #tpu.memory_space<vmem>>, %arg9: memref<128x16xbf16, #tpu.memory_space<vmem>>, %arg10: memref<128x16xbf16, #tpu.memory_space<vmem>>) attributes {dimension_semantics = [#tpu.dimension_semantics<parallel>], iteration_bounds = array<i64: 1>, scalar_prefetch = 0 : i64, scratch_operands = 0 : i64, tpu.core_type = #tpu.core_type<tc>, window_params = [{transform_indices = @transform_0, window_bounds = array<i64: 128, 16>}, {transform_indices = @transform_1, window_bounds = array<i64: 128, 16>}, {transform_indices = @transform_2, window_bounds = array<i64: 128, 16>}, {transform_indices = @transform_3, window_bounds = array<i64: 128, 16>}, {transform_indices = @transform_4, window_bounds = array<i64: 128, 16>}, {transform_indices = @transform_5, window_bounds = array<i64: 128, 16>}, {transform_indices = @transform_6, window_bounds = array<i64: 128, 16>}, {transform_indices = @transform_7, window_bounds = array<i64: 128, 16>}, {transform_indices = @transform_8, window_bounds = array<i64: 128, 16>}, {transform_indices = @transform_9, window_bounds = array<i64: 128, 16>}]} {
    %c0 = arith.constant 0 : index
    %c0_0 = arith.constant 0 : index
    %0 = vector.load %arg1[%c0, %c0_0] : memref<128x16xbf16, #tpu.memory_space<vmem>>, vector<128x16xbf16>
    %c0_1 = arith.constant 0 : index
    %c0_2 = arith.constant 0 : index
    %1 = vector.load %arg2[%c0_1, %c0_2] : memref<128x16xbf16, #tpu.memory_space<vmem>>, vector<128x16xbf16>
    %2 = arith.maximumf %0, %1 : vector<128x16xbf16>
    %c0_3 = arith.constant 0 : index
    %c0_4 = arith.constant 0 : index
    %3 = vector.load %arg3[%c0_3, %c0_4] : memref<128x16xbf16, #tpu.memory_space<vmem>>, vector<128x16xbf16>
    %4 = arith.maximumf %2, %3 : vector<128x16xbf16>
    %c0_5 = arith.constant 0 : index
    %c0_6 = arith.constant 0 : index
    %5 = vector.load %arg4[%c0_5, %c0_6] : memref<128x16xbf16, #tpu.memory_space<vmem>>, vector<128x16xbf16>
    %6 = arith.maximumf %4, %5 : vector<128x16xbf16>
    %c0_7 = arith.constant 0 : index
    %c0_8 = arith.constant 0 : index
    %7 = vector.load %arg5[%c0_7, %c0_8] : memref<128x16xbf16, #tpu.memory_space<vmem>>, vector<128x16xbf16>
    %8 = arith.maximumf %6, %7 : vector<128x16xbf16>
    %c0_9 = arith.constant 0 : index
    %c0_10 = arith.constant 0 : index
    %9 = vector.load %arg6[%c0_9, %c0_10] : memref<128x16xbf16, #tpu.memory_space<vmem>>, vector<128x16xbf16>
    %10 = arith.maximumf %8, %9 : vector<128x16xbf16>
    %c0_11 = arith.constant 0 : index
    %c0_12 = arith.constant 0 : index
    %11 = vector.load %arg7[%c0_11, %c0_12] : memref<128x16xbf16, #tpu.memory_space<vmem>>, vector<128x16xbf16>
    %12 = arith.maximumf %10, %11 : vector<128x16xbf16>
    %c0_13 = arith.constant 0 : index
    %c0_14 = arith.constant 0 : index
    %13 = vector.load %arg8[%c0_13, %c0_14] : memref<128x16xbf16, #tpu.memory_space<vmem>>, vector<128x16xbf16>
    %14 = arith.maximumf %12, %13 : vector<128x16xbf16>
    %c0_15 = arith.constant 0 : index
    %c0_16 = arith.constant 0 : index
    %15 = vector.load %arg9[%c0_15, %c0_16] : memref<128x16xbf16, #tpu.memory_space<vmem>>, vector<128x16xbf16>
    %16 = arith.maximumf %14, %15 : vector<128x16xbf16>
    %c0_17 = arith.constant 0 : index
    %c0_18 = arith.constant 0 : index
    %17 = vector.load %arg10[%c0_17, %c0_18] : memref<128x16xbf16, #tpu.memory_space<vmem>>, vector<128x16xbf16>
    tpu.vector_store %arg10[%c0_17, %c0_18], %16 {strides = array<i32>} : memref<128x16xbf16, #tpu.memory_space<vmem>>, vector<128x16xbf16>,
    return
  }
  func.func @transform_0(%arg0: i32) -> (i32, i32) {
    %c0_i32 = arith.constant 0 : i32
    %c0_i32_0 = arith.constant 0 : i32
    return %arg0, %c0_i32 : i32, i32
  }
  func.func @transform_1(%arg0: i32) -> (i32, i32) {
    %c0_i32 = arith.constant 0 : i32
    %c0_i32_0 = arith.constant 0 : i32
    return %arg0, %c0_i32 : i32, i32
  }
  func.func @transform_2(%arg0: i32) -> (i32, i32) {
    %c0_i32 = arith.constant 0 : i32
    %c0_i32_0 = arith.constant 0 : i32
    return %arg0, %c0_i32 : i32, i32
  }
  func.func @transform_3(%arg0: i32) -> (i32, i32) {
    %c0_i32 = arith.constant 0 : i32
    %c0_i32_0 = arith.constant 0 : i32
    return %arg0, %c0_i32 : i32, i32
  }
  func.func @transform_4(%arg0: i32) -> (i32, i32) {
    %c0_i32 = arith.constant 0 : i32
    %c0_i32_0 = arith.constant 0 : i32
    return %arg0, %c0_i32 : i32, i32
  }
  func.func @transform_5(%arg0: i32) -> (i32, i32) {
    %c0_i32 = arith.constant 0 : i32
    %c0_i32_0 = arith.constant 0 : i32
    return %arg0, %c0_i32 : i32, i32
  }
  func.func @transform_6(%arg0: i32) -> (i32, i32) {
    %c0_i32 = arith.constant 0 : i32
    %c0_i32_0 = arith.constant 0 : i32
    return %arg0, %c0_i32 : i32, i32
  }
  func.func @transform_7(%arg0: i32) -> (i32, i32) {
    %c0_i32 = arith.constant 0 : i32
    %c0_i32_0 = arith.constant 0 : i32
    return %arg0, %c0_i32 : i32, i32
  }
  func.func @transform_8(%arg0: i32) -> (i32, i32) {
    %c0_i32 = arith.constant 0 : i32
    %c0_i32_0 = arith.constant 0 : i32
    return %arg0, %c0_i32 : i32, i32
  }
  func.func @transform_9(%arg0: i32) -> (i32, i32) {
    %c0_i32 = arith.constant 0 : i32
    %c0_i32_0 = arith.constant 0 : i32
    return %arg0, %c0_i32 : i32, i32
  }
}

module attributes {stable_mosaic.version = 11 : i64} {
  func.func @_mm_kernel_nores(%arg0: i32, %arg1: memref<64x144xbf16, #tpu.memory_space<vmem>>, %arg2: memref<144x16xbf16, #tpu.memory_space<vmem>>, %arg3: memref<1x16xf32, #tpu.memory_space<vmem>>, %arg4: memref<64x16xbf16, #tpu.memory_space<vmem>>) attributes {dimension_semantics = [#tpu.dimension_semantics<parallel>], iteration_bounds = array<i64: 2>, scalar_prefetch = 0 : i64, scratch_operands = 0 : i64, tpu.core_type = #tpu.core_type<tc>, window_params = [{transform_indices = @transform_0, window_bounds = array<i64: 64, 144>}, {pipeline_mode = #tpu.pipeline_mode<synchronous>, transform_indices = @transform_1, window_bounds = array<i64: 144, 16>}, {pipeline_mode = #tpu.pipeline_mode<synchronous>, transform_indices = @transform_2, window_bounds = array<i64: 1, 16>}, {transform_indices = @transform_3, window_bounds = array<i64: 64, 16>}]} {
    %c0 = arith.constant 0 : index
    %c0_0 = arith.constant 0 : index
    %0 = vector.load %arg1[%c0, %c0_0] : memref<64x144xbf16, #tpu.memory_space<vmem>>, vector<64x144xbf16>
    %c0_1 = arith.constant 0 : index
    %c0_2 = arith.constant 0 : index
    %1 = vector.load %arg2[%c0_1, %c0_2] : memref<144x16xbf16, #tpu.memory_space<vmem>>, vector<144x16xbf16>
    %cst = arith.constant dense<0.000000e+00> : vector<64x16xf32>
    %2 = tpu.matmul %0, %1, %cst {dimension_numbers = #tpu.dot_dimension_numbers<[1], [0], [0], [1], [0, 0, 1, 1], [], []>} : vector<64x144xbf16>, vector<144x16xbf16>, vector<64x16xf32> -> vector<64x16xf32>
    %c0_3 = arith.constant 0 : index
    %c0_4 = arith.constant 0 : index
    %3 = vector.load %arg3[%c0_3, %c0_4] : memref<1x16xf32, #tpu.memory_space<vmem>>, vector<1x16xf32>
    %4 = vector.broadcast %3 : vector<1x16xf32> to vector<64x16xf32>
    %5 = arith.addf %2, %4 : vector<64x16xf32>
    %cst_5 = arith.constant 0.000000e+00 : f32
    %6 = vector.broadcast %cst_5 : f32 to vector<64x16xf32>
    %7 = arith.maximumf %5, %6 : vector<64x16xf32>
    %8 = arith.truncf %7 : vector<64x16xf32> to vector<64x16xbf16>
    %c0_6 = arith.constant 0 : index
    %c0_7 = arith.constant 0 : index
    %9 = vector.load %arg4[%c0_6, %c0_7] : memref<64x16xbf16, #tpu.memory_space<vmem>>, vector<64x16xbf16>
    tpu.vector_store %arg4[%c0_6, %c0_7], %8 {strides = array<i32>} : memref<64x16xbf16, #tpu.memory_space<vmem>>, vector<64x16xbf16>,
    return
  }
  func.func @transform_0(%arg0: i32) -> (i32, i32) {
    %c0_i32 = arith.constant 0 : i32
    %c0_i32_0 = arith.constant 0 : i32
    return %arg0, %c0_i32 : i32, i32
  }
  func.func @transform_1(%arg0: i32) -> (i32, i32) {
    %c0_i32 = arith.constant 0 : i32
    %c0_i32_0 = arith.constant 0 : i32
    %c0_i32_1 = arith.constant 0 : i32
    return %c0_i32, %c0_i32_0 : i32, i32
  }
  func.func @transform_2(%arg0: i32) -> (i32, i32) {
    %c0_i32 = arith.constant 0 : i32
    %c0_i32_0 = arith.constant 0 : i32
    %c0_i32_1 = arith.constant 0 : i32
    return %c0_i32, %c0_i32_0 : i32, i32
  }
  func.func @transform_3(%arg0: i32) -> (i32, i32) {
    %c0_i32 = arith.constant 0 : i32
    %c0_i32_0 = arith.constant 0 : i32
    return %arg0, %c0_i32 : i32, i32
  }
}

module attributes {stable_mosaic.version = 11 : i64} {
  func.func @_mm_kernel_res(%arg0: i32, %arg1: memref<64x144xbf16, #tpu.memory_space<vmem>>, %arg2: memref<144x16xbf16, #tpu.memory_space<vmem>>, %arg3: memref<1x16xf32, #tpu.memory_space<vmem>>, %arg4: memref<64x16xbf16, #tpu.memory_space<vmem>>, %arg5: memref<64x16xbf16, #tpu.memory_space<vmem>>) attributes {dimension_semantics = [#tpu.dimension_semantics<parallel>], iteration_bounds = array<i64: 2>, scalar_prefetch = 0 : i64, scratch_operands = 0 : i64, tpu.core_type = #tpu.core_type<tc>, window_params = [{transform_indices = @transform_0, window_bounds = array<i64: 64, 144>}, {pipeline_mode = #tpu.pipeline_mode<synchronous>, transform_indices = @transform_1, window_bounds = array<i64: 144, 16>}, {pipeline_mode = #tpu.pipeline_mode<synchronous>, transform_indices = @transform_2, window_bounds = array<i64: 1, 16>}, {transform_indices = @transform_3, window_bounds = array<i64: 64, 16>}, {transform_indices = @transform_4, window_bounds = array<i64: 64, 16>}]} {
    %c0 = arith.constant 0 : index
    %c0_0 = arith.constant 0 : index
    %0 = vector.load %arg1[%c0, %c0_0] : memref<64x144xbf16, #tpu.memory_space<vmem>>, vector<64x144xbf16>
    %c0_1 = arith.constant 0 : index
    %c0_2 = arith.constant 0 : index
    %1 = vector.load %arg2[%c0_1, %c0_2] : memref<144x16xbf16, #tpu.memory_space<vmem>>, vector<144x16xbf16>
    %cst = arith.constant dense<0.000000e+00> : vector<64x16xf32>
    %2 = tpu.matmul %0, %1, %cst {dimension_numbers = #tpu.dot_dimension_numbers<[1], [0], [0], [1], [0, 0, 1, 1], [], []>} : vector<64x144xbf16>, vector<144x16xbf16>, vector<64x16xf32> -> vector<64x16xf32>
    %c0_3 = arith.constant 0 : index
    %c0_4 = arith.constant 0 : index
    %3 = vector.load %arg3[%c0_3, %c0_4] : memref<1x16xf32, #tpu.memory_space<vmem>>, vector<1x16xf32>
    %4 = vector.broadcast %3 : vector<1x16xf32> to vector<64x16xf32>
    %5 = arith.addf %2, %4 : vector<64x16xf32>
    %c0_5 = arith.constant 0 : index
    %c0_6 = arith.constant 0 : index
    %6 = vector.load %arg4[%c0_5, %c0_6] : memref<64x16xbf16, #tpu.memory_space<vmem>>, vector<64x16xbf16>
    %7 = arith.extf %6 : vector<64x16xbf16> to vector<64x16xf32>
    %8 = arith.addf %5, %7 : vector<64x16xf32>
    %cst_7 = arith.constant 0.000000e+00 : f32
    %9 = vector.broadcast %cst_7 : f32 to vector<64x16xf32>
    %10 = arith.maximumf %8, %9 : vector<64x16xf32>
    %11 = arith.truncf %10 : vector<64x16xf32> to vector<64x16xbf16>
    %c0_8 = arith.constant 0 : index
    %c0_9 = arith.constant 0 : index
    %12 = vector.load %arg5[%c0_8, %c0_9] : memref<64x16xbf16, #tpu.memory_space<vmem>>, vector<64x16xbf16>
    tpu.vector_store %arg5[%c0_8, %c0_9], %11 {strides = array<i32>} : memref<64x16xbf16, #tpu.memory_space<vmem>>, vector<64x16xbf16>,
    return
  }
  func.func @transform_0(%arg0: i32) -> (i32, i32) {
    %c0_i32 = arith.constant 0 : i32
    %c0_i32_0 = arith.constant 0 : i32
    return %arg0, %c0_i32 : i32, i32
  }
  func.func @transform_1(%arg0: i32) -> (i32, i32) {
    %c0_i32 = arith.constant 0 : i32
    %c0_i32_0 = arith.constant 0 : i32
    %c0_i32_1 = arith.constant 0 : i32
    return %c0_i32, %c0_i32_0 : i32, i32
  }
  func.func @transform_2(%arg0: i32) -> (i32, i32) {
    %c0_i32 = arith.constant 0 : i32
    %c0_i32_0 = arith.constant 0 : i32
    %c0_i32_1 = arith.constant 0 : i32
    return %c0_i32, %c0_i32_0 : i32, i32
  }
  func.func @transform_3(%arg0: i32) -> (i32, i32) {
    %c0_i32 = arith.constant 0 : i32
    %c0_i32_0 = arith.constant 0 : i32
    return %arg0, %c0_i32 : i32, i32
  }
  func.func @transform_4(%arg0: i32) -> (i32, i32) {
    %c0_i32 = arith.constant 0 : i32
    %c0_i32_0 = arith.constant 0 : i32
    return %arg0, %c0_i32 : i32, i32
  }
}

module attributes {stable_mosaic.version = 11 : i64} {
  func.func @_mm_kernel_nores(%arg0: i32, %arg1: memref<16x144xbf16, #tpu.memory_space<vmem>>, %arg2: memref<144x32xbf16, #tpu.memory_space<vmem>>, %arg3: memref<1x32xf32, #tpu.memory_space<vmem>>, %arg4: memref<16x32xbf16, #tpu.memory_space<vmem>>) attributes {dimension_semantics = [#tpu.dimension_semantics<parallel>], iteration_bounds = array<i64: 2>, scalar_prefetch = 0 : i64, scratch_operands = 0 : i64, tpu.core_type = #tpu.core_type<tc>, window_params = [{transform_indices = @transform_0, window_bounds = array<i64: 16, 144>}, {pipeline_mode = #tpu.pipeline_mode<synchronous>, transform_indices = @transform_1, window_bounds = array<i64: 144, 32>}, {pipeline_mode = #tpu.pipeline_mode<synchronous>, transform_indices = @transform_2, window_bounds = array<i64: 1, 32>}, {transform_indices = @transform_3, window_bounds = array<i64: 16, 32>}]} {
    %c0 = arith.constant 0 : index
    %c0_0 = arith.constant 0 : index
    %0 = vector.load %arg1[%c0, %c0_0] : memref<16x144xbf16, #tpu.memory_space<vmem>>, vector<16x144xbf16>
    %c0_1 = arith.constant 0 : index
    %c0_2 = arith.constant 0 : index
    %1 = vector.load %arg2[%c0_1, %c0_2] : memref<144x32xbf16, #tpu.memory_space<vmem>>, vector<144x32xbf16>
    %cst = arith.constant dense<0.000000e+00> : vector<16x32xf32>
    %2 = tpu.matmul %0, %1, %cst {dimension_numbers = #tpu.dot_dimension_numbers<[1], [0], [0], [1], [0, 0, 1, 1], [], []>} : vector<16x144xbf16>, vector<144x32xbf16>, vector<16x32xf32> -> vector<16x32xf32>
    %c0_3 = arith.constant 0 : index
    %c0_4 = arith.constant 0 : index
    %3 = vector.load %arg3[%c0_3, %c0_4] : memref<1x32xf32, #tpu.memory_space<vmem>>, vector<1x32xf32>
    %4 = vector.broadcast %3 : vector<1x32xf32> to vector<16x32xf32>
    %5 = arith.addf %2, %4 : vector<16x32xf32>
    %cst_5 = arith.constant 0.000000e+00 : f32
    %6 = vector.broadcast %cst_5 : f32 to vector<16x32xf32>
    %7 = arith.maximumf %5, %6 : vector<16x32xf32>
    %8 = arith.truncf %7 : vector<16x32xf32> to vector<16x32xbf16>
    %c0_6 = arith.constant 0 : index
    %c0_7 = arith.constant 0 : index
    %9 = vector.load %arg4[%c0_6, %c0_7] : memref<16x32xbf16, #tpu.memory_space<vmem>>, vector<16x32xbf16>
    tpu.vector_store %arg4[%c0_6, %c0_7], %8 {strides = array<i32>} : memref<16x32xbf16, #tpu.memory_space<vmem>>, vector<16x32xbf16>,
    return
  }
  func.func @transform_0(%arg0: i32) -> (i32, i32) {
    %c0_i32 = arith.constant 0 : i32
    %c0_i32_0 = arith.constant 0 : i32
    return %arg0, %c0_i32 : i32, i32
  }
  func.func @transform_1(%arg0: i32) -> (i32, i32) {
    %c0_i32 = arith.constant 0 : i32
    %c0_i32_0 = arith.constant 0 : i32
    %c0_i32_1 = arith.constant 0 : i32
    return %c0_i32, %c0_i32_0 : i32, i32
  }
  func.func @transform_2(%arg0: i32) -> (i32, i32) {
    %c0_i32 = arith.constant 0 : i32
    %c0_i32_0 = arith.constant 0 : i32
    %c0_i32_1 = arith.constant 0 : i32
    return %c0_i32, %c0_i32_0 : i32, i32
  }
  func.func @transform_3(%arg0: i32) -> (i32, i32) {
    %c0_i32 = arith.constant 0 : i32
    %c0_i32_0 = arith.constant 0 : i32
    return %arg0, %c0_i32 : i32, i32
  }
}

module attributes {stable_mosaic.version = 11 : i64} {
  func.func @_mm_kernel_res(%arg0: i32, %arg1: memref<16x288xbf16, #tpu.memory_space<vmem>>, %arg2: memref<288x32xbf16, #tpu.memory_space<vmem>>, %arg3: memref<1x32xf32, #tpu.memory_space<vmem>>, %arg4: memref<16x32xbf16, #tpu.memory_space<vmem>>, %arg5: memref<16x32xbf16, #tpu.memory_space<vmem>>) attributes {dimension_semantics = [#tpu.dimension_semantics<parallel>], iteration_bounds = array<i64: 2>, scalar_prefetch = 0 : i64, scratch_operands = 0 : i64, tpu.core_type = #tpu.core_type<tc>, window_params = [{transform_indices = @transform_0, window_bounds = array<i64: 16, 288>}, {pipeline_mode = #tpu.pipeline_mode<synchronous>, transform_indices = @transform_1, window_bounds = array<i64: 288, 32>}, {pipeline_mode = #tpu.pipeline_mode<synchronous>, transform_indices = @transform_2, window_bounds = array<i64: 1, 32>}, {transform_indices = @transform_3, window_bounds = array<i64: 16, 32>}, {transform_indices = @transform_4, window_bounds = array<i64: 16, 32>}]} {
    %c0 = arith.constant 0 : index
    %c0_0 = arith.constant 0 : index
    %0 = vector.load %arg1[%c0, %c0_0] : memref<16x288xbf16, #tpu.memory_space<vmem>>, vector<16x288xbf16>
    %c0_1 = arith.constant 0 : index
    %c0_2 = arith.constant 0 : index
    %1 = vector.load %arg2[%c0_1, %c0_2] : memref<288x32xbf16, #tpu.memory_space<vmem>>, vector<288x32xbf16>
    %cst = arith.constant dense<0.000000e+00> : vector<16x32xf32>
    %2 = tpu.matmul %0, %1, %cst {dimension_numbers = #tpu.dot_dimension_numbers<[1], [0], [0], [1], [0, 0, 1, 1], [], []>} : vector<16x288xbf16>, vector<288x32xbf16>, vector<16x32xf32> -> vector<16x32xf32>
    %c0_3 = arith.constant 0 : index
    %c0_4 = arith.constant 0 : index
    %3 = vector.load %arg3[%c0_3, %c0_4] : memref<1x32xf32, #tpu.memory_space<vmem>>, vector<1x32xf32>
    %4 = vector.broadcast %3 : vector<1x32xf32> to vector<16x32xf32>
    %5 = arith.addf %2, %4 : vector<16x32xf32>
    %c0_5 = arith.constant 0 : index
    %c0_6 = arith.constant 0 : index
    %6 = vector.load %arg4[%c0_5, %c0_6] : memref<16x32xbf16, #tpu.memory_space<vmem>>, vector<16x32xbf16>
    %7 = arith.extf %6 : vector<16x32xbf16> to vector<16x32xf32>
    %8 = arith.addf %5, %7 : vector<16x32xf32>
    %cst_7 = arith.constant 0.000000e+00 : f32
    %9 = vector.broadcast %cst_7 : f32 to vector<16x32xf32>
    %10 = arith.maximumf %8, %9 : vector<16x32xf32>
    %11 = arith.truncf %10 : vector<16x32xf32> to vector<16x32xbf16>
    %c0_8 = arith.constant 0 : index
    %c0_9 = arith.constant 0 : index
    %12 = vector.load %arg5[%c0_8, %c0_9] : memref<16x32xbf16, #tpu.memory_space<vmem>>, vector<16x32xbf16>
    tpu.vector_store %arg5[%c0_8, %c0_9], %11 {strides = array<i32>} : memref<16x32xbf16, #tpu.memory_space<vmem>>, vector<16x32xbf16>,
    return
  }
  func.func @transform_0(%arg0: i32) -> (i32, i32) {
    %c0_i32 = arith.constant 0 : i32
    %c0_i32_0 = arith.constant 0 : i32
    return %arg0, %c0_i32 : i32, i32
  }
  func.func @transform_1(%arg0: i32) -> (i32, i32) {
    %c0_i32 = arith.constant 0 : i32
    %c0_i32_0 = arith.constant 0 : i32
    %c0_i32_1 = arith.constant 0 : i32
    return %c0_i32, %c0_i32_0 : i32, i32
  }
  func.func @transform_2(%arg0: i32) -> (i32, i32) {
    %c0_i32 = arith.constant 0 : i32
    %c0_i32_0 = arith.constant 0 : i32
    %c0_i32_1 = arith.constant 0 : i32
    return %c0_i32, %c0_i32_0 : i32, i32
  }
  func.func @transform_3(%arg0: i32) -> (i32, i32) {
    %c0_i32 = arith.constant 0 : i32
    %c0_i32_0 = arith.constant 0 : i32
    return %arg0, %c0_i32 : i32, i32
  }
  func.func @transform_4(%arg0: i32) -> (i32, i32) {
    %c0_i32 = arith.constant 0 : i32
    %c0_i32_0 = arith.constant 0 : i32
    return %arg0, %c0_i32 : i32, i32
  }
}

module attributes {stable_mosaic.version = 11 : i64} {
  func.func @_mm_kernel_nores(%arg0: i32, %arg1: memref<16x288xbf16, #tpu.memory_space<vmem>>, %arg2: memref<288x32xbf16, #tpu.memory_space<vmem>>, %arg3: memref<1x32xf32, #tpu.memory_space<vmem>>, %arg4: memref<16x32xbf16, #tpu.memory_space<vmem>>) attributes {dimension_semantics = [#tpu.dimension_semantics<parallel>], iteration_bounds = array<i64: 2>, scalar_prefetch = 0 : i64, scratch_operands = 0 : i64, tpu.core_type = #tpu.core_type<tc>, window_params = [{transform_indices = @transform_0, window_bounds = array<i64: 16, 288>}, {pipeline_mode = #tpu.pipeline_mode<synchronous>, transform_indices = @transform_1, window_bounds = array<i64: 288, 32>}, {pipeline_mode = #tpu.pipeline_mode<synchronous>, transform_indices = @transform_2, window_bounds = array<i64: 1, 32>}, {transform_indices = @transform_3, window_bounds = array<i64: 16, 32>}]} {
    %c0 = arith.constant 0 : index
    %c0_0 = arith.constant 0 : index
    %0 = vector.load %arg1[%c0, %c0_0] : memref<16x288xbf16, #tpu.memory_space<vmem>>, vector<16x288xbf16>
    %c0_1 = arith.constant 0 : index
    %c0_2 = arith.constant 0 : index
    %1 = vector.load %arg2[%c0_1, %c0_2] : memref<288x32xbf16, #tpu.memory_space<vmem>>, vector<288x32xbf16>
    %cst = arith.constant dense<0.000000e+00> : vector<16x32xf32>
    %2 = tpu.matmul %0, %1, %cst {dimension_numbers = #tpu.dot_dimension_numbers<[1], [0], [0], [1], [0, 0, 1, 1], [], []>} : vector<16x288xbf16>, vector<288x32xbf16>, vector<16x32xf32> -> vector<16x32xf32>
    %c0_3 = arith.constant 0 : index
    %c0_4 = arith.constant 0 : index
    %3 = vector.load %arg3[%c0_3, %c0_4] : memref<1x32xf32, #tpu.memory_space<vmem>>, vector<1x32xf32>
    %4 = vector.broadcast %3 : vector<1x32xf32> to vector<16x32xf32>
    %5 = arith.addf %2, %4 : vector<16x32xf32>
    %cst_5 = arith.constant 0.000000e+00 : f32
    %6 = vector.broadcast %cst_5 : f32 to vector<16x32xf32>
    %7 = arith.maximumf %5, %6 : vector<16x32xf32>
    %8 = arith.truncf %7 : vector<16x32xf32> to vector<16x32xbf16>
    %c0_6 = arith.constant 0 : index
    %c0_7 = arith.constant 0 : index
    %9 = vector.load %arg4[%c0_6, %c0_7] : memref<16x32xbf16, #tpu.memory_space<vmem>>, vector<16x32xbf16>
    tpu.vector_store %arg4[%c0_6, %c0_7], %8 {strides = array<i32>} : memref<16x32xbf16, #tpu.memory_space<vmem>>, vector<16x32xbf16>,
    return
  }
  func.func @transform_0(%arg0: i32) -> (i32, i32) {
    %c0_i32 = arith.constant 0 : i32
    %c0_i32_0 = arith.constant 0 : i32
    return %arg0, %c0_i32 : i32, i32
  }
  func.func @transform_1(%arg0: i32) -> (i32, i32) {
    %c0_i32 = arith.constant 0 : i32
    %c0_i32_0 = arith.constant 0 : i32
    %c0_i32_1 = arith.constant 0 : i32
    return %c0_i32, %c0_i32_0 : i32, i32
  }
  func.func @transform_2(%arg0: i32) -> (i32, i32) {
    %c0_i32 = arith.constant 0 : i32
    %c0_i32_0 = arith.constant 0 : i32
    %c0_i32_1 = arith.constant 0 : i32
    return %c0_i32, %c0_i32_0 : i32, i32
  }
  func.func @transform_3(%arg0: i32) -> (i32, i32) {
    %c0_i32 = arith.constant 0 : i32
    %c0_i32_0 = arith.constant 0 : i32
    return %arg0, %c0_i32 : i32, i32
  }
}

module attributes {stable_mosaic.version = 11 : i64} {
  func.func @_mm_kernel_nores(%arg0: i32, %arg1: memref<8x288xbf16, #tpu.memory_space<vmem>>, %arg2: memref<288x64xbf16, #tpu.memory_space<vmem>>, %arg3: memref<1x64xf32, #tpu.memory_space<vmem>>, %arg4: memref<8x64xbf16, #tpu.memory_space<vmem>>) attributes {dimension_semantics = [#tpu.dimension_semantics<parallel>], iteration_bounds = array<i64: 1>, scalar_prefetch = 0 : i64, scratch_operands = 0 : i64, tpu.core_type = #tpu.core_type<tc>, window_params = [{transform_indices = @transform_0, window_bounds = array<i64: 8, 288>}, {pipeline_mode = #tpu.pipeline_mode<synchronous>, transform_indices = @transform_1, window_bounds = array<i64: 288, 64>}, {pipeline_mode = #tpu.pipeline_mode<synchronous>, transform_indices = @transform_2, window_bounds = array<i64: 1, 64>}, {transform_indices = @transform_3, window_bounds = array<i64: 8, 64>}]} {
    %c0 = arith.constant 0 : index
    %c0_0 = arith.constant 0 : index
    %0 = vector.load %arg1[%c0, %c0_0] : memref<8x288xbf16, #tpu.memory_space<vmem>>, vector<8x288xbf16>
    %c0_1 = arith.constant 0 : index
    %c0_2 = arith.constant 0 : index
    %1 = vector.load %arg2[%c0_1, %c0_2] : memref<288x64xbf16, #tpu.memory_space<vmem>>, vector<288x64xbf16>
    %cst = arith.constant dense<0.000000e+00> : vector<8x64xf32>
    %2 = tpu.matmul %0, %1, %cst {dimension_numbers = #tpu.dot_dimension_numbers<[1], [0], [0], [1], [0, 0, 1, 1], [], []>} : vector<8x288xbf16>, vector<288x64xbf16>, vector<8x64xf32> -> vector<8x64xf32>
    %c0_3 = arith.constant 0 : index
    %c0_4 = arith.constant 0 : index
    %3 = vector.load %arg3[%c0_3, %c0_4] : memref<1x64xf32, #tpu.memory_space<vmem>>, vector<1x64xf32>
    %4 = vector.broadcast %3 : vector<1x64xf32> to vector<8x64xf32>
    %5 = arith.addf %2, %4 : vector<8x64xf32>
    %cst_5 = arith.constant 0.000000e+00 : f32
    %6 = vector.broadcast %cst_5 : f32 to vector<8x64xf32>
    %7 = arith.maximumf %5, %6 : vector<8x64xf32>
    %8 = arith.truncf %7 : vector<8x64xf32> to vector<8x64xbf16>
    %c0_6 = arith.constant 0 : index
    %c0_7 = arith.constant 0 : index
    %9 = vector.load %arg4[%c0_6, %c0_7] : memref<8x64xbf16, #tpu.memory_space<vmem>>, vector<8x64xbf16>
    tpu.vector_store %arg4[%c0_6, %c0_7], %8 {strides = array<i32>} : memref<8x64xbf16, #tpu.memory_space<vmem>>, vector<8x64xbf16>,
    return
  }
  func.func @transform_0(%arg0: i32) -> (i32, i32) {
    %c0_i32 = arith.constant 0 : i32
    %c0_i32_0 = arith.constant 0 : i32
    return %arg0, %c0_i32 : i32, i32
  }
  func.func @transform_1(%arg0: i32) -> (i32, i32) {
    %c0_i32 = arith.constant 0 : i32
    %c0_i32_0 = arith.constant 0 : i32
    %c0_i32_1 = arith.constant 0 : i32
    return %c0_i32, %c0_i32_0 : i32, i32
  }
  func.func @transform_2(%arg0: i32) -> (i32, i32) {
    %c0_i32 = arith.constant 0 : i32
    %c0_i32_0 = arith.constant 0 : i32
    %c0_i32_1 = arith.constant 0 : i32
    return %c0_i32, %c0_i32_0 : i32, i32
  }
  func.func @transform_3(%arg0: i32) -> (i32, i32) {
    %c0_i32 = arith.constant 0 : i32
    %c0_i32_0 = arith.constant 0 : i32
    return %arg0, %c0_i32 : i32, i32
  }
}

module attributes {stable_mosaic.version = 11 : i64} {
  func.func @_mm_kernel_nores(%arg0: i32, %arg1: memref<8x576xbf16, #tpu.memory_space<vmem>>, %arg2: memref<576x64xbf16, #tpu.memory_space<vmem>>, %arg3: memref<1x64xf32, #tpu.memory_space<vmem>>, %arg4: memref<8x64xbf16, #tpu.memory_space<vmem>>) attributes {dimension_semantics = [#tpu.dimension_semantics<parallel>], iteration_bounds = array<i64: 1>, scalar_prefetch = 0 : i64, scratch_operands = 0 : i64, tpu.core_type = #tpu.core_type<tc>, window_params = [{transform_indices = @transform_0, window_bounds = array<i64: 8, 576>}, {pipeline_mode = #tpu.pipeline_mode<synchronous>, transform_indices = @transform_1, window_bounds = array<i64: 576, 64>}, {pipeline_mode = #tpu.pipeline_mode<synchronous>, transform_indices = @transform_2, window_bounds = array<i64: 1, 64>}, {transform_indices = @transform_3, window_bounds = array<i64: 8, 64>}]} {
    %c0 = arith.constant 0 : index
    %c0_0 = arith.constant 0 : index
    %0 = vector.load %arg1[%c0, %c0_0] : memref<8x576xbf16, #tpu.memory_space<vmem>>, vector<8x576xbf16>
    %c0_1 = arith.constant 0 : index
    %c0_2 = arith.constant 0 : index
    %1 = vector.load %arg2[%c0_1, %c0_2] : memref<576x64xbf16, #tpu.memory_space<vmem>>, vector<576x64xbf16>
    %cst = arith.constant dense<0.000000e+00> : vector<8x64xf32>
    %2 = tpu.matmul %0, %1, %cst {dimension_numbers = #tpu.dot_dimension_numbers<[1], [0], [0], [1], [0, 0, 1, 1], [], []>} : vector<8x576xbf16>, vector<576x64xbf16>, vector<8x64xf32> -> vector<8x64xf32>
    %c0_3 = arith.constant 0 : index
    %c0_4 = arith.constant 0 : index
    %3 = vector.load %arg3[%c0_3, %c0_4] : memref<1x64xf32, #tpu.memory_space<vmem>>, vector<1x64xf32>
    %4 = vector.broadcast %3 : vector<1x64xf32> to vector<8x64xf32>
    %5 = arith.addf %2, %4 : vector<8x64xf32>
    %cst_5 = arith.constant 0.000000e+00 : f32
    %6 = vector.broadcast %cst_5 : f32 to vector<8x64xf32>
    %7 = arith.maximumf %5, %6 : vector<8x64xf32>
    %8 = arith.truncf %7 : vector<8x64xf32> to vector<8x64xbf16>
    %c0_6 = arith.constant 0 : index
    %c0_7 = arith.constant 0 : index
    %9 = vector.load %arg4[%c0_6, %c0_7] : memref<8x64xbf16, #tpu.memory_space<vmem>>, vector<8x64xbf16>
    tpu.vector_store %arg4[%c0_6, %c0_7], %8 {strides = array<i32>} : memref<8x64xbf16, #tpu.memory_space<vmem>>, vector<8x64xbf16>,
    return
  }
  func.func @transform_0(%arg0: i32) -> (i32, i32) {
    %c0_i32 = arith.constant 0 : i32
    %c0_i32_0 = arith.constant 0 : i32
    return %arg0, %c0_i32 : i32, i32
  }
  func.func @transform_1(%arg0: i32) -> (i32, i32) {
    %c0_i32 = arith.constant 0 : i32
    %c0_i32_0 = arith.constant 0 : i32
    %c0_i32_1 = arith.constant 0 : i32
    return %c0_i32, %c0_i32_0 : i32, i32
  }
  func.func @transform_2(%arg0: i32) -> (i32, i32) {
    %c0_i32 = arith.constant 0 : i32
    %c0_i32_0 = arith.constant 0 : i32
    %c0_i32_1 = arith.constant 0 : i32
    return %c0_i32, %c0_i32_0 : i32, i32
  }
  func.func @transform_3(%arg0: i32) -> (i32, i32) {
    %c0_i32 = arith.constant 0 : i32
    %c0_i32_0 = arith.constant 0 : i32
    return %arg0, %c0_i32 : i32, i32
  }
}

module attributes {stable_mosaic.version = 11 : i64} {
  func.func @_mm_kernel_res(%arg0: i32, %arg1: memref<8x576xbf16, #tpu.memory_space<vmem>>, %arg2: memref<576x64xbf16, #tpu.memory_space<vmem>>, %arg3: memref<1x64xf32, #tpu.memory_space<vmem>>, %arg4: memref<8x64xbf16, #tpu.memory_space<vmem>>, %arg5: memref<8x64xbf16, #tpu.memory_space<vmem>>) attributes {dimension_semantics = [#tpu.dimension_semantics<parallel>], iteration_bounds = array<i64: 1>, scalar_prefetch = 0 : i64, scratch_operands = 0 : i64, tpu.core_type = #tpu.core_type<tc>, window_params = [{transform_indices = @transform_0, window_bounds = array<i64: 8, 576>}, {pipeline_mode = #tpu.pipeline_mode<synchronous>, transform_indices = @transform_1, window_bounds = array<i64: 576, 64>}, {pipeline_mode = #tpu.pipeline_mode<synchronous>, transform_indices = @transform_2, window_bounds = array<i64: 1, 64>}, {transform_indices = @transform_3, window_bounds = array<i64: 8, 64>}, {transform_indices = @transform_4, window_bounds = array<i64: 8, 64>}]} {
    %c0 = arith.constant 0 : index
    %c0_0 = arith.constant 0 : index
    %0 = vector.load %arg1[%c0, %c0_0] : memref<8x576xbf16, #tpu.memory_space<vmem>>, vector<8x576xbf16>
    %c0_1 = arith.constant 0 : index
    %c0_2 = arith.constant 0 : index
    %1 = vector.load %arg2[%c0_1, %c0_2] : memref<576x64xbf16, #tpu.memory_space<vmem>>, vector<576x64xbf16>
    %cst = arith.constant dense<0.000000e+00> : vector<8x64xf32>
    %2 = tpu.matmul %0, %1, %cst {dimension_numbers = #tpu.dot_dimension_numbers<[1], [0], [0], [1], [0, 0, 1, 1], [], []>} : vector<8x576xbf16>, vector<576x64xbf16>, vector<8x64xf32> -> vector<8x64xf32>
    %c0_3 = arith.constant 0 : index
    %c0_4 = arith.constant 0 : index
    %3 = vector.load %arg3[%c0_3, %c0_4] : memref<1x64xf32, #tpu.memory_space<vmem>>, vector<1x64xf32>
    %4 = vector.broadcast %3 : vector<1x64xf32> to vector<8x64xf32>
    %5 = arith.addf %2, %4 : vector<8x64xf32>
    %c0_5 = arith.constant 0 : index
    %c0_6 = arith.constant 0 : index
    %6 = vector.load %arg4[%c0_5, %c0_6] : memref<8x64xbf16, #tpu.memory_space<vmem>>, vector<8x64xbf16>
    %7 = arith.extf %6 : vector<8x64xbf16> to vector<8x64xf32>
    %8 = arith.addf %5, %7 : vector<8x64xf32>
    %cst_7 = arith.constant 0.000000e+00 : f32
    %9 = vector.broadcast %cst_7 : f32 to vector<8x64xf32>
    %10 = arith.maximumf %8, %9 : vector<8x64xf32>
    %11 = arith.truncf %10 : vector<8x64xf32> to vector<8x64xbf16>
    %c0_8 = arith.constant 0 : index
    %c0_9 = arith.constant 0 : index
    %12 = vector.load %arg5[%c0_8, %c0_9] : memref<8x64xbf16, #tpu.memory_space<vmem>>, vector<8x64xbf16>
    tpu.vector_store %arg5[%c0_8, %c0_9], %11 {strides = array<i32>} : memref<8x64xbf16, #tpu.memory_space<vmem>>, vector<8x64xbf16>,
    return
  }
  func.func @transform_0(%arg0: i32) -> (i32, i32) {
    %c0_i32 = arith.constant 0 : i32
    %c0_i32_0 = arith.constant 0 : i32
    return %arg0, %c0_i32 : i32, i32
  }
  func.func @transform_1(%arg0: i32) -> (i32, i32) {
    %c0_i32 = arith.constant 0 : i32
    %c0_i32_0 = arith.constant 0 : i32
    %c0_i32_1 = arith.constant 0 : i32
    return %c0_i32, %c0_i32_0 : i32, i32
  }
  func.func @transform_2(%arg0: i32) -> (i32, i32) {
    %c0_i32 = arith.constant 0 : i32
    %c0_i32_0 = arith.constant 0 : i32
    %c0_i32_1 = arith.constant 0 : i32
    return %c0_i32, %c0_i32_0 : i32, i32
  }
  func.func @transform_3(%arg0: i32) -> (i32, i32) {
    %c0_i32 = arith.constant 0 : i32
    %c0_i32_0 = arith.constant 0 : i32
    return %arg0, %c0_i32 : i32, i32
  }
  func.func @transform_4(%arg0: i32) -> (i32, i32) {
    %c0_i32 = arith.constant 0 : i32
    %c0_i32_0 = arith.constant 0 : i32
    return %arg0, %c0_i32 : i32, i32
  }
}

module attributes {stable_mosaic.version = 11 : i64} {
  func.func @_mm_kernel_nores(%arg0: i32, %arg1: memref<8x576xbf16, #tpu.memory_space<vmem>>, %arg2: memref<576x128xbf16, #tpu.memory_space<vmem>>, %arg3: memref<1x128xf32, #tpu.memory_space<vmem>>, %arg4: memref<8x128xbf16, #tpu.memory_space<vmem>>) attributes {dimension_semantics = [#tpu.dimension_semantics<parallel>], iteration_bounds = array<i64: 1>, scalar_prefetch = 0 : i64, scratch_operands = 0 : i64, tpu.core_type = #tpu.core_type<tc>, window_params = [{transform_indices = @transform_0, window_bounds = array<i64: 8, 576>}, {pipeline_mode = #tpu.pipeline_mode<synchronous>, transform_indices = @transform_1, window_bounds = array<i64: 576, 128>}, {pipeline_mode = #tpu.pipeline_mode<synchronous>, transform_indices = @transform_2, window_bounds = array<i64: 1, 128>}, {transform_indices = @transform_3, window_bounds = array<i64: 8, 128>}]} {
    %c0 = arith.constant 0 : index
    %c0_0 = arith.constant 0 : index
    %0 = vector.load %arg1[%c0, %c0_0] : memref<8x576xbf16, #tpu.memory_space<vmem>>, vector<8x576xbf16>
    %c0_1 = arith.constant 0 : index
    %c0_2 = arith.constant 0 : index
    %1 = vector.load %arg2[%c0_1, %c0_2] : memref<576x128xbf16, #tpu.memory_space<vmem>>, vector<576x128xbf16>
    %cst = arith.constant dense<0.000000e+00> : vector<8x128xf32>
    %2 = tpu.matmul %0, %1, %cst {dimension_numbers = #tpu.dot_dimension_numbers<[1], [0], [0], [1], [0, 0, 1, 1], [], []>} : vector<8x576xbf16>, vector<576x128xbf16>, vector<8x128xf32> -> vector<8x128xf32>
    %c0_3 = arith.constant 0 : index
    %c0_4 = arith.constant 0 : index
    %3 = vector.load %arg3[%c0_3, %c0_4] : memref<1x128xf32, #tpu.memory_space<vmem>>, vector<1x128xf32>
    %4 = vector.broadcast %3 : vector<1x128xf32> to vector<8x128xf32>
    %5 = arith.addf %2, %4 : vector<8x128xf32>
    %cst_5 = arith.constant 0.000000e+00 : f32
    %6 = vector.broadcast %cst_5 : f32 to vector<8x128xf32>
    %7 = arith.maximumf %5, %6 : vector<8x128xf32>
    %8 = arith.truncf %7 : vector<8x128xf32> to vector<8x128xbf16>
    %c0_6 = arith.constant 0 : index
    %c0_7 = arith.constant 0 : index
    %9 = vector.load %arg4[%c0_6, %c0_7] : memref<8x128xbf16, #tpu.memory_space<vmem>>, vector<8x128xbf16>
    tpu.vector_store %arg4[%c0_6, %c0_7], %8 {strides = array<i32>} : memref<8x128xbf16, #tpu.memory_space<vmem>>, vector<8x128xbf16>,
    return
  }
  func.func @transform_0(%arg0: i32) -> (i32, i32) {
    %c0_i32 = arith.constant 0 : i32
    %c0_i32_0 = arith.constant 0 : i32
    return %arg0, %c0_i32 : i32, i32
  }
  func.func @transform_1(%arg0: i32) -> (i32, i32) {
    %c0_i32 = arith.constant 0 : i32
    %c0_i32_0 = arith.constant 0 : i32
    %c0_i32_1 = arith.constant 0 : i32
    return %c0_i32, %c0_i32_0 : i32, i32
  }
  func.func @transform_2(%arg0: i32) -> (i32, i32) {
    %c0_i32 = arith.constant 0 : i32
    %c0_i32_0 = arith.constant 0 : i32
    %c0_i32_1 = arith.constant 0 : i32
    return %c0_i32, %c0_i32_0 : i32, i32
  }
  func.func @transform_3(%arg0: i32) -> (i32, i32) {
    %c0_i32 = arith.constant 0 : i32
    %c0_i32_0 = arith.constant 0 : i32
    return %arg0, %c0_i32 : i32, i32
  }
}

module attributes {stable_mosaic.version = 11 : i64} {
  func.func @_mm_kernel_res(%arg0: i32, %arg1: memref<8x1152xbf16, #tpu.memory_space<vmem>>, %arg2: memref<1152x128xbf16, #tpu.memory_space<vmem>>, %arg3: memref<1x128xf32, #tpu.memory_space<vmem>>, %arg4: memref<8x128xbf16, #tpu.memory_space<vmem>>, %arg5: memref<8x128xbf16, #tpu.memory_space<vmem>>) attributes {dimension_semantics = [#tpu.dimension_semantics<parallel>], iteration_bounds = array<i64: 1>, scalar_prefetch = 0 : i64, scratch_operands = 0 : i64, tpu.core_type = #tpu.core_type<tc>, window_params = [{transform_indices = @transform_0, window_bounds = array<i64: 8, 1152>}, {pipeline_mode = #tpu.pipeline_mode<synchronous>, transform_indices = @transform_1, window_bounds = array<i64: 1152, 128>}, {pipeline_mode = #tpu.pipeline_mode<synchronous>, transform_indices = @transform_2, window_bounds = array<i64: 1, 128>}, {transform_indices = @transform_3, window_bounds = array<i64: 8, 128>}, {transform_indices = @transform_4, window_bounds = array<i64: 8, 128>}]} {
    %c0 = arith.constant 0 : index
    %c0_0 = arith.constant 0 : index
    %0 = vector.load %arg1[%c0, %c0_0] : memref<8x1152xbf16, #tpu.memory_space<vmem>>, vector<8x1152xbf16>
    %c0_1 = arith.constant 0 : index
    %c0_2 = arith.constant 0 : index
    %1 = vector.load %arg2[%c0_1, %c0_2] : memref<1152x128xbf16, #tpu.memory_space<vmem>>, vector<1152x128xbf16>
    %cst = arith.constant dense<0.000000e+00> : vector<8x128xf32>
    %2 = tpu.matmul %0, %1, %cst {dimension_numbers = #tpu.dot_dimension_numbers<[1], [0], [0], [1], [0, 0, 1, 1], [], []>} : vector<8x1152xbf16>, vector<1152x128xbf16>, vector<8x128xf32> -> vector<8x128xf32>
    %c0_3 = arith.constant 0 : index
    %c0_4 = arith.constant 0 : index
    %3 = vector.load %arg3[%c0_3, %c0_4] : memref<1x128xf32, #tpu.memory_space<vmem>>, vector<1x128xf32>
    %4 = vector.broadcast %3 : vector<1x128xf32> to vector<8x128xf32>
    %5 = arith.addf %2, %4 : vector<8x128xf32>
    %c0_5 = arith.constant 0 : index
    %c0_6 = arith.constant 0 : index
    %6 = vector.load %arg4[%c0_5, %c0_6] : memref<8x128xbf16, #tpu.memory_space<vmem>>, vector<8x128xbf16>
    %7 = arith.extf %6 : vector<8x128xbf16> to vector<8x128xf32>
    %8 = arith.addf %5, %7 : vector<8x128xf32>
    %cst_7 = arith.constant 0.000000e+00 : f32
    %9 = vector.broadcast %cst_7 : f32 to vector<8x128xf32>
    %10 = arith.maximumf %8, %9 : vector<8x128xf32>
    %11 = arith.truncf %10 : vector<8x128xf32> to vector<8x128xbf16>
    %c0_8 = arith.constant 0 : index
    %c0_9 = arith.constant 0 : index
    %12 = vector.load %arg5[%c0_8, %c0_9] : memref<8x128xbf16, #tpu.memory_space<vmem>>, vector<8x128xbf16>
    tpu.vector_store %arg5[%c0_8, %c0_9], %11 {strides = array<i32>} : memref<8x128xbf16, #tpu.memory_space<vmem>>, vector<8x128xbf16>,
    return
  }
  func.func @transform_0(%arg0: i32) -> (i32, i32) {
    %c0_i32 = arith.constant 0 : i32
    %c0_i32_0 = arith.constant 0 : i32
    return %arg0, %c0_i32 : i32, i32
  }
  func.func @transform_1(%arg0: i32) -> (i32, i32) {
    %c0_i32 = arith.constant 0 : i32
    %c0_i32_0 = arith.constant 0 : i32
    %c0_i32_1 = arith.constant 0 : i32
    return %c0_i32, %c0_i32_0 : i32, i32
  }
  func.func @transform_2(%arg0: i32) -> (i32, i32) {
    %c0_i32 = arith.constant 0 : i32
    %c0_i32_0 = arith.constant 0 : i32
    %c0_i32_1 = arith.constant 0 : i32
    return %c0_i32, %c0_i32_0 : i32, i32
  }
  func.func @transform_3(%arg0: i32) -> (i32, i32) {
    %c0_i32 = arith.constant 0 : i32
    %c0_i32_0 = arith.constant 0 : i32
    return %arg0, %c0_i32 : i32, i32
  }
  func.func @transform_4(%arg0: i32) -> (i32, i32) {
    %c0_i32 = arith.constant 0 : i32
    %c0_i32_0 = arith.constant 0 : i32
    return %arg0, %c0_i32 : i32, i32
  }
}

module attributes {stable_mosaic.version = 11 : i64} {
  func.func @_mm_kernel_nores(%arg0: i32, %arg1: memref<8x1152xbf16, #tpu.memory_space<vmem>>, %arg2: memref<1152x128xbf16, #tpu.memory_space<vmem>>, %arg3: memref<1x128xf32, #tpu.memory_space<vmem>>, %arg4: memref<8x128xbf16, #tpu.memory_space<vmem>>) attributes {dimension_semantics = [#tpu.dimension_semantics<parallel>], iteration_bounds = array<i64: 1>, scalar_prefetch = 0 : i64, scratch_operands = 0 : i64, tpu.core_type = #tpu.core_type<tc>, window_params = [{transform_indices = @transform_0, window_bounds = array<i64: 8, 1152>}, {pipeline_mode = #tpu.pipeline_mode<synchronous>, transform_indices = @transform_1, window_bounds = array<i64: 1152, 128>}, {pipeline_mode = #tpu.pipeline_mode<synchronous>, transform_indices = @transform_2, window_bounds = array<i64: 1, 128>}, {transform_indices = @transform_3, window_bounds = array<i64: 8, 128>}]} {
    %c0 = arith.constant 0 : index
    %c0_0 = arith.constant 0 : index
    %0 = vector.load %arg1[%c0, %c0_0] : memref<8x1152xbf16, #tpu.memory_space<vmem>>, vector<8x1152xbf16>
    %c0_1 = arith.constant 0 : index
    %c0_2 = arith.constant 0 : index
    %1 = vector.load %arg2[%c0_1, %c0_2] : memref<1152x128xbf16, #tpu.memory_space<vmem>>, vector<1152x128xbf16>
    %cst = arith.constant dense<0.000000e+00> : vector<8x128xf32>
    %2 = tpu.matmul %0, %1, %cst {dimension_numbers = #tpu.dot_dimension_numbers<[1], [0], [0], [1], [0, 0, 1, 1], [], []>} : vector<8x1152xbf16>, vector<1152x128xbf16>, vector<8x128xf32> -> vector<8x128xf32>
    %c0_3 = arith.constant 0 : index
    %c0_4 = arith.constant 0 : index
    %3 = vector.load %arg3[%c0_3, %c0_4] : memref<1x128xf32, #tpu.memory_space<vmem>>, vector<1x128xf32>
    %4 = vector.broadcast %3 : vector<1x128xf32> to vector<8x128xf32>
    %5 = arith.addf %2, %4 : vector<8x128xf32>
    %cst_5 = arith.constant 0.000000e+00 : f32
    %6 = vector.broadcast %cst_5 : f32 to vector<8x128xf32>
    %7 = arith.maximumf %5, %6 : vector<8x128xf32>
    %8 = arith.truncf %7 : vector<8x128xf32> to vector<8x128xbf16>
    %c0_6 = arith.constant 0 : index
    %c0_7 = arith.constant 0 : index
    %9 = vector.load %arg4[%c0_6, %c0_7] : memref<8x128xbf16, #tpu.memory_space<vmem>>, vector<8x128xbf16>
    tpu.vector_store %arg4[%c0_6, %c0_7], %8 {strides = array<i32>} : memref<8x128xbf16, #tpu.memory_space<vmem>>, vector<8x128xbf16>,
    return
  }
  func.func @transform_0(%arg0: i32) -> (i32, i32) {
    %c0_i32 = arith.constant 0 : i32
    %c0_i32_0 = arith.constant 0 : i32
    return %arg0, %c0_i32 : i32, i32
  }
  func.func @transform_1(%arg0: i32) -> (i32, i32) {
    %c0_i32 = arith.constant 0 : i32
    %c0_i32_0 = arith.constant 0 : i32
    %c0_i32_1 = arith.constant 0 : i32
    return %c0_i32, %c0_i32_0 : i32, i32
  }
  func.func @transform_2(%arg0: i32) -> (i32, i32) {
    %c0_i32 = arith.constant 0 : i32
    %c0_i32_0 = arith.constant 0 : i32
    %c0_i32_1 = arith.constant 0 : i32
    return %c0_i32, %c0_i32_0 : i32, i32
  }
  func.func @transform_3(%arg0: i32) -> (i32, i32) {
    %c0_i32 = arith.constant 0 : i32
    %c0_i32_0 = arith.constant 0 : i32
    return %arg0, %c0_i32 : i32, i32
  }
}

module attributes {stable_mosaic.version = 11 : i64} {
  func.func @_mm_kernel_nores(%arg0: i32, %arg1: memref<8x128xbf16, #tpu.memory_space<vmem>>, %arg2: memref<128x32xbf16, #tpu.memory_space<vmem>>, %arg3: memref<1x32xf32, #tpu.memory_space<vmem>>, %arg4: memref<8x32xbf16, #tpu.memory_space<vmem>>) attributes {dimension_semantics = [#tpu.dimension_semantics<parallel>], iteration_bounds = array<i64: 1>, scalar_prefetch = 0 : i64, scratch_operands = 0 : i64, tpu.core_type = #tpu.core_type<tc>, window_params = [{transform_indices = @transform_0, window_bounds = array<i64: 8, 128>}, {pipeline_mode = #tpu.pipeline_mode<synchronous>, transform_indices = @transform_1, window_bounds = array<i64: 128, 32>}, {pipeline_mode = #tpu.pipeline_mode<synchronous>, transform_indices = @transform_2, window_bounds = array<i64: 1, 32>}, {transform_indices = @transform_3, window_bounds = array<i64: 8, 32>}]} {
    %c0 = arith.constant 0 : index
    %c0_0 = arith.constant 0 : index
    %0 = vector.load %arg1[%c0, %c0_0] : memref<8x128xbf16, #tpu.memory_space<vmem>>, vector<8x128xbf16>
    %c0_1 = arith.constant 0 : index
    %c0_2 = arith.constant 0 : index
    %1 = vector.load %arg2[%c0_1, %c0_2] : memref<128x32xbf16, #tpu.memory_space<vmem>>, vector<128x32xbf16>
    %cst = arith.constant dense<0.000000e+00> : vector<8x32xf32>
    %2 = tpu.matmul %0, %1, %cst {dimension_numbers = #tpu.dot_dimension_numbers<[1], [0], [0], [1], [0, 0, 1, 1], [], []>} : vector<8x128xbf16>, vector<128x32xbf16>, vector<8x32xf32> -> vector<8x32xf32>
    %c0_3 = arith.constant 0 : index
    %c0_4 = arith.constant 0 : index
    %3 = vector.load %arg3[%c0_3, %c0_4] : memref<1x32xf32, #tpu.memory_space<vmem>>, vector<1x32xf32>
    %4 = vector.broadcast %3 : vector<1x32xf32> to vector<8x32xf32>
    %5 = arith.addf %2, %4 : vector<8x32xf32>
    %cst_5 = arith.constant 0.000000e+00 : f32
    %6 = vector.broadcast %cst_5 : f32 to vector<8x32xf32>
    %7 = arith.maximumf %5, %6 : vector<8x32xf32>
    %8 = arith.truncf %7 : vector<8x32xf32> to vector<8x32xbf16>
    %c0_6 = arith.constant 0 : index
    %c0_7 = arith.constant 0 : index
    %9 = vector.load %arg4[%c0_6, %c0_7] : memref<8x32xbf16, #tpu.memory_space<vmem>>, vector<8x32xbf16>
    tpu.vector_store %arg4[%c0_6, %c0_7], %8 {strides = array<i32>} : memref<8x32xbf16, #tpu.memory_space<vmem>>, vector<8x32xbf16>,
    return
  }
  func.func @transform_0(%arg0: i32) -> (i32, i32) {
    %c0_i32 = arith.constant 0 : i32
    %c0_i32_0 = arith.constant 0 : i32
    return %arg0, %c0_i32 : i32, i32
  }
  func.func @transform_1(%arg0: i32) -> (i32, i32) {
    %c0_i32 = arith.constant 0 : i32
    %c0_i32_0 = arith.constant 0 : i32
    %c0_i32_1 = arith.constant 0 : i32
    return %c0_i32, %c0_i32_0 : i32, i32
  }
  func.func @transform_2(%arg0: i32) -> (i32, i32) {
    %c0_i32 = arith.constant 0 : i32
    %c0_i32_0 = arith.constant 0 : i32
    %c0_i32_1 = arith.constant 0 : i32
    return %c0_i32, %c0_i32_0 : i32, i32
  }
  func.func @transform_3(%arg0: i32) -> (i32, i32) {
    %c0_i32 = arith.constant 0 : i32
    %c0_i32_0 = arith.constant 0 : i32
    return %arg0, %c0_i32 : i32, i32
  }
}

module attributes {stable_mosaic.version = 11 : i64} {
  func.func @_mm_kernel_nores(%arg0: i32, %arg1: memref<8x32xbf16, #tpu.memory_space<vmem>>, %arg2: memref<32x128xbf16, #tpu.memory_space<vmem>>, %arg3: memref<1x128xf32, #tpu.memory_space<vmem>>, %arg4: memref<8x128xbf16, #tpu.memory_space<vmem>>) attributes {dimension_semantics = [#tpu.dimension_semantics<parallel>], iteration_bounds = array<i64: 1>, scalar_prefetch = 0 : i64, scratch_operands = 0 : i64, tpu.core_type = #tpu.core_type<tc>, window_params = [{transform_indices = @transform_0, window_bounds = array<i64: 8, 32>}, {pipeline_mode = #tpu.pipeline_mode<synchronous>, transform_indices = @transform_1, window_bounds = array<i64: 32, 128>}, {pipeline_mode = #tpu.pipeline_mode<synchronous>, transform_indices = @transform_2, window_bounds = array<i64: 1, 128>}, {transform_indices = @transform_3, window_bounds = array<i64: 8, 128>}]} {
    %c0 = arith.constant 0 : index
    %c0_0 = arith.constant 0 : index
    %0 = vector.load %arg1[%c0, %c0_0] : memref<8x32xbf16, #tpu.memory_space<vmem>>, vector<8x32xbf16>
    %c0_1 = arith.constant 0 : index
    %c0_2 = arith.constant 0 : index
    %1 = vector.load %arg2[%c0_1, %c0_2] : memref<32x128xbf16, #tpu.memory_space<vmem>>, vector<32x128xbf16>
    %cst = arith.constant dense<0.000000e+00> : vector<8x128xf32>
    %2 = tpu.matmul %0, %1, %cst {dimension_numbers = #tpu.dot_dimension_numbers<[1], [0], [0], [1], [0, 0, 1, 1], [], []>} : vector<8x32xbf16>, vector<32x128xbf16>, vector<8x128xf32> -> vector<8x128xf32>
    %c0_3 = arith.constant 0 : index
    %c0_4 = arith.constant 0 : index
    %3 = vector.load %arg3[%c0_3, %c0_4] : memref<1x128xf32, #tpu.memory_space<vmem>>, vector<1x128xf32>
    %4 = vector.broadcast %3 : vector<1x128xf32> to vector<8x128xf32>
    %5 = arith.addf %2, %4 : vector<8x128xf32>
    %cst_5 = arith.constant 0.000000e+00 : f32
    %6 = vector.broadcast %cst_5 : f32 to vector<8x128xf32>
    %7 = arith.maximumf %5, %6 : vector<8x128xf32>
    %8 = arith.truncf %7 : vector<8x128xf32> to vector<8x128xbf16>
    %c0_6 = arith.constant 0 : index
    %c0_7 = arith.constant 0 : index
    %9 = vector.load %arg4[%c0_6, %c0_7] : memref<8x128xbf16, #tpu.memory_space<vmem>>, vector<8x128xbf16>
    tpu.vector_store %arg4[%c0_6, %c0_7], %8 {strides = array<i32>} : memref<8x128xbf16, #tpu.memory_space<vmem>>, vector<8x128xbf16>,
    return
  }
  func.func @transform_0(%arg0: i32) -> (i32, i32) {
    %c0_i32 = arith.constant 0 : i32
    %c0_i32_0 = arith.constant 0 : i32
    return %arg0, %c0_i32 : i32, i32
  }
  func.func @transform_1(%arg0: i32) -> (i32, i32) {
    %c0_i32 = arith.constant 0 : i32
    %c0_i32_0 = arith.constant 0 : i32
    %c0_i32_1 = arith.constant 0 : i32
    return %c0_i32, %c0_i32_0 : i32, i32
  }
  func.func @transform_2(%arg0: i32) -> (i32, i32) {
    %c0_i32 = arith.constant 0 : i32
    %c0_i32_0 = arith.constant 0 : i32
    %c0_i32_1 = arith.constant 0 : i32
    return %c0_i32, %c0_i32_0 : i32, i32
  }
  func.func @transform_3(%arg0: i32) -> (i32, i32) {
    %c0_i32 = arith.constant 0 : i32
    %c0_i32_0 = arith.constant 0 : i32
    return %arg0, %c0_i32 : i32, i32
  }
}

module attributes {stable_mosaic.version = 11 : i64} {
  func.func @_mm_kernel_res(%arg0: i32, %arg1: memref<8x32xbf16, #tpu.memory_space<vmem>>, %arg2: memref<32x64xbf16, #tpu.memory_space<vmem>>, %arg3: memref<1x64xf32, #tpu.memory_space<vmem>>, %arg4: memref<8x64xbf16, #tpu.memory_space<vmem>>, %arg5: memref<8x64xbf16, #tpu.memory_space<vmem>>) attributes {dimension_semantics = [#tpu.dimension_semantics<parallel>], iteration_bounds = array<i64: 1>, scalar_prefetch = 0 : i64, scratch_operands = 0 : i64, tpu.core_type = #tpu.core_type<tc>, window_params = [{transform_indices = @transform_0, window_bounds = array<i64: 8, 32>}, {pipeline_mode = #tpu.pipeline_mode<synchronous>, transform_indices = @transform_1, window_bounds = array<i64: 32, 64>}, {pipeline_mode = #tpu.pipeline_mode<synchronous>, transform_indices = @transform_2, window_bounds = array<i64: 1, 64>}, {transform_indices = @transform_3, window_bounds = array<i64: 8, 64>}, {transform_indices = @transform_4, window_bounds = array<i64: 8, 64>}]} {
    %c0 = arith.constant 0 : index
    %c0_0 = arith.constant 0 : index
    %0 = vector.load %arg1[%c0, %c0_0] : memref<8x32xbf16, #tpu.memory_space<vmem>>, vector<8x32xbf16>
    %c0_1 = arith.constant 0 : index
    %c0_2 = arith.constant 0 : index
    %1 = vector.load %arg2[%c0_1, %c0_2] : memref<32x64xbf16, #tpu.memory_space<vmem>>, vector<32x64xbf16>
    %cst = arith.constant dense<0.000000e+00> : vector<8x64xf32>
    %2 = tpu.matmul %0, %1, %cst {dimension_numbers = #tpu.dot_dimension_numbers<[1], [0], [0], [1], [0, 0, 1, 1], [], []>} : vector<8x32xbf16>, vector<32x64xbf16>, vector<8x64xf32> -> vector<8x64xf32>
    %c0_3 = arith.constant 0 : index
    %c0_4 = arith.constant 0 : index
    %3 = vector.load %arg3[%c0_3, %c0_4] : memref<1x64xf32, #tpu.memory_space<vmem>>, vector<1x64xf32>
    %4 = vector.broadcast %3 : vector<1x64xf32> to vector<8x64xf32>
    %5 = arith.addf %2, %4 : vector<8x64xf32>
    %cst_5 = arith.constant 0.000000e+00 : f32
    %6 = vector.broadcast %cst_5 : f32 to vector<8x64xf32>
    %7 = arith.maximumf %5, %6 : vector<8x64xf32>
    %c0_6 = arith.constant 0 : index
    %c0_7 = arith.constant 0 : index
    %8 = vector.load %arg4[%c0_6, %c0_7] : memref<8x64xbf16, #tpu.memory_space<vmem>>, vector<8x64xbf16>
    %9 = arith.extf %8 : vector<8x64xbf16> to vector<8x64xf32>
    %10 = arith.addf %7, %9 : vector<8x64xf32>
    %11 = arith.truncf %10 : vector<8x64xf32> to vector<8x64xbf16>
    %c0_8 = arith.constant 0 : index
    %c0_9 = arith.constant 0 : index
    %12 = vector.load %arg5[%c0_8, %c0_9] : memref<8x64xbf16, #tpu.memory_space<vmem>>, vector<8x64xbf16>
    tpu.vector_store %arg5[%c0_8, %c0_9], %11 {strides = array<i32>} : memref<8x64xbf16, #tpu.memory_space<vmem>>, vector<8x64xbf16>,
    return
  }
  func.func @transform_0(%arg0: i32) -> (i32, i32) {
    %c0_i32 = arith.constant 0 : i32
    %c0_i32_0 = arith.constant 0 : i32
    return %arg0, %c0_i32 : i32, i32
  }
  func.func @transform_1(%arg0: i32) -> (i32, i32) {
    %c0_i32 = arith.constant 0 : i32
    %c0_i32_0 = arith.constant 0 : i32
    %c0_i32_1 = arith.constant 0 : i32
    return %c0_i32, %c0_i32_0 : i32, i32
  }
  func.func @transform_2(%arg0: i32) -> (i32, i32) {
    %c0_i32 = arith.constant 0 : i32
    %c0_i32_0 = arith.constant 0 : i32
    %c0_i32_1 = arith.constant 0 : i32
    return %c0_i32, %c0_i32_0 : i32, i32
  }
  func.func @transform_3(%arg0: i32) -> (i32, i32) {
    %c0_i32 = arith.constant 0 : i32
    %c0_i32_0 = arith.constant 0 : i32
    return %arg0, %c0_i32 : i32, i32
  }
  func.func @transform_4(%arg0: i32) -> (i32, i32) {
    %c0_i32 = arith.constant 0 : i32
    %c0_i32_0 = arith.constant 0 : i32
    return %arg0, %c0_i32 : i32, i32
  }
}

module attributes {stable_mosaic.version = 11 : i64} {
  func.func @_mm_kernel_nores(%arg0: i32, %arg1: memref<8x64xbf16, #tpu.memory_space<vmem>>, %arg2: memref<64x16xbf16, #tpu.memory_space<vmem>>, %arg3: memref<1x16xf32, #tpu.memory_space<vmem>>, %arg4: memref<8x16xbf16, #tpu.memory_space<vmem>>) attributes {dimension_semantics = [#tpu.dimension_semantics<parallel>], iteration_bounds = array<i64: 1>, scalar_prefetch = 0 : i64, scratch_operands = 0 : i64, tpu.core_type = #tpu.core_type<tc>, window_params = [{transform_indices = @transform_0, window_bounds = array<i64: 8, 64>}, {pipeline_mode = #tpu.pipeline_mode<synchronous>, transform_indices = @transform_1, window_bounds = array<i64: 64, 16>}, {pipeline_mode = #tpu.pipeline_mode<synchronous>, transform_indices = @transform_2, window_bounds = array<i64: 1, 16>}, {transform_indices = @transform_3, window_bounds = array<i64: 8, 16>}]} {
    %c0 = arith.constant 0 : index
    %c0_0 = arith.constant 0 : index
    %0 = vector.load %arg1[%c0, %c0_0] : memref<8x64xbf16, #tpu.memory_space<vmem>>, vector<8x64xbf16>
    %c0_1 = arith.constant 0 : index
    %c0_2 = arith.constant 0 : index
    %1 = vector.load %arg2[%c0_1, %c0_2] : memref<64x16xbf16, #tpu.memory_space<vmem>>, vector<64x16xbf16>
    %cst = arith.constant dense<0.000000e+00> : vector<8x16xf32>
    %2 = tpu.matmul %0, %1, %cst {dimension_numbers = #tpu.dot_dimension_numbers<[1], [0], [0], [1], [0, 0, 1, 1], [], []>} : vector<8x64xbf16>, vector<64x16xbf16>, vector<8x16xf32> -> vector<8x16xf32>
    %c0_3 = arith.constant 0 : index
    %c0_4 = arith.constant 0 : index
    %3 = vector.load %arg3[%c0_3, %c0_4] : memref<1x16xf32, #tpu.memory_space<vmem>>, vector<1x16xf32>
    %4 = vector.broadcast %3 : vector<1x16xf32> to vector<8x16xf32>
    %5 = arith.addf %2, %4 : vector<8x16xf32>
    %cst_5 = arith.constant 0.000000e+00 : f32
    %6 = vector.broadcast %cst_5 : f32 to vector<8x16xf32>
    %7 = arith.maximumf %5, %6 : vector<8x16xf32>
    %8 = arith.truncf %7 : vector<8x16xf32> to vector<8x16xbf16>
    %c0_6 = arith.constant 0 : index
    %c0_7 = arith.constant 0 : index
    %9 = vector.load %arg4[%c0_6, %c0_7] : memref<8x16xbf16, #tpu.memory_space<vmem>>, vector<8x16xbf16>
    tpu.vector_store %arg4[%c0_6, %c0_7], %8 {strides = array<i32>} : memref<8x16xbf16, #tpu.memory_space<vmem>>, vector<8x16xbf16>,
    return
  }
  func.func @transform_0(%arg0: i32) -> (i32, i32) {
    %c0_i32 = arith.constant 0 : i32
    %c0_i32_0 = arith.constant 0 : i32
    return %arg0, %c0_i32 : i32, i32
  }
  func.func @transform_1(%arg0: i32) -> (i32, i32) {
    %c0_i32 = arith.constant 0 : i32
    %c0_i32_0 = arith.constant 0 : i32
    %c0_i32_1 = arith.constant 0 : i32
    return %c0_i32, %c0_i32_0 : i32, i32
  }
  func.func @transform_2(%arg0: i32) -> (i32, i32) {
    %c0_i32 = arith.constant 0 : i32
    %c0_i32_0 = arith.constant 0 : i32
    %c0_i32_1 = arith.constant 0 : i32
    return %c0_i32, %c0_i32_0 : i32, i32
  }
  func.func @transform_3(%arg0: i32) -> (i32, i32) {
    %c0_i32 = arith.constant 0 : i32
    %c0_i32_0 = arith.constant 0 : i32
    return %arg0, %c0_i32 : i32, i32
  }
}

module attributes {stable_mosaic.version = 11 : i64} {
  func.func @_mm_kernel_nores(%arg0: i32, %arg1: memref<8x16xbf16, #tpu.memory_space<vmem>>, %arg2: memref<16x64xbf16, #tpu.memory_space<vmem>>, %arg3: memref<1x64xf32, #tpu.memory_space<vmem>>, %arg4: memref<8x64xbf16, #tpu.memory_space<vmem>>) attributes {dimension_semantics = [#tpu.dimension_semantics<parallel>], iteration_bounds = array<i64: 1>, scalar_prefetch = 0 : i64, scratch_operands = 0 : i64, tpu.core_type = #tpu.core_type<tc>, window_params = [{transform_indices = @transform_0, window_bounds = array<i64: 8, 16>}, {pipeline_mode = #tpu.pipeline_mode<synchronous>, transform_indices = @transform_1, window_bounds = array<i64: 16, 64>}, {pipeline_mode = #tpu.pipeline_mode<synchronous>, transform_indices = @transform_2, window_bounds = array<i64: 1, 64>}, {transform_indices = @transform_3, window_bounds = array<i64: 8, 64>}]} {
    %c0 = arith.constant 0 : index
    %c0_0 = arith.constant 0 : index
    %0 = vector.load %arg1[%c0, %c0_0] : memref<8x16xbf16, #tpu.memory_space<vmem>>, vector<8x16xbf16>
    %c0_1 = arith.constant 0 : index
    %c0_2 = arith.constant 0 : index
    %1 = vector.load %arg2[%c0_1, %c0_2] : memref<16x64xbf16, #tpu.memory_space<vmem>>, vector<16x64xbf16>
    %cst = arith.constant dense<0.000000e+00> : vector<8x64xf32>
    %2 = tpu.matmul %0, %1, %cst {dimension_numbers = #tpu.dot_dimension_numbers<[1], [0], [0], [1], [0, 0, 1, 1], [], []>} : vector<8x16xbf16>, vector<16x64xbf16>, vector<8x64xf32> -> vector<8x64xf32>
    %c0_3 = arith.constant 0 : index
    %c0_4 = arith.constant 0 : index
    %3 = vector.load %arg3[%c0_3, %c0_4] : memref<1x64xf32, #tpu.memory_space<vmem>>, vector<1x64xf32>
    %4 = vector.broadcast %3 : vector<1x64xf32> to vector<8x64xf32>
    %5 = arith.addf %2, %4 : vector<8x64xf32>
    %cst_5 = arith.constant 0.000000e+00 : f32
    %6 = vector.broadcast %cst_5 : f32 to vector<8x64xf32>
    %7 = arith.maximumf %5, %6 : vector<8x64xf32>
    %8 = arith.truncf %7 : vector<8x64xf32> to vector<8x64xbf16>
    %c0_6 = arith.constant 0 : index
    %c0_7 = arith.constant 0 : index
    %9 = vector.load %arg4[%c0_6, %c0_7] : memref<8x64xbf16, #tpu.memory_space<vmem>>, vector<8x64xbf16>
    tpu.vector_store %arg4[%c0_6, %c0_7], %8 {strides = array<i32>} : memref<8x64xbf16, #tpu.memory_space<vmem>>, vector<8x64xbf16>,
    return
  }
  func.func @transform_0(%arg0: i32) -> (i32, i32) {
    %c0_i32 = arith.constant 0 : i32
    %c0_i32_0 = arith.constant 0 : i32
    return %arg0, %c0_i32 : i32, i32
  }
  func.func @transform_1(%arg0: i32) -> (i32, i32) {
    %c0_i32 = arith.constant 0 : i32
    %c0_i32_0 = arith.constant 0 : i32
    %c0_i32_1 = arith.constant 0 : i32
    return %c0_i32, %c0_i32_0 : i32, i32
  }
  func.func @transform_2(%arg0: i32) -> (i32, i32) {
    %c0_i32 = arith.constant 0 : i32
    %c0_i32_0 = arith.constant 0 : i32
    %c0_i32_1 = arith.constant 0 : i32
    return %c0_i32, %c0_i32_0 : i32, i32
  }
  func.func @transform_3(%arg0: i32) -> (i32, i32) {
    %c0_i32 = arith.constant 0 : i32
    %c0_i32_0 = arith.constant 0 : i32
    return %arg0, %c0_i32 : i32, i32
  }
}

module attributes {stable_mosaic.version = 11 : i64} {
  func.func @_mm_kernel_res(%arg0: i32, %arg1: memref<16x16xbf16, #tpu.memory_space<vmem>>, %arg2: memref<16x32xbf16, #tpu.memory_space<vmem>>, %arg3: memref<1x32xf32, #tpu.memory_space<vmem>>, %arg4: memref<16x32xbf16, #tpu.memory_space<vmem>>, %arg5: memref<16x32xbf16, #tpu.memory_space<vmem>>) attributes {dimension_semantics = [#tpu.dimension_semantics<parallel>], iteration_bounds = array<i64: 2>, scalar_prefetch = 0 : i64, scratch_operands = 0 : i64, tpu.core_type = #tpu.core_type<tc>, window_params = [{transform_indices = @transform_0, window_bounds = array<i64: 16, 16>}, {pipeline_mode = #tpu.pipeline_mode<synchronous>, transform_indices = @transform_1, window_bounds = array<i64: 16, 32>}, {pipeline_mode = #tpu.pipeline_mode<synchronous>, transform_indices = @transform_2, window_bounds = array<i64: 1, 32>}, {transform_indices = @transform_3, window_bounds = array<i64: 16, 32>}, {transform_indices = @transform_4, window_bounds = array<i64: 16, 32>}]} {
    %c0 = arith.constant 0 : index
    %c0_0 = arith.constant 0 : index
    %0 = vector.load %arg1[%c0, %c0_0] : memref<16x16xbf16, #tpu.memory_space<vmem>>, vector<16x16xbf16>
    %c0_1 = arith.constant 0 : index
    %c0_2 = arith.constant 0 : index
    %1 = vector.load %arg2[%c0_1, %c0_2] : memref<16x32xbf16, #tpu.memory_space<vmem>>, vector<16x32xbf16>
    %cst = arith.constant dense<0.000000e+00> : vector<16x32xf32>
    %2 = tpu.matmul %0, %1, %cst {dimension_numbers = #tpu.dot_dimension_numbers<[1], [0], [0], [1], [0, 0, 1, 1], [], []>} : vector<16x16xbf16>, vector<16x32xbf16>, vector<16x32xf32> -> vector<16x32xf32>
    %c0_3 = arith.constant 0 : index
    %c0_4 = arith.constant 0 : index
    %3 = vector.load %arg3[%c0_3, %c0_4] : memref<1x32xf32, #tpu.memory_space<vmem>>, vector<1x32xf32>
    %4 = vector.broadcast %3 : vector<1x32xf32> to vector<16x32xf32>
    %5 = arith.addf %2, %4 : vector<16x32xf32>
    %cst_5 = arith.constant 0.000000e+00 : f32
    %6 = vector.broadcast %cst_5 : f32 to vector<16x32xf32>
    %7 = arith.maximumf %5, %6 : vector<16x32xf32>
    %c0_6 = arith.constant 0 : index
    %c0_7 = arith.constant 0 : index
    %8 = vector.load %arg4[%c0_6, %c0_7] : memref<16x32xbf16, #tpu.memory_space<vmem>>, vector<16x32xbf16>
    %9 = arith.extf %8 : vector<16x32xbf16> to vector<16x32xf32>
    %10 = arith.addf %7, %9 : vector<16x32xf32>
    %11 = arith.truncf %10 : vector<16x32xf32> to vector<16x32xbf16>
    %c0_8 = arith.constant 0 : index
    %c0_9 = arith.constant 0 : index
    %12 = vector.load %arg5[%c0_8, %c0_9] : memref<16x32xbf16, #tpu.memory_space<vmem>>, vector<16x32xbf16>
    tpu.vector_store %arg5[%c0_8, %c0_9], %11 {strides = array<i32>} : memref<16x32xbf16, #tpu.memory_space<vmem>>, vector<16x32xbf16>,
    return
  }
  func.func @transform_0(%arg0: i32) -> (i32, i32) {
    %c0_i32 = arith.constant 0 : i32
    %c0_i32_0 = arith.constant 0 : i32
    return %arg0, %c0_i32 : i32, i32
  }
  func.func @transform_1(%arg0: i32) -> (i32, i32) {
    %c0_i32 = arith.constant 0 : i32
    %c0_i32_0 = arith.constant 0 : i32
    %c0_i32_1 = arith.constant 0 : i32
    return %c0_i32, %c0_i32_0 : i32, i32
  }
  func.func @transform_2(%arg0: i32) -> (i32, i32) {
    %c0_i32 = arith.constant 0 : i32
    %c0_i32_0 = arith.constant 0 : i32
    %c0_i32_1 = arith.constant 0 : i32
    return %c0_i32, %c0_i32_0 : i32, i32
  }
  func.func @transform_3(%arg0: i32) -> (i32, i32) {
    %c0_i32 = arith.constant 0 : i32
    %c0_i32_0 = arith.constant 0 : i32
    return %arg0, %c0_i32 : i32, i32
  }
  func.func @transform_4(%arg0: i32) -> (i32, i32) {
    %c0_i32 = arith.constant 0 : i32
    %c0_i32_0 = arith.constant 0 : i32
    return %arg0, %c0_i32 : i32, i32
  }
}

module attributes {stable_mosaic.version = 11 : i64} {
  func.func @_mm_kernel_nores(%arg0: i32, %arg1: memref<16x8xbf16, #tpu.memory_space<vmem>>, %arg2: memref<8x32xbf16, #tpu.memory_space<vmem>>, %arg3: memref<1x32xf32, #tpu.memory_space<vmem>>, %arg4: memref<16x32xbf16, #tpu.memory_space<vmem>>) attributes {dimension_semantics = [#tpu.dimension_semantics<parallel>], iteration_bounds = array<i64: 2>, scalar_prefetch = 0 : i64, scratch_operands = 0 : i64, tpu.core_type = #tpu.core_type<tc>, window_params = [{transform_indices = @transform_0, window_bounds = array<i64: 16, 8>}, {pipeline_mode = #tpu.pipeline_mode<synchronous>, transform_indices = @transform_1, window_bounds = array<i64: 8, 32>}, {pipeline_mode = #tpu.pipeline_mode<synchronous>, transform_indices = @transform_2, window_bounds = array<i64: 1, 32>}, {transform_indices = @transform_3, window_bounds = array<i64: 16, 32>}]} {
    %c0 = arith.constant 0 : index
    %c0_0 = arith.constant 0 : index
    %0 = vector.load %arg1[%c0, %c0_0] : memref<16x8xbf16, #tpu.memory_space<vmem>>, vector<16x8xbf16>
    %c0_1 = arith.constant 0 : index
    %c0_2 = arith.constant 0 : index
    %1 = vector.load %arg2[%c0_1, %c0_2] : memref<8x32xbf16, #tpu.memory_space<vmem>>, vector<8x32xbf16>
    %cst = arith.constant dense<0.000000e+00> : vector<16x32xf32>
    %2 = tpu.matmul %0, %1, %cst {dimension_numbers = #tpu.dot_dimension_numbers<[1], [0], [0], [1], [0, 0, 1, 1], [], []>} : vector<16x8xbf16>, vector<8x32xbf16>, vector<16x32xf32> -> vector<16x32xf32>
    %c0_3 = arith.constant 0 : index
    %c0_4 = arith.constant 0 : index
    %3 = vector.load %arg3[%c0_3, %c0_4] : memref<1x32xf32, #tpu.memory_space<vmem>>, vector<1x32xf32>
    %4 = vector.broadcast %3 : vector<1x32xf32> to vector<16x32xf32>
    %5 = arith.addf %2, %4 : vector<16x32xf32>
    %cst_5 = arith.constant 0.000000e+00 : f32
    %6 = vector.broadcast %cst_5 : f32 to vector<16x32xf32>
    %7 = arith.maximumf %5, %6 : vector<16x32xf32>
    %8 = arith.truncf %7 : vector<16x32xf32> to vector<16x32xbf16>
    %c0_6 = arith.constant 0 : index
    %c0_7 = arith.constant 0 : index
    %9 = vector.load %arg4[%c0_6, %c0_7] : memref<16x32xbf16, #tpu.memory_space<vmem>>, vector<16x32xbf16>
    tpu.vector_store %arg4[%c0_6, %c0_7], %8 {strides = array<i32>} : memref<16x32xbf16, #tpu.memory_space<vmem>>, vector<16x32xbf16>,
    return
  }
  func.func @transform_0(%arg0: i32) -> (i32, i32) {
    %c0_i32 = arith.constant 0 : i32
    %c0_i32_0 = arith.constant 0 : i32
    return %arg0, %c0_i32 : i32, i32
  }
  func.func @transform_1(%arg0: i32) -> (i32, i32) {
    %c0_i32 = arith.constant 0 : i32
    %c0_i32_0 = arith.constant 0 : i32
    %c0_i32_1 = arith.constant 0 : i32
    return %c0_i32, %c0_i32_0 : i32, i32
  }
  func.func @transform_2(%arg0: i32) -> (i32, i32) {
    %c0_i32 = arith.constant 0 : i32
    %c0_i32_0 = arith.constant 0 : i32
    %c0_i32_1 = arith.constant 0 : i32
    return %c0_i32, %c0_i32_0 : i32, i32
  }
  func.func @transform_3(%arg0: i32) -> (i32, i32) {
    %c0_i32 = arith.constant 0 : i32
    %c0_i32_0 = arith.constant 0 : i32
    return %arg0, %c0_i32 : i32, i32
  }
}

module attributes {stable_mosaic.version = 11 : i64} {
  func.func @_mm_kernel_nores(%arg0: i32, %arg1: memref<16x32xbf16, #tpu.memory_space<vmem>>, %arg2: memref<32x8xbf16, #tpu.memory_space<vmem>>, %arg3: memref<1x8xf32, #tpu.memory_space<vmem>>, %arg4: memref<16x8xbf16, #tpu.memory_space<vmem>>) attributes {dimension_semantics = [#tpu.dimension_semantics<parallel>], iteration_bounds = array<i64: 2>, scalar_prefetch = 0 : i64, scratch_operands = 0 : i64, tpu.core_type = #tpu.core_type<tc>, window_params = [{transform_indices = @transform_0, window_bounds = array<i64: 16, 32>}, {pipeline_mode = #tpu.pipeline_mode<synchronous>, transform_indices = @transform_1, window_bounds = array<i64: 32, 8>}, {pipeline_mode = #tpu.pipeline_mode<synchronous>, transform_indices = @transform_2, window_bounds = array<i64: 1, 8>}, {transform_indices = @transform_3, window_bounds = array<i64: 16, 8>}]} {
    %c0 = arith.constant 0 : index
    %c0_0 = arith.constant 0 : index
    %0 = vector.load %arg1[%c0, %c0_0] : memref<16x32xbf16, #tpu.memory_space<vmem>>, vector<16x32xbf16>
    %c0_1 = arith.constant 0 : index
    %c0_2 = arith.constant 0 : index
    %1 = vector.load %arg2[%c0_1, %c0_2] : memref<32x8xbf16, #tpu.memory_space<vmem>>, vector<32x8xbf16>
    %cst = arith.constant dense<0.000000e+00> : vector<16x8xf32>
    %2 = tpu.matmul %0, %1, %cst {dimension_numbers = #tpu.dot_dimension_numbers<[1], [0], [0], [1], [0, 0, 1, 1], [], []>} : vector<16x32xbf16>, vector<32x8xbf16>, vector<16x8xf32> -> vector<16x8xf32>
    %c0_3 = arith.constant 0 : index
    %c0_4 = arith.constant 0 : index
    %3 = vector.load %arg3[%c0_3, %c0_4] : memref<1x8xf32, #tpu.memory_space<vmem>>, vector<1x8xf32>
    %4 = vector.broadcast %3 : vector<1x8xf32> to vector<16x8xf32>
    %5 = arith.addf %2, %4 : vector<16x8xf32>
    %cst_5 = arith.constant 0.000000e+00 : f32
    %6 = vector.broadcast %cst_5 : f32 to vector<16x8xf32>
    %7 = arith.maximumf %5, %6 : vector<16x8xf32>
    %8 = arith.truncf %7 : vector<16x8xf32> to vector<16x8xbf16>
    %c0_6 = arith.constant 0 : index
    %c0_7 = arith.constant 0 : index
    %9 = vector.load %arg4[%c0_6, %c0_7] : memref<16x8xbf16, #tpu.memory_space<vmem>>, vector<16x8xbf16>
    tpu.vector_store %arg4[%c0_6, %c0_7], %8 {strides = array<i32>} : memref<16x8xbf16, #tpu.memory_space<vmem>>, vector<16x8xbf16>,
    return
  }
  func.func @transform_0(%arg0: i32) -> (i32, i32) {
    %c0_i32 = arith.constant 0 : i32
    %c0_i32_0 = arith.constant 0 : i32
    return %arg0, %c0_i32 : i32, i32
  }
  func.func @transform_1(%arg0: i32) -> (i32, i32) {
    %c0_i32 = arith.constant 0 : i32
    %c0_i32_0 = arith.constant 0 : i32
    %c0_i32_1 = arith.constant 0 : i32
    return %c0_i32, %c0_i32_0 : i32, i32
  }
  func.func @transform_2(%arg0: i32) -> (i32, i32) {
    %c0_i32 = arith.constant 0 : i32
    %c0_i32_0 = arith.constant 0 : i32
    %c0_i32_1 = arith.constant 0 : i32
    return %c0_i32, %c0_i32_0 : i32, i32
  }
  func.func @transform_3(%arg0: i32) -> (i32, i32) {
    %c0_i32 = arith.constant 0 : i32
    %c0_i32_0 = arith.constant 0 : i32
    return %arg0, %c0_i32 : i32, i32
  }
}

module attributes {stable_mosaic.version = 11 : i64} {
  func.func @_mm_kernel_res(%arg0: i32, %arg1: memref<64x8xbf16, #tpu.memory_space<vmem>>, %arg2: memref<8x16xbf16, #tpu.memory_space<vmem>>, %arg3: memref<1x16xf32, #tpu.memory_space<vmem>>, %arg4: memref<64x16xbf16, #tpu.memory_space<vmem>>, %arg5: memref<64x16xbf16, #tpu.memory_space<vmem>>) attributes {dimension_semantics = [#tpu.dimension_semantics<parallel>], iteration_bounds = array<i64: 2>, scalar_prefetch = 0 : i64, scratch_operands = 0 : i64, tpu.core_type = #tpu.core_type<tc>, window_params = [{transform_indices = @transform_0, window_bounds = array<i64: 64, 8>}, {pipeline_mode = #tpu.pipeline_mode<synchronous>, transform_indices = @transform_1, window_bounds = array<i64: 8, 16>}, {pipeline_mode = #tpu.pipeline_mode<synchronous>, transform_indices = @transform_2, window_bounds = array<i64: 1, 16>}, {transform_indices = @transform_3, window_bounds = array<i64: 64, 16>}, {transform_indices = @transform_4, window_bounds = array<i64: 64, 16>}]} {
    %c0 = arith.constant 0 : index
    %c0_0 = arith.constant 0 : index
    %0 = vector.load %arg1[%c0, %c0_0] : memref<64x8xbf16, #tpu.memory_space<vmem>>, vector<64x8xbf16>
    %c0_1 = arith.constant 0 : index
    %c0_2 = arith.constant 0 : index
    %1 = vector.load %arg2[%c0_1, %c0_2] : memref<8x16xbf16, #tpu.memory_space<vmem>>, vector<8x16xbf16>
    %cst = arith.constant dense<0.000000e+00> : vector<64x16xf32>
    %2 = tpu.matmul %0, %1, %cst {dimension_numbers = #tpu.dot_dimension_numbers<[1], [0], [0], [1], [0, 0, 1, 1], [], []>} : vector<64x8xbf16>, vector<8x16xbf16>, vector<64x16xf32> -> vector<64x16xf32>
    %c0_3 = arith.constant 0 : index
    %c0_4 = arith.constant 0 : index
    %3 = vector.load %arg3[%c0_3, %c0_4] : memref<1x16xf32, #tpu.memory_space<vmem>>, vector<1x16xf32>
    %4 = vector.broadcast %3 : vector<1x16xf32> to vector<64x16xf32>
    %5 = arith.addf %2, %4 : vector<64x16xf32>
    %cst_5 = arith.constant 0.000000e+00 : f32
    %6 = vector.broadcast %cst_5 : f32 to vector<64x16xf32>
    %7 = arith.maximumf %5, %6 : vector<64x16xf32>
    %c0_6 = arith.constant 0 : index
    %c0_7 = arith.constant 0 : index
    %8 = vector.load %arg4[%c0_6, %c0_7] : memref<64x16xbf16, #tpu.memory_space<vmem>>, vector<64x16xbf16>
    %9 = arith.extf %8 : vector<64x16xbf16> to vector<64x16xf32>
    %10 = arith.addf %7, %9 : vector<64x16xf32>
    %11 = arith.truncf %10 : vector<64x16xf32> to vector<64x16xbf16>
    %c0_8 = arith.constant 0 : index
    %c0_9 = arith.constant 0 : index
    %12 = vector.load %arg5[%c0_8, %c0_9] : memref<64x16xbf16, #tpu.memory_space<vmem>>, vector<64x16xbf16>
    tpu.vector_store %arg5[%c0_8, %c0_9], %11 {strides = array<i32>} : memref<64x16xbf16, #tpu.memory_space<vmem>>, vector<64x16xbf16>,
    return
  }
  func.func @transform_0(%arg0: i32) -> (i32, i32) {
    %c0_i32 = arith.constant 0 : i32
    %c0_i32_0 = arith.constant 0 : i32
    return %arg0, %c0_i32 : i32, i32
  }
  func.func @transform_1(%arg0: i32) -> (i32, i32) {
    %c0_i32 = arith.constant 0 : i32
    %c0_i32_0 = arith.constant 0 : i32
    %c0_i32_1 = arith.constant 0 : i32
    return %c0_i32, %c0_i32_0 : i32, i32
  }
  func.func @transform_2(%arg0: i32) -> (i32, i32) {
    %c0_i32 = arith.constant 0 : i32
    %c0_i32_0 = arith.constant 0 : i32
    %c0_i32_1 = arith.constant 0 : i32
    return %c0_i32, %c0_i32_0 : i32, i32
  }
  func.func @transform_3(%arg0: i32) -> (i32, i32) {
    %c0_i32 = arith.constant 0 : i32
    %c0_i32_0 = arith.constant 0 : i32
    return %arg0, %c0_i32 : i32, i32
  }
  func.func @transform_4(%arg0: i32) -> (i32, i32) {
    %c0_i32 = arith.constant 0 : i32
    %c0_i32_0 = arith.constant 0 : i32
    return %arg0, %c0_i32 : i32, i32
  }
}

module attributes {stable_mosaic.version = 11 : i64} {
  func.func @_mm_kernel_nores(%arg0: i32, %arg1: memref<64x8xbf16, #tpu.memory_space<vmem>>, %arg2: memref<8x32xbf16, #tpu.memory_space<vmem>>, %arg3: memref<1x32xf32, #tpu.memory_space<vmem>>, %arg4: memref<64x32xbf16, #tpu.memory_space<vmem>>) attributes {dimension_semantics = [#tpu.dimension_semantics<parallel>], iteration_bounds = array<i64: 2>, scalar_prefetch = 0 : i64, scratch_operands = 0 : i64, tpu.core_type = #tpu.core_type<tc>, window_params = [{transform_indices = @transform_0, window_bounds = array<i64: 64, 8>}, {pipeline_mode = #tpu.pipeline_mode<synchronous>, transform_indices = @transform_1, window_bounds = array<i64: 8, 32>}, {pipeline_mode = #tpu.pipeline_mode<synchronous>, transform_indices = @transform_2, window_bounds = array<i64: 1, 32>}, {transform_indices = @transform_3, window_bounds = array<i64: 64, 32>}]} {
    %c0 = arith.constant 0 : index
    %c0_0 = arith.constant 0 : index
    %0 = vector.load %arg1[%c0, %c0_0] : memref<64x8xbf16, #tpu.memory_space<vmem>>, vector<64x8xbf16>
    %c0_1 = arith.constant 0 : index
    %c0_2 = arith.constant 0 : index
    %1 = vector.load %arg2[%c0_1, %c0_2] : memref<8x32xbf16, #tpu.memory_space<vmem>>, vector<8x32xbf16>
    %cst = arith.constant dense<0.000000e+00> : vector<64x32xf32>
    %2 = tpu.matmul %0, %1, %cst {dimension_numbers = #tpu.dot_dimension_numbers<[1], [0], [0], [1], [0, 0, 1, 1], [], []>} : vector<64x8xbf16>, vector<8x32xbf16>, vector<64x32xf32> -> vector<64x32xf32>
    %c0_3 = arith.constant 0 : index
    %c0_4 = arith.constant 0 : index
    %3 = vector.load %arg3[%c0_3, %c0_4] : memref<1x32xf32, #tpu.memory_space<vmem>>, vector<1x32xf32>
    %4 = vector.broadcast %3 : vector<1x32xf32> to vector<64x32xf32>
    %5 = arith.addf %2, %4 : vector<64x32xf32>
    %cst_5 = arith.constant 0.000000e+00 : f32
    %6 = vector.broadcast %cst_5 : f32 to vector<64x32xf32>
    %7 = arith.maximumf %5, %6 : vector<64x32xf32>
    %8 = arith.truncf %7 : vector<64x32xf32> to vector<64x32xbf16>
    %c0_6 = arith.constant 0 : index
    %c0_7 = arith.constant 0 : index
    %9 = vector.load %arg4[%c0_6, %c0_7] : memref<64x32xbf16, #tpu.memory_space<vmem>>, vector<64x32xbf16>
    tpu.vector_store %arg4[%c0_6, %c0_7], %8 {strides = array<i32>} : memref<64x32xbf16, #tpu.memory_space<vmem>>, vector<64x32xbf16>,
    return
  }
  func.func @transform_0(%arg0: i32) -> (i32, i32) {
    %c0_i32 = arith.constant 0 : i32
    %c0_i32_0 = arith.constant 0 : i32
    return %arg0, %c0_i32 : i32, i32
  }
  func.func @transform_1(%arg0: i32) -> (i32, i32) {
    %c0_i32 = arith.constant 0 : i32
    %c0_i32_0 = arith.constant 0 : i32
    %c0_i32_1 = arith.constant 0 : i32
    return %c0_i32, %c0_i32_0 : i32, i32
  }
  func.func @transform_2(%arg0: i32) -> (i32, i32) {
    %c0_i32 = arith.constant 0 : i32
    %c0_i32_0 = arith.constant 0 : i32
    %c0_i32_1 = arith.constant 0 : i32
    return %c0_i32, %c0_i32_0 : i32, i32
  }
  func.func @transform_3(%arg0: i32) -> (i32, i32) {
    %c0_i32 = arith.constant 0 : i32
    %c0_i32_0 = arith.constant 0 : i32
    return %arg0, %c0_i32 : i32, i32
  }
}

module attributes {stable_mosaic.version = 11 : i64} {
  func.func @_mm_kernel_nores(%arg0: i32, %arg1: memref<64x16xbf16, #tpu.memory_space<vmem>>, %arg2: memref<16x8xbf16, #tpu.memory_space<vmem>>, %arg3: memref<1x8xf32, #tpu.memory_space<vmem>>, %arg4: memref<64x8xbf16, #tpu.memory_space<vmem>>) attributes {dimension_semantics = [#tpu.dimension_semantics<parallel>], iteration_bounds = array<i64: 2>, scalar_prefetch = 0 : i64, scratch_operands = 0 : i64, tpu.core_type = #tpu.core_type<tc>, window_params = [{transform_indices = @transform_0, window_bounds = array<i64: 64, 16>}, {pipeline_mode = #tpu.pipeline_mode<synchronous>, transform_indices = @transform_1, window_bounds = array<i64: 16, 8>}, {pipeline_mode = #tpu.pipeline_mode<synchronous>, transform_indices = @transform_2, window_bounds = array<i64: 1, 8>}, {transform_indices = @transform_3, window_bounds = array<i64: 64, 8>}]} {
    %c0 = arith.constant 0 : index
    %c0_0 = arith.constant 0 : index
    %0 = vector.load %arg1[%c0, %c0_0] : memref<64x16xbf16, #tpu.memory_space<vmem>>, vector<64x16xbf16>
    %c0_1 = arith.constant 0 : index
    %c0_2 = arith.constant 0 : index
    %1 = vector.load %arg2[%c0_1, %c0_2] : memref<16x8xbf16, #tpu.memory_space<vmem>>, vector<16x8xbf16>
    %cst = arith.constant dense<0.000000e+00> : vector<64x8xf32>
    %2 = tpu.matmul %0, %1, %cst {dimension_numbers = #tpu.dot_dimension_numbers<[1], [0], [0], [1], [0, 0, 1, 1], [], []>} : vector<64x16xbf16>, vector<16x8xbf16>, vector<64x8xf32> -> vector<64x8xf32>
    %c0_3 = arith.constant 0 : index
    %c0_4 = arith.constant 0 : index
    %3 = vector.load %arg3[%c0_3, %c0_4] : memref<1x8xf32, #tpu.memory_space<vmem>>, vector<1x8xf32>
    %4 = vector.broadcast %3 : vector<1x8xf32> to vector<64x8xf32>
    %5 = arith.addf %2, %4 : vector<64x8xf32>
    %cst_5 = arith.constant 0.000000e+00 : f32
    %6 = vector.broadcast %cst_5 : f32 to vector<64x8xf32>
    %7 = arith.maximumf %5, %6 : vector<64x8xf32>
    %8 = arith.truncf %7 : vector<64x8xf32> to vector<64x8xbf16>
    %c0_6 = arith.constant 0 : index
    %c0_7 = arith.constant 0 : index
    %9 = vector.load %arg4[%c0_6, %c0_7] : memref<64x8xbf16, #tpu.memory_space<vmem>>, vector<64x8xbf16>
    tpu.vector_store %arg4[%c0_6, %c0_7], %8 {strides = array<i32>} : memref<64x8xbf16, #tpu.memory_space<vmem>>, vector<64x8xbf16>,
    return
  }
  func.func @transform_0(%arg0: i32) -> (i32, i32) {
    %c0_i32 = arith.constant 0 : i32
    %c0_i32_0 = arith.constant 0 : i32
    return %arg0, %c0_i32 : i32, i32
  }
  func.func @transform_1(%arg0: i32) -> (i32, i32) {
    %c0_i32 = arith.constant 0 : i32
    %c0_i32_0 = arith.constant 0 : i32
    %c0_i32_1 = arith.constant 0 : i32
    return %c0_i32, %c0_i32_0 : i32, i32
  }
  func.func @transform_2(%arg0: i32) -> (i32, i32) {
    %c0_i32 = arith.constant 0 : i32
    %c0_i32_0 = arith.constant 0 : i32
    %c0_i32_1 = arith.constant 0 : i32
    return %c0_i32, %c0_i32_0 : i32, i32
  }
  func.func @transform_3(%arg0: i32) -> (i32, i32) {
    %c0_i32 = arith.constant 0 : i32
    %c0_i32_0 = arith.constant 0 : i32
    return %arg0, %c0_i32 : i32, i32
  }
}

module attributes {stable_mosaic.version = 11 : i64} {
  func.func @_mm_kernel_nores(%arg0: i32, %arg1: memref<256x8xbf16, #tpu.memory_space<vmem>>, %arg2: memref<8x16xbf16, #tpu.memory_space<vmem>>, %arg3: memref<1x16xf32, #tpu.memory_space<vmem>>, %arg4: memref<256x16xbf16, #tpu.memory_space<vmem>>) attributes {dimension_semantics = [#tpu.dimension_semantics<parallel>], iteration_bounds = array<i64: 2>, scalar_prefetch = 0 : i64, scratch_operands = 0 : i64, tpu.core_type = #tpu.core_type<tc>, window_params = [{transform_indices = @transform_0, window_bounds = array<i64: 256, 8>}, {pipeline_mode = #tpu.pipeline_mode<synchronous>, transform_indices = @transform_1, window_bounds = array<i64: 8, 16>}, {pipeline_mode = #tpu.pipeline_mode<synchronous>, transform_indices = @transform_2, window_bounds = array<i64: 1, 16>}, {transform_indices = @transform_3, window_bounds = array<i64: 256, 16>}]} {
    %c0 = arith.constant 0 : index
    %c0_0 = arith.constant 0 : index
    %0 = vector.load %arg1[%c0, %c0_0] : memref<256x8xbf16, #tpu.memory_space<vmem>>, vector<256x8xbf16>
    %c0_1 = arith.constant 0 : index
    %c0_2 = arith.constant 0 : index
    %1 = vector.load %arg2[%c0_1, %c0_2] : memref<8x16xbf16, #tpu.memory_space<vmem>>, vector<8x16xbf16>
    %cst = arith.constant dense<0.000000e+00> : vector<256x16xf32>
    %2 = tpu.matmul %0, %1, %cst {dimension_numbers = #tpu.dot_dimension_numbers<[1], [0], [0], [1], [0, 0, 1, 1], [], []>} : vector<256x8xbf16>, vector<8x16xbf16>, vector<256x16xf32> -> vector<256x16xf32>
    %c0_3 = arith.constant 0 : index
    %c0_4 = arith.constant 0 : index
    %3 = vector.load %arg3[%c0_3, %c0_4] : memref<1x16xf32, #tpu.memory_space<vmem>>, vector<1x16xf32>
    %4 = vector.broadcast %3 : vector<1x16xf32> to vector<256x16xf32>
    %5 = arith.addf %2, %4 : vector<256x16xf32>
    %cst_5 = arith.constant 0.000000e+00 : f32
    %6 = vector.broadcast %cst_5 : f32 to vector<256x16xf32>
    %7 = arith.maximumf %5, %6 : vector<256x16xf32>
    %8 = arith.truncf %7 : vector<256x16xf32> to vector<256x16xbf16>
    %c0_6 = arith.constant 0 : index
    %c0_7 = arith.constant 0 : index
    %9 = vector.load %arg4[%c0_6, %c0_7] : memref<256x16xbf16, #tpu.memory_space<vmem>>, vector<256x16xbf16>
    tpu.vector_store %arg4[%c0_6, %c0_7], %8 {strides = array<i32>} : memref<256x16xbf16, #tpu.memory_space<vmem>>, vector<256x16xbf16>,
    return
  }
  func.func @transform_0(%arg0: i32) -> (i32, i32) {
    %c0_i32 = arith.constant 0 : i32
    %c0_i32_0 = arith.constant 0 : i32
    return %arg0, %c0_i32 : i32, i32
  }
  func.func @transform_1(%arg0: i32) -> (i32, i32) {
    %c0_i32 = arith.constant 0 : i32
    %c0_i32_0 = arith.constant 0 : i32
    %c0_i32_1 = arith.constant 0 : i32
    return %c0_i32, %c0_i32_0 : i32, i32
  }
  func.func @transform_2(%arg0: i32) -> (i32, i32) {
    %c0_i32 = arith.constant 0 : i32
    %c0_i32_0 = arith.constant 0 : i32
    %c0_i32_1 = arith.constant 0 : i32
    return %c0_i32, %c0_i32_0 : i32, i32
  }
  func.func @transform_3(%arg0: i32) -> (i32, i32) {
    %c0_i32 = arith.constant 0 : i32
    %c0_i32_0 = arith.constant 0 : i32
    return %arg0, %c0_i32 : i32, i32
  }
}

module attributes {stable_mosaic.version = 11 : i64} {
  func.func @_mm_kernel_nores(%arg0: i32, %arg1: memref<256x16xbf16, #tpu.memory_space<vmem>>, %arg2: memref<16x32xbf16, #tpu.memory_space<vmem>>, %arg3: memref<1x32xf32, #tpu.memory_space<vmem>>, %arg4: memref<256x32xbf16, #tpu.memory_space<vmem>>) attributes {dimension_semantics = [#tpu.dimension_semantics<parallel>], iteration_bounds = array<i64: 2>, scalar_prefetch = 0 : i64, scratch_operands = 0 : i64, tpu.core_type = #tpu.core_type<tc>, window_params = [{transform_indices = @transform_0, window_bounds = array<i64: 256, 16>}, {pipeline_mode = #tpu.pipeline_mode<synchronous>, transform_indices = @transform_1, window_bounds = array<i64: 16, 32>}, {pipeline_mode = #tpu.pipeline_mode<synchronous>, transform_indices = @transform_2, window_bounds = array<i64: 1, 32>}, {transform_indices = @transform_3, window_bounds = array<i64: 256, 32>}]} {
    %c0 = arith.constant 0 : index
    %c0_0 = arith.constant 0 : index
    %0 = vector.load %arg1[%c0, %c0_0] : memref<256x16xbf16, #tpu.memory_space<vmem>>, vector<256x16xbf16>
    %c0_1 = arith.constant 0 : index
    %c0_2 = arith.constant 0 : index
    %1 = vector.load %arg2[%c0_1, %c0_2] : memref<16x32xbf16, #tpu.memory_space<vmem>>, vector<16x32xbf16>
    %cst = arith.constant dense<0.000000e+00> : vector<256x32xf32>
    %2 = tpu.matmul %0, %1, %cst {dimension_numbers = #tpu.dot_dimension_numbers<[1], [0], [0], [1], [0, 0, 1, 1], [], []>} : vector<256x16xbf16>, vector<16x32xbf16>, vector<256x32xf32> -> vector<256x32xf32>
    %c0_3 = arith.constant 0 : index
    %c0_4 = arith.constant 0 : index
    %3 = vector.load %arg3[%c0_3, %c0_4] : memref<1x32xf32, #tpu.memory_space<vmem>>, vector<1x32xf32>
    %4 = vector.broadcast %3 : vector<1x32xf32> to vector<256x32xf32>
    %5 = arith.addf %2, %4 : vector<256x32xf32>
    %cst_5 = arith.constant 0.000000e+00 : f32
    %6 = vector.broadcast %cst_5 : f32 to vector<256x32xf32>
    %7 = arith.maximumf %5, %6 : vector<256x32xf32>
    %8 = arith.truncf %7 : vector<256x32xf32> to vector<256x32xbf16>
    %c0_6 = arith.constant 0 : index
    %c0_7 = arith.constant 0 : index
    %9 = vector.load %arg4[%c0_6, %c0_7] : memref<256x32xbf16, #tpu.memory_space<vmem>>, vector<256x32xbf16>
    tpu.vector_store %arg4[%c0_6, %c0_7], %8 {strides = array<i32>} : memref<256x32xbf16, #tpu.memory_space<vmem>>, vector<256x32xbf16>,
    return
  }
  func.func @transform_0(%arg0: i32) -> (i32, i32) {
    %c0_i32 = arith.constant 0 : i32
    %c0_i32_0 = arith.constant 0 : i32
    return %arg0, %c0_i32 : i32, i32
  }
  func.func @transform_1(%arg0: i32) -> (i32, i32) {
    %c0_i32 = arith.constant 0 : i32
    %c0_i32_0 = arith.constant 0 : i32
    %c0_i32_1 = arith.constant 0 : i32
    return %c0_i32, %c0_i32_0 : i32, i32
  }
  func.func @transform_2(%arg0: i32) -> (i32, i32) {
    %c0_i32 = arith.constant 0 : i32
    %c0_i32_0 = arith.constant 0 : i32
    %c0_i32_1 = arith.constant 0 : i32
    return %c0_i32, %c0_i32_0 : i32, i32
  }
  func.func @transform_3(%arg0: i32) -> (i32, i32) {
    %c0_i32 = arith.constant 0 : i32
    %c0_i32_0 = arith.constant 0 : i32
    return %arg0, %c0_i32 : i32, i32
  }
}

module attributes {stable_mosaic.version = 11 : i64} {
  func.func @_mm_kernel_nores(%arg0: i32, %arg1: memref<256x72xbf16, #tpu.memory_space<vmem>>, %arg2: memref<72x8xbf16, #tpu.memory_space<vmem>>, %arg3: memref<1x8xf32, #tpu.memory_space<vmem>>, %arg4: memref<256x8xbf16, #tpu.memory_space<vmem>>) attributes {dimension_semantics = [#tpu.dimension_semantics<parallel>], iteration_bounds = array<i64: 8>, scalar_prefetch = 0 : i64, scratch_operands = 0 : i64, tpu.core_type = #tpu.core_type<tc>, window_params = [{transform_indices = @transform_0, window_bounds = array<i64: 256, 72>}, {pipeline_mode = #tpu.pipeline_mode<synchronous>, transform_indices = @transform_1, window_bounds = array<i64: 72, 8>}, {pipeline_mode = #tpu.pipeline_mode<synchronous>, transform_indices = @transform_2, window_bounds = array<i64: 1, 8>}, {transform_indices = @transform_3, window_bounds = array<i64: 256, 8>}]} {
    %c0 = arith.constant 0 : index
    %c0_0 = arith.constant 0 : index
    %0 = vector.load %arg1[%c0, %c0_0] : memref<256x72xbf16, #tpu.memory_space<vmem>>, vector<256x72xbf16>
    %c0_1 = arith.constant 0 : index
    %c0_2 = arith.constant 0 : index
    %1 = vector.load %arg2[%c0_1, %c0_2] : memref<72x8xbf16, #tpu.memory_space<vmem>>, vector<72x8xbf16>
    %cst = arith.constant dense<0.000000e+00> : vector<256x8xf32>
    %2 = tpu.matmul %0, %1, %cst {dimension_numbers = #tpu.dot_dimension_numbers<[1], [0], [0], [1], [0, 0, 1, 1], [], []>} : vector<256x72xbf16>, vector<72x8xbf16>, vector<256x8xf32> -> vector<256x8xf32>
    %c0_3 = arith.constant 0 : index
    %c0_4 = arith.constant 0 : index
    %3 = vector.load %arg3[%c0_3, %c0_4] : memref<1x8xf32, #tpu.memory_space<vmem>>, vector<1x8xf32>
    %4 = vector.broadcast %3 : vector<1x8xf32> to vector<256x8xf32>
    %5 = arith.addf %2, %4 : vector<256x8xf32>
    %cst_5 = arith.constant 0.000000e+00 : f32
    %6 = vector.broadcast %cst_5 : f32 to vector<256x8xf32>
    %7 = arith.maximumf %5, %6 : vector<256x8xf32>
    %8 = arith.truncf %7 : vector<256x8xf32> to vector<256x8xbf16>
    %c0_6 = arith.constant 0 : index
    %c0_7 = arith.constant 0 : index
    %9 = vector.load %arg4[%c0_6, %c0_7] : memref<256x8xbf16, #tpu.memory_space<vmem>>, vector<256x8xbf16>
    tpu.vector_store %arg4[%c0_6, %c0_7], %8 {strides = array<i32>} : memref<256x8xbf16, #tpu.memory_space<vmem>>, vector<256x8xbf16>,
    return
  }
  func.func @transform_0(%arg0: i32) -> (i32, i32) {
    %c0_i32 = arith.constant 0 : i32
    %c0_i32_0 = arith.constant 0 : i32
    return %arg0, %c0_i32 : i32, i32
  }
  func.func @transform_1(%arg0: i32) -> (i32, i32) {
    %c0_i32 = arith.constant 0 : i32
    %c0_i32_0 = arith.constant 0 : i32
    %c0_i32_1 = arith.constant 0 : i32
    return %c0_i32, %c0_i32_0 : i32, i32
  }
  func.func @transform_2(%arg0: i32) -> (i32, i32) {
    %c0_i32 = arith.constant 0 : i32
    %c0_i32_0 = arith.constant 0 : i32
    %c0_i32_1 = arith.constant 0 : i32
    return %c0_i32, %c0_i32_0 : i32, i32
  }
  func.func @transform_3(%arg0: i32) -> (i32, i32) {
    %c0_i32 = arith.constant 0 : i32
    %c0_i32_0 = arith.constant 0 : i32
    return %arg0, %c0_i32 : i32, i32
  }
}

module attributes {stable_mosaic.version = 11 : i64} {
  func.func @_mm_kernel_nores(%arg0: i32, %arg1: memref<256x72xbf16, #tpu.memory_space<vmem>>, %arg2: memref<72x2xbf16, #tpu.memory_space<vmem>>, %arg3: memref<1x2xf32, #tpu.memory_space<vmem>>, %arg4: memref<256x2xf32, #tpu.memory_space<vmem>>) attributes {dimension_semantics = [#tpu.dimension_semantics<parallel>], iteration_bounds = array<i64: 8>, scalar_prefetch = 0 : i64, scratch_operands = 0 : i64, tpu.core_type = #tpu.core_type<tc>, window_params = [{transform_indices = @transform_0, window_bounds = array<i64: 256, 72>}, {pipeline_mode = #tpu.pipeline_mode<synchronous>, transform_indices = @transform_1, window_bounds = array<i64: 72, 2>}, {pipeline_mode = #tpu.pipeline_mode<synchronous>, transform_indices = @transform_2, window_bounds = array<i64: 1, 2>}, {transform_indices = @transform_3, window_bounds = array<i64: 256, 2>}]} {
    %c0 = arith.constant 0 : index
    %c0_0 = arith.constant 0 : index
    %0 = vector.load %arg1[%c0, %c0_0] : memref<256x72xbf16, #tpu.memory_space<vmem>>, vector<256x72xbf16>
    %c0_1 = arith.constant 0 : index
    %c0_2 = arith.constant 0 : index
    %1 = vector.load %arg2[%c0_1, %c0_2] : memref<72x2xbf16, #tpu.memory_space<vmem>>, vector<72x2xbf16>
    %cst = arith.constant dense<0.000000e+00> : vector<256x2xf32>
    %2 = tpu.matmul %0, %1, %cst {dimension_numbers = #tpu.dot_dimension_numbers<[1], [0], [0], [1], [0, 0, 1, 1], [], []>} : vector<256x72xbf16>, vector<72x2xbf16>, vector<256x2xf32> -> vector<256x2xf32>
    %c0_3 = arith.constant 0 : index
    %c0_4 = arith.constant 0 : index
    %3 = vector.load %arg3[%c0_3, %c0_4] : memref<1x2xf32, #tpu.memory_space<vmem>>, vector<1x2xf32>
    %4 = vector.broadcast %3 : vector<1x2xf32> to vector<256x2xf32>
    %5 = arith.addf %2, %4 : vector<256x2xf32>
    %c0_5 = arith.constant 0 : index
    %c0_6 = arith.constant 0 : index
    %6 = vector.load %arg4[%c0_5, %c0_6] : memref<256x2xf32, #tpu.memory_space<vmem>>, vector<256x2xf32>
    tpu.vector_store %arg4[%c0_5, %c0_6], %5 {strides = array<i32>} : memref<256x2xf32, #tpu.memory_space<vmem>>, vector<256x2xf32>,
    return
  }
  func.func @transform_0(%arg0: i32) -> (i32, i32) {
    %c0_i32 = arith.constant 0 : i32
    %c0_i32_0 = arith.constant 0 : i32
    return %arg0, %c0_i32 : i32, i32
  }
  func.func @transform_1(%arg0: i32) -> (i32, i32) {
    %c0_i32 = arith.constant 0 : i32
    %c0_i32_0 = arith.constant 0 : i32
    %c0_i32_1 = arith.constant 0 : i32
    return %c0_i32, %c0_i32_0 : i32, i32
  }
  func.func @transform_2(%arg0: i32) -> (i32, i32) {
    %c0_i32 = arith.constant 0 : i32
    %c0_i32_0 = arith.constant 0 : i32
    %c0_i32_1 = arith.constant 0 : i32
    return %c0_i32, %c0_i32_0 : i32, i32
  }
  func.func @transform_3(%arg0: i32) -> (i32, i32) {
    %c0_i32 = arith.constant 0 : i32
    %c0_i32_0 = arith.constant 0 : i32
    return %arg0, %c0_i32 : i32, i32
  }
}

</mosaic_0001>

<bundles_post_ra>
// kernel: _lambda_.37
= control target key start
LH: loop header
LB: loop body
LE: loop exit
PB: predicated region body
PF: predicated region fallthrough
CT: control target
= control target key end

     0   :  { %vm304_vm0 = vcmask 125952   ;;  %s871_s0 = inlined_call_operand.vmem [shape: bf16[128,16], index: 0, kind: input, shape index: {}]   ;;  %s872_s1 = inlined_call_operand.vmem [shape: bf16[128,16], index: 1, kind: input, shape index: {}]   ;;  %s873_s2 = inlined_call_operand.vmem [shape: bf16[128,16], index: 2, kind: input, shape index: {}]   ;;  %s874_s3 = inlined_call_operand.vmem [shape: bf16[128,16], index: 3, kind: input, shape index: {}]   ;;  %s875_s4 = inlined_call_operand.vmem [shape: bf16[128,16], index: 4, kind: input, shape index: {}]   ;;  %s876_s5 = inlined_call_operand.vmem [shape: bf16[128,16], index: 5, kind: input, shape index: {}]   ;;  %s877_s6 = inlined_call_operand.vmem [shape: bf16[128,16], index: 6, kind: input, shape index: {}]   ;;  %s878_s7 = inlined_call_operand.vmem [shape: bf16[128,16], index: 7, kind: input, shape index: {}]   ;;  %s879_s8 = inlined_call_operand.vmem [shape: bf16[128,16], index: 8, kind: input, shape index: {}]   ;;  %s880_s9 = inlined_call_operand.vmem [shape: bf16[128,16], index: 9, kind: output, shape index: {}]  }
   0x1   :  { %v32_v0 = vld [vmem:[%s871_s0] sm:$0xf]  ;;  %v33_v6 = vld [vmem:[%s871_s0 + $0x4] sm:$0xf]  ;;  %v34_v15 = vld [vmem:[%s871_s0 + $0x8] sm:$0xf] }
   0x2   :  { %v48_v1 = vld [vmem:[%s872_s1] sm:$0xf]  ;;  %v49_v7 = vld [vmem:[%s872_s1 + $0x4] sm:$0xf]  ;;  %v50_v16 = vld [vmem:[%s872_s1 + $0x8] sm:$0xf] }
   0x3   :  { %v80_v2 = vld [vmem:[%s873_s2] sm:$0xf]  ;;  %v64_v3 = vmax.bf16 %v48_v1, %v32_v0  ;;  %v81_v8 = vld [vmem:[%s873_s2 + $0x4] sm:$0xf]  ;;  %v65_v10 = vmax.bf16 %v49_v7, %v33_v6  ;;  %v82_v17 = vld [vmem:[%s873_s2 + $0x8] sm:$0xf]  ;;  %v66_v20 = vmax.bf16 %v50_v16, %v34_v15 }
   0x4   :  { %v112_v4 = vld [vmem:[%s874_s3] sm:$0xf]  ;;  %v113_v13 = vld [vmem:[%s874_s3 + $0x4] sm:$0xf]  ;;  %v114_v24 = vld [vmem:[%s874_s3 + $0x8] sm:$0xf] }
   0x5   :  { %v96_v5 = vmax.bf16 %v80_v2, %v64_v3  ;;  %v144_v9 = vld [vmem:[%s875_s4] sm:$0xf]  ;;  %v97_v14 = vmax.bf16 %v81_v8, %v65_v10  ;;  %v145_v19 = vld [vmem:[%s875_s4 + $0x4] sm:$0xf]  ;;  %v98_v26 = vmax.bf16 %v82_v17, %v66_v20  ;;  %v35_v27 = vld [vmem:[%s871_s0 + $0xc] sm:$0xf] }
   0x6   :  { %v176_v12 = vld [vmem:[%s876_s5] sm:$0xf]  ;;  %v177_v23 = vld [vmem:[%s876_s5 + $0x4] sm:$0xf]  ;;  %v51_v28 = vld [vmem:[%s872_s1 + $0xc] sm:$0xf] }
   0x7   :  { %v128_v11 = vmax.bf16 %v112_v4, %v96_v5  ;;  %v208_v21 = vld [vmem:[%s877_s6] sm:$0xf]  ;;  %v129_v22 = vmax.bf16 %v113_v13, %v97_v14  ;;  %v83_v29 = vld [vmem:[%s873_s2 + $0xc] sm:$0xf]  ;;  %v146_v33 = vld [vmem:[%s875_s4 + $0x8] sm:$0xf]  ;;  %v67_v34 = vmax.bf16 %v51_v28, %v35_v27  ;;  %v130_v37 = vmax.bf16 %v114_v24, %v98_v26 }
   0x8   :  { %v240_v30 = vld [vmem:[%s878_s7] sm:$0xf]  ;;  %v209_v36 = vld [vmem:[%s877_s6 + $0x4] sm:$0xf]  ;;  %v178_v38 = vld [vmem:[%s876_s5 + $0x8] sm:$0xf] }
   0x9   :  { %v160_v18 = vmax.bf16 %v144_v9, %v128_v11  ;;  %v272_v31 = vld [vmem:[%s879_s8] sm:$0xf]  ;;  %v161_v32 = vmax.bf16 %v145_v19, %v129_v22  ;;  %v115_v39 = vld [vmem:[%s874_s3 + $0xc] sm:$0xf]  ;;  %v99_v41 = vmax.bf16 %v83_v29, %v67_v34  ;;  %v36_v42 = vld [vmem:[%s871_s0 + $0x10] sm:$0xf]  ;;  %v162_v48 = vmax.bf16 %v146_v33, %v130_v37 }
   0xa   :  { %v52_v43 = vld [vmem:[%s872_s1 + $0x10] sm:$0xf]  ;;  %v241_v46 = vld [vmem:[%s878_s7 + $0x4] sm:$0xf]  ;;  %v147_v49 = vld [vmem:[%s875_s4 + $0xc] sm:$0xf] }
   0xb   :  { %v192_v25 = vmax.bf16 %v176_v12, %v160_v18  ;;  %v193_v40 = vmax.bf16 %v177_v23, %v161_v32  ;;  %v84_v44 = vld [vmem:[%s873_s2 + $0x10] sm:$0xf]  ;;  %v273_v47 = vld [vmem:[%s879_s8 + $0x4] sm:$0xf]  ;;  %v68_v50 = vmax.bf16 %v52_v43, %v36_v42  ;;  %v210_v52 = vld [vmem:[%s877_s6 + $0x8] sm:$0xf]  ;;  %v131_v53 = vmax.bf16 %v115_v39, %v99_v41 }
   0xc   :  { %v179_v54 = vld [vmem:[%s876_s5 + $0xc] sm:$0xf]  ;;  %v116_v55 = vld [vmem:[%s874_s3 + $0x10] sm:$0xf]  ;;  %v194_v57 = vmax.bf16 %v178_v38, %v162_v48  ;;  %v37_v59 = vld [vmem:[%s871_s0 + $0x14] sm:$0xf] }
   0xd   :  { %v224_v35 = vmax.bf16 %v208_v21, %v192_v25  ;;  %v225_v51 = vmax.bf16 %v209_v36, %v193_v40  ;;  %v100_v58 = vmax.bf16 %v84_v44, %v68_v50  ;;  %v53_v60 = vld [vmem:[%s872_s1 + $0x14] sm:$0xf]  ;;  %v242_v63 = vld [vmem:[%s878_s7 + $0x8] sm:$0xf]  ;;  %v163_v1 = vmax.bf16 %v147_v49, %v131_v53  ;;  %v148_v2 = vld [vmem:[%s875_s4 + $0x10] sm:$0xf] }
   0xe   :  { %v85_v61 = vld [vmem:[%s873_s2 + $0x14] sm:$0xf]  ;;  %v274_v0 = vld [vmem:[%s879_s8 + $0x8] sm:$0xf]  ;;  %v69_v3 = vmax.bf16 %v53_v60, %v37_v59  ;;  %v226_v4 = vmax.bf16 %v210_v52, %v194_v57  ;;  %v211_v5 = vld [vmem:[%s877_s6 + $0xc] sm:$0xf] }
   0xf   :  { %v256_v45 = vmax.bf16 %v240_v30, %v224_v35  ;;  %v257_v62 = vmax.bf16 %v241_v46, %v225_v51  ;;  %v132_v6 = vmax.bf16 %v116_v55, %v100_v58  ;;  %v180_v7 = vld [vmem:[%s876_s5 + $0x10] sm:$0xf]  ;;  %v117_v8 = vld [vmem:[%s874_s3 + $0x14] sm:$0xf]  ;;  %v195_v10 = vmax.bf16 %v179_v54, %v163_v1  ;;  %v38_v12 = vld [vmem:[%s871_s0 + $0x18] sm:$0xf] }
  0x10   :  { %v101_v11 = vmax.bf16 %v85_v61, %v69_v3  ;;  %v54_v13 = vld [vmem:[%s872_s1 + $0x18] sm:$0xf]  ;;  %v258_v15 = vmax.bf16 %v242_v63, %v226_v4  ;;  %v243_v16 = vld [vmem:[%s878_s7 + $0xc] sm:$0xf]  ;;  %v149_v19 = vld [vmem:[%s875_s4 + $0x14] sm:$0xf] }
  0x11   :  { %v288_v56 = vmax.bf16 %v272_v31, %v256_v45  ;;  %v289_v9 = vmax.bf16 %v273_v47, %v257_v62  ;;  %v86_v14 = vld [vmem:[%s873_s2 + $0x18] sm:$0xf]  ;;  %v275_v17 = vld [vmem:[%s879_s8 + $0xc] sm:$0xf]  ;;  %v164_v18 = vmax.bf16 %v148_v2, %v132_v6  ;;  %v70_v20 = vmax.bf16 %v54_v13, %v38_v12  ;;  %v212_v22 = vld [vmem:[%s877_s6 + $0x10] sm:$0xf] }
  0x12   :  { %v227_v21 = vmax.bf16 %v211_v5, %v195_v10  ;;  %v133_v23 = vmax.bf16 %v117_v8, %v101_v11  ;;  %v181_v24 = vld [vmem:[%s876_s5 + $0x14] sm:$0xf]  ;;  %v118_v25 = vld [vmem:[%s874_s3 + $0x18] sm:$0xf]  ;;  %v290_v26 = vmax.bf16 %v274_v0, %v258_v15  ;;  %v39_v29 = vld [vmem:[%s871_s0 + $0x1c] sm:$0xf] }
  0x13   :  { %305 = vst.msk [vmem:[%s880_s9] sm:$0xf] %vm304_vm0, %v288_v56  ;;  %306 = vst.msk [vmem:[%s880_s9 + $0x4] sm:$0xf] %vm304_vm0, %v289_v9  ;;  %v196_v27 = vmax.bf16 %v180_v7, %v164_v18  ;;  %v102_v28 = vmax.bf16 %v86_v14, %v70_v20  ;;  %v55_v30 = vld [vmem:[%s872_s1 + $0x1c] sm:$0xf] }
  0x14   :  { %v87_v31 = vld [vmem:[%s873_s2 + $0x1c] sm:$0xf]  ;;  %v259_v32 = vmax.bf16 %v243_v16, %v227_v21  ;;  %v244_v33 = vld [vmem:[%s878_s7 + $0x10] sm:$0xf]  ;;  %v165_v35 = vmax.bf16 %v149_v19, %v133_v23  ;;  %v150_v36 = vld [vmem:[%s875_s4 + $0x18] sm:$0xf]  ;;  %v71_v37 = vmax.bf16 %v55_v30, %v39_v29 }
  0x15   :  { %v276_v34 = vld [vmem:[%s879_s8 + $0x10] sm:$0xf]  ;;  %307 = vst.msk [vmem:[%s880_s9 + $0x8] sm:$0xf] %vm304_vm0, %v290_v26  ;;  %v228_v38 = vmax.bf16 %v212_v22, %v196_v27  ;;  %v213_v39 = vld [vmem:[%s877_s6 + $0x14] sm:$0xf]  ;;  %v134_v40 = vmax.bf16 %v118_v25, %v102_v28 }
  0x16   :  { %v182_v41 = vld [vmem:[%s876_s5 + $0x18] sm:$0xf]  ;;  %v119_v42 = vld [vmem:[%s874_s3 + $0x1c] sm:$0xf]  ;;  %v291_v43 = vmax.bf16 %v275_v17, %v259_v32  ;;  %v197_v44 = vmax.bf16 %v181_v24, %v165_v35  ;;  %v103_v45 = vmax.bf16 %v87_v31, %v71_v37  ;;  %v40_v46 = vld [vmem:[%s871_s0 + $0x20] sm:$0xf] }
  0x17   :  { %v56_v47 = vld [vmem:[%s872_s1 + $0x20] sm:$0xf]  ;;  %v260_v49 = vmax.bf16 %v244_v33, %v228_v38  ;;  %v245_v50 = vld [vmem:[%s878_s7 + $0x14] sm:$0xf]  ;;  %v166_v52 = vmax.bf16 %v150_v36, %v134_v40  ;;  %v151_v53 = vld [vmem:[%s875_s4 + $0x1c] sm:$0xf] }
  0x18   :  { %v88_v48 = vld [vmem:[%s873_s2 + $0x20] sm:$0xf]  ;;  %v277_v51 = vld [vmem:[%s879_s8 + $0x14] sm:$0xf]  ;;  %v72_v54 = vmax.bf16 %v56_v47, %v40_v46  ;;  %308 = vst.msk [vmem:[%s880_s9 + $0xc] sm:$0xf] %vm304_vm0, %v291_v43  ;;  %v229_v55 = vmax.bf16 %v213_v39, %v197_v44  ;;  %v135_v57 = vmax.bf16 %v119_v42, %v103_v45 }
  0x19   :  { %v214_v56 = vld [vmem:[%s877_s6 + $0x18] sm:$0xf]  ;;  %v183_v58 = vld [vmem:[%s876_s5 + $0x1c] sm:$0xf]  ;;  %v120_v59 = vld [vmem:[%s874_s3 + $0x20] sm:$0xf]  ;;  %v292_v60 = vmax.bf16 %v276_v34, %v260_v49  ;;  %v198_v61 = vmax.bf16 %v182_v41, %v166_v52 }
  0x1a   :  { %v104_v62 = vmax.bf16 %v88_v48, %v72_v54  ;;  %v41_v63 = vld [vmem:[%s871_s0 + $0x24] sm:$0xf]  ;;  %v261_v2 = vmax.bf16 %v245_v50, %v229_v55  ;;  %v246_v3 = vld [vmem:[%s878_s7 + $0x18] sm:$0xf]  ;;  %v167_v5 = vmax.bf16 %v151_v53, %v135_v57  ;;  %v152_v6 = vld [vmem:[%s875_s4 + $0x20] sm:$0xf] }
  0x1b   :  { %v57_v0 = vld [vmem:[%s872_s1 + $0x24] sm:$0xf]  ;;  %v278_v4 = vld [vmem:[%s879_s8 + $0x18] sm:$0xf]  ;;  %309 = vst.msk [vmem:[%s880_s9 + $0x10] sm:$0xf] %vm304_vm0, %v292_v60  ;;  %v230_v8 = vmax.bf16 %v214_v56, %v198_v61 }
  0x1c   :  { %v89_v1 = vld [vmem:[%s873_s2 + $0x24] sm:$0xf]  ;;  %v73_v7 = vmax.bf16 %v57_v0, %v41_v63  ;;  %v215_v9 = vld [vmem:[%s877_s6 + $0x1c] sm:$0xf]  ;;  %v136_v10 = vmax.bf16 %v120_v59, %v104_v62  ;;  %v184_v11 = vld [vmem:[%s876_s5 + $0x20] sm:$0xf]  ;;  %v293_v13 = vmax.bf16 %v277_v51, %v261_v2  ;;  %v199_v14 = vmax.bf16 %v183_v58, %v167_v5 }
  0x1d   :  { %v121_v12 = vld [vmem:[%s874_s3 + $0x24] sm:$0xf]  ;;  %v42_v16 = vld [vmem:[%s871_s0 + $0x28] sm:$0xf]  ;;  %v262_v19 = vmax.bf16 %v246_v3, %v230_v8  ;;  %v247_v20 = vld [vmem:[%s878_s7 + $0x1c] sm:$0xf] }
  0x1e   :  { %v105_v15 = vmax.bf16 %v89_v1, %v73_v7  ;;  %v58_v17 = vld [vmem:[%s872_s1 + $0x28] sm:$0xf]  ;;  %v279_v21 = vld [vmem:[%s879_s8 + $0x1c] sm:$0xf]  ;;  %v168_v22 = vmax.bf16 %v152_v6, %v136_v10  ;;  %v153_v23 = vld [vmem:[%s875_s4 + $0x24] sm:$0xf]  ;;  %v231_v25 = vmax.bf16 %v215_v9, %v199_v14 }
  0x1f   :  { %v90_v18 = vld [vmem:[%s873_s2 + $0x28] sm:$0xf]  ;;  %v74_v24 = vmax.bf16 %v58_v17, %v42_v16  ;;  %310 = vst.msk [vmem:[%s880_s9 + $0x14] sm:$0xf] %vm304_vm0, %v293_v13  ;;  %v216_v26 = vld [vmem:[%s877_s6 + $0x20] sm:$0xf]  ;;  %v294_v30 = vmax.bf16 %v278_v4, %v262_v19 }
  0x20   :  { %v137_v27 = vmax.bf16 %v121_v12, %v105_v15  ;;  %v185_v28 = vld [vmem:[%s876_s5 + $0x24] sm:$0xf]  ;;  %v122_v29 = vld [vmem:[%s874_s3 + $0x28] sm:$0xf]  ;;  %v200_v31 = vmax.bf16 %v184_v11, %v168_v22  ;;  %v43_v33 = vld [vmem:[%s871_s0 + $0x2c] sm:$0xf]  ;;  %v263_v36 = vmax.bf16 %v247_v20, %v231_v25 }
  0x21   :  { %v106_v32 = vmax.bf16 %v90_v18, %v74_v24  ;;  %v59_v34 = vld [vmem:[%s872_s1 + $0x2c] sm:$0xf]  ;;  %v248_v37 = vld [vmem:[%s878_s7 + $0x20] sm:$0xf]  ;;  %v154_v40 = vld [vmem:[%s875_s4 + $0x28] sm:$0xf] }
  0x22   :  { %v91_v35 = vld [vmem:[%s873_s2 + $0x2c] sm:$0xf]  ;;  %v280_v38 = vld [vmem:[%s879_s8 + $0x20] sm:$0xf]  ;;  %v169_v39 = vmax.bf16 %v153_v23, %v137_v27  ;;  %v75_v41 = vmax.bf16 %v59_v34, %v43_v33  ;;  %311 = vst.msk [vmem:[%s880_s9 + $0x18] sm:$0xf] %vm304_vm0, %v294_v30  ;;  %v232_v42 = vmax.bf16 %v216_v26, %v200_v31  ;;  %v295_v47 = vmax.bf16 %v279_v21, %v263_v36 }
  0x23   :  { %v217_v43 = vld [vmem:[%s877_s6 + $0x24] sm:$0xf]  ;;  %v138_v44 = vmax.bf16 %v122_v29, %v106_v32  ;;  %v186_v45 = vld [vmem:[%s876_s5 + $0x28] sm:$0xf]  ;;  %v123_v46 = vld [vmem:[%s874_s3 + $0x2c] sm:$0xf] }
  0x24   :  { %v201_v48 = vmax.bf16 %v185_v28, %v169_v39  ;;  %v107_v49 = vmax.bf16 %v91_v35, %v75_v41  ;;  %v44_v50 = vld [vmem:[%s871_s0 + $0x30] sm:$0xf]  ;;  %v264_v53 = vmax.bf16 %v248_v37, %v232_v42  ;;  %v249_v54 = vld [vmem:[%s878_s7 + $0x24] sm:$0xf]  ;;  %v155_v57 = vld [vmem:[%s875_s4 + $0x2c] sm:$0xf] }
  0x25   :  { %v60_v51 = vld [vmem:[%s872_s1 + $0x30] sm:$0xf]  ;;  %v281_v55 = vld [vmem:[%s879_s8 + $0x24] sm:$0xf]  ;;  %v170_v56 = vmax.bf16 %v154_v40, %v138_v44  ;;  %312 = vst.msk [vmem:[%s880_s9 + $0x1c] sm:$0xf] %vm304_vm0, %v295_v47 }
  0x26   :  { %v92_v52 = vld [vmem:[%s873_s2 + $0x30] sm:$0xf]  ;;  %v76_v58 = vmax.bf16 %v60_v51, %v44_v50  ;;  %v233_v59 = vmax.bf16 %v217_v43, %v201_v48  ;;  %v218_v60 = vld [vmem:[%s877_s6 + $0x28] sm:$0xf]  ;;  %v139_v61 = vmax.bf16 %v123_v46, %v107_v49  ;;  %v187_v62 = vld [vmem:[%s876_s5 + $0x2c] sm:$0xf]  ;;  %v296_v0 = vmax.bf16 %v280_v38, %v264_v53 }
  0x27   :  { %v124_v63 = vld [vmem:[%s874_s3 + $0x30] sm:$0xf]  ;;  %v202_v1 = vmax.bf16 %v186_v45, %v170_v56  ;;  %v45_v3 = vld [vmem:[%s871_s0 + $0x34] sm:$0xf]  ;;  %v250_v7 = vld [vmem:[%s878_s7 + $0x28] sm:$0xf] }
  0x28   :  { %v108_v2 = vmax.bf16 %v92_v52, %v76_v58  ;;  %v61_v4 = vld [vmem:[%s872_s1 + $0x34] sm:$0xf]  ;;  %v265_v6 = vmax.bf16 %v249_v54, %v233_v59  ;;  %v282_v8 = vld [vmem:[%s879_s8 + $0x28] sm:$0xf]  ;;  %v171_v9 = vmax.bf16 %v155_v57, %v139_v61  ;;  %v156_v10 = vld [vmem:[%s875_s4 + $0x30] sm:$0xf] }
  0x29   :  { %v93_v5 = vld [vmem:[%s873_s2 + $0x34] sm:$0xf]  ;;  %v77_v11 = vmax.bf16 %v61_v4, %v45_v3  ;;  %313 = vst.msk [vmem:[%s880_s9 + $0x20] sm:$0xf] %vm304_vm0, %v296_v0  ;;  %v234_v12 = vmax.bf16 %v218_v60, %v202_v1  ;;  %v219_v13 = vld [vmem:[%s877_s6 + $0x2c] sm:$0xf] }
  0x2a   :  { %v140_v14 = vmax.bf16 %v124_v63, %v108_v2  ;;  %v188_v15 = vld [vmem:[%s876_s5 + $0x30] sm:$0xf]  ;;  %v125_v16 = vld [vmem:[%s874_s3 + $0x34] sm:$0xf]  ;;  %v297_v17 = vmax.bf16 %v281_v55, %v265_v6  ;;  %v203_v18 = vmax.bf16 %v187_v62, %v171_v9  ;;  %v46_v20 = vld [vmem:[%s871_s0 + $0x38] sm:$0xf] }
  0x2b   :  { %v109_v19 = vmax.bf16 %v93_v5, %v77_v11  ;;  %v62_v21 = vld [vmem:[%s872_s1 + $0x38] sm:$0xf]  ;;  %v266_v23 = vmax.bf16 %v250_v7, %v234_v12  ;;  %v251_v24 = vld [vmem:[%s878_s7 + $0x2c] sm:$0xf]  ;;  %v157_v27 = vld [vmem:[%s875_s4 + $0x34] sm:$0xf] }
  0x2c   :  { %v94_v22 = vld [vmem:[%s873_s2 + $0x38] sm:$0xf]  ;;  %v283_v25 = vld [vmem:[%s879_s8 + $0x2c] sm:$0xf]  ;;  %v172_v26 = vmax.bf16 %v156_v10, %v140_v14  ;;  %v78_v28 = vmax.bf16 %v62_v21, %v46_v20  ;;  %314 = vst.msk [vmem:[%s880_s9 + $0x24] sm:$0xf] %vm304_vm0, %v297_v17  ;;  %v235_v29 = vmax.bf16 %v219_v13, %v203_v18 }
  0x2d   :  { %v220_v30 = vld [vmem:[%s877_s6 + $0x30] sm:$0xf]  ;;  %v141_v31 = vmax.bf16 %v125_v16, %v109_v19  ;;  %v189_v32 = vld [vmem:[%s876_s5 + $0x34] sm:$0xf]  ;;  %v126_v33 = vld [vmem:[%s874_s3 + $0x38] sm:$0xf]  ;;  %v298_v34 = vmax.bf16 %v282_v8, %v266_v23 }
  0x2e   :  { %v204_v35 = vmax.bf16 %v188_v15, %v172_v26  ;;  %v110_v36 = vmax.bf16 %v94_v22, %v78_v28  ;;  %v47_v37 = vld [vmem:[%s871_s0 + $0x3c] sm:$0xf]  ;;  %v267_v40 = vmax.bf16 %v251_v24, %v235_v29  ;;  %v252_v41 = vld [vmem:[%s878_s7 + $0x30] sm:$0xf]  ;;  %v158_v43 = vld [vmem:[%s875_s4 + $0x38] sm:$0xf] }
  0x2f   :  { %v63_v38 = vld [vmem:[%s872_s1 + $0x3c] sm:$0xf]  ;;  %v173_v42 = vmax.bf16 %v157_v27, %v141_v31  ;;  %315 = vst.msk [vmem:[%s880_s9 + $0x28] sm:$0xf] %vm304_vm0, %v298_v34  ;;  %v221_v46 = vld [vmem:[%s877_s6 + $0x34] sm:$0xf] }
  0x30   :  { %v95_v39 = vld [vmem:[%s873_s2 + $0x3c] sm:$0xf]  ;;  %v79_v44 = vmax.bf16 %v63_v38, %v47_v37  ;;  %v236_v45 = vmax.bf16 %v220_v30, %v204_v35  ;;  %v142_v47 = vmax.bf16 %v126_v33, %v110_v36  ;;  %v299_v49 = vmax.bf16 %v283_v25, %v267_v40  ;;  %v284_v50 = vld [vmem:[%s879_s8 + $0x30] sm:$0xf]  ;;  %v190_v52 = vld [vmem:[%s876_s5 + $0x38] sm:$0xf] }
  0x31   :  { %v127_v48 = vld [vmem:[%s874_s3 + $0x3c] sm:$0xf]  ;;  %v205_v51 = vmax.bf16 %v189_v32, %v173_v42  ;;  %v253_v55 = vld [vmem:[%s878_s7 + $0x34] sm:$0xf]  ;;  %v222_v59 = vld [vmem:[%s877_s6 + $0x38] sm:$0xf] }
  0x32   :  { %v111_v53 = vmax.bf16 %v95_v39, %v79_v44  ;;  %v268_v54 = vmax.bf16 %v252_v41, %v236_v45  ;;  %v174_v56 = vmax.bf16 %v158_v43, %v142_v47  ;;  %v159_v57 = vld [vmem:[%s875_s4 + $0x3c] sm:$0xf]  ;;  %316 = vst.msk [vmem:[%s880_s9 + $0x2c] sm:$0xf] %vm304_vm0, %v299_v49  ;;  %v285_v62 = vld [vmem:[%s879_s8 + $0x34] sm:$0xf] }
  0x33   :  { %v237_v58 = vmax.bf16 %v221_v46, %v205_v51  ;;  %v191_v0 = vld [vmem:[%s876_s5 + $0x3c] sm:$0xf]  ;;  %v254_v2 = vld [vmem:[%s878_s7 + $0x38] sm:$0xf] }
  0x34   :  { %v143_v60 = vmax.bf16 %v127_v48, %v111_v53  ;;  %v300_v61 = vmax.bf16 %v284_v50, %v268_v54  ;;  %v206_v63 = vmax.bf16 %v190_v52, %v174_v56  ;;  %v223_v5 = vld [vmem:[%s877_s6 + $0x3c] sm:$0xf]  ;;  %v286_v7 = vld [vmem:[%s879_s8 + $0x38] sm:$0xf] }
  0x35   :  { %v269_v1 = vmax.bf16 %v253_v55, %v237_v58  ;;  %v255_v10 = vld [vmem:[%s878_s7 + $0x3c] sm:$0xf] }
  0x36   :  { %v175_v3 = vmax.bf16 %v159_v57, %v143_v60  ;;  %317 = vst.msk [vmem:[%s880_s9 + $0x30] sm:$0xf] %vm304_vm0, %v300_v61  ;;  %v238_v4 = vmax.bf16 %v222_v59, %v206_v63  ;;  %v287_v13 = vld [vmem:[%s879_s8 + $0x3c] sm:$0xf] }
  0x37   :  { %v301_v6 = vmax.bf16 %v285_v62, %v269_v1 }
  0x38   :  { %v207_v8 = vmax.bf16 %v191_v0, %v175_v3  ;;  %v270_v9 = vmax.bf16 %v254_v2, %v238_v4 }
  0x39   :  { %318 = vst.msk [vmem:[%s880_s9 + $0x34] sm:$0xf] %vm304_vm0, %v301_v6 }
  0x3a   :  { %v239_v11 = vmax.bf16 %v223_v5, %v207_v8  ;;  %v302_v12 = vmax.bf16 %v286_v7, %v270_v9 }
  0x3c   :  { %v271_v14 = vmax.bf16 %v255_v10, %v239_v11  ;;  %319 = vst.msk [vmem:[%s880_s9 + $0x38] sm:$0xf] %vm304_vm0, %v302_v12 }
  0x3e   :  { %v303_v15 = vmax.bf16 %v287_v13, %v271_v14 }
  0x40   :  { %320 = vst.msk [vmem:[%s880_s9 + $0x3c] sm:$0xf] %vm304_vm0, %v303_v15 }

// kernel: _lambda_.36
= control target key start
LH: loop header
LB: loop body
LE: loop exit
PB: predicated region body
PF: predicated region fallthrough
CT: control target
= control target key end

     0   :  { %s1157_s12 = smov 0   ;;  %s1361_s0 = inlined_call_operand.vmem [shape: bf16[512,147], index: 0, kind: input, shape index: {}]   ;;  %s1362_s1 = inlined_call_operand.vmem [shape: bf16[147,16], index: 1, kind: input, shape index: {}]   ;;  %s1363_s2 = inlined_call_operand.vmem [shape: f32[1,16], index: 2, kind: input, shape index: {}]   ;;  %s1364_s3 = inlined_call_operand.vmem [shape: bf16[512,16], index: 3, kind: output, shape index: {}]  }
   0x1 LB: > { %s903_s13 = sadd.s32 4294967295, %s1133_s12   ;;  %p907_p0 = scmp.ge.s32.totalorder %s1133_s12, 1  ;;  %s1133_s12 = sphi %s1157_s12, %s13_s12  }
   0x2   : > { %p139_p1 = scmp.lt.s32.totalorder %s1133_s12, 3 }
   0x4   : > { %p140_p2 = pnand %p907_p0, %p139_p1 }
   0x5   : > { %v1069_v0 = vld [vmem:[%s1362_s1] sm:$0xff] (!%p140_p2)   ;;  %v1135_v1 = vmov (!%p140_p2), 0   ;;  %v1070_v2 = vld [vmem:[%s1362_s1 + $0x8] sm:$0xff] (!%p140_p2)   ;;  %v1071_v3 = vld [vmem:[%s1362_s1 + $0x10] sm:$0xff] (!%p140_p2)   ;;  %s908_s20 = sshll.u32 (!%p140_p2), %s903_s13, 5  ;;  %vm437_vm0 = vcmask (!%p140_p2), 154624  }
   0x6   : > { %143 = sbr.rel (%p140_p2) target bundleno = 323 (0x143), region = 32  ;;  %493 = vmatprep.subr.bf16.mxu0 (!%p140_p2), %v1135_v1  ;;  %1039 = vmatprep.subr.bf16.mxu1 (!%p140_p2), %v1135_v1  ;;  %p165_p3 = scmp.lt.s32.totalorder (!%p140_p2), %s908_s20, 63  ;;  %v1072_v4 = vld [vmem:[%s1362_s1 + $0x18] sm:$0xff] (!%p140_p2)   ;;  %v1073_v5 = vld [vmem:[%s1362_s1 + $0x20] sm:$0xff] (!%p140_p2)   ;;  %v1074_v8 = vld [vmem:[%s1362_s1 + $0x28] sm:$0xff] (!%p140_p2)   ;;  %vm486_vm1 = vcmask (!%p140_p2), 1040384  }
   0x7   : > { %494 = vmatpush1.bf16.msra.mxu0 (!%p140_p2), %v1069_v0  ;;  %1049 = vmatpush1.bf16.msra.mxu1 (!%p140_p2), %v1069_v0  ;;  %v1075_v9 = vld [vmem:[%s1362_s1 + $0x30] sm:$0xff] (!%p140_p2)   ;;  %v1076_v10 = vld [vmem:[%s1362_s1 + $0x38] sm:$0xff] (!%p140_p2)   ;;  %vm487_vm2 = vcmask (!%p140_p2), 1041408   ;;  %v1136_v11 = vmov (!%p140_p2), 65535   ;;  %v1077_v13 = vld [vmem:[%s1362_s1 + $0x40] sm:$0xff] (!%p140_p2)   ;;  %vm814_vm3 = vcmask (!%p140_p2), 125952  }
   0x8   : > { %495 = vmatprep.subr.bf16.mxu0 (!%p140_p2), %v1135_v1  ;;  %1040 = vmatprep.subr.bf16.mxu1 (!%p140_p2), %v1135_v1  ;;  %v488_v12 = vsel (!%p140_p2), %vm486_vm1, 4294967295, %v1136_v11  ;;  %v1078_v14 = vld [vmem:[%s1362_s1 + $0x48] ss:$0 sps:$4 sm:$0x33] (!%p140_p2)   ;;  %v1254_v47 = vld [vmem:[%s1363_s2] ss:$0 sm:$0xff] (!%p140_p2) }
   0x9   : > { %v489_v15 = vsel (!%p140_p2), %vm487_vm2, %v488_v12, 0 }
   0xa   : > { %v491_v16 = vand.u32 (!%p140_p2), %v1078_v14, %v489_v15 }
   0xb   : > { %496 = vmatpush1.bf16.msra.mxu0 (!%p140_p2), %v1070_v2  ;;  %1050 = vmatpush1.bf16.msra.mxu1 (!%p140_p2), %v1070_v2 }
   0xc   : > { %497 = vmatprep.subr.bf16.mxu0 (!%p140_p2), %v1135_v1  ;;  %1041 = vmatprep.subr.bf16.mxu1 (!%p140_p2), %v1135_v1 }
   0xd   : > { %s1366_s20 = smov (!%p165_p3, %s908_s20), 63 }
   0xe   : > { %s1006_s23 = sshll.u32 %s1366_s20, 3  ;;  %s912_s15 = sshll.u32 %s1366_s20, 2 }
   0xf   : > { %498 = vmatpush1.bf16.msra.mxu0 %v1071_v3  ;;  %1051 = vmatpush1.bf16.msra.mxu1 %v1071_v3  ;;  %s1183_s26 = scalar_lea.vmem %s1361_s0, %s1006_s23  ;;  %s1264_s18 = scalar_lea.vmem %s1364_s3, %s912_s15 }
  0x10   : > { %499 = vmatprep.subr.bf16.mxu0 %v1135_v1  ;;  %1042 = vmatprep.subr.bf16.mxu1 %v1135_v1  ;;  %v1081_v6 = vld [vmem:[%s1183_s26 + $0x4] ss:$8 sps:$4 sm:$0xff]   ;;  %v1079_v17 = vld [vmem:[%s1183_s26] ss:$8 sps:$4 sm:$0xff]   ;;  %v1085_v19 = vld [vmem:[%s1183_s26 + $0x14] ss:$8 sps:$4 sm:$0xff]  }
  0x11   : > { %v1084_v7 = vld [vmem:[%s1183_s26 + $0x84] ss:$8 sps:$4 sm:$0xff]   ;;  %956 = vmatprep.mubr.msk.bf16.mxu0 %vm437_vm0, %v1081_v6  ;;  %v1082_v18 = vld [vmem:[%s1183_s26 + $0x80] ss:$8 sps:$4 sm:$0xff]   ;;  %v1087_v20 = vld [vmem:[%s1183_s26 + $0x94] ss:$8 sps:$4 sm:$0xff]  }
  0x12   : > { %964 = vmatprep.mubr.msk.bf16.mxu1 %vm437_vm0, %v1084_v7  ;;  %v1089_v21 = vld [vmem:[%s1183_s26 + $0x10] ss:$8 sps:$4 sm:$0xff]   ;;  %v1091_v23 = vld [vmem:[%s1183_s26 + $0x24] ss:$8 sps:$4 sm:$0xff]   ;;  %v1095_v25 = vld [vmem:[%s1183_s26 + $0x20] ss:$8 sps:$4 sm:$0xff]  }
  0x13   : > { %500 = vmatpush1.bf16.msra.mxu0 %v1072_v4  ;;  %1052 = vmatpush1.bf16.msra.mxu1 %v1072_v4  ;;  %v1090_v22 = vld [vmem:[%s1183_s26 + $0x90] ss:$8 sps:$4 sm:$0xff]   ;;  %v1093_v24 = vld [vmem:[%s1183_s26 + $0xa4] ss:$8 sps:$4 sm:$0xff]   ;;  %v1096_v26 = vld [vmem:[%s1183_s26 + $0xa0] ss:$8 sps:$4 sm:$0xff]  }
  0x14   : > { %501 = vmatprep.subr.bf16.mxu0 %v1135_v1  ;;  %1043 = vmatprep.subr.bf16.mxu1 %v1135_v1  ;;  %v1097_v27 = vld [vmem:[%s1183_s26 + $0x34] ss:$8 sps:$4 sm:$0xff]   ;;  %v1101_v29 = vld [vmem:[%s1183_s26 + $0x30] ss:$8 sps:$4 sm:$0xff]   ;;  %v1103_v31 = vld [vmem:[%s1183_s26 + $0x44] ss:$8 sps:$4 sm:$0xff]  }
  0x15   : > { %v1099_v28 = vld [vmem:[%s1183_s26 + $0xb4] ss:$8 sps:$4 sm:$0xff]   ;;  %v1102_v30 = vld [vmem:[%s1183_s26 + $0xb0] ss:$8 sps:$4 sm:$0xff]   ;;  %v1105_v32 = vld [vmem:[%s1183_s26 + $0xc4] ss:$8 sps:$4 sm:$0xff]  }
  0x16   : > { %v1107_v33 = vld [vmem:[%s1183_s26 + $0x40] ss:$8 sps:$4 sm:$0xff]   ;;  %v1109_v35 = vld [vmem:[%s1183_s26 + $0x54] ss:$8 sps:$4 sm:$0xff]   ;;  %v1113_v37 = vld [vmem:[%s1183_s26 + $0x50] ss:$8 sps:$4 sm:$0xff]  }
  0x17   : > { %502 = vmatpush1.bf16.msra.mxu0 %v1073_v5  ;;  %1053 = vmatpush1.bf16.msra.mxu1 %v1073_v5  ;;  %v1108_v34 = vld [vmem:[%s1183_s26 + $0xc0] ss:$8 sps:$4 sm:$0xff]   ;;  %v1111_v36 = vld [vmem:[%s1183_s26 + $0xd4] ss:$8 sps:$4 sm:$0xff]   ;;  %v1114_v38 = vld [vmem:[%s1183_s26 + $0xd0] ss:$8 sps:$4 sm:$0xff]  }
  0x18   : > { %503 = vmatprep.subr.bf16.mxu0 %v1135_v1  ;;  %1044 = vmatprep.subr.bf16.mxu1 %v1135_v1  ;;  %v1115_v39 = vld [vmem:[%s1183_s26 + $0x64] ss:$8 sps:$4 sm:$0xff]   ;;  %v1119_v41 = vld [vmem:[%s1183_s26 + $0x60] ss:$8 sps:$4 sm:$0xff]   ;;  %v1121_v43 = vld [vmem:[%s1183_s26 + $0x74] ss:$8 sps:$4 sm:$0xff]  }
  0x19   : > { %v1117_v40 = vld [vmem:[%s1183_s26 + $0xe4] ss:$8 sps:$4 sm:$0xff]   ;;  %v1120_v42 = vld [vmem:[%s1183_s26 + $0xe0] ss:$8 sps:$4 sm:$0xff]   ;;  %v1123_v44 = vld [vmem:[%s1183_s26 + $0xf4] ss:$8 sps:$4 sm:$0xff]  }
  0x1a   : > { %v1125_v45 = vld [vmem:[%s1183_s26 + $0x70] ss:$8 sps:$4 sm:$0xff]  }
  0x1b   : > { %504 = vmatpush1.bf16.msra.mxu0 %v1074_v8  ;;  %1054 = vmatpush1.bf16.msra.mxu1 %v1074_v8  ;;  %v1126_v46 = vld [vmem:[%s1183_s26 + $0xf0] ss:$8 sps:$4 sm:$0xff]  }
  0x1c   : > { %505 = vmatprep.subr.bf16.mxu0 %v1135_v1  ;;  %1045 = vmatprep.subr.bf16.mxu1 %v1135_v1 }
  0x1f   : > { %506 = vmatpush1.bf16.msra.mxu0 %v1075_v9  ;;  %1055 = vmatpush1.bf16.msra.mxu1 %v1075_v9 }
  0x20   : > { %507 = vmatprep.subr.bf16.mxu0 %v1135_v1  ;;  %1046 = vmatprep.subr.bf16.mxu1 %v1135_v1 }
  0x23   : > { %508 = vmatpush1.bf16.msra.mxu0 %v1076_v10  ;;  %1056 = vmatpush1.bf16.msra.mxu1 %v1076_v10 }
  0x24   : > { %509 = vmatprep.subr.bf16.mxu0 %v1135_v1  ;;  %1047 = vmatprep.subr.bf16.mxu1 %v1135_v1 }
  0x27   : > { %510 = vmatpush1.bf16.msra.mxu0 %v1077_v13  ;;  %1057 = vmatpush1.bf16.msra.mxu1 %v1077_v13 }
  0x28   : > { %511 = vmatprep.subr.bf16.mxu0 %v1135_v1  ;;  %1048 = vmatprep.subr.bf16.mxu1 %v1135_v1 }
  0x2b   : > { %512 = vmatpush1.bf16.msra.mxu0 %v491_v16  ;;  %1058 = vmatpush1.bf16.msra.mxu1 %v491_v16 }
  0x2e   : > { %526 = vmatmul.mubr.bf16.vlgmr.msra.gmra.mrb[0].mxu0 %v1079_v17  ;;  %590 = vmatmul.mubr.bf16.vlgmr.msra.gmra.mrb[0].mxu1 %v1082_v18 }
  0x2f   : > { %957 = vmatprep.mubr.msk.bf16.mxu0 %vm437_vm0, %v1085_v19  ;;  %965 = vmatprep.mubr.msk.bf16.mxu1 %vm437_vm0, %v1087_v20 }
  0x36   : > { %534 = vmatmul.mubr.bf16.gmra.mrb[4].mxu0 %v1089_v21  ;;  %598 = vmatmul.mubr.bf16.gmra.mrb[4].mxu1 %v1090_v22 }
  0x37   : > { %958 = vmatprep.mubr.msk.bf16.mxu0 %vm437_vm0, %v1091_v23  ;;  %966 = vmatprep.mubr.msk.bf16.mxu1 %vm437_vm0, %v1093_v24 }
  0x3e   : > { %542 = vmatmul.mubr.bf16.gmra.mrb[8].mxu0 %v1095_v25  ;;  %606 = vmatmul.mubr.bf16.gmra.mrb[8].mxu1 %v1096_v26 }
  0x3f   : > { %959 = vmatprep.mubr.msk.bf16.mxu0 %vm437_vm0, %v1097_v27  ;;  %967 = vmatprep.mubr.msk.bf16.mxu1 %vm437_vm0, %v1099_v28 }
  0x46   : > { %550 = vmatmul.mubr.bf16.gmra.mrb[12].mxu0 %v1101_v29  ;;  %614 = vmatmul.mubr.bf16.gmra.mrb[12].mxu1 %v1102_v30 }
  0x47   : > { %960 = vmatprep.mubr.msk.bf16.mxu0 %vm437_vm0, %v1103_v31  ;;  %968 = vmatprep.mubr.msk.bf16.mxu1 %vm437_vm0, %v1105_v32 }
  0x4e   : > { %558 = vmatmul.mubr.bf16.gmra.mrb[16].mxu0 %v1107_v33  ;;  %622 = vmatmul.mubr.bf16.gmra.mrb[16].mxu1 %v1108_v34 }
  0x4f   : > { %961 = vmatprep.mubr.msk.bf16.mxu0 %vm437_vm0, %v1109_v35  ;;  %969 = vmatprep.mubr.msk.bf16.mxu1 %vm437_vm0, %v1111_v36 }
  0x56   : > { %566 = vmatmul.mubr.bf16.gmra.mrb[20].mxu0 %v1113_v37  ;;  %630 = vmatmul.mubr.bf16.gmra.mrb[20].mxu1 %v1114_v38 }
  0x57   : > { %962 = vmatprep.mubr.msk.bf16.mxu0 %vm437_vm0, %v1115_v39  ;;  %970 = vmatprep.mubr.msk.bf16.mxu1 %vm437_vm0, %v1117_v40 }
  0x5e   : > { %574 = vmatmul.mubr.bf16.gmra.mrb[24].mxu0 %v1119_v41  ;;  %638 = vmatmul.mubr.bf16.gmra.mrb[24].mxu1 %v1120_v42 }
  0x5f   : > { %963 = vmatprep.mubr.msk.bf16.mxu0 %vm437_vm0, %v1121_v43  ;;  %971 = vmatprep.mubr.msk.bf16.mxu1 %vm437_vm0, %v1123_v44 }
  0x66   : > { %582 = vmatmul.mubr.bf16.gmra.mrb[28].mxu0 %v1125_v45  ;;  %646 = vmatmul.mubr.bf16.gmra.mrb[28].mxu1 %v1126_v46 }
 0x101   : > { %v527_v48 = vpop.f32.mrb[0].mxu0  ;;  %v591_v49 = vpop.f32.mrb[0].mxu1 }
 0x102   : > { %v528_v50 = vadd.f32 %v1254_v47, %v527_v48  ;;  %v592_v51 = vadd.f32 %v1254_v47, %v591_v49  ;;  %v529_v52 = vpop.f32.mrb[1].mxu0  ;;  %v593_v53 = vpop.f32.mrb[1].mxu1 }
 0x103   : > { %v530_v54 = vpop.f32.mrb[2].mxu0  ;;  %v594_v55 = vpop.f32.mrb[2].mxu1 }
 0x104   : > { %v654_v56 = vmax.f32 %v528_v50, 0.0  ;;  %v670_v57 = vmax.f32 %v592_v51, 0.0  ;;  %v531_v58 = vadd.f32 %v1254_v47, %v530_v54  ;;  %v595_v59 = vadd.f32 %v1254_v47, %v594_v55  ;;  %v532_v60 = vpop.f32.mrb[3].mxu0  ;;  %v596_v61 = vpop.f32.mrb[3].mxu1 }
 0x106   : > { %v1007_v62 = vpack.c.bf16 %v654_v56, %v654_v56  ;;  %v1023_v63 = vpack.c.bf16 %v670_v57, %v670_v57  ;;  %v655_v0 = vmax.f32 %v531_v58, 0.0  ;;  %v671_v1 = vmax.f32 %v595_v59, 0.0 }
 0x108   : > { %815 = vst.msk [vmem:[%s1264_s18] sm:$0xf] %vm814_vm3, %v1007_v62  ;;  %831 = vst.msk [vmem:[%s1264_s18 + $0x40] sm:$0xf] %vm814_vm3, %v1023_v63  ;;  %v1008_v2 = vpack.c.bf16 %v655_v0, %v655_v0  ;;  %v1024_v3 = vpack.c.bf16 %v671_v1, %v671_v1 }
 0x109   : > { %v535_v4 = vpop.f32.mrb[4].mxu0  ;;  %v599_v5 = vpop.f32.mrb[4].mxu1 }
 0x10a   : > { %816 = vst.msk [vmem:[%s1264_s18 + $0x4] sm:$0xf] %vm814_vm3, %v1008_v2  ;;  %832 = vst.msk [vmem:[%s1264_s18 + $0x44] sm:$0xf] %vm814_vm3, %v1024_v3  ;;  %v536_v6 = vadd.f32 %v1254_v47, %v535_v4  ;;  %v600_v7 = vadd.f32 %v1254_v47, %v599_v5  ;;  %v537_v8 = vpop.f32.mrb[5].mxu0  ;;  %v601_v9 = vpop.f32.mrb[5].mxu1 }
 0x10b   : > { %v538_v10 = vpop.f32.mrb[6].mxu0  ;;  %v602_v11 = vpop.f32.mrb[6].mxu1 }
 0x10c   : > { %v656_v12 = vmax.f32 %v536_v6, 0.0  ;;  %v672_v13 = vmax.f32 %v600_v7, 0.0  ;;  %v539_v14 = vadd.f32 %v1254_v47, %v538_v10  ;;  %v603_v15 = vadd.f32 %v1254_v47, %v602_v11  ;;  %v540_v16 = vpop.f32.mrb[7].mxu0  ;;  %v604_v17 = vpop.f32.mrb[7].mxu1 }
 0x10e   : > { %v1009_v18 = vpack.c.bf16 %v656_v12, %v656_v12  ;;  %v1025_v19 = vpack.c.bf16 %v672_v13, %v672_v13  ;;  %v657_v20 = vmax.f32 %v539_v14, 0.0  ;;  %v673_v21 = vmax.f32 %v603_v15, 0.0 }
 0x110   : > { %817 = vst.msk [vmem:[%s1264_s18 + $0x8] sm:$0xf] %vm814_vm3, %v1009_v18  ;;  %833 = vst.msk [vmem:[%s1264_s18 + $0x48] sm:$0xf] %vm814_vm3, %v1025_v19  ;;  %v1010_v22 = vpack.c.bf16 %v657_v20, %v657_v20  ;;  %v1026_v23 = vpack.c.bf16 %v673_v21, %v673_v21 }
 0x111   : > { %v543_v24 = vpop.f32.mrb[8].mxu0  ;;  %v607_v25 = vpop.f32.mrb[8].mxu1 }
 0x112   : > { %818 = vst.msk [vmem:[%s1264_s18 + $0xc] sm:$0xf] %vm814_vm3, %v1010_v22  ;;  %834 = vst.msk [vmem:[%s1264_s18 + $0x4c] sm:$0xf] %vm814_vm3, %v1026_v23  ;;  %v544_v26 = vadd.f32 %v1254_v47, %v543_v24  ;;  %v608_v27 = vadd.f32 %v1254_v47, %v607_v25  ;;  %v545_v28 = vpop.f32.mrb[9].mxu0  ;;  %v609_v29 = vpop.f32.mrb[9].mxu1 }
 0x113   : > { %v546_v30 = vpop.f32.mrb[10].mxu0  ;;  %v610_v31 = vpop.f32.mrb[10].mxu1 }
 0x114   : > { %v658_v32 = vmax.f32 %v544_v26, 0.0  ;;  %v674_v33 = vmax.f32 %v608_v27, 0.0  ;;  %v547_v34 = vadd.f32 %v1254_v47, %v546_v30  ;;  %v611_v35 = vadd.f32 %v1254_v47, %v610_v31  ;;  %v548_v36 = vpop.f32.mrb[11].mxu0  ;;  %v612_v37 = vpop.f32.mrb[11].mxu1 }
 0x116   : > { %v1011_v38 = vpack.c.bf16 %v658_v32, %v658_v32  ;;  %v1027_v39 = vpack.c.bf16 %v674_v33, %v674_v33  ;;  %v659_v40 = vmax.f32 %v547_v34, 0.0  ;;  %v675_v41 = vmax.f32 %v611_v35, 0.0 }
 0x118   : > { %819 = vst.msk [vmem:[%s1264_s18 + $0x10] sm:$0xf] %vm814_vm3, %v1011_v38  ;;  %835 = vst.msk [vmem:[%s1264_s18 + $0x50] sm:$0xf] %vm814_vm3, %v1027_v39  ;;  %v1012_v42 = vpack.c.bf16 %v659_v40, %v659_v40  ;;  %v1028_v43 = vpack.c.bf16 %v675_v41, %v675_v41 }
 0x119   : > { %v551_v44 = vpop.f32.mrb[12].mxu0  ;;  %v615_v45 = vpop.f32.mrb[12].mxu1 }
 0x11a   : > { %820 = vst.msk [vmem:[%s1264_s18 + $0x14] sm:$0xf] %vm814_vm3, %v1012_v42  ;;  %836 = vst.msk [vmem:[%s1264_s18 + $0x54] sm:$0xf] %vm814_vm3, %v1028_v43  ;;  %v552_v46 = vadd.f32 %v1254_v47, %v551_v44  ;;  %v616_v48 = vadd.f32 %v1254_v47, %v615_v45  ;;  %v553_v49 = vpop.f32.mrb[13].mxu0  ;;  %v617_v50 = vpop.f32.mrb[13].mxu1 }
 0x11b   : > { %v554_v51 = vpop.f32.mrb[14].mxu0  ;;  %v618_v52 = vpop.f32.mrb[14].mxu1 }
 0x11c   : > { %v660_v53 = vmax.f32 %v552_v46, 0.0  ;;  %v676_v54 = vmax.f32 %v616_v48, 0.0  ;;  %v555_v55 = vadd.f32 %v1254_v47, %v554_v51  ;;  %v619_v56 = vadd.f32 %v1254_v47, %v618_v52  ;;  %v556_v57 = vpop.f32.mrb[15].mxu0  ;;  %v620_v58 = vpop.f32.mrb[15].mxu1 }
 0x11e   : > { %v1013_v59 = vpack.c.bf16 %v660_v53, %v660_v53  ;;  %v1029_v60 = vpack.c.bf16 %v676_v54, %v676_v54  ;;  %v661_v61 = vmax.f32 %v555_v55, 0.0  ;;  %v677_v62 = vmax.f32 %v619_v56, 0.0 }
 0x120   : > { %821 = vst.msk [vmem:[%s1264_s18 + $0x18] sm:$0xf] %vm814_vm3, %v1013_v59  ;;  %837 = vst.msk [vmem:[%s1264_s18 + $0x58] sm:$0xf] %vm814_vm3, %v1029_v60  ;;  %v1014_v63 = vpack.c.bf16 %v661_v61, %v661_v61  ;;  %v1030_v0 = vpack.c.bf16 %v677_v62, %v677_v62 }
 0x121   : > { %v559_v1 = vpop.f32.mrb[16].mxu0  ;;  %v623_v2 = vpop.f32.mrb[16].mxu1 }
 0x122   : > { %822 = vst.msk [vmem:[%s1264_s18 + $0x1c] sm:$0xf] %vm814_vm3, %v1014_v63  ;;  %838 = vst.msk [vmem:[%s1264_s18 + $0x5c] sm:$0xf] %vm814_vm3, %v1030_v0  ;;  %v560_v3 = vadd.f32 %v1254_v47, %v559_v1  ;;  %v624_v4 = vadd.f32 %v1254_v47, %v623_v2  ;;  %v561_v5 = vpop.f32.mrb[17].mxu0  ;;  %v625_v6 = vpop.f32.mrb[17].mxu1 }
 0x123   : > { %v562_v7 = vpop.f32.mrb[18].mxu0  ;;  %v626_v8 = vpop.f32.mrb[18].mxu1 }
 0x124   : > { %v662_v9 = vmax.f32 %v560_v3, 0.0  ;;  %v678_v10 = vmax.f32 %v624_v4, 0.0  ;;  %v563_v11 = vadd.f32 %v1254_v47, %v562_v7  ;;  %v627_v12 = vadd.f32 %v1254_v47, %v626_v8  ;;  %v564_v13 = vpop.f32.mrb[19].mxu0  ;;  %v628_v14 = vpop.f32.mrb[19].mxu1 }
 0x126   : > { %v1015_v15 = vpack.c.bf16 %v662_v9, %v662_v9  ;;  %v1031_v16 = vpack.c.bf16 %v678_v10, %v678_v10  ;;  %v663_v17 = vmax.f32 %v563_v11, 0.0  ;;  %v679_v18 = vmax.f32 %v627_v12, 0.0 }
 0x128   : > { %823 = vst.msk [vmem:[%s1264_s18 + $0x20] sm:$0xf] %vm814_vm3, %v1015_v15  ;;  %839 = vst.msk [vmem:[%s1264_s18 + $0x60] sm:$0xf] %vm814_vm3, %v1031_v16  ;;  %v1016_v19 = vpack.c.bf16 %v663_v17, %v663_v17  ;;  %v1032_v20 = vpack.c.bf16 %v679_v18, %v679_v18 }
 0x129   : > { %v567_v21 = vpop.f32.mrb[20].mxu0  ;;  %v631_v22 = vpop.f32.mrb[20].mxu1 }
 0x12a   : > { %824 = vst.msk [vmem:[%s1264_s18 + $0x24] sm:$0xf] %vm814_vm3, %v1016_v19  ;;  %840 = vst.msk [vmem:[%s1264_s18 + $0x64] sm:$0xf] %vm814_vm3, %v1032_v20  ;;  %v568_v23 = vadd.f32 %v1254_v47, %v567_v21  ;;  %v632_v24 = vadd.f32 %v1254_v47, %v631_v22  ;;  %v569_v25 = vpop.f32.mrb[21].mxu0  ;;  %v633_v26 = vpop.f32.mrb[21].mxu1 }
 0x12b   : > { %v570_v27 = vpop.f32.mrb[22].mxu0  ;;  %v634_v28 = vpop.f32.mrb[22].mxu1 }
 0x12c   : > { %v664_v29 = vmax.f32 %v568_v23, 0.0  ;;  %v680_v30 = vmax.f32 %v632_v24, 0.0  ;;  %v571_v31 = vadd.f32 %v1254_v47, %v570_v27  ;;  %v635_v32 = vadd.f32 %v1254_v47, %v634_v28  ;;  %v572_v33 = vpop.f32.mrb[23].mxu0  ;;  %v636_v34 = vpop.f32.mrb[23].mxu1 }
 0x12e   : > { %v1017_v35 = vpack.c.bf16 %v664_v29, %v664_v29  ;;  %v1033_v36 = vpack.c.bf16 %v680_v30, %v680_v30  ;;  %v665_v37 = vmax.f32 %v571_v31, 0.0  ;;  %v681_v38 = vmax.f32 %v635_v32, 0.0 }
 0x130   : > { %825 = vst.msk [vmem:[%s1264_s18 + $0x28] sm:$0xf] %vm814_vm3, %v1017_v35  ;;  %841 = vst.msk [vmem:[%s1264_s18 + $0x68] sm:$0xf] %vm814_vm3, %v1033_v36  ;;  %v1018_v39 = vpack.c.bf16 %v665_v37, %v665_v37  ;;  %v1034_v40 = vpack.c.bf16 %v681_v38, %v681_v38 }
 0x131   : > { %v575_v41 = vpop.f32.mrb[24].mxu0  ;;  %v639_v42 = vpop.f32.mrb[24].mxu1 }
 0x132   : > { %826 = vst.msk [vmem:[%s1264_s18 + $0x2c] sm:$0xf] %vm814_vm3, %v1018_v39  ;;  %842 = vst.msk [vmem:[%s1264_s18 + $0x6c] sm:$0xf] %vm814_vm3, %v1034_v40  ;;  %v576_v43 = vadd.f32 %v1254_v47, %v575_v41  ;;  %v640_v44 = vadd.f32 %v1254_v47, %v639_v42  ;;  %v577_v45 = vpop.f32.mrb[25].mxu0  ;;  %v641_v46 = vpop.f32.mrb[25].mxu1 }
 0x133   : > { %v578_v48 = vpop.f32.mrb[26].mxu0  ;;  %v642_v49 = vpop.f32.mrb[26].mxu1 }
 0x134   : > { %v666_v50 = vmax.f32 %v576_v43, 0.0  ;;  %v682_v51 = vmax.f32 %v640_v44, 0.0  ;;  %v579_v52 = vadd.f32 %v1254_v47, %v578_v48  ;;  %v643_v53 = vadd.f32 %v1254_v47, %v642_v49  ;;  %v580_v54 = vpop.f32.mrb[27].mxu0  ;;  %v644_v55 = vpop.f32.mrb[27].mxu1 }
 0x136   : > { %v1019_v56 = vpack.c.bf16 %v666_v50, %v666_v50  ;;  %v1035_v57 = vpack.c.bf16 %v682_v51, %v682_v51  ;;  %v667_v58 = vmax.f32 %v579_v52, 0.0  ;;  %v683_v59 = vmax.f32 %v643_v53, 0.0 }
 0x138   : > { %827 = vst.msk [vmem:[%s1264_s18 + $0x30] sm:$0xf] %vm814_vm3, %v1019_v56  ;;  %843 = vst.msk [vmem:[%s1264_s18 + $0x70] sm:$0xf] %vm814_vm3, %v1035_v57  ;;  %v1020_v60 = vpack.c.bf16 %v667_v58, %v667_v58  ;;  %v1036_v61 = vpack.c.bf16 %v683_v59, %v683_v59 }
 0x139   : > { %v583_v62 = vpop.f32.mrb[28].mxu0  ;;  %v647_v63 = vpop.f32.mrb[28].mxu1 }
 0x13a   : > { %828 = vst.msk [vmem:[%s1264_s18 + $0x34] sm:$0xf] %vm814_vm3, %v1020_v60  ;;  %844 = vst.msk [vmem:[%s1264_s18 + $0x74] sm:$0xf] %vm814_vm3, %v1036_v61  ;;  %v584_v0 = vadd.f32 %v1254_v47, %v583_v62  ;;  %v648_v1 = vadd.f32 %v1254_v47, %v647_v63  ;;  %v585_v2 = vpop.f32.mrb[29].mxu0  ;;  %v649_v3 = vpop.f32.mrb[29].mxu1 }
 0x13b   : > { %v586_v4 = vpop.f32.mrb[30].mxu0  ;;  %v650_v5 = vpop.f32.mrb[30].mxu1 }
 0x13c   : > { %v668_v6 = vmax.f32 %v584_v0, 0.0  ;;  %v684_v7 = vmax.f32 %v648_v1, 0.0  ;;  %v587_v8 = vadd.f32 %v1254_v47, %v586_v4  ;;  %v651_v9 = vadd.f32 %v1254_v47, %v650_v5  ;;  %v588_v10 = vpop.f32.mrb[31].mxu0  ;;  %v652_v11 = vpop.f32.mrb[31].mxu1 }
 0x13e   : > { %v1021_v12 = vpack.c.bf16 %v668_v6, %v668_v6  ;;  %v1037_v13 = vpack.c.bf16 %v684_v7, %v684_v7  ;;  %v669_v14 = vmax.f32 %v587_v8, 0.0  ;;  %v685_v15 = vmax.f32 %v651_v9, 0.0 }
 0x140   : > { %829 = vst.msk [vmem:[%s1264_s18 + $0x38] sm:$0xf] %vm814_vm3, %v1021_v12  ;;  %845 = vst.msk [vmem:[%s1264_s18 + $0x78] sm:$0xf] %vm814_vm3, %v1037_v13  ;;  %v1022_v16 = vpack.c.bf16 %v669_v14, %v669_v14  ;;  %v1038_v17 = vpack.c.bf16 %v685_v15, %v685_v15 }
 0x142   : > { %830 = vst.msk [vmem:[%s1264_s18 + $0x3c] sm:$0xf] %vm814_vm3, %v1022_v16  ;;  %846 = vst.msk [vmem:[%s1264_s18 + $0x7c] sm:$0xf] %vm814_vm3, %v1038_v17 }
 0x143 PF: > { %s13_s12 = sadd.s32 1, %s1133_s12  }
 0x144   : > { %p10_p4 = scmp.ge.s32.totalorder %s13_s12, 4  }
 0x146   :  { %12 = sbr.rel (!%p10_p4) target bundleno = 1 (0x1), region = 62 }

// kernel: _lambda_.39
= control target key start
LH: loop header
LB: loop body
LE: loop exit
PB: predicated region body
PF: predicated region fallthrough
CT: control target
= control target key end

     0   :  { %s723_s15 = smov 0   ;;  %s813_s0 = inlined_call_operand.vmem [shape: bf16[128,144], index: 0, kind: input, shape index: {}]   ;;  %s814_s1 = inlined_call_operand.vmem [shape: bf16[144,16], index: 1, kind: input, shape index: {}]   ;;  %s815_s2 = inlined_call_operand.vmem [shape: f32[1,16], index: 2, kind: input, shape index: {}]   ;;  %s816_s3 = inlined_call_operand.vmem [shape: bf16[128,16], index: 3, kind: input, shape index: {}]   ;;  %s817_s4 = inlined_call_operand.vmem [shape: bf16[128,16], index: 4, kind: output, shape index: {}]  }
   0x1 LB: > { %s569_s16 = sadd.s32 4294967295, %s695_s15   ;;  %p573_p0 = scmp.ge.s32.totalorder %s695_s15, 1  ;;  %s695_s15 = sphi %s723_s15, %s14_s15  }
   0x2   : > { %p175_p1 = scmp.lt.s32.totalorder %s695_s15, 3 }
   0x4   : > { %p176_p2 = pnand %p573_p0, %p175_p1 }
   0x5   : > { %v668_v0 = vld [vmem:[%s814_s1] sm:$0xff] (!%p176_p2)   ;;  %v697_v1 = vmov (!%p176_p2), 0   ;;  %s574_s19 = sshll.u32 (!%p176_p2), %s569_s16, 3  ;;  %v669_v2 = vld [vmem:[%s814_s1 + $0x8] sm:$0xff] (!%p176_p2)   ;;  %v670_v3 = vld [vmem:[%s814_s1 + $0x10] sm:$0xff] (!%p176_p2)   ;;  %vm350_vm0 = vcmask (!%p176_p2), 130048  }
   0x6   : > { %179 = sbr.rel (%p176_p2) target bundleno = 273 (0x111), region = 36  ;;  %363 = vmatprep.subr.bf16.mxu0 (!%p176_p2), %v697_v1  ;;  %641 = vmatprep.subr.bf16.mxu1 (!%p176_p2), %v697_v1  ;;  %p208_p3 = scmp.lt.s32.totalorder (!%p176_p2), %s574_s19, 15  ;;  %v671_v4 = vld [vmem:[%s814_s1 + $0x18] sm:$0xff] (!%p176_p2)   ;;  %v672_v7 = vld [vmem:[%s814_s1 + $0x20] sm:$0xff] (!%p176_p2)   ;;  %v673_v8 = vld [vmem:[%s814_s1 + $0x28] sm:$0xff] (!%p176_p2)   ;;  %vm492_vm1 = vcmask (!%p176_p2), 125952  }
   0x7   : > { %364 = vmatpush1.bf16.msra.mxu0 (!%p176_p2), %v668_v0  ;;  %650 = vmatpush1.bf16.msra.mxu1 (!%p176_p2), %v668_v0  ;;  %v674_v9 = vld [vmem:[%s814_s1 + $0x30] sm:$0xff] (!%p176_p2)   ;;  %v675_v10 = vld [vmem:[%s814_s1 + $0x38] sm:$0xff] (!%p176_p2)   ;;  %v676_v11 = vld [vmem:[%s814_s1 + $0x40] sm:$0xff] (!%p176_p2)  }
   0x8   : > { %365 = vmatprep.subr.bf16.mxu0 (!%p176_p2), %v697_v1  ;;  %642 = vmatprep.subr.bf16.mxu1 (!%p176_p2), %v697_v1  ;;  %v581_v20 = vld [vmem:[%s815_s2] ss:$0 sm:$0xff] (!%p176_p2) }
   0xb   : > { %366 = vmatpush1.bf16.msra.mxu0 (!%p176_p2), %v669_v2  ;;  %651 = vmatpush1.bf16.msra.mxu1 (!%p176_p2), %v669_v2 }
   0xc   : > { %367 = vmatprep.subr.bf16.mxu0 (!%p176_p2), %v697_v1  ;;  %643 = vmatprep.subr.bf16.mxu1 (!%p176_p2), %v697_v1 }
   0xd   : > { %s819_s19 = smov (!%p208_p3, %s574_s19), 15 }
   0xe   : > { %s613_s24 = sshll.u32 %s819_s19, 3  ;;  %s578_s14 = sshll.u32 %s819_s19, 2 }
   0xf   : > { %s746_s27 = scalar_lea.vmem %s813_s0, %s613_s24  ;;  %368 = vmatpush1.bf16.msra.mxu0 %v670_v3  ;;  %652 = vmatpush1.bf16.msra.mxu1 %v670_v3  ;;  %s218_s18 = scalar_lea.vmem %s816_s3, %s578_s14 }
  0x10   : > { %v679_v5 = vld [vmem:[%s746_s27 + $0x4] ss:$8 sps:$4 sm:$0xff]   ;;  %369 = vmatprep.subr.bf16.mxu0 %v697_v1  ;;  %644 = vmatprep.subr.bf16.mxu1 %v697_v1  ;;  %v677_v12 = vld [vmem:[%s746_s27] ss:$8 sps:$4 sm:$0xff]   ;;  %v683_v14 = vld [vmem:[%s746_s27 + $0x14] ss:$8 sps:$4 sm:$0xff]   ;;  %s792_s24 = scalar_lea.vmem %s817_s4, %s578_s14 }
  0x11   : > { %v682_v6 = vld [vmem:[%s746_s27 + $0x24] ss:$8 sps:$4 sm:$0xff]   ;;  %599 = vmatprep.mubr.msk.bf16.mxu0 %vm350_vm0, %v679_v5  ;;  %v680_v13 = vld [vmem:[%s746_s27 + $0x20] ss:$8 sps:$4 sm:$0xff]   ;;  %v685_v15 = vld [vmem:[%s746_s27 + $0x34] ss:$8 sps:$4 sm:$0xff]  }
  0x12   : > { %601 = vmatprep.mubr.msk.bf16.mxu1 %vm350_vm0, %v682_v6  ;;  %v687_v16 = vld [vmem:[%s746_s27 + $0x10] ss:$8 sps:$4 sm:$0xff]   ;;  %v623_v18 = vld [vmem:[%s218_s18] sm:$0xff]   ;;  %v638_v39 = vld [vmem:[%s218_s18 + $0x8] sm:$0xff]  }
  0x13   : > { %370 = vmatpush1.bf16.msra.mxu0 %v671_v4  ;;  %653 = vmatpush1.bf16.msra.mxu1 %v671_v4  ;;  %v688_v17 = vld [vmem:[%s746_s27 + $0x30] ss:$8 sps:$4 sm:$0xff]   ;;  %v624_v21 = vunpack.c.l.bf16 %v623_v18  ;;  %v625_v29 = vunpack.c.h.bf16 %v623_v18  ;;  %v628_v45 = vunpack.c.l.bf16 %v638_v39  ;;  %v629_v53 = vunpack.c.h.bf16 %v638_v39 }
  0x14   : > { %371 = vmatprep.subr.bf16.mxu0 %v697_v1  ;;  %645 = vmatprep.subr.bf16.mxu1 %v697_v1  ;;  %v639_v19 = vld [vmem:[%s218_s18 + $0x10] sm:$0xff]   ;;  %v640_v40 = vld [vmem:[%s218_s18 + $0x18] sm:$0xff]  }
  0x15   : > { %v632_v22 = vunpack.c.l.bf16 %v639_v19  ;;  %v633_v30 = vunpack.c.h.bf16 %v639_v19  ;;  %v636_v46 = vunpack.c.l.bf16 %v640_v40  ;;  %v637_v54 = vunpack.c.h.bf16 %v640_v40 }
  0x17   : > { %372 = vmatpush1.bf16.msra.mxu0 %v672_v7  ;;  %654 = vmatpush1.bf16.msra.mxu1 %v672_v7 }
  0x18   : > { %373 = vmatprep.subr.bf16.mxu0 %v697_v1  ;;  %646 = vmatprep.subr.bf16.mxu1 %v697_v1 }
  0x1b   : > { %374 = vmatpush1.bf16.msra.mxu0 %v673_v8  ;;  %655 = vmatpush1.bf16.msra.mxu1 %v673_v8 }
  0x1c   : > { %375 = vmatprep.subr.bf16.mxu0 %v697_v1  ;;  %647 = vmatprep.subr.bf16.mxu1 %v697_v1 }
  0x1f   : > { %376 = vmatpush1.bf16.msra.mxu0 %v674_v9  ;;  %656 = vmatpush1.bf16.msra.mxu1 %v674_v9 }
  0x20   : > { %377 = vmatprep.subr.bf16.mxu0 %v697_v1  ;;  %648 = vmatprep.subr.bf16.mxu1 %v697_v1 }
  0x23   : > { %378 = vmatpush1.bf16.msra.mxu0 %v675_v10  ;;  %657 = vmatpush1.bf16.msra.mxu1 %v675_v10 }
  0x24   : > { %379 = vmatprep.subr.bf16.mxu0 %v697_v1  ;;  %649 = vmatprep.subr.bf16.mxu1 %v697_v1 }
  0x27   : > { %380 = vmatpush1.bf16.msra.mxu0 %v676_v11  ;;  %658 = vmatpush1.bf16.msra.mxu1 %v676_v11 }
  0x2a   : > { %396 = vmatmul.mubr.bf16.vlgmr.msra.gmra.mrb[0].mxu0 %v677_v12  ;;  %412 = vmatmul.mubr.bf16.vlgmr.msra.gmra.mrb[0].mxu1 %v680_v13 }
  0x2b   : > { %600 = vmatprep.mubr.msk.bf16.mxu0 %vm350_vm0, %v683_v14  ;;  %602 = vmatprep.mubr.msk.bf16.mxu1 %vm350_vm0, %v685_v15 }
  0x32   : > { %404 = vmatmul.mubr.bf16.gmra.mrb[4].mxu0 %v687_v16  ;;  %420 = vmatmul.mubr.bf16.gmra.mrb[4].mxu1 %v688_v17 }
  0xfd   : > { %v397_v23 = vpop.f32.mrb[0].mxu0  ;;  %v413_v24 = vpop.f32.mrb[0].mxu1 }
  0xfe   : > { %v398_v25 = vadd.f32 %v581_v20, %v397_v23  ;;  %v414_v26 = vadd.f32 %v581_v20, %v413_v24  ;;  %v399_v27 = vpop.f32.mrb[1].mxu0  ;;  %v415_v28 = vpop.f32.mrb[1].mxu1 }
  0xff   : > { %v400_v31 = vpop.f32.mrb[2].mxu0  ;;  %v416_v32 = vpop.f32.mrb[2].mxu1 }
 0x100   : > { %v444_v33 = vadd.f32 %v624_v21, %v398_v25  ;;  %v448_v34 = vadd.f32 %v632_v22, %v414_v26  ;;  %v401_v35 = vadd.f32 %v581_v20, %v400_v31  ;;  %v417_v36 = vadd.f32 %v581_v20, %v416_v32  ;;  %v402_v37 = vpop.f32.mrb[3].mxu0  ;;  %v418_v38 = vpop.f32.mrb[3].mxu1 }
 0x102   : > { %v452_v41 = vmax.f32 %v444_v33, 0.0  ;;  %v456_v42 = vmax.f32 %v448_v34, 0.0  ;;  %v445_v43 = vadd.f32 %v625_v29, %v401_v35  ;;  %v449_v44 = vadd.f32 %v633_v30, %v417_v36 }
 0x104   : > { %v614_v47 = vpack.c.bf16 %v452_v41, %v452_v41  ;;  %v618_v48 = vpack.c.bf16 %v456_v42, %v456_v42  ;;  %v453_v49 = vmax.f32 %v445_v43, 0.0  ;;  %v457_v50 = vmax.f32 %v449_v44, 0.0 }
 0x105   : > { %v405_v51 = vpop.f32.mrb[4].mxu0  ;;  %v421_v52 = vpop.f32.mrb[4].mxu1 }
 0x106   : > { %493 = vst.msk [vmem:[%s792_s24] sm:$0xf] %vm492_vm1, %v614_v47  ;;  %497 = vst.msk [vmem:[%s792_s24 + $0x10] sm:$0xf] %vm492_vm1, %v618_v48  ;;  %v615_v55 = vpack.c.bf16 %v453_v49, %v453_v49  ;;  %v619_v56 = vpack.c.bf16 %v457_v50, %v457_v50  ;;  %v406_v57 = vadd.f32 %v581_v20, %v405_v51  ;;  %v407_v59 = vpop.f32.mrb[5].mxu0  ;;  %v423_v60 = vpop.f32.mrb[5].mxu1 }
 0x107   : > { %v422_v58 = vadd.f32 %v581_v20, %v421_v52  ;;  %v408_v61 = vpop.f32.mrb[6].mxu0  ;;  %v424_v62 = vpop.f32.mrb[6].mxu1 }
 0x108   : > { %494 = vst.msk [vmem:[%s792_s24 + $0x4] sm:$0xf] %vm492_vm1, %v615_v55  ;;  %498 = vst.msk [vmem:[%s792_s24 + $0x14] sm:$0xf] %vm492_vm1, %v619_v56  ;;  %v446_v63 = vadd.f32 %v628_v45, %v406_v57  ;;  %v409_v1 = vadd.f32 %v581_v20, %v408_v61  ;;  %v425_v2 = vadd.f32 %v581_v20, %v424_v62  ;;  %v410_v3 = vpop.f32.mrb[7].mxu0  ;;  %v426_v4 = vpop.f32.mrb[7].mxu1 }
 0x109   : > { %v450_v0 = vadd.f32 %v636_v46, %v422_v58 }
 0x10a   : > { %v454_v5 = vmax.f32 %v446_v63, 0.0  ;;  %v447_v7 = vadd.f32 %v629_v53, %v409_v1  ;;  %v451_v8 = vadd.f32 %v637_v54, %v425_v2 }
 0x10b   : > { %v458_v6 = vmax.f32 %v450_v0, 0.0 }
 0x10c   : > { %v616_v9 = vpack.c.bf16 %v454_v5, %v454_v5  ;;  %v455_v11 = vmax.f32 %v447_v7, 0.0  ;;  %v459_v12 = vmax.f32 %v451_v8, 0.0 }
 0x10d   : > { %v620_v10 = vpack.c.bf16 %v458_v6, %v458_v6 }
 0x10e   : > { %495 = vst.msk [vmem:[%s792_s24 + $0x8] sm:$0xf] %vm492_vm1, %v616_v9  ;;  %v617_v13 = vpack.c.bf16 %v455_v11, %v455_v11  ;;  %v621_v14 = vpack.c.bf16 %v459_v12, %v459_v12 }
 0x10f   : > { %499 = vst.msk [vmem:[%s792_s24 + $0x18] sm:$0xf] %vm492_vm1, %v620_v10 }
 0x110   : > { %496 = vst.msk [vmem:[%s792_s24 + $0xc] sm:$0xf] %vm492_vm1, %v617_v13  ;;  %500 = vst.msk [vmem:[%s792_s24 + $0x1c] sm:$0xf] %vm492_vm1, %v621_v14 }
 0x111 PF: > { %s14_s15 = sadd.s32 1, %s695_s15  }
 0x112   : > { %p11_p4 = scmp.ge.s32.totalorder %s14_s15, 4  }
 0x114   :  { %13 = sbr.rel (!%p11_p4) target bundleno = 1 (0x1), region = 69 }

// kernel: _lambda_.38
= control target key start
LH: loop header
LB: loop body
LE: loop exit
PB: predicated region body
PF: predicated region fallthrough
CT: control target
= control target key end

     0   :  { %s612_s12 = smov 0   ;;  %s695_s0 = inlined_call_operand.vmem [shape: bf16[128,144], index: 0, kind: input, shape index: {}]   ;;  %s696_s1 = inlined_call_operand.vmem [shape: bf16[144,16], index: 1, kind: input, shape index: {}]   ;;  %s697_s2 = inlined_call_operand.vmem [shape: f32[1,16], index: 2, kind: input, shape index: {}]   ;;  %s698_s3 = inlined_call_operand.vmem [shape: bf16[128,16], index: 3, kind: output, shape index: {}]  }
   0x1 LB: > { %s484_s13 = sadd.s32 4294967295, %s589_s12   ;;  %p488_p0 = scmp.ge.s32.totalorder %s589_s12, 1  ;;  %s589_s12 = sphi %s612_s12, %s13_s12  }
   0x2   : > { %p139_p1 = scmp.lt.s32.totalorder %s589_s12, 3 }
   0x4   : > { %p140_p2 = pnand %p488_p0, %p139_p1 }
   0x5   : > { %v562_v0 = vld [vmem:[%s696_s1] sm:$0xff] (!%p140_p2)   ;;  %v591_v1 = vmov (!%p140_p2), 0   ;;  %s489_s16 = sshll.u32 (!%p140_p2), %s484_s13, 3  ;;  %v563_v2 = vld [vmem:[%s696_s1 + $0x8] sm:$0xff] (!%p140_p2)   ;;  %v564_v3 = vld [vmem:[%s696_s1 + $0x10] sm:$0xff] (!%p140_p2)   ;;  %vm301_vm0 = vcmask (!%p140_p2), 130048  }
   0x6   : > { %143 = sbr.rel (%p140_p2) target bundleno = 271 (0x10f), region = 32  ;;  %314 = vmatprep.subr.bf16.mxu0 (!%p140_p2), %v591_v1  ;;  %535 = vmatprep.subr.bf16.mxu1 (!%p140_p2), %v591_v1  ;;  %p165_p3 = scmp.lt.s32.totalorder (!%p140_p2), %s489_s16, 15  ;;  %v565_v4 = vld [vmem:[%s696_s1 + $0x18] sm:$0xff] (!%p140_p2)   ;;  %v566_v7 = vld [vmem:[%s696_s1 + $0x20] sm:$0xff] (!%p140_p2)   ;;  %v567_v8 = vld [vmem:[%s696_s1 + $0x28] sm:$0xff] (!%p140_p2)   ;;  %vm419_vm1 = vcmask (!%p140_p2), 125952  }
   0x7   : > { %315 = vmatpush1.bf16.msra.mxu0 (!%p140_p2), %v562_v0  ;;  %544 = vmatpush1.bf16.msra.mxu1 (!%p140_p2), %v562_v0  ;;  %v568_v9 = vld [vmem:[%s696_s1 + $0x30] sm:$0xff] (!%p140_p2)   ;;  %v569_v10 = vld [vmem:[%s696_s1 + $0x38] sm:$0xff] (!%p140_p2)   ;;  %v570_v11 = vld [vmem:[%s696_s1 + $0x40] sm:$0xff] (!%p140_p2)  }
   0x8   : > { %316 = vmatprep.subr.bf16.mxu0 (!%p140_p2), %v591_v1  ;;  %536 = vmatprep.subr.bf16.mxu1 (!%p140_p2), %v591_v1  ;;  %v494_v18 = vld [vmem:[%s697_s2] ss:$0 sm:$0xff] (!%p140_p2) }
   0xb   : > { %317 = vmatpush1.bf16.msra.mxu0 (!%p140_p2), %v563_v2  ;;  %545 = vmatpush1.bf16.msra.mxu1 (!%p140_p2), %v563_v2 }
   0xc   : > { %318 = vmatprep.subr.bf16.mxu0 (!%p140_p2), %v591_v1  ;;  %537 = vmatprep.subr.bf16.mxu1 (!%p140_p2), %v591_v1 }
   0xd   : > { %s700_s16 = smov (!%p165_p3, %s489_s16), 15 }
   0xe   : > { %s526_s21 = sshll.u32 %s700_s16, 3  ;;  %s493_s13 = sshll.u32 %s700_s16, 2 }
   0xf   : > { %s635_s24 = scalar_lea.vmem %s695_s0, %s526_s21  ;;  %319 = vmatpush1.bf16.msra.mxu0 %v564_v3  ;;  %546 = vmatpush1.bf16.msra.mxu1 %v564_v3  ;;  %s674_s17 = scalar_lea.vmem %s698_s3, %s493_s13 }
  0x10   : > { %v573_v5 = vld [vmem:[%s635_s24 + $0x4] ss:$8 sps:$4 sm:$0xff]   ;;  %320 = vmatprep.subr.bf16.mxu0 %v591_v1  ;;  %538 = vmatprep.subr.bf16.mxu1 %v591_v1  ;;  %v571_v12 = vld [vmem:[%s635_s24] ss:$8 sps:$4 sm:$0xff]   ;;  %v577_v14 = vld [vmem:[%s635_s24 + $0x14] ss:$8 sps:$4 sm:$0xff]  }
  0x11   : > { %v576_v6 = vld [vmem:[%s635_s24 + $0x24] ss:$8 sps:$4 sm:$0xff]   ;;  %512 = vmatprep.mubr.msk.bf16.mxu0 %vm301_vm0, %v573_v5  ;;  %v574_v13 = vld [vmem:[%s635_s24 + $0x20] ss:$8 sps:$4 sm:$0xff]   ;;  %v579_v15 = vld [vmem:[%s635_s24 + $0x34] ss:$8 sps:$4 sm:$0xff]  }
  0x12   : > { %514 = vmatprep.mubr.msk.bf16.mxu1 %vm301_vm0, %v576_v6  ;;  %v581_v16 = vld [vmem:[%s635_s24 + $0x10] ss:$8 sps:$4 sm:$0xff]  }
  0x13   : > { %321 = vmatpush1.bf16.msra.mxu0 %v565_v4  ;;  %547 = vmatpush1.bf16.msra.mxu1 %v565_v4  ;;  %v582_v17 = vld [vmem:[%s635_s24 + $0x30] ss:$8 sps:$4 sm:$0xff]  }
  0x14   : > { %322 = vmatprep.subr.bf16.mxu0 %v591_v1  ;;  %539 = vmatprep.subr.bf16.mxu1 %v591_v1 }
  0x17   : > { %323 = vmatpush1.bf16.msra.mxu0 %v566_v7  ;;  %548 = vmatpush1.bf16.msra.mxu1 %v566_v7 }
  0x18   : > { %324 = vmatprep.subr.bf16.mxu0 %v591_v1  ;;  %540 = vmatprep.subr.bf16.mxu1 %v591_v1 }
  0x1b   : > { %325 = vmatpush1.bf16.msra.mxu0 %v567_v8  ;;  %549 = vmatpush1.bf16.msra.mxu1 %v567_v8 }
  0x1c   : > { %326 = vmatprep.subr.bf16.mxu0 %v591_v1  ;;  %541 = vmatprep.subr.bf16.mxu1 %v591_v1 }
  0x1f   : > { %327 = vmatpush1.bf16.msra.mxu0 %v568_v9  ;;  %550 = vmatpush1.bf16.msra.mxu1 %v568_v9 }
  0x20   : > { %328 = vmatprep.subr.bf16.mxu0 %v591_v1  ;;  %542 = vmatprep.subr.bf16.mxu1 %v591_v1 }
  0x23   : > { %329 = vmatpush1.bf16.msra.mxu0 %v569_v10  ;;  %551 = vmatpush1.bf16.msra.mxu1 %v569_v10 }
  0x24   : > { %330 = vmatprep.subr.bf16.mxu0 %v591_v1  ;;  %543 = vmatprep.subr.bf16.mxu1 %v591_v1 }
  0x27   : > { %331 = vmatpush1.bf16.msra.mxu0 %v570_v11  ;;  %552 = vmatpush1.bf16.msra.mxu1 %v570_v11 }
  0x2a   : > { %347 = vmatmul.mubr.bf16.vlgmr.msra.gmra.mrb[0].mxu0 %v571_v12  ;;  %363 = vmatmul.mubr.bf16.vlgmr.msra.gmra.mrb[0].mxu1 %v574_v13 }
  0x2b   : > { %513 = vmatprep.mubr.msk.bf16.mxu0 %vm301_vm0, %v577_v14  ;;  %515 = vmatprep.mubr.msk.bf16.mxu1 %vm301_vm0, %v579_v15 }
  0x32   : > { %355 = vmatmul.mubr.bf16.gmra.mrb[4].mxu0 %v581_v16  ;;  %371 = vmatmul.mubr.bf16.gmra.mrb[4].mxu1 %v582_v17 }
  0xfd   : > { %v348_v19 = vpop.f32.mrb[0].mxu0  ;;  %v364_v20 = vpop.f32.mrb[0].mxu1 }
  0xfe   : > { %v349_v21 = vadd.f32 %v494_v18, %v348_v19  ;;  %v365_v22 = vadd.f32 %v494_v18, %v364_v20  ;;  %v350_v23 = vpop.f32.mrb[1].mxu0  ;;  %v366_v24 = vpop.f32.mrb[1].mxu1 }
  0xff   : > { %v351_v25 = vpop.f32.mrb[2].mxu0  ;;  %v367_v26 = vpop.f32.mrb[2].mxu1 }
 0x100   : > { %v379_v27 = vmax.f32 %v349_v21, 0.0  ;;  %v383_v28 = vmax.f32 %v365_v22, 0.0  ;;  %v352_v29 = vadd.f32 %v494_v18, %v351_v25  ;;  %v368_v30 = vadd.f32 %v494_v18, %v367_v26  ;;  %v353_v31 = vpop.f32.mrb[3].mxu0  ;;  %v369_v32 = vpop.f32.mrb[3].mxu1 }
 0x102   : > { %v527_v33 = vpack.c.bf16 %v379_v27, %v379_v27  ;;  %v531_v34 = vpack.c.bf16 %v383_v28, %v383_v28  ;;  %v380_v35 = vmax.f32 %v352_v29, 0.0  ;;  %v384_v36 = vmax.f32 %v368_v30, 0.0 }
 0x104   : > { %420 = vst.msk [vmem:[%s674_s17] sm:$0xf] %vm419_vm1, %v527_v33  ;;  %424 = vst.msk [vmem:[%s674_s17 + $0x10] sm:$0xf] %vm419_vm1, %v531_v34  ;;  %v528_v37 = vpack.c.bf16 %v380_v35, %v380_v35  ;;  %v532_v38 = vpack.c.bf16 %v384_v36, %v384_v36 }
 0x105   : > { %v356_v39 = vpop.f32.mrb[4].mxu0  ;;  %v372_v40 = vpop.f32.mrb[4].mxu1 }
 0x106   : > { %421 = vst.msk [vmem:[%s674_s17 + $0x4] sm:$0xf] %vm419_vm1, %v528_v37  ;;  %425 = vst.msk [vmem:[%s674_s17 + $0x14] sm:$0xf] %vm419_vm1, %v532_v38  ;;  %v357_v41 = vadd.f32 %v494_v18, %v356_v39  ;;  %v373_v42 = vadd.f32 %v494_v18, %v372_v40  ;;  %v358_v43 = vpop.f32.mrb[5].mxu0  ;;  %v374_v44 = vpop.f32.mrb[5].mxu1 }
 0x107   : > { %v359_v45 = vpop.f32.mrb[6].mxu0  ;;  %v375_v46 = vpop.f32.mrb[6].mxu1 }
 0x108   : > { %v381_v47 = vmax.f32 %v357_v41, 0.0  ;;  %v385_v48 = vmax.f32 %v373_v42, 0.0  ;;  %v360_v49 = vadd.f32 %v494_v18, %v359_v45  ;;  %v376_v50 = vadd.f32 %v494_v18, %v375_v46  ;;  %v361_v51 = vpop.f32.mrb[7].mxu0  ;;  %v377_v52 = vpop.f32.mrb[7].mxu1 }
 0x10a   : > { %v529_v53 = vpack.c.bf16 %v381_v47, %v381_v47  ;;  %v533_v54 = vpack.c.bf16 %v385_v48, %v385_v48  ;;  %v382_v55 = vmax.f32 %v360_v49, 0.0  ;;  %v386_v56 = vmax.f32 %v376_v50, 0.0 }
 0x10c   : > { %422 = vst.msk [vmem:[%s674_s17 + $0x8] sm:$0xf] %vm419_vm1, %v529_v53  ;;  %426 = vst.msk [vmem:[%s674_s17 + $0x18] sm:$0xf] %vm419_vm1, %v533_v54  ;;  %v530_v57 = vpack.c.bf16 %v382_v55, %v382_v55  ;;  %v534_v58 = vpack.c.bf16 %v386_v56, %v386_v56 }
 0x10e   : > { %423 = vst.msk [vmem:[%s674_s17 + $0xc] sm:$0xf] %vm419_vm1, %v530_v57  ;;  %427 = vst.msk [vmem:[%s674_s17 + $0x1c] sm:$0xf] %vm419_vm1, %v534_v58 }
 0x10f PF: > { %s13_s12 = sadd.s32 1, %s589_s12  }
 0x110   : > { %p10_p4 = scmp.ge.s32.totalorder %s13_s12, 4  }
 0x112   :  { %12 = sbr.rel (!%p10_p4) target bundleno = 1 (0x1), region = 62 }

// kernel: _lambda_.43
= control target key start
LH: loop header
LB: loop body
LE: loop exit
PB: predicated region body
PF: predicated region fallthrough
CT: control target
= control target key end

     0   :  { %s462_s12 = smov 0   ;;  %s513_s0 = inlined_call_operand.vmem [shape: bf16[32,144], index: 0, kind: input, shape index: {}]   ;;  %s514_s1 = inlined_call_operand.vmem [shape: bf16[144,32], index: 1, kind: input, shape index: {}]   ;;  %s515_s2 = inlined_call_operand.vmem [shape: f32[1,32], index: 2, kind: input, shape index: {}]   ;;  %s516_s3 = inlined_call_operand.vmem [shape: bf16[32,32], index: 3, kind: output, shape index: {}]  }
   0x1 LB: > { %s382_s13 = sadd.s32 4294967295, %s439_s12   ;;  %p386_p0 = scmp.ge.s32.totalorder %s439_s12, 1  ;;  %s439_s12 = sphi %s462_s12, %s13_s12  }
   0x2   : > { %p139_p1 = scmp.lt.s32.totalorder %s439_s12, 3 }
   0x4   : > { %p140_p2 = pnand %p386_p0, %p139_p1 }
   0x5   : > { %v421_v0 = vld [vmem:[%s514_s1] sm:$0xff] (!%p140_p2)   ;;  %v441_v1 = vmov (!%p140_p2), 0   ;;  %s387_s16 = sshll.u32 (!%p140_p2), %s382_s13, 1  ;;  %v422_v2 = vld [vmem:[%s514_s1 + $0x8] sm:$0xff] (!%p140_p2)   ;;  %v423_v3 = vld [vmem:[%s514_s1 + $0x10] sm:$0xff] (!%p140_p2)   ;;  %vm268_vm0 = vcmask (!%p140_p2), 130048  }
   0x6   : > { %143 = sbr.rel (%p140_p2) target bundleno = 263 (0x107), region = 32  ;;  %272 = vmatprep.subr.bf16.mxu0 (!%p140_p2), %v441_v1  ;;  %p165_p3 = scmp.lt.s32.totalorder (!%p140_p2), %s387_s16, 3  ;;  %v424_v4 = vld [vmem:[%s514_s1 + $0x18] sm:$0xff] (!%p140_p2)   ;;  %v425_v6 = vld [vmem:[%s514_s1 + $0x20] sm:$0xff] (!%p140_p2)   ;;  %v426_v7 = vld [vmem:[%s514_s1 + $0x28] sm:$0xff] (!%p140_p2)   ;;  %vm323_vm1 = vcmask (!%p140_p2), 257024  }
   0x7   : > { %273 = vmatpush1.bf16.msra.mxu0 (!%p140_p2), %v421_v0  ;;  %v427_v8 = vld [vmem:[%s514_s1 + $0x30] sm:$0xff] (!%p140_p2)   ;;  %v428_v9 = vld [vmem:[%s514_s1 + $0x38] sm:$0xff] (!%p140_p2)   ;;  %v429_v10 = vld [vmem:[%s514_s1 + $0x40] sm:$0xff] (!%p140_p2)  }
   0x8   : > { %274 = vmatprep.subr.bf16.mxu0 (!%p140_p2), %v441_v1  ;;  %v392_v12 = vld [vmem:[%s515_s2] ss:$0 sm:$0xff] (!%p140_p2) }
   0xb   : > { %275 = vmatpush1.bf16.msra.mxu0 (!%p140_p2), %v422_v2 }
   0xc   : > { %276 = vmatprep.subr.bf16.mxu0 (!%p140_p2), %v441_v1 }
   0xd   : > { %s518_s16 = smov (!%p165_p3, %s387_s16), 3 }
   0xe   : > { %s409_s21 = sshll.u32 %s518_s16, 3  ;;  %s391_s13 = sshll.u32 %s518_s16, 2 }
   0xf   : > { %s169_s24 = scalar_lea.vmem %s513_s0, %s409_s21  ;;  %277 = vmatpush1.bf16.msra.mxu0 %v423_v3  ;;  %s175_s17 = scalar_lea.vmem %s516_s3, %s391_s13 }
  0x10   : > { %v432_v5 = vld [vmem:[%s169_s24 + $0x4] ss:$8 sps:$4 sm:$0xff]   ;;  %278 = vmatprep.subr.bf16.mxu0 %v441_v1  ;;  %v430_v11 = vld [vmem:[%s169_s24] ss:$8 sps:$4 sm:$0xff]  }
  0x11   : > { %404 = vmatprep.mubr.msk.bf16.mxu0 %vm268_vm0, %v432_v5 }
  0x13   : > { %279 = vmatpush1.bf16.msra.mxu0 %v424_v4 }
  0x14   : > { %280 = vmatprep.subr.bf16.mxu0 %v441_v1 }
  0x17   : > { %281 = vmatpush1.bf16.msra.mxu0 %v425_v6 }
  0x18   : > { %282 = vmatprep.subr.bf16.mxu0 %v441_v1 }
  0x1b   : > { %283 = vmatpush1.bf16.msra.mxu0 %v426_v7 }
  0x1c   : > { %284 = vmatprep.subr.bf16.mxu0 %v441_v1 }
  0x1f   : > { %285 = vmatpush1.bf16.msra.mxu0 %v427_v8 }
  0x20   : > { %286 = vmatprep.subr.bf16.mxu0 %v441_v1 }
  0x23   : > { %287 = vmatpush1.bf16.msra.mxu0 %v428_v9 }
  0x24   : > { %288 = vmatprep.subr.bf16.mxu0 %v441_v1 }
  0x27   : > { %289 = vmatpush1.bf16.msra.mxu0 %v429_v10 }
  0x2a   : > { %305 = vmatmul.mubr.bf16.vlgmr.msra.gmra.mrb[0].mxu0 %v430_v11 }
  0xfd   : > { %v306_v13 = vpop.f32.mrb[0].mxu0 }
  0xfe   : > { %v307_v14 = vadd.f32 %v392_v12, %v306_v13  ;;  %v308_v15 = vpop.f32.mrb[1].mxu0 }
  0xff   : > { %v309_v16 = vpop.f32.mrb[2].mxu0 }
 0x100   : > { %v313_v17 = vmax.f32 %v307_v14, 0.0  ;;  %v310_v18 = vadd.f32 %v392_v12, %v309_v16  ;;  %v311_v19 = vpop.f32.mrb[3].mxu0 }
 0x102   : > { %v410_v20 = vpack.c.bf16 %v313_v17, %v313_v17  ;;  %v314_v21 = vmax.f32 %v310_v18, 0.0 }
 0x104   : > { %324 = vst.msk [vmem:[%s175_s17] sm:$0xf] %vm323_vm1, %v410_v20  ;;  %v411_v22 = vpack.c.bf16 %v314_v21, %v314_v21 }
 0x106   : > { %325 = vst.msk [vmem:[%s175_s17 + $0x4] sm:$0xf] %vm323_vm1, %v411_v22 }
 0x107 PF: > { %s13_s12 = sadd.s32 1, %s439_s12  }
 0x108   : > { %p10_p4 = scmp.ge.s32.totalorder %s13_s12, 4  }
 0x10a   :  { %12 = sbr.rel (!%p10_p4) target bundleno = 1 (0x1), region = 62 }

// kernel: _lambda_.44
= control target key start
LH: loop header
LB: loop body
LE: loop exit
PB: predicated region body
PF: predicated region fallthrough
CT: control target
= control target key end

     0   :  { %s715_s15 = smov 0   ;;  %s796_s0 = inlined_call_operand.vmem [shape: bf16[32,288], index: 0, kind: input, shape index: {}]   ;;  %s797_s1 = inlined_call_operand.vmem [shape: bf16[288,32], index: 1, kind: input, shape index: {}]   ;;  %s798_s2 = inlined_call_operand.vmem [shape: f32[1,32], index: 2, kind: input, shape index: {}]   ;;  %s799_s3 = inlined_call_operand.vmem [shape: bf16[32,32], index: 3, kind: input, shape index: {}]   ;;  %s800_s4 = inlined_call_operand.vmem [shape: bf16[32,32], index: 4, kind: output, shape index: {}]  }
   0x1 LB: > { %s570_s16 = sadd.s32 4294967295, %s686_s15   ;;  %p574_p0 = scmp.ge.s32.totalorder %s686_s15, 1  ;;  %s686_s15 = sphi %s715_s15, %s14_s15  }
   0x2   : > { %p175_p1 = scmp.lt.s32.totalorder %s686_s15, 3 }
   0x4   : > { %p176_p2 = pnand %p574_p0, %p175_p1 }
   0x5   : > { %v658_v0 = vld [vmem:[%s797_s1 + $0x40] sm:$0xff] (!%p176_p2)   ;;  %v688_v2 = vmov (!%p176_p2), 0.0   ;;  %s575_s21 = sshll.u32 (!%p176_p2), %s570_s16, 1  ;;  %v660_v3 = vld [vmem:[%s797_s1 + $0x48] sm:$0xff] (!%p176_p2)   ;;  %v662_v5 = vld [vmem:[%s797_s1 + $0x50] sm:$0xff] (!%p176_p2)   ;;  %vm689_vm0 = vmmov (!%p176_p2), 0  }
   0x6   : > { %179 = sbr.rel (%p176_p2) target bundleno = 266 (0x10a), region = 36  ;;  %v659_v1 = vld [vmem:[%s797_s1] sm:$0xff] (!%p176_p2)   ;;  %639 = vmatprep.subr.bf16.mxu1 (!%p176_p2), %v688_v2  ;;  %614 = vmatprep.subr.bf16.mxu0 (!%p176_p2), %v658_v0  ;;  %p208_p3 = scmp.lt.s32.totalorder (!%p176_p2), %s575_s21, 3  ;;  %v661_v4 = vld [vmem:[%s797_s1 + $0x8] sm:$0xff] (!%p176_p2)   ;;  %v663_v6 = vld [vmem:[%s797_s1 + $0x10] sm:$0xff] (!%p176_p2)   ;;  %vm397_vm1 = vcmask (!%p176_p2), 261120  }
   0x7   : > { %615 = vmatpush3.bf16.msra.mxu0 (!%p176_p2), %v659_v1  ;;  %643 = vmatprep.mubr.msk.bf16.mxu1 (!%p176_p2), %vm689_vm0, %v688_v2  ;;  %v664_v7 = vld [vmem:[%s797_s1 + $0x58] sm:$0xff] (!%p176_p2)   ;;  %v666_v9 = vld [vmem:[%s797_s1 + $0x60] sm:$0xff] (!%p176_p2)   ;;  %v668_v12 = vld [vmem:[%s797_s1 + $0x68] sm:$0xff] (!%p176_p2)   ;;  %vm499_vm2 = vcmask (!%p176_p2), 257024  }
   0x8   : > { %616 = vmatprep.subr.bf16.mxu0 (!%p176_p2), %v660_v3  ;;  %v665_v8 = vld [vmem:[%s797_s1 + $0x18] sm:$0xff] (!%p176_p2)   ;;  %v672_v10 = vld [vmem:[%s797_s1 + $0x80] sm:$0xff] (!%p176_p2)   ;;  %v669_v13 = vld [vmem:[%s797_s1 + $0x28] sm:$0xff] (!%p176_p2)  }
   0x9   : > { %v667_v11 = vld [vmem:[%s797_s1 + $0x20] sm:$0xff] (!%p176_p2)   ;;  %640 = vmatpush3.bf16.msra.mxu1 (!%p176_p2), %v672_v10  ;;  %v678_v15 = vld [vmem:[%s797_s1 + $0x88] sm:$0xff] (!%p176_p2)   ;;  %v670_v16 = vld [vmem:[%s797_s1 + $0x70] sm:$0xff] (!%p176_p2)  }
   0xa   : > { %641 = vmatprep.subr.bf16.mxu1 (!%p176_p2), %v688_v2  ;;  %v671_v18 = vld [vmem:[%s797_s1 + $0x30] sm:$0xff] (!%p176_p2)   ;;  %v673_v19 = vld [vmem:[%s797_s1 + $0x78] sm:$0xff] (!%p176_p2)   ;;  %v581_v28 = vld [vmem:[%s798_s2] ss:$0 sm:$0xff] (!%p176_p2) }
   0xb   : > { %617 = vmatpush3.bf16.msra.mxu0 (!%p176_p2), %v661_v4  ;;  %v674_v20 = vld [vmem:[%s797_s1 + $0x38] sm:$0xff] (!%p176_p2)  }
   0xc   : > { %618 = vmatprep.subr.bf16.mxu0 (!%p176_p2), %v662_v5 }
   0xd   : > { %s802_s21 = smov (!%p208_p3, %s575_s21), 3  ;;  %642 = vmatpush3.bf16.msra.mxu1 %v678_v15 }
   0xe   : > { %s647_s8 = smul.u32 12, %s802_s21 }
   0xf   : > { %619 = vmatpush3.bf16.msra.mxu0 %v663_v6 }
  0x10   : > { %620 = vmatprep.subr.bf16.mxu0 %v664_v7  ;;  %s212_s18 = scalar_lea.vmem %s796_s0, %s647_s8  ;;  %s578_s8 = sshll.u32 %s802_s21, 2 }
  0x11   : > { %v677_v14 = vld [vmem:[%s212_s18 + $0x4] ss:$12 sps:$4 sm:$0xff]   ;;  %v679_v17 = vld [vmem:[%s212_s18 + $0x8] ss:$12 sps:$4 sm:$0xff]   ;;  %v675_v21 = vld [vmem:[%s212_s18] ss:$12 sps:$4 sm:$0xff]   ;;  %s218_s11 = scalar_lea.vmem %s799_s3, %s578_s8  ;;  %s224_s16 = scalar_lea.vmem %s800_s4, %s578_s8 }
  0x12   : > { %433 = vmatprep.mubr.bf16.mxu0 %v677_v14  ;;  %644 = vmatmul.mubr.msk.bf16.vlgmr.msra.gmra.mrb[0].mxu1 %vm397_vm1, %v679_v17  ;;  %v611_v29 = vld [vmem:[%s218_s11] sm:$0xff]  }
  0x13   : > { %621 = vmatpush3.bf16.msra.mxu0 %v665_v8  ;;  %v612_v34 = vunpack.c.l.bf16 %v611_v29  ;;  %v613_v38 = vunpack.c.h.bf16 %v611_v29 }
  0x14   : > { %622 = vmatprep.subr.bf16.mxu0 %v666_v9 }
  0x17   : > { %623 = vmatpush3.bf16.msra.mxu0 %v667_v11 }
  0x18   : > { %624 = vmatprep.subr.bf16.mxu0 %v668_v12 }
  0x1b   : > { %625 = vmatpush3.bf16.msra.mxu0 %v669_v13 }
  0x1c   : > { %626 = vmatprep.subr.bf16.mxu0 %v670_v16 }
  0x1f   : > { %627 = vmatpush3.bf16.msra.mxu0 %v671_v18 }
  0x20   : > { %628 = vmatprep.subr.bf16.mxu0 %v673_v19 }
  0x23   : > { %629 = vmatpush3.bf16.msra.mxu0 %v674_v20 }
  0x26   : > { %434 = vmatmul.mubr.bf16.vlgmr.msra.gmra.mrb[0].mxu0 %v675_v21 }
  0xe5   : > { %v476_v22 = vpop.f32.mrb[0].mxu1 }
  0xe6   : > { %v645_v23 = vpop.f32.mrb[1].mxu1 }
  0xe7   : > { %v479_v24 = vpop.f32.mrb[2].mxu1 }
  0xe8   : > { %v646_v25 = vpop.f32.mrb[3].mxu1 }
  0xf9   : > { %v630_v26 = vpop.f32.mrb[0].mxu0 }
  0xfa   : > { %v631_v27 = vpop.f32.mrb[1].mxu0 }
  0xfb   : > { %v632_v30 = vadd.f32 %v631_v27, %v630_v26  ;;  %v633_v31 = vpop.f32.mrb[2].mxu0 }
  0xfc   : > { %v634_v32 = vpop.f32.mrb[3].mxu0 }
  0xfd   : > { %v436_v33 = vadd.f32 %v632_v30, %v581_v28  ;;  %v635_v35 = vadd.f32 %v634_v32, %v633_v31 }
  0xff   : > { %v477_v36 = vadd.f32 %v476_v22, %v436_v33  ;;  %v439_v37 = vadd.f32 %v635_v35, %v581_v28 }
 0x101   : > { %v487_v39 = vadd.f32 %v612_v34, %v477_v36  ;;  %v480_v40 = vadd.f32 %v479_v24, %v439_v37 }
 0x103   : > { %v489_v41 = vmax.f32 %v487_v39, 0.0  ;;  %v488_v42 = vadd.f32 %v613_v38, %v480_v40 }
 0x105   : > { %v608_v43 = vpack.c.bf16 %v489_v41, %v489_v41  ;;  %v490_v44 = vmax.f32 %v488_v42, 0.0 }
 0x107   : > { %500 = vst.msk [vmem:[%s224_s16] sm:$0xf] %vm499_vm2, %v608_v43  ;;  %v609_v45 = vpack.c.bf16 %v490_v44, %v490_v44 }
 0x109   : > { %501 = vst.msk [vmem:[%s224_s16 + $0x4] sm:$0xf] %vm499_vm2, %v609_v45 }
 0x10a PF: > { %s14_s15 = sadd.s32 1, %s686_s15  }
 0x10b   : > { %p11_p4 = scmp.ge.s32.totalorder %s14_s15, 4  }
 0x10d   :  { %13 = sbr.rel (!%p11_p4) target bundleno = 1 (0x1), region = 69 }

// kernel: _lambda_.45
= control target key start
LH: loop header
LB: loop body
LE: loop exit
PB: predicated region body
PF: predicated region fallthrough
CT: control target
= control target key end

     0   :  { %s637_s12 = smov 0   ;;  %s715_s0 = inlined_call_operand.vmem [shape: bf16[32,288], index: 0, kind: input, shape index: {}]   ;;  %s716_s1 = inlined_call_operand.vmem [shape: bf16[288,32], index: 1, kind: input, shape index: {}]   ;;  %s717_s2 = inlined_call_operand.vmem [shape: f32[1,32], index: 2, kind: input, shape index: {}]   ;;  %s718_s3 = inlined_call_operand.vmem [shape: bf16[32,32], index: 3, kind: output, shape index: {}]  }
   0x1 LB: > { %s503_s13 = sadd.s32 4294967295, %s613_s12   ;;  %p507_p0 = scmp.ge.s32.totalorder %s613_s12, 1  ;;  %s613_s12 = sphi %s637_s12, %s13_s12  }
   0x2   : > { %p139_p1 = scmp.lt.s32.totalorder %s613_s12, 3 }
   0x4   : > { %p140_p2 = pnand %p507_p0, %p139_p1 }
   0x5   : > { %v585_v0 = vld [vmem:[%s716_s1 + $0x40] sm:$0xff] (!%p140_p2)   ;;  %v615_v2 = vmov (!%p140_p2), 0.0   ;;  %s508_s18 = sshll.u32 (!%p140_p2), %s503_s13, 1  ;;  %v587_v3 = vld [vmem:[%s716_s1 + $0x48] sm:$0xff] (!%p140_p2)   ;;  %v589_v5 = vld [vmem:[%s716_s1 + $0x50] sm:$0xff] (!%p140_p2)   ;;  %vm616_vm0 = vmmov (!%p140_p2), 0  }
   0x6   : > { %143 = sbr.rel (%p140_p2) target bundleno = 264 (0x108), region = 32  ;;  %v586_v1 = vld [vmem:[%s716_s1] sm:$0xff] (!%p140_p2)   ;;  %566 = vmatprep.subr.bf16.mxu1 (!%p140_p2), %v615_v2  ;;  %541 = vmatprep.subr.bf16.mxu0 (!%p140_p2), %v585_v0  ;;  %p165_p3 = scmp.lt.s32.totalorder (!%p140_p2), %s508_s18, 3  ;;  %v588_v4 = vld [vmem:[%s716_s1 + $0x8] sm:$0xff] (!%p140_p2)   ;;  %v590_v6 = vld [vmem:[%s716_s1 + $0x10] sm:$0xff] (!%p140_p2)   ;;  %vm348_vm1 = vcmask (!%p140_p2), 261120  }
   0x7   : > { %542 = vmatpush3.bf16.msra.mxu0 (!%p140_p2), %v586_v1  ;;  %570 = vmatprep.mubr.msk.bf16.mxu1 (!%p140_p2), %vm616_vm0, %v615_v2  ;;  %v591_v7 = vld [vmem:[%s716_s1 + $0x58] sm:$0xff] (!%p140_p2)   ;;  %v593_v9 = vld [vmem:[%s716_s1 + $0x60] sm:$0xff] (!%p140_p2)   ;;  %v595_v12 = vld [vmem:[%s716_s1 + $0x68] sm:$0xff] (!%p140_p2)   ;;  %vm444_vm2 = vcmask (!%p140_p2), 257024  }
   0x8   : > { %543 = vmatprep.subr.bf16.mxu0 (!%p140_p2), %v587_v3  ;;  %v592_v8 = vld [vmem:[%s716_s1 + $0x18] sm:$0xff] (!%p140_p2)   ;;  %v599_v10 = vld [vmem:[%s716_s1 + $0x80] sm:$0xff] (!%p140_p2)   ;;  %v596_v13 = vld [vmem:[%s716_s1 + $0x28] sm:$0xff] (!%p140_p2)  }
   0x9   : > { %v594_v11 = vld [vmem:[%s716_s1 + $0x20] sm:$0xff] (!%p140_p2)   ;;  %567 = vmatpush3.bf16.msra.mxu1 (!%p140_p2), %v599_v10  ;;  %v605_v15 = vld [vmem:[%s716_s1 + $0x88] sm:$0xff] (!%p140_p2)   ;;  %v597_v16 = vld [vmem:[%s716_s1 + $0x70] sm:$0xff] (!%p140_p2)  }
   0xa   : > { %568 = vmatprep.subr.bf16.mxu1 (!%p140_p2), %v615_v2  ;;  %v598_v18 = vld [vmem:[%s716_s1 + $0x30] sm:$0xff] (!%p140_p2)   ;;  %v600_v19 = vld [vmem:[%s716_s1 + $0x78] sm:$0xff] (!%p140_p2)   ;;  %v512_v28 = vld [vmem:[%s717_s2] ss:$0 sm:$0xff] (!%p140_p2) }
   0xb   : > { %544 = vmatpush3.bf16.msra.mxu0 (!%p140_p2), %v588_v4  ;;  %v601_v20 = vld [vmem:[%s716_s1 + $0x38] sm:$0xff] (!%p140_p2)  }
   0xc   : > { %545 = vmatprep.subr.bf16.mxu0 (!%p140_p2), %v589_v5 }
   0xd   : > { %s720_s18 = smov (!%p165_p3, %s508_s18), 3  ;;  %569 = vmatpush3.bf16.msra.mxu1 %v605_v15 }
   0xe   : > { %s574_s4 = smul.u32 12, %s720_s18  ;;  %s511_s5 = sshll.u32 %s720_s18, 2 }
   0xf   : > { %546 = vmatpush3.bf16.msra.mxu0 %v590_v6  ;;  %s175_s8 = scalar_lea.vmem %s718_s3, %s511_s5 }
  0x10   : > { %547 = vmatprep.subr.bf16.mxu0 %v591_v7  ;;  %s169_s14 = scalar_lea.vmem %s715_s0, %s574_s4 }
  0x11   : > { %v604_v14 = vld [vmem:[%s169_s14 + $0x4] ss:$12 sps:$4 sm:$0xff]   ;;  %v606_v17 = vld [vmem:[%s169_s14 + $0x8] ss:$12 sps:$4 sm:$0xff]   ;;  %v602_v21 = vld [vmem:[%s169_s14] ss:$12 sps:$4 sm:$0xff]  }
  0x12   : > { %384 = vmatprep.mubr.bf16.mxu0 %v604_v14  ;;  %571 = vmatmul.mubr.msk.bf16.vlgmr.msra.gmra.mrb[0].mxu1 %vm348_vm1, %v606_v17 }
  0x13   : > { %548 = vmatpush3.bf16.msra.mxu0 %v592_v8 }
  0x14   : > { %549 = vmatprep.subr.bf16.mxu0 %v593_v9 }
  0x17   : > { %550 = vmatpush3.bf16.msra.mxu0 %v594_v11 }
  0x18   : > { %551 = vmatprep.subr.bf16.mxu0 %v595_v12 }
  0x1b   : > { %552 = vmatpush3.bf16.msra.mxu0 %v596_v13 }
  0x1c   : > { %553 = vmatprep.subr.bf16.mxu0 %v597_v16 }
  0x1f   : > { %554 = vmatpush3.bf16.msra.mxu0 %v598_v18 }
  0x20   : > { %555 = vmatprep.subr.bf16.mxu0 %v600_v19 }
  0x23   : > { %556 = vmatpush3.bf16.msra.mxu0 %v601_v20 }
  0x26   : > { %385 = vmatmul.mubr.bf16.vlgmr.msra.gmra.mrb[0].mxu0 %v602_v21 }
  0xe5   : > { %v427_v22 = vpop.f32.mrb[0].mxu1 }
  0xe6   : > { %v572_v23 = vpop.f32.mrb[1].mxu1 }
  0xe7   : > { %v430_v24 = vpop.f32.mrb[2].mxu1 }
  0xe8   : > { %v573_v25 = vpop.f32.mrb[3].mxu1 }
  0xf9   : > { %v557_v26 = vpop.f32.mrb[0].mxu0 }
  0xfa   : > { %v558_v27 = vpop.f32.mrb[1].mxu0 }
  0xfb   : > { %v559_v29 = vadd.f32 %v558_v27, %v557_v26  ;;  %v560_v30 = vpop.f32.mrb[2].mxu0 }
  0xfc   : > { %v561_v31 = vpop.f32.mrb[3].mxu0 }
  0xfd   : > { %v387_v32 = vadd.f32 %v559_v29, %v512_v28  ;;  %v562_v33 = vadd.f32 %v561_v31, %v560_v30 }
  0xff   : > { %v428_v34 = vadd.f32 %v427_v22, %v387_v32  ;;  %v390_v35 = vadd.f32 %v562_v33, %v512_v28 }
 0x101   : > { %v434_v36 = vmax.f32 %v428_v34, 0.0  ;;  %v431_v37 = vadd.f32 %v430_v24, %v390_v35 }
 0x103   : > { %v539_v38 = vpack.c.bf16 %v434_v36, %v434_v36  ;;  %v435_v39 = vmax.f32 %v431_v37, 0.0 }
 0x105   : > { %445 = vst.msk [vmem:[%s175_s8] sm:$0xf] %vm444_vm2, %v539_v38  ;;  %v540_v40 = vpack.c.bf16 %v435_v39, %v435_v39 }
 0x107   : > { %446 = vst.msk [vmem:[%s175_s8 + $0x4] sm:$0xf] %vm444_vm2, %v540_v40 }
 0x108 PF: > { %s13_s12 = sadd.s32 1, %s613_s12  }
 0x109   : > { %p10_p4 = scmp.ge.s32.totalorder %s13_s12, 4  }
 0x10b   :  { %12 = sbr.rel (!%p10_p4) target bundleno = 1 (0x1), region = 62 }

// kernel: _lambda_.48
= control target key start
LH: loop header
LB: loop body
LE: loop exit
PB: predicated region body
PF: predicated region fallthrough
CT: control target
= control target key end

     0   :  { %v349_v1 = vmov 0.0   ;;  %vm350_vm0 = vmmov 0   ;;  %vm178_vm1 = vcmask 261120   ;;  %vm264_vm2 = vcmask 519168   ;;  %s437_s1 = inlined_call_operand.vmem [shape: bf16[288,64], index: 1, kind: input, shape index: {}]   ;;  %s438_s0 = inlined_call_operand.vmem [shape: bf16[8,288], index: 0, kind: input, shape index: {}]   ;;  %s439_s2 = inlined_call_operand.vmem [shape: f32[1,64], index: 2, kind: input, shape index: {}]   ;;  %s440_s3 = inlined_call_operand.vmem [shape: bf16[8,64], index: 3, kind: output, shape index: {}]  }
   0x1   :  { %v328_v0 = vld [vmem:[%s437_s1 + $0x40] sm:$0xff]   ;;  %318 = vmatprep.subr.bf16.mxu1 %v349_v1  ;;  %322 = vmatprep.mubr.msk.bf16.mxu1 %vm350_vm0, %v349_v1  ;;  %v330_v3 = vld [vmem:[%s437_s1 + $0x48] sm:$0xff]   ;;  %v332_v5 = vld [vmem:[%s437_s1 + $0x50] sm:$0xff]  }
   0x2   :  { %v329_v2 = vld [vmem:[%s437_s1] sm:$0xff]   ;;  %293 = vmatprep.subr.bf16.mxu0 %v328_v0  ;;  %v331_v4 = vld [vmem:[%s437_s1 + $0x8] sm:$0xff]   ;;  %v333_v6 = vld [vmem:[%s437_s1 + $0x10] sm:$0xff]  }
   0x3   :  { %294 = vmatpush3.bf16.msra.mxu0 %v329_v2  ;;  %v334_v7 = vld [vmem:[%s437_s1 + $0x58] sm:$0xff]   ;;  %v336_v9 = vld [vmem:[%s437_s1 + $0x60] sm:$0xff]   ;;  %v338_v12 = vld [vmem:[%s437_s1 + $0x68] sm:$0xff]  }
   0x4   :  { %295 = vmatprep.subr.bf16.mxu0 %v330_v3  ;;  %v335_v8 = vld [vmem:[%s437_s1 + $0x18] sm:$0xff]   ;;  %v342_v10 = vld [vmem:[%s437_s1 + $0x80] sm:$0xff]   ;;  %v348_v15 = vld [vmem:[%s437_s1 + $0x88] sm:$0xff]  }
   0x5   :  { %v337_v11 = vld [vmem:[%s437_s1 + $0x20] sm:$0xff]   ;;  %319 = vmatpush3.bf16.msra.mxu1 %v342_v10  ;;  %v339_v16 = vld [vmem:[%s437_s1 + $0x28] sm:$0xff]   ;;  %v340_v17 = vld [vmem:[%s437_s1 + $0x70] sm:$0xff]  }
   0x6   :  { %320 = vmatprep.subr.bf16.mxu1 %v349_v1  ;;  %v15_v13 = vld [vmem:[%s438_s0] sm:$0xff]  ;;  %v347_v18 = vld [vmem:[%s438_s0 + $0x8] ss:$0 sps:$4 sm:$0xff]   ;;  %v341_v19 = vld [vmem:[%s437_s1 + $0x30] sm:$0xff]  }
   0x7   :  { %296 = vmatpush3.bf16.msra.mxu0 %v331_v4  ;;  %v272_v14 = vcombine.high %v15_v13, %v15_v13  ;;  %v343_v20 = vld [vmem:[%s437_s1 + $0x78] sm:$0xff]   ;;  %v271_v22 = vcombine.low %v15_v13, %v15_v13  ;;  %v270_v29 = vld [vmem:[%s439_s2] ss:$0 sm:$0xff] }
   0x8   :  { %297 = vmatprep.subr.bf16.mxu0 %v332_v5  ;;  %v344_v21 = vld [vmem:[%s437_s1 + $0x38] sm:$0xff]  }
   0x9   :  { %214 = vmatprep.mubr.bf16.mxu0 %v272_v14  ;;  %321 = vmatpush3.bf16.msra.mxu1 %v348_v15 }
   0xb   :  { %298 = vmatpush3.bf16.msra.mxu0 %v333_v6 }
   0xc   :  { %299 = vmatprep.subr.bf16.mxu0 %v334_v7  ;;  %323 = vmatmul.mubr.msk.bf16.vlgmr.msra.gmra.mrb[0].mxu1 %vm178_vm1, %v347_v18 }
   0xf   :  { %300 = vmatpush3.bf16.msra.mxu0 %v335_v8 }
  0x10   :  { %301 = vmatprep.subr.bf16.mxu0 %v336_v9 }
  0x13   :  { %302 = vmatpush3.bf16.msra.mxu0 %v337_v11 }
  0x14   :  { %303 = vmatprep.subr.bf16.mxu0 %v338_v12 }
  0x17   :  { %304 = vmatpush3.bf16.msra.mxu0 %v339_v16 }
  0x18   :  { %305 = vmatprep.subr.bf16.mxu0 %v340_v17 }
  0x1b   :  { %306 = vmatpush3.bf16.msra.mxu0 %v341_v19 }
  0x1c   :  { %307 = vmatprep.subr.bf16.mxu0 %v343_v20 }
  0x1f   :  { %308 = vmatpush3.bf16.msra.mxu0 %v344_v21 }
  0x22   :  { %215 = vmatmul.mubr.bf16.vlgmr.msra.gmra.mrb[0].mxu0 %v271_v22 }
  0xdf   :  { %v256_v23 = vpop.f32.mrb[0].mxu1 }
  0xe0   :  { %v324_v24 = vpop.f32.mrb[1].mxu1 }
  0xe1   :  { %v259_v25 = vpop.f32.mrb[2].mxu1 }
  0xe2   :  { %v325_v26 = vpop.f32.mrb[3].mxu1 }
  0xf5   :  { %v309_v27 = vpop.f32.mrb[0].mxu0 }
  0xf6   :  { %v310_v28 = vpop.f32.mrb[1].mxu0 }
  0xf7   :  { %v311_v30 = vadd.f32 %v310_v28, %v309_v27  ;;  %v312_v31 = vpop.f32.mrb[2].mxu0 }
  0xf8   :  { %v313_v32 = vpop.f32.mrb[3].mxu0 }
  0xf9   :  { %v217_v33 = vadd.f32 %v311_v30, %v270_v29 }
  0xfb   :  { %v257_v34 = vadd.f32 %v256_v23, %v217_v33 }
  0xfd   :  { %v262_v35 = vmax.f32 %v257_v34, 0.0 }
  0xff   :  { %v263_v36 = vpack.c.bf16 %v262_v35, %v262_v35 }
 0x101   :  { %265 = vst.msk [vmem:[%s440_s3] sm:$0xf] %vm264_vm2, %v263_v36 }

// kernel: _lambda_.50
= control target key start
LH: loop header
LB: loop body
LE: loop exit
PB: predicated region body
PF: predicated region fallthrough
CT: control target
= control target key end

     0   :  { %v609_v35 = vmov 0.0   ;;  %vm610_vm0 = vmmov 0   ;;  %vm330_vm1 = vcmask 523264   ;;  %vm456_vm2 = vcmask 519168   ;;  %s754_s1 = inlined_call_operand.vmem [shape: bf16[576,64], index: 1, kind: input, shape index: {}]   ;;  %s755_s0 = inlined_call_operand.vmem [shape: bf16[8,576], index: 0, kind: input, shape index: {}]   ;;  %s756_s2 = inlined_call_operand.vmem [shape: f32[1,64], index: 2, kind: input, shape index: {}]   ;;  %s757_s3 = inlined_call_operand.vmem [shape: bf16[8,64], index: 3, kind: output, shape index: {}]  }
   0x1   :  { %v568_v0 = vld [vmem:[%s754_s1 + $0x40] sm:$0xff]   ;;  %v572_v4 = vld [vmem:[%s754_s1 + $0x48] sm:$0xff]   ;;  %v576_v8 = vld [vmem:[%s754_s1 + $0x50] sm:$0xff]  }
   0x2   :  { %v569_v1 = vld [vmem:[%s754_s1] sm:$0xff]   ;;  %505 = vmatprep.subr.bf16.mxu0 %v568_v0  ;;  %v573_v5 = vld [vmem:[%s754_s1 + $0x8] sm:$0xff]   ;;  %v577_v9 = vld [vmem:[%s754_s1 + $0x10] sm:$0xff]  }
   0x3   :  { %v570_v2 = vld [vmem:[%s754_s1 + $0xc0] sm:$0xff]   ;;  %506 = vmatpush3.bf16.msra.mxu0 %v569_v1  ;;  %v574_v6 = vld [vmem:[%s754_s1 + $0xc8] sm:$0xff]   ;;  %v578_v10 = vld [vmem:[%s754_s1 + $0xd0] sm:$0xff]  }
   0x4   :  { %v571_v3 = vld [vmem:[%s754_s1 + $0x80] sm:$0xff]   ;;  %527 = vmatprep.subr.bf16.mxu1 %v570_v2  ;;  %507 = vmatprep.subr.bf16.mxu0 %v572_v4  ;;  %v575_v7 = vld [vmem:[%s754_s1 + $0x88] sm:$0xff]   ;;  %v579_v11 = vld [vmem:[%s754_s1 + $0x90] sm:$0xff]  }
   0x5   :  { %528 = vmatpush3.bf16.msra.mxu1 %v571_v3  ;;  %v580_v12 = vld [vmem:[%s754_s1 + $0x58] sm:$0xff]   ;;  %v584_v16 = vld [vmem:[%s754_s1 + $0x60] sm:$0xff]   ;;  %v588_v20 = vld [vmem:[%s754_s1 + $0x68] sm:$0xff]  }
   0x6   :  { %529 = vmatprep.subr.bf16.mxu1 %v574_v6  ;;  %v581_v13 = vld [vmem:[%s754_s1 + $0x18] sm:$0xff]   ;;  %v585_v17 = vld [vmem:[%s754_s1 + $0x20] sm:$0xff]   ;;  %v589_v21 = vld [vmem:[%s754_s1 + $0x28] sm:$0xff]  }
   0x7   :  { %508 = vmatpush3.bf16.msra.mxu0 %v573_v5  ;;  %v582_v14 = vld [vmem:[%s754_s1 + $0xd8] sm:$0xff]   ;;  %v586_v18 = vld [vmem:[%s754_s1 + $0xe0] sm:$0xff]   ;;  %v590_v22 = vld [vmem:[%s754_s1 + $0xe8] sm:$0xff]  }
   0x8   :  { %509 = vmatprep.subr.bf16.mxu0 %v576_v8  ;;  %v583_v15 = vld [vmem:[%s754_s1 + $0x98] sm:$0xff]   ;;  %v587_v19 = vld [vmem:[%s754_s1 + $0xa0] sm:$0xff]   ;;  %v591_v23 = vld [vmem:[%s754_s1 + $0xa8] sm:$0xff]  }
   0x9   :  { %530 = vmatpush3.bf16.msra.mxu1 %v575_v7  ;;  %v592_v24 = vld [vmem:[%s754_s1 + $0x70] sm:$0xff]   ;;  %v596_v28 = vld [vmem:[%s754_s1 + $0x78] sm:$0xff]   ;;  %v15_v31 = vld [vmem:[%s755_s0] sm:$0xff] }
   0xa   :  { %531 = vmatprep.subr.bf16.mxu1 %v578_v10  ;;  %v593_v25 = vld [vmem:[%s754_s1 + $0x30] sm:$0xff]   ;;  %v597_v29 = vld [vmem:[%s754_s1 + $0x38] sm:$0xff]   ;;  %v463_v32 = vcombine.low %v15_v31, %v15_v31  ;;  %v464_v33 = vcombine.high %v15_v31, %v15_v31  ;;  %v16_v36 = vld [vmem:[%s755_s0 + $0x8] sm:$0xff] }
   0xb   :  { %510 = vmatpush3.bf16.msra.mxu0 %v577_v9  ;;  %v594_v26 = vld [vmem:[%s754_s1 + $0xf0] sm:$0xff]   ;;  %v598_v30 = vld [vmem:[%s754_s1 + $0xf8] sm:$0xff]   ;;  %v465_v37 = vcombine.low %v16_v36, %v16_v36  ;;  %v466_v38 = vcombine.high %v16_v36, %v16_v36  ;;  %v605_v39 = vld [vmem:[%s754_s1 + $0x100] sm:$0xff]  }
   0xc   :  { %511 = vmatprep.subr.bf16.mxu0 %v580_v12  ;;  %v595_v27 = vld [vmem:[%s754_s1 + $0xb0] sm:$0xff]   ;;  %v602_v34 = vld [vmem:[%s754_s1 + $0xb8] sm:$0xff]   ;;  %366 = vmatprep.mubr.bf16.mxu0 %v464_v33  ;;  %v606_v40 = vld [vmem:[%s754_s1 + $0x108] sm:$0xff]  }
   0xd   :  { %532 = vmatpush3.bf16.msra.mxu1 %v579_v11  ;;  %406 = vmatprep.mubr.bf16.mxu1 %v466_v38  ;;  %v607_v41 = vld [vmem:[%s754_s1 + $0x110] sm:$0xff]   ;;  %v608_v42 = vld [vmem:[%s754_s1 + $0x118] sm:$0xff]   ;;  %v462_v45 = vld [vmem:[%s756_s2] ss:$0 sm:$0xff] }
   0xe   :  { %533 = vmatprep.subr.bf16.mxu1 %v582_v14  ;;  %v601_v43 = vld [vmem:[%s755_s0 + $0x10] ss:$0 sps:$4 sm:$0xff]  }
   0xf   :  { %512 = vmatpush3.bf16.msra.mxu0 %v581_v13 }
  0x10   :  { %513 = vmatprep.subr.bf16.mxu0 %v584_v16 }
  0x11   :  { %534 = vmatpush3.bf16.msra.mxu1 %v583_v15 }
  0x12   :  { %535 = vmatprep.subr.bf16.mxu1 %v586_v18 }
  0x13   :  { %514 = vmatpush3.bf16.msra.mxu0 %v585_v17 }
  0x14   :  { %515 = vmatprep.subr.bf16.mxu0 %v588_v20 }
  0x15   :  { %536 = vmatpush3.bf16.msra.mxu1 %v587_v19 }
  0x16   :  { %537 = vmatprep.subr.bf16.mxu1 %v590_v22 }
  0x17   :  { %516 = vmatpush3.bf16.msra.mxu0 %v589_v21 }
  0x18   :  { %517 = vmatprep.subr.bf16.mxu0 %v592_v24 }
  0x19   :  { %538 = vmatpush3.bf16.msra.mxu1 %v591_v23 }
  0x1a   :  { %539 = vmatprep.subr.bf16.mxu1 %v594_v26 }
  0x1b   :  { %518 = vmatpush3.bf16.msra.mxu0 %v593_v25 }
  0x1c   :  { %519 = vmatprep.subr.bf16.mxu0 %v596_v28 }
  0x1d   :  { %540 = vmatpush3.bf16.msra.mxu1 %v595_v27 }
  0x1e   :  { %541 = vmatprep.subr.bf16.mxu1 %v598_v30 }
  0x1f   :  { %520 = vmatpush3.bf16.msra.mxu0 %v597_v29 }
  0x20   :  { %554 = vmatprep.subr.bf16.mxu0 %v609_v35 }
  0x21   :  { %542 = vmatpush3.bf16.msra.mxu1 %v602_v34 }
  0x22   :  { %367 = vmatmul.mubr.bf16.vlgmr.msra.gmra.mrb[0].mxu0 %v463_v32 }
  0x23   :  { %555 = vmatpush3.bf16.msra.mxu0 %v605_v39  ;;  %562 = vmatprep.mubr.msk.bf16.mxu0 %vm610_vm0, %v609_v35 }
  0x24   :  { %407 = vmatmul.mubr.bf16.vlgmr.msra.gmra.mrb[0].mxu1 %v465_v37  ;;  %556 = vmatprep.subr.bf16.mxu0 %v609_v35 }
  0x27   :  { %557 = vmatpush3.bf16.msra.mxu0 %v606_v40 }
  0x28   :  { %558 = vmatprep.subr.bf16.mxu0 %v609_v35 }
  0x2b   :  { %559 = vmatpush3.bf16.msra.mxu0 %v607_v41 }
  0x2c   :  { %560 = vmatprep.subr.bf16.mxu0 %v609_v35 }
  0x2f   :  { %561 = vmatpush3.bf16.msra.mxu0 %v608_v42 }
  0x32   :  { %563 = vmatmul.mubr.msk.bf16.vlgmr.msra.gmra.mrb[4].mxu0 %vm330_vm1, %v601_v43 }
  0xf5   :  { %v521_v44 = vpop.f32.mrb[0].mxu0 }
  0xf6   :  { %v522_v46 = vpop.f32.mrb[1].mxu0 }
  0xf7   :  { %v523_v47 = vadd.f32 %v522_v46, %v521_v44  ;;  %v524_v48 = vpop.f32.mrb[2].mxu0  ;;  %v543_v49 = vpop.f32.mrb[0].mxu1 }
  0xf8   :  { %v525_v50 = vpop.f32.mrb[3].mxu0  ;;  %v544_v51 = vpop.f32.mrb[1].mxu1 }
  0xf9   :  { %v369_v52 = vadd.f32 %v523_v47, %v462_v45  ;;  %v545_v53 = vadd.f32 %v544_v51, %v543_v49  ;;  %v546_v54 = vpop.f32.mrb[2].mxu1 }
  0xfa   :  { %v547_v55 = vpop.f32.mrb[3].mxu1 }
  0xfb   :  { %v409_v56 = vadd.f32 %v545_v53, %v369_v52 }
 0x105   :  { %v448_v57 = vpop.f32.mrb[4].mxu0 }
 0x106   :  { %v449_v58 = vadd.f32 %v448_v57, %v409_v56  ;;  %v564_v59 = vpop.f32.mrb[5].mxu0 }
 0x107   :  { %v451_v60 = vpop.f32.mrb[6].mxu0 }
 0x108   :  { %v454_v61 = vmax.f32 %v449_v58, 0.0  ;;  %v565_v62 = vpop.f32.mrb[7].mxu0 }
 0x10a   :  { %v455_v63 = vpack.c.bf16 %v454_v61, %v454_v61 }
 0x10c   :  { %457 = vst.msk [vmem:[%s757_s3] sm:$0xf] %vm456_vm2, %v455_v63 }

// kernel: _lambda_.49
= control target key start
LH: loop header
LB: loop body
LE: loop exit
PB: predicated region body
PF: predicated region fallthrough
CT: control target
= control target key end

     0   :  { %v615_v35 = vmov 0.0   ;;  %vm616_vm0 = vmmov 0   ;;  %vm333_vm1 = vcmask 523264   ;;  %vm462_vm2 = vcmask 519168   ;;  %s768_s1 = inlined_call_operand.vmem [shape: bf16[576,64], index: 1, kind: input, shape index: {}]   ;;  %s769_s0 = inlined_call_operand.vmem [shape: bf16[8,576], index: 0, kind: input, shape index: {}]   ;;  %s770_s2 = inlined_call_operand.vmem [shape: f32[1,64], index: 2, kind: input, shape index: {}]   ;;  %s771_s3 = inlined_call_operand.vmem [shape: bf16[8,64], index: 3, kind: input, shape index: {}]   ;;  %s772_s4 = inlined_call_operand.vmem [shape: bf16[8,64], index: 4, kind: output, shape index: {}]  }
   0x1   :  { %v574_v0 = vld [vmem:[%s768_s1 + $0x40] sm:$0xff]   ;;  %v578_v4 = vld [vmem:[%s768_s1 + $0x48] sm:$0xff]   ;;  %v582_v8 = vld [vmem:[%s768_s1 + $0x50] sm:$0xff]  }
   0x2   :  { %v575_v1 = vld [vmem:[%s768_s1] sm:$0xff]   ;;  %511 = vmatprep.subr.bf16.mxu0 %v574_v0  ;;  %v579_v5 = vld [vmem:[%s768_s1 + $0x8] sm:$0xff]   ;;  %v583_v9 = vld [vmem:[%s768_s1 + $0x10] sm:$0xff]  }
   0x3   :  { %v576_v2 = vld [vmem:[%s768_s1 + $0xc0] sm:$0xff]   ;;  %512 = vmatpush3.bf16.msra.mxu0 %v575_v1  ;;  %v580_v6 = vld [vmem:[%s768_s1 + $0xc8] sm:$0xff]   ;;  %v584_v10 = vld [vmem:[%s768_s1 + $0xd0] sm:$0xff]  }
   0x4   :  { %v577_v3 = vld [vmem:[%s768_s1 + $0x80] sm:$0xff]   ;;  %533 = vmatprep.subr.bf16.mxu1 %v576_v2  ;;  %513 = vmatprep.subr.bf16.mxu0 %v578_v4  ;;  %v581_v7 = vld [vmem:[%s768_s1 + $0x88] sm:$0xff]   ;;  %v585_v11 = vld [vmem:[%s768_s1 + $0x90] sm:$0xff]  }
   0x5   :  { %534 = vmatpush3.bf16.msra.mxu1 %v577_v3  ;;  %v586_v12 = vld [vmem:[%s768_s1 + $0x58] sm:$0xff]   ;;  %v590_v16 = vld [vmem:[%s768_s1 + $0x60] sm:$0xff]   ;;  %v594_v20 = vld [vmem:[%s768_s1 + $0x68] sm:$0xff]  }
   0x6   :  { %535 = vmatprep.subr.bf16.mxu1 %v580_v6  ;;  %v587_v13 = vld [vmem:[%s768_s1 + $0x18] sm:$0xff]   ;;  %v591_v17 = vld [vmem:[%s768_s1 + $0x20] sm:$0xff]   ;;  %v595_v21 = vld [vmem:[%s768_s1 + $0x28] sm:$0xff]  }
   0x7   :  { %514 = vmatpush3.bf16.msra.mxu0 %v579_v5  ;;  %v588_v14 = vld [vmem:[%s768_s1 + $0xd8] sm:$0xff]   ;;  %v592_v18 = vld [vmem:[%s768_s1 + $0xe0] sm:$0xff]   ;;  %v596_v22 = vld [vmem:[%s768_s1 + $0xe8] sm:$0xff]  }
   0x8   :  { %515 = vmatprep.subr.bf16.mxu0 %v582_v8  ;;  %v589_v15 = vld [vmem:[%s768_s1 + $0x98] sm:$0xff]   ;;  %v593_v19 = vld [vmem:[%s768_s1 + $0xa0] sm:$0xff]   ;;  %v597_v23 = vld [vmem:[%s768_s1 + $0xa8] sm:$0xff]  }
   0x9   :  { %536 = vmatpush3.bf16.msra.mxu1 %v581_v7  ;;  %v598_v24 = vld [vmem:[%s768_s1 + $0x70] sm:$0xff]   ;;  %v602_v28 = vld [vmem:[%s768_s1 + $0x78] sm:$0xff]   ;;  %v18_v31 = vld [vmem:[%s769_s0] sm:$0xff] }
   0xa   :  { %537 = vmatprep.subr.bf16.mxu1 %v584_v10  ;;  %v599_v25 = vld [vmem:[%s768_s1 + $0x30] sm:$0xff]   ;;  %v603_v29 = vld [vmem:[%s768_s1 + $0x38] sm:$0xff]   ;;  %v469_v32 = vcombine.low %v18_v31, %v18_v31  ;;  %v470_v33 = vcombine.high %v18_v31, %v18_v31  ;;  %v19_v36 = vld [vmem:[%s769_s0 + $0x8] sm:$0xff] }
   0xb   :  { %516 = vmatpush3.bf16.msra.mxu0 %v583_v9  ;;  %v600_v26 = vld [vmem:[%s768_s1 + $0xf0] sm:$0xff]   ;;  %v604_v30 = vld [vmem:[%s768_s1 + $0xf8] sm:$0xff]   ;;  %v471_v37 = vcombine.low %v19_v36, %v19_v36  ;;  %v472_v38 = vcombine.high %v19_v36, %v19_v36  ;;  %v611_v39 = vld [vmem:[%s768_s1 + $0x100] sm:$0xff]  }
   0xc   :  { %517 = vmatprep.subr.bf16.mxu0 %v586_v12  ;;  %v601_v27 = vld [vmem:[%s768_s1 + $0xb0] sm:$0xff]   ;;  %v608_v34 = vld [vmem:[%s768_s1 + $0xb8] sm:$0xff]   ;;  %369 = vmatprep.mubr.bf16.mxu0 %v470_v33  ;;  %v612_v40 = vld [vmem:[%s768_s1 + $0x108] sm:$0xff]  }
   0xd   :  { %538 = vmatpush3.bf16.msra.mxu1 %v585_v11  ;;  %409 = vmatprep.mubr.bf16.mxu1 %v472_v38  ;;  %v613_v41 = vld [vmem:[%s768_s1 + $0x110] sm:$0xff]   ;;  %v614_v42 = vld [vmem:[%s768_s1 + $0x118] sm:$0xff]   ;;  %v468_v45 = vld [vmem:[%s770_s2] ss:$0 sm:$0xff] }
   0xe   :  { %539 = vmatprep.subr.bf16.mxu1 %v588_v14  ;;  %v607_v43 = vld [vmem:[%s769_s0 + $0x10] ss:$0 sps:$4 sm:$0xff]   ;;  %v457_v57 = vld [vmem:[%s771_s3] sm:$0xf] }
   0xf   :  { %518 = vmatpush3.bf16.msra.mxu0 %v587_v13  ;;  %v458_v58 = vunpack.c.l.bf16 %v457_v57 }
  0x10   :  { %519 = vmatprep.subr.bf16.mxu0 %v590_v16 }
  0x11   :  { %540 = vmatpush3.bf16.msra.mxu1 %v589_v15 }
  0x12   :  { %541 = vmatprep.subr.bf16.mxu1 %v592_v18 }
  0x13   :  { %520 = vmatpush3.bf16.msra.mxu0 %v591_v17 }
  0x14   :  { %521 = vmatprep.subr.bf16.mxu0 %v594_v20 }
  0x15   :  { %542 = vmatpush3.bf16.msra.mxu1 %v593_v19 }
  0x16   :  { %543 = vmatprep.subr.bf16.mxu1 %v596_v22 }
  0x17   :  { %522 = vmatpush3.bf16.msra.mxu0 %v595_v21 }
  0x18   :  { %523 = vmatprep.subr.bf16.mxu0 %v598_v24 }
  0x19   :  { %544 = vmatpush3.bf16.msra.mxu1 %v597_v23 }
  0x1a   :  { %545 = vmatprep.subr.bf16.mxu1 %v600_v26 }
  0x1b   :  { %524 = vmatpush3.bf16.msra.mxu0 %v599_v25 }
  0x1c   :  { %525 = vmatprep.subr.bf16.mxu0 %v602_v28 }
  0x1d   :  { %546 = vmatpush3.bf16.msra.mxu1 %v601_v27 }
  0x1e   :  { %547 = vmatprep.subr.bf16.mxu1 %v604_v30 }
  0x1f   :  { %526 = vmatpush3.bf16.msra.mxu0 %v603_v29 }
  0x20   :  { %560 = vmatprep.subr.bf16.mxu0 %v615_v35 }
  0x21   :  { %548 = vmatpush3.bf16.msra.mxu1 %v608_v34 }
  0x22   :  { %370 = vmatmul.mubr.bf16.vlgmr.msra.gmra.mrb[0].mxu0 %v469_v32 }
  0x23   :  { %561 = vmatpush3.bf16.msra.mxu0 %v611_v39  ;;  %568 = vmatprep.mubr.msk.bf16.mxu0 %vm616_vm0, %v615_v35 }
  0x24   :  { %410 = vmatmul.mubr.bf16.vlgmr.msra.gmra.mrb[0].mxu1 %v471_v37  ;;  %562 = vmatprep.subr.bf16.mxu0 %v615_v35 }
  0x27   :  { %563 = vmatpush3.bf16.msra.mxu0 %v612_v40 }
  0x28   :  { %564 = vmatprep.subr.bf16.mxu0 %v615_v35 }
  0x2b   :  { %565 = vmatpush3.bf16.msra.mxu0 %v613_v41 }
  0x2c   :  { %566 = vmatprep.subr.bf16.mxu0 %v615_v35 }
  0x2f   :  { %567 = vmatpush3.bf16.msra.mxu0 %v614_v42 }
  0x32   :  { %569 = vmatmul.mubr.msk.bf16.vlgmr.msra.gmra.mrb[4].mxu0 %vm333_vm1, %v607_v43 }
  0xf5   :  { %v527_v44 = vpop.f32.mrb[0].mxu0 }
  0xf6   :  { %v528_v46 = vpop.f32.mrb[1].mxu0 }
  0xf7   :  { %v529_v47 = vadd.f32 %v528_v46, %v527_v44  ;;  %v530_v48 = vpop.f32.mrb[2].mxu0  ;;  %v549_v49 = vpop.f32.mrb[0].mxu1 }
  0xf8   :  { %v531_v50 = vpop.f32.mrb[3].mxu0  ;;  %v550_v51 = vpop.f32.mrb[1].mxu1 }
  0xf9   :  { %v372_v52 = vadd.f32 %v529_v47, %v468_v45  ;;  %v551_v53 = vadd.f32 %v550_v51, %v549_v49  ;;  %v552_v54 = vpop.f32.mrb[2].mxu1 }
  0xfa   :  { %v553_v55 = vpop.f32.mrb[3].mxu1 }
  0xfb   :  { %v412_v56 = vadd.f32 %v551_v53, %v372_v52 }
 0x105   :  { %v451_v59 = vpop.f32.mrb[4].mxu0 }
 0x106   :  { %v452_v60 = vadd.f32 %v451_v59, %v412_v56  ;;  %v570_v61 = vpop.f32.mrb[5].mxu0 }
 0x107   :  { %v454_v62 = vpop.f32.mrb[6].mxu0 }
 0x108   :  { %v459_v63 = vadd.f32 %v458_v58, %v452_v60  ;;  %v571_v0 = vpop.f32.mrb[7].mxu0 }
 0x10a   :  { %v460_v1 = vmax.f32 %v459_v63, 0.0 }
 0x10c   :  { %v461_v2 = vpack.c.bf16 %v460_v1, %v460_v1 }
 0x10e   :  { %463 = vst.msk [vmem:[%s772_s4] sm:$0xf] %vm462_vm2, %v461_v2 }

// kernel: _lambda_.53
= control target key start
LH: loop header
LB: loop body
LE: loop exit
PB: predicated region body
PF: predicated region fallthrough
CT: control target
= control target key end

     0   :  { %v608_v35 = vmov 0.0   ;;  %vm609_vm0 = vmmov 0   ;;  %vm330_vm1 = vcmask 523264   ;;  %s753_s1 = inlined_call_operand.vmem [shape: bf16[576,128], index: 1, kind: input, shape index: {}]   ;;  %s754_s0 = inlined_call_operand.vmem [shape: bf16[8,576], index: 0, kind: input, shape index: {}]   ;;  %s755_s2 = inlined_call_operand.vmem [shape: f32[1,128], index: 2, kind: input, shape index: {}]   ;;  %s756_s3 = inlined_call_operand.vmem [shape: bf16[8,128], index: 3, kind: output, shape index: {}]  }
   0x1   :  { %v567_v0 = vld [vmem:[%s753_s1 + $0x40] sm:$0xff]   ;;  %v571_v4 = vld [vmem:[%s753_s1 + $0x48] sm:$0xff]   ;;  %v575_v8 = vld [vmem:[%s753_s1 + $0x50] sm:$0xff]  }
   0x2   :  { %v568_v1 = vld [vmem:[%s753_s1] sm:$0xff]   ;;  %504 = vmatprep.subr.bf16.mxu0 %v567_v0  ;;  %v572_v5 = vld [vmem:[%s753_s1 + $0x8] sm:$0xff]   ;;  %v576_v9 = vld [vmem:[%s753_s1 + $0x10] sm:$0xff]  }
   0x3   :  { %v569_v2 = vld [vmem:[%s753_s1 + $0xc0] sm:$0xff]   ;;  %505 = vmatpush3.bf16.msra.mxu0 %v568_v1  ;;  %v573_v6 = vld [vmem:[%s753_s1 + $0xc8] sm:$0xff]   ;;  %v577_v10 = vld [vmem:[%s753_s1 + $0xd0] sm:$0xff]  }
   0x4   :  { %v570_v3 = vld [vmem:[%s753_s1 + $0x80] sm:$0xff]   ;;  %526 = vmatprep.subr.bf16.mxu1 %v569_v2  ;;  %506 = vmatprep.subr.bf16.mxu0 %v571_v4  ;;  %v574_v7 = vld [vmem:[%s753_s1 + $0x88] sm:$0xff]   ;;  %v578_v11 = vld [vmem:[%s753_s1 + $0x90] sm:$0xff]  }
   0x5   :  { %527 = vmatpush3.bf16.msra.mxu1 %v570_v3  ;;  %v579_v12 = vld [vmem:[%s753_s1 + $0x58] sm:$0xff]   ;;  %v583_v16 = vld [vmem:[%s753_s1 + $0x60] sm:$0xff]   ;;  %v587_v20 = vld [vmem:[%s753_s1 + $0x68] sm:$0xff]  }
   0x6   :  { %528 = vmatprep.subr.bf16.mxu1 %v573_v6  ;;  %v580_v13 = vld [vmem:[%s753_s1 + $0x18] sm:$0xff]   ;;  %v584_v17 = vld [vmem:[%s753_s1 + $0x20] sm:$0xff]   ;;  %v588_v21 = vld [vmem:[%s753_s1 + $0x28] sm:$0xff]  }
   0x7   :  { %507 = vmatpush3.bf16.msra.mxu0 %v572_v5  ;;  %v581_v14 = vld [vmem:[%s753_s1 + $0xd8] sm:$0xff]   ;;  %v585_v18 = vld [vmem:[%s753_s1 + $0xe0] sm:$0xff]   ;;  %v589_v22 = vld [vmem:[%s753_s1 + $0xe8] sm:$0xff]  }
   0x8   :  { %508 = vmatprep.subr.bf16.mxu0 %v575_v8  ;;  %v582_v15 = vld [vmem:[%s753_s1 + $0x98] sm:$0xff]   ;;  %v586_v19 = vld [vmem:[%s753_s1 + $0xa0] sm:$0xff]   ;;  %v590_v23 = vld [vmem:[%s753_s1 + $0xa8] sm:$0xff]  }
   0x9   :  { %529 = vmatpush3.bf16.msra.mxu1 %v574_v7  ;;  %v591_v24 = vld [vmem:[%s753_s1 + $0x70] sm:$0xff]   ;;  %v595_v28 = vld [vmem:[%s753_s1 + $0x78] sm:$0xff]   ;;  %v15_v31 = vld [vmem:[%s754_s0] sm:$0xff] }
   0xa   :  { %530 = vmatprep.subr.bf16.mxu1 %v577_v10  ;;  %v592_v25 = vld [vmem:[%s753_s1 + $0x30] sm:$0xff]   ;;  %v596_v29 = vld [vmem:[%s753_s1 + $0x38] sm:$0xff]   ;;  %v462_v32 = vcombine.low %v15_v31, %v15_v31  ;;  %v463_v33 = vcombine.high %v15_v31, %v15_v31  ;;  %v16_v36 = vld [vmem:[%s754_s0 + $0x8] sm:$0xff] }
   0xb   :  { %509 = vmatpush3.bf16.msra.mxu0 %v576_v9  ;;  %v593_v26 = vld [vmem:[%s753_s1 + $0xf0] sm:$0xff]   ;;  %v597_v30 = vld [vmem:[%s753_s1 + $0xf8] sm:$0xff]   ;;  %v464_v37 = vcombine.low %v16_v36, %v16_v36  ;;  %v465_v38 = vcombine.high %v16_v36, %v16_v36  ;;  %v604_v39 = vld [vmem:[%s753_s1 + $0x100] sm:$0xff]  }
   0xc   :  { %510 = vmatprep.subr.bf16.mxu0 %v579_v12  ;;  %v594_v27 = vld [vmem:[%s753_s1 + $0xb0] sm:$0xff]   ;;  %v601_v34 = vld [vmem:[%s753_s1 + $0xb8] sm:$0xff]   ;;  %366 = vmatprep.mubr.bf16.mxu0 %v463_v33  ;;  %v605_v40 = vld [vmem:[%s753_s1 + $0x108] sm:$0xff]  }
   0xd   :  { %531 = vmatpush3.bf16.msra.mxu1 %v578_v11  ;;  %406 = vmatprep.mubr.bf16.mxu1 %v465_v38  ;;  %v606_v41 = vld [vmem:[%s753_s1 + $0x110] sm:$0xff]   ;;  %v607_v42 = vld [vmem:[%s753_s1 + $0x118] sm:$0xff]   ;;  %v461_v45 = vld [vmem:[%s755_s2] ss:$0 sm:$0xff] }
   0xe   :  { %532 = vmatprep.subr.bf16.mxu1 %v581_v14  ;;  %v600_v43 = vld [vmem:[%s754_s0 + $0x10] ss:$0 sps:$4 sm:$0xff]  }
   0xf   :  { %511 = vmatpush3.bf16.msra.mxu0 %v580_v13 }
  0x10   :  { %512 = vmatprep.subr.bf16.mxu0 %v583_v16 }
  0x11   :  { %533 = vmatpush3.bf16.msra.mxu1 %v582_v15 }
  0x12   :  { %534 = vmatprep.subr.bf16.mxu1 %v585_v18 }
  0x13   :  { %513 = vmatpush3.bf16.msra.mxu0 %v584_v17 }
  0x14   :  { %514 = vmatprep.subr.bf16.mxu0 %v587_v20 }
  0x15   :  { %535 = vmatpush3.bf16.msra.mxu1 %v586_v19 }
  0x16   :  { %536 = vmatprep.subr.bf16.mxu1 %v589_v22 }
  0x17   :  { %515 = vmatpush3.bf16.msra.mxu0 %v588_v21 }
  0x18   :  { %516 = vmatprep.subr.bf16.mxu0 %v591_v24 }
  0x19   :  { %537 = vmatpush3.bf16.msra.mxu1 %v590_v23 }
  0x1a   :  { %538 = vmatprep.subr.bf16.mxu1 %v593_v26 }
  0x1b   :  { %517 = vmatpush3.bf16.msra.mxu0 %v592_v25 }
  0x1c   :  { %518 = vmatprep.subr.bf16.mxu0 %v595_v28 }
  0x1d   :  { %539 = vmatpush3.bf16.msra.mxu1 %v594_v27 }
  0x1e   :  { %540 = vmatprep.subr.bf16.mxu1 %v597_v30 }
  0x1f   :  { %519 = vmatpush3.bf16.msra.mxu0 %v596_v29 }
  0x20   :  { %553 = vmatprep.subr.bf16.mxu0 %v608_v35 }
  0x21   :  { %541 = vmatpush3.bf16.msra.mxu1 %v601_v34 }
  0x22   :  { %367 = vmatmul.mubr.bf16.vlgmr.msra.gmra.mrb[0].mxu0 %v462_v32 }
  0x23   :  { %554 = vmatpush3.bf16.msra.mxu0 %v604_v39  ;;  %561 = vmatprep.mubr.msk.bf16.mxu0 %vm609_vm0, %v608_v35 }
  0x24   :  { %407 = vmatmul.mubr.bf16.vlgmr.msra.gmra.mrb[0].mxu1 %v464_v37  ;;  %555 = vmatprep.subr.bf16.mxu0 %v608_v35 }
  0x27   :  { %556 = vmatpush3.bf16.msra.mxu0 %v605_v40 }
  0x28   :  { %557 = vmatprep.subr.bf16.mxu0 %v608_v35 }
  0x2b   :  { %558 = vmatpush3.bf16.msra.mxu0 %v606_v41 }
  0x2c   :  { %559 = vmatprep.subr.bf16.mxu0 %v608_v35 }
  0x2f   :  { %560 = vmatpush3.bf16.msra.mxu0 %v607_v42 }
  0x32   :  { %562 = vmatmul.mubr.msk.bf16.vlgmr.msra.gmra.mrb[4].mxu0 %vm330_vm1, %v600_v43 }
  0xf5   :  { %v520_v44 = vpop.f32.mrb[0].mxu0 }
  0xf6   :  { %v521_v46 = vpop.f32.mrb[1].mxu0 }
  0xf7   :  { %v522_v47 = vadd.f32 %v521_v46, %v520_v44  ;;  %v523_v48 = vpop.f32.mrb[2].mxu0  ;;  %v542_v49 = vpop.f32.mrb[0].mxu1 }
  0xf8   :  { %v524_v50 = vpop.f32.mrb[3].mxu0  ;;  %v543_v51 = vpop.f32.mrb[1].mxu1 }
  0xf9   :  { %v369_v52 = vadd.f32 %v522_v47, %v461_v45  ;;  %v544_v53 = vadd.f32 %v543_v51, %v542_v49  ;;  %v545_v54 = vpop.f32.mrb[2].mxu1 }
  0xfa   :  { %v546_v55 = vpop.f32.mrb[3].mxu1 }
  0xfb   :  { %v409_v56 = vadd.f32 %v544_v53, %v369_v52 }
 0x105   :  { %v448_v57 = vpop.f32.mrb[4].mxu0 }
 0x106   :  { %v449_v58 = vadd.f32 %v448_v57, %v409_v56  ;;  %v563_v59 = vpop.f32.mrb[5].mxu0 }
 0x107   :  { %v451_v60 = vpop.f32.mrb[6].mxu0 }
 0x108   :  { %v454_v61 = vmax.f32 %v449_v58, 0.0  ;;  %v564_v62 = vpop.f32.mrb[7].mxu0 }
 0x10a   :  { %v455_v63 = vpack.c.bf16 %v454_v61, %v454_v61 }
 0x10c   :  { %456 = vst [vmem:[%s756_s3] sm:$0xf] %v455_v63 }

// kernel: tile.42
= control target key start
LH: loop header
LB: loop body
LE: loop exit
PB: predicated region body
PF: predicated region fallthrough
CT: control target
= control target key end

     0   :  { %s22_s0 = inlined_call_operand.vmem [shape: f32[32], index: 0, kind: input, shape index: {}]   ;;  %s23_s1 = inlined_call_operand.vmem [shape: f32[4,32], index: 1, kind: output, shape index: {}]  }
   0x1   :  { %v4_v0 = vld [vmem:[%s22_s0] ss:$0 sm:$0xff] }
   0x2   :  { %5 = vst [vmem:[%s23_s1] sm:$0xf] %v4_v0 }

// kernel: mul.166
= control target key start
LH: loop header
LB: loop body
LE: loop exit
PB: predicated region body
PF: predicated region fallthrough
CT: control target
= control target key end

     0   :  { %vm7_vm0 = vcmask 261120   ;;  %s37_s8 = smov 32   ;;  %s38_s9 = smov 64   ;;  %vm13_vm1 = vcmask 1048320   ;;  %vm19_vm2 = vcmask 785920   ;;  %vm25_vm3 = vcmask 523520   ;;  %s55_s0 = inlined_call_operand.vmem [shape: f32[4,32], index: 0, kind: input, shape index: {}]   ;;  %s56_s1 = inlined_call_operand.vmem [shape: f32[128], index: 1, kind: output, shape index: {}]  }
   0x1   :  { %v4_v0 = vld [vmem:[%s55_s0] sm:$0xf]  ;;  %s36_s0 = smov 96  }
   0x2   :  { %5 = vst [vmem:[#allocation1] sm:$0xf] %v4_v0 }
   0x9   :  { %v10_v1 = vld [vmem:[#allocation1 + $0x3] sm:$0x1]   ;;  %v22_v2 = vld [vmem:[#allocation1 + $0x1] sm:$0x1]   ;;  %v6_v3 = vld [vmem:[#allocation1] sm:$0x1]  }
   0xa   :  { %11 = vrot.lane.b32.xlu0 %v10_v1, %s36_s0  ;;  %23 = vrot.lane.b32.xlu1 %v22_v2, %s37_s8  ;;  %v16_v4 = vld [vmem:[#allocation1 + $0x2] sm:$0x1]   ;;  %8 = vst.msk [vmem:[#allocation0] sm:$0x1] %vm7_vm0, %v6_v3  }
   0xe   :  { %17 = vrot.lane.b32.xlu0 %v16_v4, %s38_s9 }
  0x7c   :  { %v12_v5 = vpop.permute.xlu0 %11   ;;  %v24_v6 = vpop.permute.xlu1 %23  }
  0x7d   :  { %14 = vst.msk [vmem:[#allocation0] sm:$0x1] %vm13_vm1, %v12_v5  }
  0x80   :  { %v18_v7 = vpop.permute.xlu0 %17  }
  0x81   :  { %20 = vst.msk [vmem:[#allocation0] sm:$0x1] %vm19_vm2, %v18_v7  }
  0x82   :  { %26 = vst.msk [vmem:[#allocation0] sm:$0x1] %vm25_vm3, %v24_v6  }
  0x89   :  { %v30_v8 = vld [vmem:[#allocation0] sm:$0x1] }
  0x8a   :  { %32 = vst [vmem:[%s56_s1] sm:$0x1] %v30_v8 }

// kernel: tile.47
= control target key start
LH: loop header
LB: loop body
LE: loop exit
PB: predicated region body
PF: predicated region fallthrough
CT: control target
= control target key end

     0   :  { %vm7_vm0 = vcmask 261120   ;;  %s37_s8 = smov 32   ;;  %s38_s9 = smov 64   ;;  %vm13_vm1 = vcmask 1048320   ;;  %vm19_vm2 = vcmask 785920   ;;  %vm25_vm3 = vcmask 523520   ;;  %s55_s0 = inlined_call_operand.vmem [shape: f32[4,32], index: 0, kind: input, shape index: {}]   ;;  %s56_s1 = inlined_call_operand.vmem [shape: f32[1,128], index: 1, kind: output, shape index: {}]  }
   0x1   :  { %v4_v0 = vld [vmem:[%s55_s0] sm:$0xf]  ;;  %s36_s0 = smov 96  }
   0x2   :  { %5 = vst [vmem:[#allocation1] sm:$0xf] %v4_v0 }
   0x9   :  { %v10_v1 = vld [vmem:[#allocation1 + $0x3] sm:$0x1]   ;;  %v22_v2 = vld [vmem:[#allocation1 + $0x1] sm:$0x1]   ;;  %v6_v3 = vld [vmem:[#allocation1] sm:$0x1]  }
   0xa   :  { %11 = vrot.lane.b32.xlu0 %v10_v1, %s36_s0  ;;  %23 = vrot.lane.b32.xlu1 %v22_v2, %s37_s8  ;;  %v16_v4 = vld [vmem:[#allocation1 + $0x2] sm:$0x1]   ;;  %8 = vst.msk [vmem:[#allocation0] sm:$0x1] %vm7_vm0, %v6_v3  }
   0xe   :  { %17 = vrot.lane.b32.xlu0 %v16_v4, %s38_s9 }
  0x7c   :  { %v12_v5 = vpop.permute.xlu0 %11   ;;  %v24_v6 = vpop.permute.xlu1 %23  }
  0x7d   :  { %14 = vst.msk [vmem:[#allocation0] sm:$0x1] %vm13_vm1, %v12_v5  }
  0x80   :  { %v18_v7 = vpop.permute.xlu0 %17  }
  0x81   :  { %20 = vst.msk [vmem:[#allocation0] sm:$0x1] %vm19_vm2, %v18_v7  }
  0x82   :  { %26 = vst.msk [vmem:[#allocation0] sm:$0x1] %vm25_vm3, %v24_v6  }
  0x89   :  { %v30_v8 = vld [vmem:[#allocation0] sm:$0x1] }
  0x8a   :  { %32 = vst [vmem:[%s56_s1] sm:$0x1] %v30_v8 }

// kernel: _lambda_.57
= control target key start
LH: loop header
LB: loop body
LE: loop exit
PB: predicated region body
PF: predicated region fallthrough
CT: control target
= control target key end

     0   :  { %v183_v0 = vmov 0.0   ;;  %vm184_vm0 = vmmov 0   ;;  %vm129_vm1 = vcmask 257024   ;;  %s238_s1 = inlined_call_operand.vmem [shape: bf16[128,32], index: 1, kind: input, shape index: {}]   ;;  %s239_s0 = inlined_call_operand.vmem [shape: bf16[8,128], index: 0, kind: input, shape index: {}]   ;;  %s240_s2 = inlined_call_operand.vmem [shape: f32[1,32], index: 2, kind: input, shape index: {}]   ;;  %s241_s3 = inlined_call_operand.vmem [shape: bf16[8,32], index: 3, kind: output, shape index: {}]  }
   0x1   :  { %153 = vmatprep.subr.bf16.mxu0 %v183_v0  ;;  %v175_v1 = vld [vmem:[%s238_s1] sm:$0xff]   ;;  %169 = vmatprep.mubr.msk.bf16.mxu0 %vm184_vm0, %v183_v0  ;;  %v176_v2 = vld [vmem:[%s238_s1 + $0x8] sm:$0xff]   ;;  %v177_v3 = vld [vmem:[%s238_s1 + $0x10] sm:$0xff]  }
   0x2   :  { %154 = vmatpush3.bf16.msra.mxu0 %v175_v1  ;;  %v178_v4 = vld [vmem:[%s238_s1 + $0x18] sm:$0xff]   ;;  %v179_v5 = vld [vmem:[%s238_s1 + $0x20] sm:$0xff]   ;;  %v180_v6 = vld [vmem:[%s238_s1 + $0x28] sm:$0xff]  }
   0x3   :  { %155 = vmatprep.subr.bf16.mxu0 %v183_v0  ;;  %v181_v7 = vld [vmem:[%s238_s1 + $0x30] sm:$0xff]   ;;  %v182_v8 = vld [vmem:[%s238_s1 + $0x38] sm:$0xff]   ;;  %v15_v9 = vld [vmem:[%s239_s0] sm:$0xf] }
   0x4   :  { %v135_v10 = vld [vmem:[%s240_s2] ss:$0 sm:$0xff] }
   0x6   :  { %156 = vmatpush3.bf16.msra.mxu0 %v176_v2 }
   0x7   :  { %157 = vmatprep.subr.bf16.mxu0 %v183_v0 }
   0xa   :  { %158 = vmatpush3.bf16.msra.mxu0 %v177_v3 }
   0xb   :  { %159 = vmatprep.subr.bf16.mxu0 %v183_v0 }
   0xe   :  { %160 = vmatpush3.bf16.msra.mxu0 %v178_v4 }
   0xf   :  { %161 = vmatprep.subr.bf16.mxu0 %v183_v0 }
  0x12   :  { %162 = vmatpush3.bf16.msra.mxu0 %v179_v5 }
  0x13   :  { %163 = vmatprep.subr.bf16.mxu0 %v183_v0 }
  0x16   :  { %164 = vmatpush3.bf16.msra.mxu0 %v180_v6 }
  0x17   :  { %165 = vmatprep.subr.bf16.mxu0 %v183_v0 }
  0x1a   :  { %166 = vmatpush3.bf16.msra.mxu0 %v181_v7 }
  0x1b   :  { %167 = vmatprep.subr.bf16.mxu0 %v183_v0 }
  0x1e   :  { %168 = vmatpush3.bf16.msra.mxu0 %v182_v8 }
  0x21   :  { %170 = vmatmul.mubr.bf16.vlgmr.msra.gmra.mrb[0].mxu0 %v15_v9 }
  0xf4   :  { %v121_v11 = vpop.f32.mrb[0].mxu0 }
  0xf5   :  { %v122_v12 = vadd.f32 %v135_v10, %v121_v11  ;;  %v171_v13 = vpop.f32.mrb[1].mxu0 }
  0xf6   :  { %v124_v14 = vpop.f32.mrb[2].mxu0 }
  0xf7   :  { %v127_v15 = vmax.f32 %v122_v12, 0.0  ;;  %v172_v16 = vpop.f32.mrb[3].mxu0 }
  0xf9   :  { %v128_v17 = vpack.c.bf16 %v127_v15, %v127_v15 }
  0xfb   :  { %130 = vst.msk [vmem:[%s241_s3] sm:$0xf] %vm129_vm1, %v128_v17 }

// kernel: _lambda_.54
= control target key start
LH: loop header
LB: loop body
LE: loop exit
PB: predicated region body
PF: predicated region fallthrough
CT: control target
= control target key end

     0   :  { %vm1131_vm0 = vmmov 0   ;;  %s1397_s1 = inlined_call_operand.vmem [shape: bf16[1152,128], index: 1, kind: input, shape index: {}]   ;;  %s1398_s0 = inlined_call_operand.vmem [shape: bf16[8,1152], index: 0, kind: input, shape index: {}]   ;;  %s1399_s2 = inlined_call_operand.vmem [shape: f32[1,128], index: 2, kind: input, shape index: {}]   ;;  %s1400_s3 = inlined_call_operand.vmem [shape: bf16[8,128], index: 3, kind: input, shape index: {}]   ;;  %s1401_s4 = inlined_call_operand.vmem [shape: bf16[8,128], index: 4, kind: output, shape index: {}]  }
   0x1   :  { %v1049_v0 = vld [vmem:[%s1397_s1 + $0x40] sm:$0xff]   ;;  %v1053_v4 = vld [vmem:[%s1397_s1 + $0x48] sm:$0xff]   ;;  %v1057_v8 = vld [vmem:[%s1397_s1 + $0x50] sm:$0xff]  }
   0x2   :  { %v1050_v1 = vld [vmem:[%s1397_s1] sm:$0xff]   ;;  %930 = vmatprep.subr.bf16.mxu0 %v1049_v0  ;;  %v1054_v5 = vld [vmem:[%s1397_s1 + $0x8] sm:$0xff]   ;;  %v1058_v9 = vld [vmem:[%s1397_s1 + $0x10] sm:$0xff]  }
   0x3   :  { %v1051_v2 = vld [vmem:[%s1397_s1 + $0xc0] sm:$0xff]   ;;  %931 = vmatpush3.bf16.msra.mxu0 %v1050_v1  ;;  %v1055_v6 = vld [vmem:[%s1397_s1 + $0xc8] sm:$0xff]   ;;  %v1059_v10 = vld [vmem:[%s1397_s1 + $0xd0] sm:$0xff]  }
   0x4   :  { %v1052_v3 = vld [vmem:[%s1397_s1 + $0x80] sm:$0xff]   ;;  %952 = vmatprep.subr.bf16.mxu1 %v1051_v2  ;;  %932 = vmatprep.subr.bf16.mxu0 %v1053_v4  ;;  %v1056_v7 = vld [vmem:[%s1397_s1 + $0x88] sm:$0xff]   ;;  %v1060_v11 = vld [vmem:[%s1397_s1 + $0x90] sm:$0xff]  }
   0x5   :  { %953 = vmatpush3.bf16.msra.mxu1 %v1052_v3  ;;  %v1061_v12 = vld [vmem:[%s1397_s1 + $0x58] sm:$0xff]   ;;  %v1065_v16 = vld [vmem:[%s1397_s1 + $0x60] sm:$0xff]   ;;  %v1069_v20 = vld [vmem:[%s1397_s1 + $0x68] sm:$0xff]  }
   0x6   :  { %954 = vmatprep.subr.bf16.mxu1 %v1055_v6  ;;  %v1062_v13 = vld [vmem:[%s1397_s1 + $0x18] sm:$0xff]   ;;  %v1066_v17 = vld [vmem:[%s1397_s1 + $0x20] sm:$0xff]   ;;  %v1070_v21 = vld [vmem:[%s1397_s1 + $0x28] sm:$0xff]  }
   0x7   :  { %933 = vmatpush3.bf16.msra.mxu0 %v1054_v5  ;;  %v1063_v14 = vld [vmem:[%s1397_s1 + $0xd8] sm:$0xff]   ;;  %v1067_v18 = vld [vmem:[%s1397_s1 + $0xe0] sm:$0xff]   ;;  %v1071_v22 = vld [vmem:[%s1397_s1 + $0xe8] sm:$0xff]  }
   0x8   :  { %934 = vmatprep.subr.bf16.mxu0 %v1057_v8  ;;  %v1064_v15 = vld [vmem:[%s1397_s1 + $0x98] sm:$0xff]   ;;  %v1068_v19 = vld [vmem:[%s1397_s1 + $0xa0] sm:$0xff]   ;;  %v1072_v23 = vld [vmem:[%s1397_s1 + $0xa8] sm:$0xff]  }
   0x9   :  { %955 = vmatpush3.bf16.msra.mxu1 %v1056_v7  ;;  %v1073_v24 = vld [vmem:[%s1397_s1 + $0x70] sm:$0xff]   ;;  %v1077_v28 = vld [vmem:[%s1397_s1 + $0x78] sm:$0xff]   ;;  %v18_v31 = vld [vmem:[%s1398_s0] sm:$0xff] }
   0xa   :  { %956 = vmatprep.subr.bf16.mxu1 %v1059_v10  ;;  %v1074_v25 = vld [vmem:[%s1397_s1 + $0x30] sm:$0xff]   ;;  %v1078_v29 = vld [vmem:[%s1397_s1 + $0x38] sm:$0xff]   ;;  %v849_v32 = vcombine.low %v18_v31, %v18_v31  ;;  %v850_v33 = vcombine.high %v18_v31, %v18_v31  ;;  %v1083_v35 = vld [vmem:[%s1397_s1 + $0x140] sm:$0xff]  }
   0xb   :  { %935 = vmatpush3.bf16.msra.mxu0 %v1058_v9  ;;  %v1075_v26 = vld [vmem:[%s1397_s1 + $0xf0] sm:$0xff]   ;;  %v1079_v30 = vld [vmem:[%s1397_s1 + $0xf8] sm:$0xff]   ;;  %v19_v36 = vld [vmem:[%s1398_s0 + $0x8] sm:$0xff]  ;;  %v1130_v9 = vmov 0.0  }
   0xc   :  { %936 = vmatprep.subr.bf16.mxu0 %v1061_v12  ;;  %v1076_v27 = vld [vmem:[%s1397_s1 + $0xb0] sm:$0xff]   ;;  %v1082_v34 = vld [vmem:[%s1397_s1 + $0xb8] sm:$0xff]   ;;  %670 = vmatprep.mubr.bf16.mxu0 %v850_v33  ;;  %v851_v37 = vcombine.low %v19_v36, %v19_v36  ;;  %v852_v38 = vcombine.high %v19_v36, %v19_v36  ;;  %v1086_v39 = vld [vmem:[%s1397_s1 + $0x100] sm:$0xff]  }
   0xd   :  { %957 = vmatpush3.bf16.msra.mxu1 %v1060_v11  ;;  %v1087_v40 = vld [vmem:[%s1397_s1 + $0x1c0] sm:$0xff]   ;;  %v1089_v42 = vld [vmem:[%s1397_s1 + $0x148] sm:$0xff]   ;;  %v1093_v46 = vld [vmem:[%s1397_s1 + $0x150] sm:$0xff]  }
   0xe   :  { %958 = vmatprep.subr.bf16.mxu1 %v1063_v14  ;;  %710 = vmatprep.mubr.bf16.mxu1 %v852_v38  ;;  %v1088_v41 = vld [vmem:[%s1397_s1 + $0x180] sm:$0xff]   ;;  %v1090_v43 = vld [vmem:[%s1397_s1 + $0x108] sm:$0xff]   ;;  %v1094_v47 = vld [vmem:[%s1397_s1 + $0x110] sm:$0xff]  }
   0xf   :  { %937 = vmatpush3.bf16.msra.mxu0 %v1062_v13  ;;  %v1091_v44 = vld [vmem:[%s1397_s1 + $0x1c8] sm:$0xff]   ;;  %v1095_v48 = vld [vmem:[%s1397_s1 + $0x1d0] sm:$0xff]   ;;  %v1097_v50 = vld [vmem:[%s1397_s1 + $0x158] sm:$0xff]  }
  0x10   :  { %938 = vmatprep.subr.bf16.mxu0 %v1065_v16  ;;  %v1092_v45 = vld [vmem:[%s1397_s1 + $0x188] sm:$0xff]   ;;  %v1096_v49 = vld [vmem:[%s1397_s1 + $0x190] sm:$0xff]   ;;  %v1098_v51 = vld [vmem:[%s1397_s1 + $0x118] sm:$0xff]  }
  0x11   :  { %959 = vmatpush3.bf16.msra.mxu1 %v1064_v15  ;;  %v1099_v52 = vld [vmem:[%s1397_s1 + $0x1d8] sm:$0xff]   ;;  %v1101_v54 = vld [vmem:[%s1397_s1 + $0x160] sm:$0xff]   ;;  %v1105_v58 = vld [vmem:[%s1397_s1 + $0x168] sm:$0xff]  }
  0x12   :  { %960 = vmatprep.subr.bf16.mxu1 %v1067_v18  ;;  %v1100_v53 = vld [vmem:[%s1397_s1 + $0x198] sm:$0xff]   ;;  %v1102_v55 = vld [vmem:[%s1397_s1 + $0x120] sm:$0xff]   ;;  %v1106_v59 = vld [vmem:[%s1397_s1 + $0x128] sm:$0xff]  }
  0x13   :  { %939 = vmatpush3.bf16.msra.mxu0 %v1066_v17  ;;  %v1103_v56 = vld [vmem:[%s1397_s1 + $0x1e0] sm:$0xff]   ;;  %v1107_v60 = vld [vmem:[%s1397_s1 + $0x1e8] sm:$0xff]   ;;  %v1109_v62 = vld [vmem:[%s1397_s1 + $0x170] sm:$0xff]  }
  0x14   :  { %940 = vmatprep.subr.bf16.mxu0 %v1069_v20  ;;  %v1104_v57 = vld [vmem:[%s1397_s1 + $0x1a0] sm:$0xff]   ;;  %v1108_v61 = vld [vmem:[%s1397_s1 + $0x1a8] sm:$0xff]   ;;  %v1110_v63 = vld [vmem:[%s1397_s1 + $0x130] sm:$0xff]  }
  0x15   :  { %961 = vmatpush3.bf16.msra.mxu1 %v1068_v19  ;;  %v1111_v0 = vld [vmem:[%s1397_s1 + $0x1f0] sm:$0xff]   ;;  %v1113_v2 = vld [vmem:[%s1397_s1 + $0x178] sm:$0xff]   ;;  %v1121_v13 = vld [vmem:[%s1397_s1 + $0x200] sm:$0xff]  }
  0x16   :  { %962 = vmatprep.subr.bf16.mxu1 %v1071_v22  ;;  %v1112_v1 = vld [vmem:[%s1397_s1 + $0x1b0] sm:$0xff]   ;;  %v1114_v3 = vld [vmem:[%s1397_s1 + $0x138] sm:$0xff]   ;;  %v1122_v14 = vld [vmem:[%s1397_s1 + $0x208] sm:$0xff]  }
  0x17   :  { %941 = vmatpush3.bf16.msra.mxu0 %v1070_v21  ;;  %v1115_v4 = vld [vmem:[%s1397_s1 + $0x1f8] sm:$0xff]   ;;  %v20_v5 = vld [vmem:[%s1398_s0 + $0x10] sm:$0xff]  ;;  %v1125_v17 = vld [vmem:[%s1397_s1 + $0x220] sm:$0xff]  }
  0x18   :  { %942 = vmatprep.subr.bf16.mxu0 %v1073_v24  ;;  %v853_v6 = vcombine.low %v20_v5, %v20_v5  ;;  %v854_v7 = vcombine.high %v20_v5, %v20_v5  ;;  %v1118_v8 = vld [vmem:[%s1397_s1 + $0x1b8] sm:$0xff]   ;;  %v1123_v15 = vld [vmem:[%s1397_s1 + $0x210] sm:$0xff]   ;;  %v1126_v18 = vld [vmem:[%s1397_s1 + $0x228] sm:$0xff]  }
  0x19   :  { %963 = vmatpush3.bf16.msra.mxu1 %v1072_v23  ;;  %v21_v10 = vld [vmem:[%s1398_s0 + $0x18] sm:$0xff]  ;;  %v1127_v19 = vld [vmem:[%s1397_s1 + $0x230] sm:$0xff]   ;;  %v1129_v21 = vld [vmem:[%s1398_s0 + $0x20] ss:$0 sps:$4 sm:$0xff]  }
  0x1a   :  { %964 = vmatprep.subr.bf16.mxu1 %v1075_v26  ;;  %v855_v11 = vcombine.low %v21_v10, %v21_v10  ;;  %v856_v12 = vcombine.high %v21_v10, %v21_v10  ;;  %v1124_v16 = vld [vmem:[%s1397_s1 + $0x218] sm:$0xff]   ;;  %v848_v23 = vld [vmem:[%s1399_s2] ss:$0 sm:$0xff] }
  0x1b   :  { %943 = vmatpush3.bf16.msra.mxu0 %v1074_v25  ;;  %v1128_v20 = vld [vmem:[%s1397_s1 + $0x238] sm:$0xff]  }
  0x1c   :  { %944 = vmatprep.subr.bf16.mxu0 %v1077_v28 }
  0x1d   :  { %965 = vmatpush3.bf16.msra.mxu1 %v1076_v27 }
  0x1e   :  { %966 = vmatprep.subr.bf16.mxu1 %v1079_v30 }
  0x1f   :  { %945 = vmatpush3.bf16.msra.mxu0 %v1078_v29 }
  0x20   :  { %974 = vmatprep.subr.bf16.mxu0 %v1083_v35 }
  0x21   :  { %967 = vmatpush3.bf16.msra.mxu1 %v1082_v34 }
  0x22   :  { %671 = vmatmul.mubr.bf16.vlgmr.msra.gmra.mrb[0].mxu0 %v849_v32  ;;  %996 = vmatprep.subr.bf16.mxu1 %v1087_v40 }
  0x23   :  { %975 = vmatpush3.bf16.msra.mxu0 %v1086_v39  ;;  %750 = vmatprep.mubr.bf16.mxu0 %v854_v7 }
  0x24   :  { %711 = vmatmul.mubr.bf16.vlgmr.msra.gmra.mrb[0].mxu1 %v851_v37  ;;  %976 = vmatprep.subr.bf16.mxu0 %v1089_v42 }
  0x25   :  { %997 = vmatpush3.bf16.msra.mxu1 %v1088_v41  ;;  %790 = vmatprep.mubr.bf16.mxu1 %v856_v12 }
  0x26   :  { %998 = vmatprep.subr.bf16.mxu1 %v1091_v44 }
  0x27   :  { %977 = vmatpush3.bf16.msra.mxu0 %v1090_v43 }
  0x28   :  { %978 = vmatprep.subr.bf16.mxu0 %v1093_v46 }
  0x29   :  { %999 = vmatpush3.bf16.msra.mxu1 %v1092_v45 }
  0x2a   :  { %1000 = vmatprep.subr.bf16.mxu1 %v1095_v48 }
  0x2b   :  { %979 = vmatpush3.bf16.msra.mxu0 %v1094_v47  ;;  %v838_v47 = vld [vmem:[%s1400_s3] sm:$0xf] }
  0x2c   :  { %980 = vmatprep.subr.bf16.mxu0 %v1097_v50  ;;  %v839_v48 = vunpack.c.l.bf16 %v838_v47 }
  0x2d   :  { %1001 = vmatpush3.bf16.msra.mxu1 %v1096_v49 }
  0x2e   :  { %1002 = vmatprep.subr.bf16.mxu1 %v1099_v52 }
  0x2f   :  { %981 = vmatpush3.bf16.msra.mxu0 %v1098_v51 }
  0x30   :  { %982 = vmatprep.subr.bf16.mxu0 %v1101_v54 }
  0x31   :  { %1003 = vmatpush3.bf16.msra.mxu1 %v1100_v53 }
  0x32   :  { %1004 = vmatprep.subr.bf16.mxu1 %v1103_v56 }
  0x33   :  { %983 = vmatpush3.bf16.msra.mxu0 %v1102_v55 }
  0x34   :  { %984 = vmatprep.subr.bf16.mxu0 %v1105_v58 }
  0x35   :  { %1005 = vmatpush3.bf16.msra.mxu1 %v1104_v57 }
  0x36   :  { %1006 = vmatprep.subr.bf16.mxu1 %v1107_v60 }
  0x37   :  { %985 = vmatpush3.bf16.msra.mxu0 %v1106_v59 }
  0x38   :  { %986 = vmatprep.subr.bf16.mxu0 %v1109_v62 }
  0x39   :  { %1007 = vmatpush3.bf16.msra.mxu1 %v1108_v61 }
  0x3a   :  { %1008 = vmatprep.subr.bf16.mxu1 %v1111_v0 }
  0x3b   :  { %987 = vmatpush3.bf16.msra.mxu0 %v1110_v63 }
  0x3c   :  { %988 = vmatprep.subr.bf16.mxu0 %v1113_v2 }
  0x3d   :  { %1009 = vmatpush3.bf16.msra.mxu1 %v1112_v1 }
  0x3e   :  { %1010 = vmatprep.subr.bf16.mxu1 %v1115_v4 }
  0x3f   :  { %989 = vmatpush3.bf16.msra.mxu0 %v1114_v3 }
  0x40   :  { %1027 = vmatprep.subr.bf16.mxu0 %v1130_v9 }
  0x41   :  { %1011 = vmatpush3.bf16.msra.mxu1 %v1118_v8 }
  0x42   :  { %751 = vmatmul.mubr.bf16.vlgmr.msra.gmra.mrb[4].mxu0 %v853_v6 }
  0x43   :  { %1028 = vmatpush3.bf16.msra.mxu0 %v1121_v13  ;;  %1043 = vmatprep.mubr.msk.bf16.mxu0 %vm1131_vm0, %v1130_v9 }
  0x44   :  { %791 = vmatmul.mubr.bf16.vlgmr.msra.gmra.mrb[4].mxu1 %v855_v11  ;;  %1029 = vmatprep.subr.bf16.mxu0 %v1130_v9 }
  0x47   :  { %1030 = vmatpush3.bf16.msra.mxu0 %v1122_v14 }
  0x48   :  { %1031 = vmatprep.subr.bf16.mxu0 %v1130_v9 }
  0x4b   :  { %1032 = vmatpush3.bf16.msra.mxu0 %v1123_v15 }
  0x4c   :  { %1033 = vmatprep.subr.bf16.mxu0 %v1130_v9 }
  0x4f   :  { %1034 = vmatpush3.bf16.msra.mxu0 %v1124_v16 }
  0x50   :  { %1035 = vmatprep.subr.bf16.mxu0 %v1130_v9 }
  0x53   :  { %1036 = vmatpush3.bf16.msra.mxu0 %v1125_v17 }
  0x54   :  { %1037 = vmatprep.subr.bf16.mxu0 %v1130_v9 }
  0x57   :  { %1038 = vmatpush3.bf16.msra.mxu0 %v1126_v18 }
  0x58   :  { %1039 = vmatprep.subr.bf16.mxu0 %v1130_v9 }
  0x5b   :  { %1040 = vmatpush3.bf16.msra.mxu0 %v1127_v19 }
  0x5c   :  { %1041 = vmatprep.subr.bf16.mxu0 %v1130_v9 }
  0x5f   :  { %1042 = vmatpush3.bf16.msra.mxu0 %v1128_v20 }
  0x62   :  { %1044 = vmatmul.mubr.bf16.vlgmr.msra.gmra.mrb[8].mxu0 %v1129_v21 }
  0xf5   :  { %v946_v22 = vpop.f32.mrb[0].mxu0 }
  0xf6   :  { %v947_v24 = vpop.f32.mrb[1].mxu0 }
  0xf7   :  { %v948_v25 = vadd.f32 %v947_v24, %v946_v22  ;;  %v949_v26 = vpop.f32.mrb[2].mxu0  ;;  %v968_v27 = vpop.f32.mrb[0].mxu1 }
  0xf8   :  { %v950_v28 = vpop.f32.mrb[3].mxu0  ;;  %v969_v29 = vpop.f32.mrb[1].mxu1 }
  0xf9   :  { %v673_v30 = vadd.f32 %v948_v25, %v848_v23  ;;  %v970_v31 = vadd.f32 %v969_v29, %v968_v27  ;;  %v971_v32 = vpop.f32.mrb[2].mxu1 }
  0xfa   :  { %v972_v33 = vpop.f32.mrb[3].mxu1 }
  0xfb   :  { %v713_v34 = vadd.f32 %v970_v31, %v673_v30 }
 0x115   :  { %v990_v35 = vpop.f32.mrb[4].mxu0 }
 0x116   :  { %v991_v36 = vpop.f32.mrb[5].mxu0 }
 0x117   :  { %v992_v37 = vadd.f32 %v991_v36, %v990_v35  ;;  %v993_v38 = vpop.f32.mrb[6].mxu0  ;;  %v1012_v39 = vpop.f32.mrb[4].mxu1 }
 0x118   :  { %v994_v40 = vpop.f32.mrb[7].mxu0  ;;  %v1013_v41 = vpop.f32.mrb[5].mxu1 }
 0x119   :  { %v753_v42 = vadd.f32 %v992_v37, %v713_v34  ;;  %v1014_v43 = vadd.f32 %v1013_v41, %v1012_v39  ;;  %v1015_v44 = vpop.f32.mrb[6].mxu1 }
 0x11a   :  { %v1016_v45 = vpop.f32.mrb[7].mxu1 }
 0x11b   :  { %v793_v46 = vadd.f32 %v1014_v43, %v753_v42 }
 0x135   :  { %v832_v49 = vpop.f32.mrb[8].mxu0 }
 0x136   :  { %v833_v50 = vadd.f32 %v832_v49, %v793_v46  ;;  %v1045_v51 = vpop.f32.mrb[9].mxu0 }
 0x137   :  { %v835_v52 = vpop.f32.mrb[10].mxu0 }
 0x138   :  { %v840_v53 = vadd.f32 %v839_v48, %v833_v50  ;;  %v1046_v54 = vpop.f32.mrb[11].mxu0 }
 0x13a   :  { %v841_v55 = vmax.f32 %v840_v53, 0.0 }
 0x13c   :  { %v842_v56 = vpack.c.bf16 %v841_v55, %v841_v55 }
 0x13e   :  { %843 = vst [vmem:[%s1401_s4] sm:$0xf] %v842_v56 }

// kernel: _lambda_.55
= control target key start
LH: loop header
LB: loop body
LE: loop exit
PB: predicated region body
PF: predicated region fallthrough
CT: control target
= control target key end

     0   :  { %vm1125_vm0 = vmmov 0   ;;  %s1383_s1 = inlined_call_operand.vmem [shape: bf16[1152,128], index: 1, kind: input, shape index: {}]   ;;  %s1384_s0 = inlined_call_operand.vmem [shape: bf16[8,1152], index: 0, kind: input, shape index: {}]   ;;  %s1385_s2 = inlined_call_operand.vmem [shape: f32[1,128], index: 2, kind: input, shape index: {}]   ;;  %s1386_s3 = inlined_call_operand.vmem [shape: bf16[8,128], index: 3, kind: output, shape index: {}]  }
   0x1   :  { %v1043_v0 = vld [vmem:[%s1383_s1 + $0x40] sm:$0xff]   ;;  %v1047_v4 = vld [vmem:[%s1383_s1 + $0x48] sm:$0xff]   ;;  %v1051_v8 = vld [vmem:[%s1383_s1 + $0x50] sm:$0xff]  }
   0x2   :  { %v1044_v1 = vld [vmem:[%s1383_s1] sm:$0xff]   ;;  %924 = vmatprep.subr.bf16.mxu0 %v1043_v0  ;;  %v1048_v5 = vld [vmem:[%s1383_s1 + $0x8] sm:$0xff]   ;;  %v1052_v9 = vld [vmem:[%s1383_s1 + $0x10] sm:$0xff]  }
   0x3   :  { %v1045_v2 = vld [vmem:[%s1383_s1 + $0xc0] sm:$0xff]   ;;  %925 = vmatpush3.bf16.msra.mxu0 %v1044_v1  ;;  %v1049_v6 = vld [vmem:[%s1383_s1 + $0xc8] sm:$0xff]   ;;  %v1053_v10 = vld [vmem:[%s1383_s1 + $0xd0] sm:$0xff]  }
   0x4   :  { %v1046_v3 = vld [vmem:[%s1383_s1 + $0x80] sm:$0xff]   ;;  %946 = vmatprep.subr.bf16.mxu1 %v1045_v2  ;;  %926 = vmatprep.subr.bf16.mxu0 %v1047_v4  ;;  %v1050_v7 = vld [vmem:[%s1383_s1 + $0x88] sm:$0xff]   ;;  %v1054_v11 = vld [vmem:[%s1383_s1 + $0x90] sm:$0xff]  }
   0x5   :  { %947 = vmatpush3.bf16.msra.mxu1 %v1046_v3  ;;  %v1055_v12 = vld [vmem:[%s1383_s1 + $0x58] sm:$0xff]   ;;  %v1059_v16 = vld [vmem:[%s1383_s1 + $0x60] sm:$0xff]   ;;  %v1063_v20 = vld [vmem:[%s1383_s1 + $0x68] sm:$0xff]  }
   0x6   :  { %948 = vmatprep.subr.bf16.mxu1 %v1049_v6  ;;  %v1056_v13 = vld [vmem:[%s1383_s1 + $0x18] sm:$0xff]   ;;  %v1060_v17 = vld [vmem:[%s1383_s1 + $0x20] sm:$0xff]   ;;  %v1064_v21 = vld [vmem:[%s1383_s1 + $0x28] sm:$0xff]  }
   0x7   :  { %927 = vmatpush3.bf16.msra.mxu0 %v1048_v5  ;;  %v1057_v14 = vld [vmem:[%s1383_s1 + $0xd8] sm:$0xff]   ;;  %v1061_v18 = vld [vmem:[%s1383_s1 + $0xe0] sm:$0xff]   ;;  %v1065_v22 = vld [vmem:[%s1383_s1 + $0xe8] sm:$0xff]  }
   0x8   :  { %928 = vmatprep.subr.bf16.mxu0 %v1051_v8  ;;  %v1058_v15 = vld [vmem:[%s1383_s1 + $0x98] sm:$0xff]   ;;  %v1062_v19 = vld [vmem:[%s1383_s1 + $0xa0] sm:$0xff]   ;;  %v1066_v23 = vld [vmem:[%s1383_s1 + $0xa8] sm:$0xff]  }
   0x9   :  { %949 = vmatpush3.bf16.msra.mxu1 %v1050_v7  ;;  %v1067_v24 = vld [vmem:[%s1383_s1 + $0x70] sm:$0xff]   ;;  %v1071_v28 = vld [vmem:[%s1383_s1 + $0x78] sm:$0xff]   ;;  %v15_v31 = vld [vmem:[%s1384_s0] sm:$0xff] }
   0xa   :  { %950 = vmatprep.subr.bf16.mxu1 %v1053_v10  ;;  %v1068_v25 = vld [vmem:[%s1383_s1 + $0x30] sm:$0xff]   ;;  %v1072_v29 = vld [vmem:[%s1383_s1 + $0x38] sm:$0xff]   ;;  %v843_v32 = vcombine.low %v15_v31, %v15_v31  ;;  %v844_v33 = vcombine.high %v15_v31, %v15_v31  ;;  %v1077_v35 = vld [vmem:[%s1383_s1 + $0x140] sm:$0xff]  }
   0xb   :  { %929 = vmatpush3.bf16.msra.mxu0 %v1052_v9  ;;  %v1069_v26 = vld [vmem:[%s1383_s1 + $0xf0] sm:$0xff]   ;;  %v1073_v30 = vld [vmem:[%s1383_s1 + $0xf8] sm:$0xff]   ;;  %v16_v36 = vld [vmem:[%s1384_s0 + $0x8] sm:$0xff]  ;;  %v1124_v9 = vmov 0.0  }
   0xc   :  { %930 = vmatprep.subr.bf16.mxu0 %v1055_v12  ;;  %v1070_v27 = vld [vmem:[%s1383_s1 + $0xb0] sm:$0xff]   ;;  %v1076_v34 = vld [vmem:[%s1383_s1 + $0xb8] sm:$0xff]   ;;  %667 = vmatprep.mubr.bf16.mxu0 %v844_v33  ;;  %v845_v37 = vcombine.low %v16_v36, %v16_v36  ;;  %v846_v38 = vcombine.high %v16_v36, %v16_v36  ;;  %v1080_v39 = vld [vmem:[%s1383_s1 + $0x100] sm:$0xff]  }
   0xd   :  { %951 = vmatpush3.bf16.msra.mxu1 %v1054_v11  ;;  %v1081_v40 = vld [vmem:[%s1383_s1 + $0x1c0] sm:$0xff]   ;;  %v1083_v42 = vld [vmem:[%s1383_s1 + $0x148] sm:$0xff]   ;;  %v1087_v46 = vld [vmem:[%s1383_s1 + $0x150] sm:$0xff]  }
   0xe   :  { %952 = vmatprep.subr.bf16.mxu1 %v1057_v14  ;;  %707 = vmatprep.mubr.bf16.mxu1 %v846_v38  ;;  %v1082_v41 = vld [vmem:[%s1383_s1 + $0x180] sm:$0xff]   ;;  %v1084_v43 = vld [vmem:[%s1383_s1 + $0x108] sm:$0xff]   ;;  %v1088_v47 = vld [vmem:[%s1383_s1 + $0x110] sm:$0xff]  }
   0xf   :  { %931 = vmatpush3.bf16.msra.mxu0 %v1056_v13  ;;  %v1085_v44 = vld [vmem:[%s1383_s1 + $0x1c8] sm:$0xff]   ;;  %v1089_v48 = vld [vmem:[%s1383_s1 + $0x1d0] sm:$0xff]   ;;  %v1091_v50 = vld [vmem:[%s1383_s1 + $0x158] sm:$0xff]  }
  0x10   :  { %932 = vmatprep.subr.bf16.mxu0 %v1059_v16  ;;  %v1086_v45 = vld [vmem:[%s1383_s1 + $0x188] sm:$0xff]   ;;  %v1090_v49 = vld [vmem:[%s1383_s1 + $0x190] sm:$0xff]   ;;  %v1092_v51 = vld [vmem:[%s1383_s1 + $0x118] sm:$0xff]  }
  0x11   :  { %953 = vmatpush3.bf16.msra.mxu1 %v1058_v15  ;;  %v1093_v52 = vld [vmem:[%s1383_s1 + $0x1d8] sm:$0xff]   ;;  %v1095_v54 = vld [vmem:[%s1383_s1 + $0x160] sm:$0xff]   ;;  %v1099_v58 = vld [vmem:[%s1383_s1 + $0x168] sm:$0xff]  }
  0x12   :  { %954 = vmatprep.subr.bf16.mxu1 %v1061_v18  ;;  %v1094_v53 = vld [vmem:[%s1383_s1 + $0x198] sm:$0xff]   ;;  %v1096_v55 = vld [vmem:[%s1383_s1 + $0x120] sm:$0xff]   ;;  %v1100_v59 = vld [vmem:[%s1383_s1 + $0x128] sm:$0xff]  }
  0x13   :  { %933 = vmatpush3.bf16.msra.mxu0 %v1060_v17  ;;  %v1097_v56 = vld [vmem:[%s1383_s1 + $0x1e0] sm:$0xff]   ;;  %v1101_v60 = vld [vmem:[%s1383_s1 + $0x1e8] sm:$0xff]   ;;  %v1103_v62 = vld [vmem:[%s1383_s1 + $0x170] sm:$0xff]  }
  0x14   :  { %934 = vmatprep.subr.bf16.mxu0 %v1063_v20  ;;  %v1098_v57 = vld [vmem:[%s1383_s1 + $0x1a0] sm:$0xff]   ;;  %v1102_v61 = vld [vmem:[%s1383_s1 + $0x1a8] sm:$0xff]   ;;  %v1104_v63 = vld [vmem:[%s1383_s1 + $0x130] sm:$0xff]  }
  0x15   :  { %955 = vmatpush3.bf16.msra.mxu1 %v1062_v19  ;;  %v1105_v0 = vld [vmem:[%s1383_s1 + $0x1f0] sm:$0xff]   ;;  %v1107_v2 = vld [vmem:[%s1383_s1 + $0x178] sm:$0xff]   ;;  %v1115_v13 = vld [vmem:[%s1383_s1 + $0x200] sm:$0xff]  }
  0x16   :  { %956 = vmatprep.subr.bf16.mxu1 %v1065_v22  ;;  %v1106_v1 = vld [vmem:[%s1383_s1 + $0x1b0] sm:$0xff]   ;;  %v1108_v3 = vld [vmem:[%s1383_s1 + $0x138] sm:$0xff]   ;;  %v1116_v14 = vld [vmem:[%s1383_s1 + $0x208] sm:$0xff]  }
  0x17   :  { %935 = vmatpush3.bf16.msra.mxu0 %v1064_v21  ;;  %v1109_v4 = vld [vmem:[%s1383_s1 + $0x1f8] sm:$0xff]   ;;  %v17_v5 = vld [vmem:[%s1384_s0 + $0x10] sm:$0xff]  ;;  %v1119_v17 = vld [vmem:[%s1383_s1 + $0x220] sm:$0xff]  }
  0x18   :  { %936 = vmatprep.subr.bf16.mxu0 %v1067_v24  ;;  %v847_v6 = vcombine.low %v17_v5, %v17_v5  ;;  %v848_v7 = vcombine.high %v17_v5, %v17_v5  ;;  %v1112_v8 = vld [vmem:[%s1383_s1 + $0x1b8] sm:$0xff]   ;;  %v1117_v15 = vld [vmem:[%s1383_s1 + $0x210] sm:$0xff]   ;;  %v1120_v18 = vld [vmem:[%s1383_s1 + $0x228] sm:$0xff]  }
  0x19   :  { %957 = vmatpush3.bf16.msra.mxu1 %v1066_v23  ;;  %v18_v10 = vld [vmem:[%s1384_s0 + $0x18] sm:$0xff]  ;;  %v1121_v19 = vld [vmem:[%s1383_s1 + $0x230] sm:$0xff]   ;;  %v1123_v21 = vld [vmem:[%s1384_s0 + $0x20] ss:$0 sps:$4 sm:$0xff]  }
  0x1a   :  { %958 = vmatprep.subr.bf16.mxu1 %v1069_v26  ;;  %v849_v11 = vcombine.low %v18_v10, %v18_v10  ;;  %v850_v12 = vcombine.high %v18_v10, %v18_v10  ;;  %v1118_v16 = vld [vmem:[%s1383_s1 + $0x218] sm:$0xff]   ;;  %v842_v23 = vld [vmem:[%s1385_s2] ss:$0 sm:$0xff] }
  0x1b   :  { %937 = vmatpush3.bf16.msra.mxu0 %v1068_v25  ;;  %v1122_v20 = vld [vmem:[%s1383_s1 + $0x238] sm:$0xff]  }
  0x1c   :  { %938 = vmatprep.subr.bf16.mxu0 %v1071_v28 }
  0x1d   :  { %959 = vmatpush3.bf16.msra.mxu1 %v1070_v27 }
  0x1e   :  { %960 = vmatprep.subr.bf16.mxu1 %v1073_v30 }
  0x1f   :  { %939 = vmatpush3.bf16.msra.mxu0 %v1072_v29 }
  0x20   :  { %968 = vmatprep.subr.bf16.mxu0 %v1077_v35 }
  0x21   :  { %961 = vmatpush3.bf16.msra.mxu1 %v1076_v34 }
  0x22   :  { %668 = vmatmul.mubr.bf16.vlgmr.msra.gmra.mrb[0].mxu0 %v843_v32  ;;  %990 = vmatprep.subr.bf16.mxu1 %v1081_v40 }
  0x23   :  { %969 = vmatpush3.bf16.msra.mxu0 %v1080_v39  ;;  %747 = vmatprep.mubr.bf16.mxu0 %v848_v7 }
  0x24   :  { %708 = vmatmul.mubr.bf16.vlgmr.msra.gmra.mrb[0].mxu1 %v845_v37  ;;  %970 = vmatprep.subr.bf16.mxu0 %v1083_v42 }
  0x25   :  { %991 = vmatpush3.bf16.msra.mxu1 %v1082_v41  ;;  %787 = vmatprep.mubr.bf16.mxu1 %v850_v12 }
  0x26   :  { %992 = vmatprep.subr.bf16.mxu1 %v1085_v44 }
  0x27   :  { %971 = vmatpush3.bf16.msra.mxu0 %v1084_v43 }
  0x28   :  { %972 = vmatprep.subr.bf16.mxu0 %v1087_v46 }
  0x29   :  { %993 = vmatpush3.bf16.msra.mxu1 %v1086_v45 }
  0x2a   :  { %994 = vmatprep.subr.bf16.mxu1 %v1089_v48 }
  0x2b   :  { %973 = vmatpush3.bf16.msra.mxu0 %v1088_v47 }
  0x2c   :  { %974 = vmatprep.subr.bf16.mxu0 %v1091_v50 }
  0x2d   :  { %995 = vmatpush3.bf16.msra.mxu1 %v1090_v49 }
  0x2e   :  { %996 = vmatprep.subr.bf16.mxu1 %v1093_v52 }
  0x2f   :  { %975 = vmatpush3.bf16.msra.mxu0 %v1092_v51 }
  0x30   :  { %976 = vmatprep.subr.bf16.mxu0 %v1095_v54 }
  0x31   :  { %997 = vmatpush3.bf16.msra.mxu1 %v1094_v53 }
  0x32   :  { %998 = vmatprep.subr.bf16.mxu1 %v1097_v56 }
  0x33   :  { %977 = vmatpush3.bf16.msra.mxu0 %v1096_v55 }
  0x34   :  { %978 = vmatprep.subr.bf16.mxu0 %v1099_v58 }
  0x35   :  { %999 = vmatpush3.bf16.msra.mxu1 %v1098_v57 }
  0x36   :  { %1000 = vmatprep.subr.bf16.mxu1 %v1101_v60 }
  0x37   :  { %979 = vmatpush3.bf16.msra.mxu0 %v1100_v59 }
  0x38   :  { %980 = vmatprep.subr.bf16.mxu0 %v1103_v62 }
  0x39   :  { %1001 = vmatpush3.bf16.msra.mxu1 %v1102_v61 }
  0x3a   :  { %1002 = vmatprep.subr.bf16.mxu1 %v1105_v0 }
  0x3b   :  { %981 = vmatpush3.bf16.msra.mxu0 %v1104_v63 }
  0x3c   :  { %982 = vmatprep.subr.bf16.mxu0 %v1107_v2 }
  0x3d   :  { %1003 = vmatpush3.bf16.msra.mxu1 %v1106_v1 }
  0x3e   :  { %1004 = vmatprep.subr.bf16.mxu1 %v1109_v4 }
  0x3f   :  { %983 = vmatpush3.bf16.msra.mxu0 %v1108_v3 }
  0x40   :  { %1021 = vmatprep.subr.bf16.mxu0 %v1124_v9 }
  0x41   :  { %1005 = vmatpush3.bf16.msra.mxu1 %v1112_v8 }
  0x42   :  { %748 = vmatmul.mubr.bf16.vlgmr.msra.gmra.mrb[4].mxu0 %v847_v6 }
  0x43   :  { %1022 = vmatpush3.bf16.msra.mxu0 %v1115_v13  ;;  %1037 = vmatprep.mubr.msk.bf16.mxu0 %vm1125_vm0, %v1124_v9 }
  0x44   :  { %788 = vmatmul.mubr.bf16.vlgmr.msra.gmra.mrb[4].mxu1 %v849_v11  ;;  %1023 = vmatprep.subr.bf16.mxu0 %v1124_v9 }
  0x47   :  { %1024 = vmatpush3.bf16.msra.mxu0 %v1116_v14 }
  0x48   :  { %1025 = vmatprep.subr.bf16.mxu0 %v1124_v9 }
  0x4b   :  { %1026 = vmatpush3.bf16.msra.mxu0 %v1117_v15 }
  0x4c   :  { %1027 = vmatprep.subr.bf16.mxu0 %v1124_v9 }
  0x4f   :  { %1028 = vmatpush3.bf16.msra.mxu0 %v1118_v16 }
  0x50   :  { %1029 = vmatprep.subr.bf16.mxu0 %v1124_v9 }
  0x53   :  { %1030 = vmatpush3.bf16.msra.mxu0 %v1119_v17 }
  0x54   :  { %1031 = vmatprep.subr.bf16.mxu0 %v1124_v9 }
  0x57   :  { %1032 = vmatpush3.bf16.msra.mxu0 %v1120_v18 }
  0x58   :  { %1033 = vmatprep.subr.bf16.mxu0 %v1124_v9 }
  0x5b   :  { %1034 = vmatpush3.bf16.msra.mxu0 %v1121_v19 }
  0x5c   :  { %1035 = vmatprep.subr.bf16.mxu0 %v1124_v9 }
  0x5f   :  { %1036 = vmatpush3.bf16.msra.mxu0 %v1122_v20 }
  0x62   :  { %1038 = vmatmul.mubr.bf16.vlgmr.msra.gmra.mrb[8].mxu0 %v1123_v21 }
  0xf5   :  { %v940_v22 = vpop.f32.mrb[0].mxu0 }
  0xf6   :  { %v941_v24 = vpop.f32.mrb[1].mxu0 }
  0xf7   :  { %v942_v25 = vadd.f32 %v941_v24, %v940_v22  ;;  %v943_v26 = vpop.f32.mrb[2].mxu0  ;;  %v962_v27 = vpop.f32.mrb[0].mxu1 }
  0xf8   :  { %v944_v28 = vpop.f32.mrb[3].mxu0  ;;  %v963_v29 = vpop.f32.mrb[1].mxu1 }
  0xf9   :  { %v670_v30 = vadd.f32 %v942_v25, %v842_v23  ;;  %v964_v31 = vadd.f32 %v963_v29, %v962_v27  ;;  %v965_v32 = vpop.f32.mrb[2].mxu1 }
  0xfa   :  { %v966_v33 = vpop.f32.mrb[3].mxu1 }
  0xfb   :  { %v710_v34 = vadd.f32 %v964_v31, %v670_v30 }
 0x115   :  { %v984_v35 = vpop.f32.mrb[4].mxu0 }
 0x116   :  { %v985_v36 = vpop.f32.mrb[5].mxu0 }
 0x117   :  { %v986_v37 = vadd.f32 %v985_v36, %v984_v35  ;;  %v987_v38 = vpop.f32.mrb[6].mxu0  ;;  %v1006_v39 = vpop.f32.mrb[4].mxu1 }
 0x118   :  { %v988_v40 = vpop.f32.mrb[7].mxu0  ;;  %v1007_v41 = vpop.f32.mrb[5].mxu1 }
 0x119   :  { %v750_v42 = vadd.f32 %v986_v37, %v710_v34  ;;  %v1008_v43 = vadd.f32 %v1007_v41, %v1006_v39  ;;  %v1009_v44 = vpop.f32.mrb[6].mxu1 }
 0x11a   :  { %v1010_v45 = vpop.f32.mrb[7].mxu1 }
 0x11b   :  { %v790_v46 = vadd.f32 %v1008_v43, %v750_v42 }
 0x135   :  { %v829_v47 = vpop.f32.mrb[8].mxu0 }
 0x136   :  { %v830_v48 = vadd.f32 %v829_v47, %v790_v46  ;;  %v1039_v49 = vpop.f32.mrb[9].mxu0 }
 0x137   :  { %v832_v50 = vpop.f32.mrb[10].mxu0 }
 0x138   :  { %v835_v51 = vmax.f32 %v830_v48, 0.0  ;;  %v1040_v52 = vpop.f32.mrb[11].mxu0 }
 0x13a   :  { %v836_v53 = vpack.c.bf16 %v835_v51, %v835_v51 }
 0x13c   :  { %837 = vst [vmem:[%s1386_s3] sm:$0xf] %v836_v53 }

// kernel: _lambda_.58
= control target key start
LH: loop header
LB: loop body
LE: loop exit
PB: predicated region body
PF: predicated region fallthrough
CT: control target
= control target key end

     0   :  { %v109_v0 = vmov 0.0   ;;  %vm110_vm0 = vmmov 0   ;;  %vm39_vm1 = vcmask 261120   ;;  %s146_s1 = inlined_call_operand.vmem [shape: bf16[32,128], index: 1, kind: input, shape index: {}]   ;;  %s147_s0 = inlined_call_operand.vmem [shape: bf16[8,32], index: 0, kind: input, shape index: {}]   ;;  %s148_s2 = inlined_call_operand.vmem [shape: f32[1,128], index: 2, kind: input, shape index: {}]   ;;  %s149_s3 = inlined_call_operand.vmem [shape: bf16[8,128], index: 3, kind: output, shape index: {}]  }
   0x1   :  { %97 = vmatprep.subr.bf16.mxu0 %v109_v0  ;;  %v107_v1 = vld [vmem:[%s146_s1] sm:$0xff]   ;;  %101 = vmatprep.mubr.msk.bf16.mxu0 %vm110_vm0, %v109_v0  ;;  %v108_v2 = vld [vmem:[%s146_s1 + $0x8] sm:$0xff]  }
   0x2   :  { %98 = vmatpush3.bf16.msra.mxu0 %v107_v1  ;;  %v15_v3 = vld [vmem:[%s147_s0] sm:$0xf] }
   0x3   :  { %99 = vmatprep.subr.bf16.mxu0 %v109_v0  ;;  %v90_v4 = vld [vmem:[%s148_s2] ss:$0 sm:$0xff] }
   0x6   :  { %100 = vmatpush3.bf16.msra.mxu0 %v108_v2 }
   0x9   :  { %102 = vmatmul.mubr.msk.bf16.vlgmr.msra.gmra.mrb[0].mxu0 %vm39_vm1, %v15_v3 }
  0xdc   :  { %v77_v5 = vpop.f32.mrb[0].mxu0 }
  0xdd   :  { %v78_v6 = vadd.f32 %v90_v4, %v77_v5  ;;  %v103_v7 = vpop.f32.mrb[1].mxu0 }
  0xde   :  { %v80_v8 = vpop.f32.mrb[2].mxu0 }
  0xdf   :  { %v83_v9 = vmax.f32 %v78_v6, 0.0  ;;  %v104_v10 = vpop.f32.mrb[3].mxu0 }
  0xe1   :  { %v84_v11 = vpack.c.bf16 %v83_v9, %v83_v9 }
  0xe3   :  { %85 = vst [vmem:[%s149_s3] sm:$0xf] %v84_v11 }

// kernel: tile.50
= control target key start
LH: loop header
LB: loop body
LE: loop exit
PB: predicated region body
PF: predicated region fallthrough
CT: control target
= control target key end

     0   :  { %s22_s0 = inlined_call_operand.vmem [shape: f32[16], index: 0, kind: input, shape index: {}]   ;;  %s23_s1 = inlined_call_operand.vmem [shape: f32[4,16], index: 1, kind: output, shape index: {}]  }
   0x1   :  { %v4_v0 = vld [vmem:[%s22_s0] ss:$0 sm:$0xff] }
   0x2   :  { %5 = vst [vmem:[%s23_s1] sm:$0xf] %v4_v0 }

// kernel: mul.175
= control target key start
LH: loop header
LB: loop body
LE: loop exit
PB: predicated region body
PF: predicated region fallthrough
CT: control target
= control target key end

     0   :  { %vm7_vm0 = vcmask 130048   ;;  %s37_s8 = smov 16   ;;  %s38_s9 = smov 32   ;;  %vm13_vm1 = vcmask 523648   ;;  %vm19_vm2 = vcmask 392448   ;;  %vm25_vm3 = vcmask 261248   ;;  %s55_s0 = inlined_call_operand.vmem [shape: f32[4,16], index: 0, kind: input, shape index: {}]   ;;  %s56_s1 = inlined_call_operand.vmem [shape: f32[64], index: 1, kind: output, shape index: {}]  }
   0x1   :  { %v4_v0 = vld [vmem:[%s55_s0] sm:$0xf]  ;;  %s36_s0 = smov 48  }
   0x2   :  { %5 = vst [vmem:[#allocation1] sm:$0xf] %v4_v0 }
   0x9   :  { %v10_v1 = vld [vmem:[#allocation1 + $0x3] sm:$0x1]   ;;  %v22_v2 = vld [vmem:[#allocation1 + $0x1] sm:$0x1]   ;;  %v6_v3 = vld [vmem:[#allocation1] sm:$0x1]  }
   0xa   :  { %11 = vrot.lane.b32.xlu0 %v10_v1, %s36_s0  ;;  %23 = vrot.lane.b32.xlu1 %v22_v2, %s37_s8  ;;  %v16_v4 = vld [vmem:[#allocation1 + $0x2] sm:$0x1]   ;;  %8 = vst.msk [vmem:[#allocation0] sm:$0x1] %vm7_vm0, %v6_v3  }
   0xe   :  { %17 = vrot.lane.b32.xlu0 %v16_v4, %s38_s9 }
  0x7c   :  { %v12_v5 = vpop.permute.xlu0 %11   ;;  %v24_v6 = vpop.permute.xlu1 %23  }
  0x7d   :  { %14 = vst.msk [vmem:[#allocation0] sm:$0x1] %vm13_vm1, %v12_v5  }
  0x80   :  { %v18_v7 = vpop.permute.xlu0 %17  }
  0x81   :  { %20 = vst.msk [vmem:[#allocation0] sm:$0x1] %vm19_vm2, %v18_v7  }
  0x82   :  { %26 = vst.msk [vmem:[#allocation0] sm:$0x1] %vm25_vm3, %v24_v6  }
  0x89   :  { %v30_v8 = vld [vmem:[#allocation0] sm:$0x1] }
  0x8a   :  { %32 = vst [vmem:[%s56_s1] sm:$0x1] %v30_v8 }

// kernel: tile.55
= control target key start
LH: loop header
LB: loop body
LE: loop exit
PB: predicated region body
PF: predicated region fallthrough
CT: control target
= control target key end

     0   :  { %vm7_vm0 = vcmask 130048   ;;  %s37_s8 = smov 16   ;;  %s38_s9 = smov 32   ;;  %vm13_vm1 = vcmask 523648   ;;  %vm19_vm2 = vcmask 392448   ;;  %vm25_vm3 = vcmask 261248   ;;  %s55_s0 = inlined_call_operand.vmem [shape: f32[4,16], index: 0, kind: input, shape index: {}]   ;;  %s56_s1 = inlined_call_operand.vmem [shape: f32[1,64], index: 1, kind: output, shape index: {}]  }
   0x1   :  { %v4_v0 = vld [vmem:[%s55_s0] sm:$0xf]  ;;  %s36_s0 = smov 48  }
   0x2   :  { %5 = vst [vmem:[#allocation1] sm:$0xf] %v4_v0 }
   0x9   :  { %v10_v1 = vld [vmem:[#allocation1 + $0x3] sm:$0x1]   ;;  %v22_v2 = vld [vmem:[#allocation1 + $0x1] sm:$0x1]   ;;  %v6_v3 = vld [vmem:[#allocation1] sm:$0x1]  }
   0xa   :  { %11 = vrot.lane.b32.xlu0 %v10_v1, %s36_s0  ;;  %23 = vrot.lane.b32.xlu1 %v22_v2, %s37_s8  ;;  %v16_v4 = vld [vmem:[#allocation1 + $0x2] sm:$0x1]   ;;  %8 = vst.msk [vmem:[#allocation0] sm:$0x1] %vm7_vm0, %v6_v3  }
   0xe   :  { %17 = vrot.lane.b32.xlu0 %v16_v4, %s38_s9 }
  0x7c   :  { %v12_v5 = vpop.permute.xlu0 %11   ;;  %v24_v6 = vpop.permute.xlu1 %23  }
  0x7d   :  { %14 = vst.msk [vmem:[#allocation0] sm:$0x1] %vm13_vm1, %v12_v5  }
  0x80   :  { %v18_v7 = vpop.permute.xlu0 %17  }
  0x81   :  { %20 = vst.msk [vmem:[#allocation0] sm:$0x1] %vm19_vm2, %v18_v7  }
  0x82   :  { %26 = vst.msk [vmem:[#allocation0] sm:$0x1] %vm25_vm3, %v24_v6  }
  0x89   :  { %v30_v8 = vld [vmem:[#allocation0] sm:$0x1] }
  0x8a   :  { %32 = vst [vmem:[%s56_s1] sm:$0x1] %v30_v8 }

// kernel: _lambda_.60
= control target key start
LH: loop header
LB: loop body
LE: loop exit
PB: predicated region body
PF: predicated region fallthrough
CT: control target
= control target key end

     0   :  { %v136_v0 = vmov 0.0   ;;  %vm137_vm0 = vmmov 0   ;;  %vm55_vm1 = vcmask 523264   ;;  %vm101_vm2 = vcmask 125952   ;;  %s179_s1 = inlined_call_operand.vmem [shape: bf16[64,16], index: 1, kind: input, shape index: {}]   ;;  %s180_s0 = inlined_call_operand.vmem [shape: bf16[8,64], index: 0, kind: input, shape index: {}]   ;;  %s181_s2 = inlined_call_operand.vmem [shape: f32[1,16], index: 2, kind: input, shape index: {}]   ;;  %s182_s3 = inlined_call_operand.vmem [shape: bf16[8,16], index: 3, kind: output, shape index: {}]  }
   0x1   :  { %118 = vmatprep.subr.bf16.mxu0 %v136_v0  ;;  %v132_v1 = vld [vmem:[%s179_s1] sm:$0xff]   ;;  %126 = vmatprep.mubr.msk.bf16.mxu0 %vm137_vm0, %v136_v0  ;;  %v133_v2 = vld [vmem:[%s179_s1 + $0x8] sm:$0xff]   ;;  %v134_v3 = vld [vmem:[%s179_s1 + $0x10] sm:$0xff]  }
   0x2   :  { %119 = vmatpush3.bf16.msra.mxu0 %v132_v1  ;;  %v135_v4 = vld [vmem:[%s179_s1 + $0x18] sm:$0xff]   ;;  %v15_v5 = vld [vmem:[%s180_s0] sm:$0xf] }
   0x3   :  { %120 = vmatprep.subr.bf16.mxu0 %v136_v0  ;;  %v107_v6 = vld [vmem:[%s181_s2] ss:$0 sm:$0xff] }
   0x6   :  { %121 = vmatpush3.bf16.msra.mxu0 %v133_v2 }
   0x7   :  { %122 = vmatprep.subr.bf16.mxu0 %v136_v0 }
   0xa   :  { %123 = vmatpush3.bf16.msra.mxu0 %v134_v3 }
   0xb   :  { %124 = vmatprep.subr.bf16.mxu0 %v136_v0 }
   0xe   :  { %125 = vmatpush3.bf16.msra.mxu0 %v135_v4 }
  0x11   :  { %127 = vmatmul.mubr.msk.bf16.vlgmr.msra.gmra.mrb[0].mxu0 %vm55_vm1, %v15_v5 }
  0xe4   :  { %v93_v7 = vpop.f32.mrb[0].mxu0 }
  0xe5   :  { %v94_v8 = vadd.f32 %v107_v6, %v93_v7  ;;  %v128_v9 = vpop.f32.mrb[1].mxu0 }
  0xe6   :  { %v96_v10 = vpop.f32.mrb[2].mxu0 }
  0xe7   :  { %v99_v11 = vmax.f32 %v94_v8, 0.0  ;;  %v129_v12 = vpop.f32.mrb[3].mxu0 }
  0xe9   :  { %v100_v13 = vpack.c.bf16 %v99_v11, %v99_v11 }
  0xeb   :  { %102 = vst.msk [vmem:[%s182_s3] sm:$0xf] %vm101_vm2, %v100_v13 }

// kernel: _lambda_.59
= control target key start
LH: loop header
LB: loop body
LE: loop exit
PB: predicated region body
PF: predicated region fallthrough
CT: control target
= control target key end

     0   :  { %v116_v0 = vmov 0.0   ;;  %vm117_vm0 = vmmov 0   ;;  %vm42_vm1 = vcmask 261120   ;;  %vm91_vm2 = vcmask 519168   ;;  %s161_s1 = inlined_call_operand.vmem [shape: bf16[32,64], index: 1, kind: input, shape index: {}]   ;;  %s162_s0 = inlined_call_operand.vmem [shape: bf16[8,32], index: 0, kind: input, shape index: {}]   ;;  %s163_s2 = inlined_call_operand.vmem [shape: f32[1,64], index: 2, kind: input, shape index: {}]   ;;  %s164_s3 = inlined_call_operand.vmem [shape: bf16[8,64], index: 3, kind: input, shape index: {}]   ;;  %s165_s4 = inlined_call_operand.vmem [shape: bf16[8,64], index: 4, kind: output, shape index: {}]  }
   0x1   :  { %104 = vmatprep.subr.bf16.mxu0 %v116_v0  ;;  %v114_v1 = vld [vmem:[%s161_s1] sm:$0xff]   ;;  %108 = vmatprep.mubr.msk.bf16.mxu0 %vm117_vm0, %v116_v0  ;;  %v115_v2 = vld [vmem:[%s161_s1 + $0x8] sm:$0xff]  }
   0x2   :  { %105 = vmatpush3.bf16.msra.mxu0 %v114_v1  ;;  %v18_v3 = vld [vmem:[%s162_s0] sm:$0xf] }
   0x3   :  { %106 = vmatprep.subr.bf16.mxu0 %v116_v0  ;;  %v97_v4 = vld [vmem:[%s163_s2] ss:$0 sm:$0xff] }
   0x4   :  { %v87_v5 = vld [vmem:[%s164_s3] sm:$0xf] }
   0x5   :  { %v88_v8 = vunpack.c.l.bf16 %v87_v5 }
   0x6   :  { %107 = vmatpush3.bf16.msra.mxu0 %v115_v2 }
   0x9   :  { %109 = vmatmul.mubr.msk.bf16.vlgmr.msra.gmra.mrb[0].mxu0 %vm42_vm1, %v18_v3 }
  0xdc   :  { %v80_v6 = vpop.f32.mrb[0].mxu0 }
  0xdd   :  { %v81_v7 = vadd.f32 %v97_v4, %v80_v6  ;;  %v110_v9 = vpop.f32.mrb[1].mxu0 }
  0xde   :  { %v83_v10 = vpop.f32.mrb[2].mxu0 }
  0xdf   :  { %v86_v11 = vmax.f32 %v81_v7, 0.0  ;;  %v111_v12 = vpop.f32.mrb[3].mxu0 }
  0xe1   :  { %v89_v13 = vadd.f32 %v88_v8, %v86_v11 }
  0xe3   :  { %v90_v14 = vpack.c.bf16 %v89_v13, %v89_v13 }
  0xe5   :  { %92 = vst.msk [vmem:[%s165_s4] sm:$0xf] %vm91_vm2, %v90_v14 }

// kernel: tile.58
= control target key start
LH: loop header
LB: loop body
LE: loop exit
PB: predicated region body
PF: predicated region fallthrough
CT: control target
= control target key end

     0   :  { %s22_s0 = inlined_call_operand.vmem [shape: f32[8], index: 0, kind: input, shape index: {}]   ;;  %s23_s1 = inlined_call_operand.vmem [shape: f32[4,8], index: 1, kind: output, shape index: {}]  }
   0x1   :  { %v4_v0 = vld [vmem:[%s22_s0] ss:$0 sm:$0xff] }
   0x2   :  { %5 = vst [vmem:[%s23_s1] sm:$0xf] %v4_v0 }

// kernel: mul.184
= control target key start
LH: loop header
LB: loop body
LE: loop exit
PB: predicated region body
PF: predicated region fallthrough
CT: control target
= control target key end

     0   :  { %vm7_vm0 = vcmask 64512   ;;  %s37_s8 = smov 8   ;;  %s38_s9 = smov 16   ;;  %vm13_vm1 = vcmask 261312   ;;  %vm19_vm2 = vcmask 195712   ;;  %vm25_vm3 = vcmask 130112   ;;  %s55_s0 = inlined_call_operand.vmem [shape: f32[4,8], index: 0, kind: input, shape index: {}]   ;;  %s56_s1 = inlined_call_operand.vmem [shape: f32[32], index: 1, kind: output, shape index: {}]  }
   0x1   :  { %v4_v0 = vld [vmem:[%s55_s0] sm:$0xf]  ;;  %s36_s0 = smov 24  }
   0x2   :  { %5 = vst [vmem:[#allocation1] sm:$0xf] %v4_v0 }
   0x9   :  { %v10_v1 = vld [vmem:[#allocation1 + $0x3] sm:$0x1]   ;;  %v22_v2 = vld [vmem:[#allocation1 + $0x1] sm:$0x1]   ;;  %v6_v3 = vld [vmem:[#allocation1] sm:$0x1]  }
   0xa   :  { %11 = vrot.lane.b32.xlu0 %v10_v1, %s36_s0  ;;  %23 = vrot.lane.b32.xlu1 %v22_v2, %s37_s8  ;;  %v16_v4 = vld [vmem:[#allocation1 + $0x2] sm:$0x1]   ;;  %8 = vst.msk [vmem:[#allocation0] sm:$0x1] %vm7_vm0, %v6_v3  }
   0xe   :  { %17 = vrot.lane.b32.xlu0 %v16_v4, %s38_s9 }
  0x7c   :  { %v12_v5 = vpop.permute.xlu0 %11   ;;  %v24_v6 = vpop.permute.xlu1 %23  }
  0x7d   :  { %14 = vst.msk [vmem:[#allocation0] sm:$0x1] %vm13_vm1, %v12_v5  }
  0x80   :  { %v18_v7 = vpop.permute.xlu0 %17  }
  0x81   :  { %20 = vst.msk [vmem:[#allocation0] sm:$0x1] %vm19_vm2, %v18_v7  }
  0x82   :  { %26 = vst.msk [vmem:[#allocation0] sm:$0x1] %vm25_vm3, %v24_v6  }
  0x89   :  { %v30_v8 = vld [vmem:[#allocation0] sm:$0x1] }
  0x8a   :  { %32 = vst [vmem:[%s56_s1] sm:$0x1] %v30_v8 }

// kernel: tile.63
= control target key start
LH: loop header
LB: loop body
LE: loop exit
PB: predicated region body
PF: predicated region fallthrough
CT: control target
= control target key end

     0   :  { %vm7_vm0 = vcmask 64512   ;;  %s37_s8 = smov 8   ;;  %s38_s9 = smov 16   ;;  %vm13_vm1 = vcmask 261312   ;;  %vm19_vm2 = vcmask 195712   ;;  %vm25_vm3 = vcmask 130112   ;;  %s55_s0 = inlined_call_operand.vmem [shape: f32[4,8], index: 0, kind: input, shape index: {}]   ;;  %s56_s1 = inlined_call_operand.vmem [shape: f32[1,32], index: 1, kind: output, shape index: {}]  }
   0x1   :  { %v4_v0 = vld [vmem:[%s55_s0] sm:$0xf]  ;;  %s36_s0 = smov 24  }
   0x2   :  { %5 = vst [vmem:[#allocation1] sm:$0xf] %v4_v0 }
   0x9   :  { %v10_v1 = vld [vmem:[#allocation1 + $0x3] sm:$0x1]   ;;  %v22_v2 = vld [vmem:[#allocation1 + $0x1] sm:$0x1]   ;;  %v6_v3 = vld [vmem:[#allocation1] sm:$0x1]  }
   0xa   :  { %11 = vrot.lane.b32.xlu0 %v10_v1, %s36_s0  ;;  %23 = vrot.lane.b32.xlu1 %v22_v2, %s37_s8  ;;  %v16_v4 = vld [vmem:[#allocation1 + $0x2] sm:$0x1]   ;;  %8 = vst.msk [vmem:[#allocation0] sm:$0x1] %vm7_vm0, %v6_v3  }
   0xe   :  { %17 = vrot.lane.b32.xlu0 %v16_v4, %s38_s9 }
  0x7c   :  { %v12_v5 = vpop.permute.xlu0 %11   ;;  %v24_v6 = vpop.permute.xlu1 %23  }
  0x7d   :  { %14 = vst.msk [vmem:[#allocation0] sm:$0x1] %vm13_vm1, %v12_v5  }
  0x80   :  { %v18_v7 = vpop.permute.xlu0 %17  }
  0x81   :  { %20 = vst.msk [vmem:[#allocation0] sm:$0x1] %vm19_vm2, %v18_v7  }
  0x82   :  { %26 = vst.msk [vmem:[#allocation0] sm:$0x1] %vm25_vm3, %v24_v6  }
  0x89   :  { %v30_v8 = vld [vmem:[#allocation0] sm:$0x1] }
  0x8a   :  { %32 = vst [vmem:[%s56_s1] sm:$0x1] %v30_v8 }

// kernel: _lambda_.61
= control target key start
LH: loop header
LB: loop body
LE: loop exit
PB: predicated region body
PF: predicated region fallthrough
CT: control target
= control target key end

     0   :  { %v97_v0 = vmov 0.0   ;;  %vm98_vm0 = vmmov 0   ;;  %vm31_vm1 = vcmask 130048   ;;  %vm77_vm2 = vcmask 519168   ;;  %s131_s1 = inlined_call_operand.vmem [shape: bf16[16,64], index: 1, kind: input, shape index: {}]   ;;  %s132_s0 = inlined_call_operand.vmem [shape: bf16[8,16], index: 0, kind: input, shape index: {}]   ;;  %s133_s2 = inlined_call_operand.vmem [shape: f32[1,64], index: 2, kind: input, shape index: {}]   ;;  %s134_s3 = inlined_call_operand.vmem [shape: bf16[8,64], index: 3, kind: output, shape index: {}]  }
   0x1   :  { %88 = vmatprep.subr.bf16.mxu0 %v97_v0  ;;  %v96_v1 = vld [vmem:[%s131_s1] sm:$0xff]   ;;  %90 = vmatprep.mubr.msk.bf16.mxu0 %vm98_vm0, %v97_v0 }
   0x2   :  { %89 = vmatpush3.bf16.msra.mxu0 %v96_v1  ;;  %v15_v2 = vld [vmem:[%s132_s0] sm:$0xf] }
   0x3   :  { %v83_v3 = vld [vmem:[%s133_s2] ss:$0 sm:$0xff] }
   0x5   :  { %91 = vmatmul.mubr.msk.bf16.vlgmr.msra.gmra.mrb[0].mxu0 %vm31_vm1, %v15_v2 }
  0xd8   :  { %v69_v4 = vpop.f32.mrb[0].mxu0 }
  0xd9   :  { %v70_v5 = vadd.f32 %v83_v3, %v69_v4  ;;  %v92_v6 = vpop.f32.mrb[1].mxu0 }
  0xda   :  { %v72_v7 = vpop.f32.mrb[2].mxu0 }
  0xdb   :  { %v75_v8 = vmax.f32 %v70_v5, 0.0  ;;  %v93_v9 = vpop.f32.mrb[3].mxu0 }
  0xdd   :  { %v76_v10 = vpack.c.bf16 %v75_v8, %v75_v8 }
  0xdf   :  { %78 = vst.msk [vmem:[%s134_s3] sm:$0xf] %vm77_vm2, %v76_v10 }

// kernel: _lambda_.64
= control target key start
LH: loop header
LB: loop body
LE: loop exit
PB: predicated region body
PF: predicated region fallthrough
CT: control target
= control target key end

     0   :  { %s375_s12 = smov 0   ;;  %s398_s0 = inlined_call_operand.vmem [shape: bf16[32,8], index: 0, kind: input, shape index: {}]   ;;  %s399_s1 = inlined_call_operand.vmem [shape: bf16[8,32], index: 1, kind: input, shape index: {}]   ;;  %s400_s2 = inlined_call_operand.vmem [shape: f32[1,32], index: 2, kind: input, shape index: {}]   ;;  %s401_s3 = inlined_call_operand.vmem [shape: bf16[32,32], index: 3, kind: output, shape index: {}]  }
   0x1 LB: > { %s308_s13 = sadd.s32 4294967295, %s351_s12   ;;  %p312_p0 = scmp.ge.s32.totalorder %s351_s12, 1  ;;  %s351_s12 = sphi %s375_s12, %s13_s12  }
   0x2   : > { %p138_p1 = scmp.lt.s32.totalorder %s351_s12, 3 }
   0x4   : > { %p139_p2 = pnand %p312_p0, %p138_p1 }
   0x5   : > { %v177_v0 = vld [vmem:[%s399_s1] sm:$0xf] (!%p139_p2)  ;;  %vm194_vm0 = vcmask (!%p139_p2), 1043456   ;;  %s313_s16 = sshll.u32 (!%p139_p2), %s308_s13, 1  ;;  %v353_v1 = vmov (!%p139_p2), 0.0   ;;  %vm354_vm1 = vmmov (!%p139_p2), 0  }
   0x6   : > { %142 = sbr.rel (%p139_p2) target bundleno = 238 (0xee), region = 32  ;;  %328 = vmatprep.subr.bf16.mxu0 (!%p139_p2), %v353_v1  ;;  %v196_v2 = vsel (!%p139_p2), %vm194_vm0, %v177_v0, 0  ;;  %330 = vmatprep.mubr.msk.bf16.mxu0 (!%p139_p2), %vm354_vm1, %v353_v1  ;;  %p163_p3 = scmp.lt.s32.totalorder (!%p139_p2), %s313_s16, 3  ;;  %vm190_vm2 = vcmask (!%p139_p2), 64512   ;;  %v317_v4 = vld [vmem:[%s400_s2] ss:$0 sm:$0xff] (!%p139_p2) }
   0x7   : > { %329 = vmatpush3.bf16.msra.mxu0 (!%p139_p2), %v196_v2  ;;  %vm249_vm3 = vcmask (!%p139_p2), 257024  }
   0xd   : > { %s403_s16 = smov (!%p163_p3, %s313_s16), 3 }
   0xe   : > { %s314_s17 = sshll.u32 %s403_s16, 2 }
   0xf   : > { %s166_s20 = scalar_lea.vmem %s398_s0, %s314_s17  ;;  %s172_s25 = scalar_lea.vmem %s401_s3, %s314_s17 }
  0x10   : > { %v344_v3 = vld [vmem:[%s166_s20] sm:$0xff]  }
  0x11   : > { %331 = vmatmul.mubr.msk.bf16.vlgmr.msra.gmra.mrb[0].mxu0 %vm190_vm2, %v344_v3 }
  0xe4   : > { %v232_v5 = vpop.f32.mrb[0].mxu0 }
  0xe5   : > { %v233_v6 = vadd.f32 %v317_v4, %v232_v5  ;;  %v332_v7 = vpop.f32.mrb[1].mxu0 }
  0xe6   : > { %v235_v8 = vpop.f32.mrb[2].mxu0 }
  0xe7   : > { %v239_v9 = vmax.f32 %v233_v6, 0.0  ;;  %v236_v10 = vadd.f32 %v317_v4, %v235_v8  ;;  %v333_v11 = vpop.f32.mrb[3].mxu0 }
  0xe9   : > { %v324_v12 = vpack.c.bf16 %v239_v9, %v239_v9  ;;  %v240_v13 = vmax.f32 %v236_v10, 0.0 }
  0xeb   : > { %250 = vst.msk [vmem:[%s172_s25] sm:$0xf] %vm249_vm3, %v324_v12  ;;  %v325_v14 = vpack.c.bf16 %v240_v13, %v240_v13 }
  0xed   : > { %251 = vst.msk [vmem:[%s172_s25 + $0x4] sm:$0xf] %vm249_vm3, %v325_v14 }
  0xee PF: > { %s13_s12 = sadd.s32 1, %s351_s12  }
  0xef   : > { %p10_p4 = scmp.ge.s32.totalorder %s13_s12, 4  }
  0xf1   :  { %12 = sbr.rel (!%p10_p4) target bundleno = 1 (0x1), region = 62 }

// kernel: _lambda_.62
= control target key start
LH: loop header
LB: loop body
LE: loop exit
PB: predicated region body
PF: predicated region fallthrough
CT: control target
= control target key end

     0   :  { %s458_s15 = smov 0   ;;  %s484_s0 = inlined_call_operand.vmem [shape: bf16[32,16], index: 0, kind: input, shape index: {}]   ;;  %s485_s1 = inlined_call_operand.vmem [shape: bf16[16,32], index: 1, kind: input, shape index: {}]   ;;  %s486_s2 = inlined_call_operand.vmem [shape: f32[1,32], index: 2, kind: input, shape index: {}]   ;;  %s487_s3 = inlined_call_operand.vmem [shape: bf16[32,32], index: 3, kind: input, shape index: {}]   ;;  %s488_s4 = inlined_call_operand.vmem [shape: bf16[32,32], index: 4, kind: output, shape index: {}]  }
   0x1 LB: > { %s378_s16 = sadd.s32 4294967295, %s429_s15   ;;  %p382_p0 = scmp.ge.s32.totalorder %s429_s15, 1  ;;  %s429_s15 = sphi %s458_s15, %s14_s15  }
   0x2   : > { %p174_p1 = scmp.lt.s32.totalorder %s429_s15, 3 }
   0x4   : > { %p175_p2 = pnand %p382_p0, %p174_p1 }
   0x5   : > { %v421_v0 = vld [vmem:[%s485_s1] sm:$0xff] (!%p175_p2)   ;;  %v431_v1 = vmov (!%p175_p2), 0.0   ;;  %s383_s19 = sshll.u32 (!%p175_p2), %s378_s16, 1  ;;  %vm432_vm0 = vmmov (!%p175_p2), 0   ;;  %vm246_vm1 = vcmask (!%p175_p2), 130048   ;;  %vm307_vm2 = vcmask (!%p175_p2), 257024  }
   0x6   : > { %178 = sbr.rel (%p175_p2) target bundleno = 240 (0xf0), region = 36  ;;  %405 = vmatprep.subr.bf16.mxu0 (!%p175_p2), %v431_v1  ;;  %407 = vmatprep.mubr.msk.bf16.mxu0 (!%p175_p2), %vm432_vm0, %v431_v1  ;;  %p206_p3 = scmp.lt.s32.totalorder (!%p175_p2), %s383_s19, 3  ;;  %v389_v3 = vld [vmem:[%s486_s2] ss:$0 sm:$0xff] (!%p175_p2) }
   0x7   : > { %406 = vmatpush3.bf16.msra.mxu0 (!%p175_p2), %v421_v0 }
   0xd   : > { %s490_s19 = smov (!%p206_p3, %s383_s19), 3 }
   0xe   : > { %s384_s20 = sshll.u32 %s490_s19, 2 }
   0xf   : > { %s209_s23 = scalar_lea.vmem %s484_s0, %s384_s20  ;;  %s215_s26 = scalar_lea.vmem %s487_s3, %s384_s20 }
  0x10   : > { %v422_v2 = vld [vmem:[%s209_s23] sm:$0xff]   ;;  %s221_s5 = scalar_lea.vmem %s488_s4, %s384_s20 }
  0x11   : > { %408 = vmatmul.mubr.msk.bf16.vlgmr.msra.gmra.mrb[0].mxu0 %vm246_vm1, %v422_v2  ;;  %v400_v4 = vld [vmem:[%s215_s26] sm:$0xff]  }
  0x12   : > { %v401_v7 = vunpack.c.l.bf16 %v400_v4  ;;  %v402_v12 = vunpack.c.h.bf16 %v400_v4 }
  0xe4   : > { %v284_v5 = vpop.f32.mrb[0].mxu0 }
  0xe5   : > { %v285_v6 = vadd.f32 %v389_v3, %v284_v5  ;;  %v409_v8 = vpop.f32.mrb[1].mxu0 }
  0xe6   : > { %v287_v9 = vpop.f32.mrb[2].mxu0 }
  0xe7   : > { %v291_v10 = vmax.f32 %v285_v6, 0.0  ;;  %v288_v11 = vadd.f32 %v389_v3, %v287_v9  ;;  %v410_v13 = vpop.f32.mrb[3].mxu0 }
  0xe9   : > { %v297_v14 = vadd.f32 %v401_v7, %v291_v10  ;;  %v292_v15 = vmax.f32 %v288_v11, 0.0 }
  0xeb   : > { %v397_v16 = vpack.c.bf16 %v297_v14, %v297_v14  ;;  %v298_v17 = vadd.f32 %v402_v12, %v292_v15 }
  0xed   : > { %308 = vst.msk [vmem:[%s221_s5] sm:$0xf] %vm307_vm2, %v397_v16  ;;  %v398_v18 = vpack.c.bf16 %v298_v17, %v298_v17 }
  0xef   : > { %309 = vst.msk [vmem:[%s221_s5 + $0x4] sm:$0xf] %vm307_vm2, %v398_v18 }
  0xf0 PF: > { %s14_s15 = sadd.s32 1, %s429_s15  }
  0xf1   : > { %p11_p4 = scmp.ge.s32.totalorder %s14_s15, 4  }
  0xf3   :  { %13 = sbr.rel (!%p11_p4) target bundleno = 1 (0x1), region = 69 }

// kernel: _lambda_.63
= control target key start
LH: loop header
LB: loop body
LE: loop exit
PB: predicated region body
PF: predicated region fallthrough
CT: control target
= control target key end

     0   :  { %s393_s12 = smov 0   ;;  %s419_s0 = inlined_call_operand.vmem [shape: bf16[32,32], index: 0, kind: input, shape index: {}]   ;;  %s420_s1 = inlined_call_operand.vmem [shape: bf16[32,8], index: 1, kind: input, shape index: {}]   ;;  %s421_s2 = inlined_call_operand.vmem [shape: f32[1,8], index: 2, kind: input, shape index: {}]   ;;  %s422_s3 = inlined_call_operand.vmem [shape: bf16[32,8], index: 3, kind: output, shape index: {}]  }
   0x1 LB: > { %s319_s13 = sadd.s32 4294967295, %s369_s12   ;;  %p323_p0 = scmp.ge.s32.totalorder %s369_s12, 1  ;;  %s369_s12 = sphi %s393_s12, %s13_s12  }
   0x2   : > { %p138_p1 = scmp.lt.s32.totalorder %s369_s12, 3 }
   0x4   : > { %p139_p2 = pnand %p323_p0, %p138_p1 }
   0x5   : > { %v360_v0 = vld [vmem:[%s420_s1] sm:$0xff] (!%p139_p2)   ;;  %v371_v1 = vmov (!%p139_p2), 0.0   ;;  %v361_v2 = vld [vmem:[%s420_s1 + $0x8] sm:$0xff] (!%p139_p2)   ;;  %vm372_vm0 = vmmov (!%p139_p2), 0   ;;  %s324_s18 = sshll.u32 (!%p139_p2), %s319_s13, 1  ;;  %vm205_vm1 = vcmask (!%p139_p2), 261120  }
   0x6   : > { %142 = sbr.rel (%p139_p2) target bundleno = 238 (0xee), region = 32  ;;  %342 = vmatprep.subr.bf16.mxu0 (!%p139_p2), %v371_v1  ;;  %346 = vmatprep.mubr.msk.bf16.mxu0 (!%p139_p2), %vm372_vm0, %v371_v1  ;;  %p163_p3 = scmp.lt.s32.totalorder (!%p139_p2), %s324_s18, 3  ;;  %v328_v4 = vld [vmem:[%s421_s2] ss:$0 sm:$0xff] (!%p139_p2)  ;;  %vm260_vm2 = vcmask (!%p139_p2), 60416  }
   0x7   : > { %343 = vmatpush3.bf16.msra.mxu0 (!%p139_p2), %v360_v0 }
   0x8   : > { %344 = vmatprep.subr.bf16.mxu0 (!%p139_p2), %v371_v1 }
   0xb   : > { %345 = vmatpush3.bf16.msra.mxu0 (!%p139_p2), %v361_v2 }
   0xd   : > { %s424_s18 = smov (!%p163_p3, %s324_s18), 3 }
   0xe   : > { %s325_s19 = sshll.u32 %s424_s18, 2 }
   0xf   : > { %s166_s22 = scalar_lea.vmem %s419_s0, %s325_s19  ;;  %s172_s27 = scalar_lea.vmem %s422_s3, %s325_s19 }
  0x10   : > { %v362_v3 = vld [vmem:[%s166_s22] sm:$0xff]  }
  0x11   : > { %347 = vmatmul.mubr.msk.bf16.vlgmr.msra.gmra.mrb[0].mxu0 %vm205_vm1, %v362_v3 }
  0xe4   : > { %v243_v5 = vpop.f32.mrb[0].mxu0 }
  0xe5   : > { %v244_v6 = vadd.f32 %v328_v4, %v243_v5  ;;  %v348_v7 = vpop.f32.mrb[1].mxu0 }
  0xe6   : > { %v246_v8 = vpop.f32.mrb[2].mxu0 }
  0xe7   : > { %v250_v9 = vmax.f32 %v244_v6, 0.0  ;;  %v247_v10 = vadd.f32 %v328_v4, %v246_v8  ;;  %v349_v11 = vpop.f32.mrb[3].mxu0 }
  0xe9   : > { %v337_v12 = vpack.c.bf16 %v250_v9, %v250_v9  ;;  %v251_v13 = vmax.f32 %v247_v10, 0.0 }
  0xeb   : > { %261 = vst.msk [vmem:[%s172_s27] sm:$0xf] %vm260_vm2, %v337_v12  ;;  %v338_v14 = vpack.c.bf16 %v251_v13, %v251_v13 }
  0xed   : > { %262 = vst.msk [vmem:[%s172_s27 + $0x4] sm:$0xf] %vm260_vm2, %v338_v14 }
  0xee PF: > { %s13_s12 = sadd.s32 1, %s369_s12  }
  0xef   : > { %p10_p4 = scmp.ge.s32.totalorder %s13_s12, 4  }
  0xf1   :  { %12 = sbr.rel (!%p10_p4) target bundleno = 1 (0x1), region = 62 }

// kernel: _lambda_.65
= control target key start
LH: loop header
LB: loop body
LE: loop exit
PB: predicated region body
PF: predicated region fallthrough
CT: control target
= control target key end

     0   :  { %s604_s15 = smov 0   ;;  %s643_s0 = inlined_call_operand.vmem [shape: bf16[128,8], index: 0, kind: input, shape index: {}]   ;;  %s644_s1 = inlined_call_operand.vmem [shape: bf16[8,16], index: 1, kind: input, shape index: {}]   ;;  %s645_s2 = inlined_call_operand.vmem [shape: f32[1,16], index: 2, kind: input, shape index: {}]   ;;  %s646_s3 = inlined_call_operand.vmem [shape: bf16[128,16], index: 3, kind: input, shape index: {}]   ;;  %s647_s4 = inlined_call_operand.vmem [shape: bf16[128,16], index: 4, kind: output, shape index: {}]  }
   0x1 LB: > { %s483_s16 = sadd.s32 4294967295, %s577_s15   ;;  %p487_p0 = scmp.ge.s32.totalorder %s577_s15, 1  ;;  %s577_s15 = sphi %s604_s15, %s14_s15  }
   0x2   : > { %p174_p1 = scmp.lt.s32.totalorder %s577_s15, 3 }
   0x4   : > { %p175_p2 = pnand %p487_p0, %p174_p1 }
   0x5   : > { %v232_v0 = vld [vmem:[%s644_s1] sm:$0xf] (!%p175_p2)  ;;  %vm273_vm0 = vcmask (!%p175_p2), 1043456   ;;  %s488_s19 = sshll.u32 (!%p175_p2), %s483_s16, 3  ;;  %vm260_vm1 = vcmask (!%p175_p2), 64512   ;;  %vm406_vm2 = vcmask (!%p175_p2), 125952  }
   0x6   : > { %178 = sbr.rel (%p175_p2) target bundleno = 242 (0xf2), region = 36  ;;  %557 = vmatprep.subr.msk.bf16.mxu0 (!%p175_p2), %vm273_vm0, %v232_v0  ;;  %558 = vmatprep.subr.msk.bf16.mxu1 (!%p175_p2), %vm273_vm0, %v232_v0  ;;  %v275_v1 = vsel (!%p175_p2), %vm273_vm0, %v232_v0, 0  ;;  %p206_p3 = scmp.lt.s32.totalorder (!%p175_p2), %s488_s19, 15  ;;  %v494_v9 = vld [vmem:[%s645_s2] ss:$0 sm:$0xff] (!%p175_p2) }
   0x7   : > { %546 = vmatpush3.bf16.msra.mxu0 (!%p175_p2), %v275_v1  ;;  %556 = vmatpush3.bf16.msra.mxu1 (!%p175_p2), %v275_v1 }
   0xd   : > { %s649_s19 = smov (!%p206_p3, %s488_s19), 15 }
   0xe   : > { %s615_s20 = sshll.u32 %s649_s19, 2 }
   0xf   : > { %s209_s23 = scalar_lea.vmem %s643_s0, %s615_s20  ;;  %s215_s26 = scalar_lea.vmem %s646_s3, %s615_s20 }
  0x10   : > { %v567_v2 = vld [vmem:[%s209_s23] sm:$0xff]   ;;  %v568_v3 = vld [vmem:[%s209_s23 + $0x10] sm:$0xff]   ;;  %v569_v4 = vld [vmem:[%s209_s23 + $0x8] sm:$0xff]   ;;  %s221_s5 = scalar_lea.vmem %s647_s4, %s615_s20 }
  0x11   : > { %547 = vmatprep.mubr.msk.bf16.mxu0 %vm260_vm1, %v567_v2  ;;  %551 = vmatprep.mubr.msk.bf16.mxu1 %vm260_vm1, %v568_v3  ;;  %v570_v5 = vld [vmem:[%s209_s23 + $0x18] sm:$0xff]   ;;  %v537_v6 = vld [vmem:[%s215_s26 + $0x8] sm:$0xff]   ;;  %v522_v8 = vld [vmem:[%s215_s26] sm:$0xff]  }
  0x12   : > { %548 = vmatmul.mubr.msk.bf16.vlgmr.msra.gmra.mrb[0].mxu0 %vm260_vm1, %v569_v4  ;;  %552 = vmatmul.mubr.msk.bf16.vlgmr.msra.gmra.mrb[0].mxu1 %vm260_vm1, %v570_v5  ;;  %v539_v7 = vld [vmem:[%s215_s26 + $0x18] sm:$0xff]   ;;  %v538_v10 = vld [vmem:[%s215_s26 + $0x10] sm:$0xff]   ;;  %v527_v12 = vunpack.c.l.bf16 %v537_v6  ;;  %v523_v14 = vunpack.c.l.bf16 %v522_v8  ;;  %v528_v19 = vunpack.c.h.bf16 %v537_v6  ;;  %v524_v25 = vunpack.c.h.bf16 %v522_v8 }
  0x13   : > { %v535_v13 = vunpack.c.l.bf16 %v539_v7  ;;  %v531_v18 = vunpack.c.l.bf16 %v538_v10  ;;  %v536_v20 = vunpack.c.h.bf16 %v539_v7  ;;  %v532_v31 = vunpack.c.h.bf16 %v538_v10 }
  0xe5   : > { %v549_v11 = vpop.f32.mrb[0].mxu0  ;;  %v553_v16 = vpop.f32.mrb[0].mxu1 }
  0xe6   : > { %v320_v15 = vadd.f32 %v549_v11, %v494_v9  ;;  %v311_v17 = vpop.f32.mrb[1].mxu0  ;;  %v336_v21 = vadd.f32 %v553_v16, %v494_v9  ;;  %v327_v23 = vpop.f32.mrb[1].mxu1 }
  0xe7   : > { %v312_v22 = vadd.f32 %v494_v9, %v311_v17  ;;  %v550_v24 = vpop.f32.mrb[2].mxu0  ;;  %v328_v27 = vadd.f32 %v494_v9, %v327_v23  ;;  %v554_v29 = vpop.f32.mrb[2].mxu1 }
  0xe8   : > { %v344_v26 = vmax.f32 %v320_v15, 0.0  ;;  %v323_v28 = vadd.f32 %v550_v24, %v494_v9  ;;  %v314_v30 = vpop.f32.mrb[3].mxu0  ;;  %v348_v32 = vmax.f32 %v336_v21, 0.0  ;;  %v339_v34 = vadd.f32 %v554_v29, %v494_v9  ;;  %v330_v36 = vpop.f32.mrb[3].mxu1 }
  0xe9   : > { %v342_v33 = vmax.f32 %v312_v22, 0.0  ;;  %v315_v35 = vadd.f32 %v494_v9, %v314_v30  ;;  %v346_v38 = vmax.f32 %v328_v27, 0.0  ;;  %v331_v40 = vadd.f32 %v494_v9, %v330_v36 }
  0xea   : > { %v368_v37 = vadd.f32 %v527_v12, %v344_v26  ;;  %v345_v39 = vmax.f32 %v323_v28, 0.0  ;;  %v372_v41 = vadd.f32 %v535_v13, %v348_v32  ;;  %v349_v43 = vmax.f32 %v339_v34, 0.0 }
  0xeb   : > { %v366_v42 = vadd.f32 %v523_v14, %v342_v33  ;;  %v343_v44 = vmax.f32 %v315_v35, 0.0  ;;  %v370_v46 = vadd.f32 %v531_v18, %v346_v38  ;;  %v347_v48 = vmax.f32 %v331_v40, 0.0 }
  0xec   : > { %v515_v45 = vpack.c.bf16 %v368_v37, %v368_v37  ;;  %v369_v47 = vadd.f32 %v528_v19, %v345_v39  ;;  %v519_v49 = vpack.c.bf16 %v372_v41, %v372_v41  ;;  %v373_v51 = vadd.f32 %v536_v20, %v349_v43 }
  0xed   : > { %v513_v50 = vpack.c.bf16 %v366_v42, %v366_v42  ;;  %v367_v52 = vadd.f32 %v524_v25, %v343_v44  ;;  %v517_v53 = vpack.c.bf16 %v370_v46, %v370_v46  ;;  %v371_v55 = vadd.f32 %v532_v31, %v347_v48 }
  0xee   : > { %409 = vst.msk [vmem:[%s221_s5 + $0x8] sm:$0xf] %vm406_vm2, %v515_v45  ;;  %v516_v54 = vpack.c.bf16 %v369_v47, %v369_v47  ;;  %413 = vst.msk [vmem:[%s221_s5 + $0x18] sm:$0xf] %vm406_vm2, %v519_v49  ;;  %v520_v56 = vpack.c.bf16 %v373_v51, %v373_v51 }
  0xef   : > { %407 = vst.msk [vmem:[%s221_s5] sm:$0xf] %vm406_vm2, %v513_v50  ;;  %v514_v57 = vpack.c.bf16 %v367_v52, %v367_v52  ;;  %411 = vst.msk [vmem:[%s221_s5 + $0x10] sm:$0xf] %vm406_vm2, %v517_v53  ;;  %v518_v58 = vpack.c.bf16 %v371_v55, %v371_v55 }
  0xf0   : > { %410 = vst.msk [vmem:[%s221_s5 + $0xc] sm:$0xf] %vm406_vm2, %v516_v54  ;;  %414 = vst.msk [vmem:[%s221_s5 + $0x1c] sm:$0xf] %vm406_vm2, %v520_v56 }
  0xf1   : > { %408 = vst.msk [vmem:[%s221_s5 + $0x4] sm:$0xf] %vm406_vm2, %v514_v57  ;;  %412 = vst.msk [vmem:[%s221_s5 + $0x14] sm:$0xf] %vm406_vm2, %v518_v58 }
  0xf2 PF: > { %s14_s15 = sadd.s32 1, %s577_s15  }
  0xf3   : > { %p11_p4 = scmp.ge.s32.totalorder %s14_s15, 4  }
  0xf5   :  { %13 = sbr.rel (!%p11_p4) target bundleno = 1 (0x1), region = 69 }

// kernel: _lambda_.67
= control target key start
LH: loop header
LB: loop body
LE: loop exit
PB: predicated region body
PF: predicated region fallthrough
CT: control target
= control target key end

     0   :  { %s493_s12 = smov 0   ;;  %s524_s0 = inlined_call_operand.vmem [shape: bf16[128,8], index: 0, kind: input, shape index: {}]   ;;  %s525_s1 = inlined_call_operand.vmem [shape: bf16[8,32], index: 1, kind: input, shape index: {}]   ;;  %s526_s2 = inlined_call_operand.vmem [shape: f32[1,32], index: 2, kind: input, shape index: {}]   ;;  %s527_s3 = inlined_call_operand.vmem [shape: bf16[128,32], index: 3, kind: output, shape index: {}]  }
   0x1 LB: > { %s398_s13 = sadd.s32 4294967295, %s471_s12   ;;  %p402_p0 = scmp.ge.s32.totalorder %s471_s12, 1  ;;  %s471_s12 = sphi %s493_s12, %s13_s12  }
   0x2   : > { %p138_p1 = scmp.lt.s32.totalorder %s471_s12, 3 }
   0x4   : > { %p139_p2 = pnand %p402_p0, %p138_p1 }
   0x5   : > { %v183_v0 = vld [vmem:[%s525_s1] sm:$0xf] (!%p139_p2)  ;;  %vm224_vm0 = vcmask (!%p139_p2), 1043456   ;;  %s403_s16 = sshll.u32 (!%p139_p2), %s398_s13, 3  ;;  %vm211_vm1 = vcmask (!%p139_p2), 64512   ;;  %vm333_vm2 = vcmask (!%p139_p2), 257024  }
   0x6   : > { %142 = sbr.rel (%p139_p2) target bundleno = 240 (0xf0), region = 32  ;;  %451 = vmatprep.subr.msk.bf16.mxu0 (!%p139_p2), %vm224_vm0, %v183_v0  ;;  %452 = vmatprep.subr.msk.bf16.mxu1 (!%p139_p2), %vm224_vm0, %v183_v0  ;;  %v226_v1 = vsel (!%p139_p2), %vm224_vm0, %v183_v0, 0  ;;  %p163_p3 = scmp.lt.s32.totalorder (!%p139_p2), %s403_s16, 15  ;;  %v407_v6 = vld [vmem:[%s526_s2] ss:$0 sm:$0xff] (!%p139_p2) }
   0x7   : > { %440 = vmatpush3.bf16.msra.mxu0 (!%p139_p2), %v226_v1  ;;  %450 = vmatpush3.bf16.msra.mxu1 (!%p139_p2), %v226_v1 }
   0xd   : > { %s529_s16 = smov (!%p163_p3, %s403_s16), 15 }
   0xe   : > { %s404_s17 = sshll.u32 %s529_s16, 2 }
   0xf   : > { %s166_s20 = scalar_lea.vmem %s524_s0, %s404_s17  ;;  %s172_s25 = scalar_lea.vmem %s527_s3, %s404_s17 }
  0x10   : > { %v461_v2 = vld [vmem:[%s166_s20] sm:$0xff]   ;;  %v462_v3 = vld [vmem:[%s166_s20 + $0x10] sm:$0xff]   ;;  %v463_v4 = vld [vmem:[%s166_s20 + $0x8] sm:$0xff]  }
  0x11   : > { %441 = vmatprep.mubr.msk.bf16.mxu0 %vm211_vm1, %v461_v2  ;;  %445 = vmatprep.mubr.msk.bf16.mxu1 %vm211_vm1, %v462_v3  ;;  %v464_v5 = vld [vmem:[%s166_s20 + $0x18] sm:$0xff]  }
  0x12   : > { %442 = vmatmul.mubr.msk.bf16.vlgmr.msra.gmra.mrb[0].mxu0 %vm211_vm1, %v463_v4  ;;  %446 = vmatmul.mubr.msk.bf16.vlgmr.msra.gmra.mrb[0].mxu1 %vm211_vm1, %v464_v5 }
  0xe5   : > { %v443_v7 = vpop.f32.mrb[0].mxu0  ;;  %v447_v9 = vpop.f32.mrb[0].mxu1 }
  0xe6   : > { %v271_v8 = vadd.f32 %v443_v7, %v407_v6  ;;  %v262_v10 = vpop.f32.mrb[1].mxu0  ;;  %v287_v11 = vadd.f32 %v447_v9, %v407_v6  ;;  %v278_v13 = vpop.f32.mrb[1].mxu1 }
  0xe7   : > { %v263_v12 = vadd.f32 %v407_v6, %v262_v10  ;;  %v444_v14 = vpop.f32.mrb[2].mxu0  ;;  %v279_v16 = vadd.f32 %v407_v6, %v278_v13  ;;  %v448_v18 = vpop.f32.mrb[2].mxu1 }
  0xe8   : > { %v295_v15 = vmax.f32 %v271_v8, 0.0  ;;  %v274_v17 = vadd.f32 %v444_v14, %v407_v6  ;;  %v265_v19 = vpop.f32.mrb[3].mxu0  ;;  %v299_v20 = vmax.f32 %v287_v11, 0.0  ;;  %v290_v22 = vadd.f32 %v448_v18, %v407_v6  ;;  %v281_v24 = vpop.f32.mrb[3].mxu1 }
  0xe9   : > { %v293_v21 = vmax.f32 %v263_v12, 0.0  ;;  %v266_v23 = vadd.f32 %v407_v6, %v265_v19  ;;  %v297_v26 = vmax.f32 %v279_v16, 0.0  ;;  %v282_v28 = vadd.f32 %v407_v6, %v281_v24 }
  0xea   : > { %v428_v25 = vpack.c.bf16 %v295_v15, %v295_v15  ;;  %v296_v27 = vmax.f32 %v274_v17, 0.0  ;;  %v432_v29 = vpack.c.bf16 %v299_v20, %v299_v20  ;;  %v300_v31 = vmax.f32 %v290_v22, 0.0 }
  0xeb   : > { %v426_v30 = vpack.c.bf16 %v293_v21, %v293_v21  ;;  %v294_v32 = vmax.f32 %v266_v23, 0.0  ;;  %v430_v33 = vpack.c.bf16 %v297_v26, %v297_v26  ;;  %v298_v35 = vmax.f32 %v282_v28, 0.0 }
  0xec   : > { %336 = vst.msk [vmem:[%s172_s25 + $0x8] sm:$0xf] %vm333_vm2, %v428_v25  ;;  %v429_v34 = vpack.c.bf16 %v296_v27, %v296_v27  ;;  %340 = vst.msk [vmem:[%s172_s25 + $0x18] sm:$0xf] %vm333_vm2, %v432_v29  ;;  %v433_v36 = vpack.c.bf16 %v300_v31, %v300_v31 }
  0xed   : > { %334 = vst.msk [vmem:[%s172_s25] sm:$0xf] %vm333_vm2, %v426_v30  ;;  %v427_v37 = vpack.c.bf16 %v294_v32, %v294_v32  ;;  %338 = vst.msk [vmem:[%s172_s25 + $0x10] sm:$0xf] %vm333_vm2, %v430_v33  ;;  %v431_v38 = vpack.c.bf16 %v298_v35, %v298_v35 }
  0xee   : > { %337 = vst.msk [vmem:[%s172_s25 + $0xc] sm:$0xf] %vm333_vm2, %v429_v34  ;;  %341 = vst.msk [vmem:[%s172_s25 + $0x1c] sm:$0xf] %vm333_vm2, %v433_v36 }
  0xef   : > { %335 = vst.msk [vmem:[%s172_s25 + $0x4] sm:$0xf] %vm333_vm2, %v427_v37  ;;  %339 = vst.msk [vmem:[%s172_s25 + $0x14] sm:$0xf] %vm333_vm2, %v431_v38 }
  0xf0 PF: > { %s13_s12 = sadd.s32 1, %s471_s12  }
  0xf1   : > { %p10_p4 = scmp.ge.s32.totalorder %s13_s12, 4  }
  0xf3   :  { %12 = sbr.rel (!%p10_p4) target bundleno = 1 (0x1), region = 62 }

// kernel: _lambda_.66
= control target key start
LH: loop header
LB: loop body
LE: loop exit
PB: predicated region body
PF: predicated region fallthrough
CT: control target
= control target key end

     0   :  { %s496_s12 = smov 0   ;;  %s527_s0 = inlined_call_operand.vmem [shape: bf16[128,16], index: 0, kind: input, shape index: {}]   ;;  %s528_s1 = inlined_call_operand.vmem [shape: bf16[16,8], index: 1, kind: input, shape index: {}]   ;;  %s529_s2 = inlined_call_operand.vmem [shape: f32[1,8], index: 2, kind: input, shape index: {}]   ;;  %s530_s3 = inlined_call_operand.vmem [shape: bf16[128,8], index: 3, kind: output, shape index: {}]  }
   0x1 LB: > { %s401_s13 = sadd.s32 4294967295, %s474_s12   ;;  %p405_p0 = scmp.ge.s32.totalorder %s474_s12, 1  ;;  %s474_s12 = sphi %s496_s12, %s13_s12  }
   0x2   : > { %p138_p1 = scmp.lt.s32.totalorder %s474_s12, 3 }
   0x4   : > { %p139_p2 = pnand %p405_p0, %p138_p1 }
   0x5   : > { %v463_v0 = vld [vmem:[%s528_s1] sm:$0xff] (!%p139_p2)   ;;  %s406_s16 = sshll.u32 (!%p139_p2), %s401_s13, 3  ;;  %vm218_vm0 = vcmask (!%p139_p2), 130048   ;;  %vm336_vm1 = vcmask (!%p139_p2), 60416  }
   0x6   : > { %142 = sbr.rel (%p139_p2) target bundleno = 240 (0xf0), region = 32  ;;  %p163_p3 = scmp.lt.s32.totalorder (!%p139_p2), %s406_s16, 15  ;;  %443 = vmatprep.subr.bf16.mxu0 (!%p139_p2), %v463_v0  ;;  %453 = vmatprep.subr.bf16.mxu1 (!%p139_p2), %v463_v0  ;;  %v410_v5 = vld [vmem:[%s529_s2] ss:$0 sm:$0xff] (!%p139_p2) }
   0x7   : > { %444 = vmatpush3.bf16.msra.mxu0 (!%p139_p2), %v463_v0  ;;  %454 = vmatpush3.bf16.msra.mxu1 (!%p139_p2), %v463_v0 }
   0xd   : > { %s532_s16 = smov (!%p163_p3, %s406_s16), 15 }
   0xe   : > { %s407_s17 = sshll.u32 %s532_s16, 2 }
   0xf   : > { %s166_s20 = scalar_lea.vmem %s527_s0, %s407_s17  ;;  %s172_s25 = scalar_lea.vmem %s530_s3, %s407_s17 }
  0x10   : > { %v464_v1 = vld [vmem:[%s166_s20] sm:$0xff]   ;;  %v465_v2 = vld [vmem:[%s166_s20 + $0x10] sm:$0xff]   ;;  %v466_v3 = vld [vmem:[%s166_s20 + $0x8] sm:$0xff]  }
  0x11   : > { %445 = vmatprep.mubr.msk.bf16.mxu0 %vm218_vm0, %v464_v1  ;;  %449 = vmatprep.mubr.msk.bf16.mxu1 %vm218_vm0, %v465_v2  ;;  %v467_v4 = vld [vmem:[%s166_s20 + $0x18] sm:$0xff]  }
  0x12   : > { %446 = vmatmul.mubr.msk.bf16.vlgmr.msra.gmra.mrb[0].mxu0 %vm218_vm0, %v466_v3  ;;  %450 = vmatmul.mubr.msk.bf16.vlgmr.msra.gmra.mrb[0].mxu1 %vm218_vm0, %v467_v4 }
  0xe5   : > { %v447_v6 = vpop.f32.mrb[0].mxu0  ;;  %v451_v8 = vpop.f32.mrb[0].mxu1 }
  0xe6   : > { %v274_v7 = vadd.f32 %v447_v6, %v410_v5  ;;  %v265_v9 = vpop.f32.mrb[1].mxu0  ;;  %v290_v10 = vadd.f32 %v451_v8, %v410_v5  ;;  %v281_v12 = vpop.f32.mrb[1].mxu1 }
  0xe7   : > { %v266_v11 = vadd.f32 %v410_v5, %v265_v9  ;;  %v448_v13 = vpop.f32.mrb[2].mxu0  ;;  %v282_v15 = vadd.f32 %v410_v5, %v281_v12  ;;  %v452_v17 = vpop.f32.mrb[2].mxu1 }
  0xe8   : > { %v298_v14 = vmax.f32 %v274_v7, 0.0  ;;  %v277_v16 = vadd.f32 %v448_v13, %v410_v5  ;;  %v268_v18 = vpop.f32.mrb[3].mxu0  ;;  %v302_v19 = vmax.f32 %v290_v10, 0.0  ;;  %v293_v21 = vadd.f32 %v452_v17, %v410_v5  ;;  %v284_v23 = vpop.f32.mrb[3].mxu1 }
  0xe9   : > { %v296_v20 = vmax.f32 %v266_v11, 0.0  ;;  %v269_v22 = vadd.f32 %v410_v5, %v268_v18  ;;  %v300_v25 = vmax.f32 %v282_v15, 0.0  ;;  %v285_v27 = vadd.f32 %v410_v5, %v284_v23 }
  0xea   : > { %v432_v24 = vpack.c.bf16 %v298_v14, %v298_v14  ;;  %v299_v26 = vmax.f32 %v277_v16, 0.0  ;;  %v436_v28 = vpack.c.bf16 %v302_v19, %v302_v19  ;;  %v303_v30 = vmax.f32 %v293_v21, 0.0 }
  0xeb   : > { %v430_v29 = vpack.c.bf16 %v296_v20, %v296_v20  ;;  %v297_v31 = vmax.f32 %v269_v22, 0.0  ;;  %v434_v32 = vpack.c.bf16 %v300_v25, %v300_v25  ;;  %v301_v34 = vmax.f32 %v285_v27, 0.0 }
  0xec   : > { %339 = vst.msk [vmem:[%s172_s25 + $0x8] sm:$0xf] %vm336_vm1, %v432_v24  ;;  %v433_v33 = vpack.c.bf16 %v299_v26, %v299_v26  ;;  %343 = vst.msk [vmem:[%s172_s25 + $0x18] sm:$0xf] %vm336_vm1, %v436_v28  ;;  %v437_v35 = vpack.c.bf16 %v303_v30, %v303_v30 }
  0xed   : > { %337 = vst.msk [vmem:[%s172_s25] sm:$0xf] %vm336_vm1, %v430_v29  ;;  %v431_v36 = vpack.c.bf16 %v297_v31, %v297_v31  ;;  %341 = vst.msk [vmem:[%s172_s25 + $0x10] sm:$0xf] %vm336_vm1, %v434_v32  ;;  %v435_v37 = vpack.c.bf16 %v301_v34, %v301_v34 }
  0xee   : > { %340 = vst.msk [vmem:[%s172_s25 + $0xc] sm:$0xf] %vm336_vm1, %v433_v33  ;;  %344 = vst.msk [vmem:[%s172_s25 + $0x1c] sm:$0xf] %vm336_vm1, %v437_v35 }
  0xef   : > { %338 = vst.msk [vmem:[%s172_s25 + $0x4] sm:$0xf] %vm336_vm1, %v431_v36  ;;  %342 = vst.msk [vmem:[%s172_s25 + $0x14] sm:$0xf] %vm336_vm1, %v435_v37 }
  0xf0 PF: > { %s13_s12 = sadd.s32 1, %s474_s12  }
  0xf1   : > { %p10_p4 = scmp.ge.s32.totalorder %s13_s12, 4  }
  0xf3   :  { %12 = sbr.rel (!%p10_p4) target bundleno = 1 (0x1), region = 62 }

// kernel: _lambda_.68
= control target key start
LH: loop header
LB: loop body
LE: loop exit
PB: predicated region body
PF: predicated region fallthrough
CT: control target
= control target key end

     0   :  { %s973_s12 = smov 0   ;;  %s1137_s0 = inlined_call_operand.vmem [shape: bf16[512,8], index: 0, kind: input, shape index: {}]   ;;  %s1138_s1 = inlined_call_operand.vmem [shape: bf16[8,16], index: 1, kind: input, shape index: {}]   ;;  %s1139_s2 = inlined_call_operand.vmem [shape: f32[1,16], index: 2, kind: input, shape index: {}]   ;;  %s1140_s3 = inlined_call_operand.vmem [shape: bf16[512,16], index: 3, kind: output, shape index: {}]  }
   0x1 LB: > { %s758_s13 = sadd.s32 4294967295, %s951_s12   ;;  %p762_p0 = scmp.ge.s32.totalorder %s951_s12, 1  ;;  %s951_s12 = sphi %s973_s12, %s13_s12  }
   0x2   : > { %p138_p1 = scmp.lt.s32.totalorder %s951_s12, 3 }
   0x4   : > { %p139_p2 = pnand %p762_p0, %p138_p1 }
   0x5   : > { %v207_v0 = vld [vmem:[%s1138_s1] sm:$0xf] (!%p139_p2)  ;;  %vm344_vm0 = vcmask (!%p139_p2), 1043456   ;;  %s763_s16 = sshll.u32 (!%p139_p2), %s758_s13, 5  ;;  %vm295_vm1 = vcmask (!%p139_p2), 64512   ;;  %vm669_vm2 = vcmask (!%p139_p2), 125952  }
   0x6   : > { %142 = sbr.rel (%p139_p2) target bundleno = 265 (0x109), region = 32  ;;  %919 = vmatprep.subr.msk.bf16.mxu0 (!%p139_p2), %vm344_vm0, %v207_v0  ;;  %920 = vmatprep.subr.msk.bf16.mxu1 (!%p139_p2), %vm344_vm0, %v207_v0  ;;  %v346_v1 = vsel (!%p139_p2), %vm344_vm0, %v207_v0, 0  ;;  %p163_p3 = scmp.lt.s32.totalorder (!%p139_p2), %s763_s16, 63  ;;  %v1029_v18 = vld [vmem:[%s1139_s2] ss:$0 sm:$0xff] (!%p139_p2) }
   0x7   : > { %884 = vmatpush3.bf16.msra.mxu0 (!%p139_p2), %v346_v1  ;;  %918 = vmatpush3.bf16.msra.mxu1 (!%p139_p2), %v346_v1 }
   0xd   : > { %s1142_s16 = smov (!%p163_p3, %s763_s16), 63 }
   0xe   : > { %s764_s17 = sshll.u32 %s1142_s16, 2 }
   0xf   : > { %s992_s20 = scalar_lea.vmem %s1137_s0, %s764_s17  ;;  %s1041_s25 = scalar_lea.vmem %s1140_s3, %s764_s17 }
  0x10   : > { %v929_v2 = vld [vmem:[%s992_s20] sm:$0xff]   ;;  %v931_v4 = vld [vmem:[%s992_s20 + $0x8] sm:$0xff]   ;;  %v933_v6 = vld [vmem:[%s992_s20 + $0x10] sm:$0xff]  }
  0x11   : > { %v930_v3 = vld [vmem:[%s992_s20 + $0x40] sm:$0xff]   ;;  %885 = vmatprep.mubr.msk.bf16.mxu0 %vm295_vm1, %v929_v2  ;;  %v932_v5 = vld [vmem:[%s992_s20 + $0x48] sm:$0xff]   ;;  %v934_v7 = vld [vmem:[%s992_s20 + $0x50] sm:$0xff]  }
  0x12   : > { %901 = vmatprep.mubr.msk.bf16.mxu1 %vm295_vm1, %v930_v3  ;;  %886 = vmatmul.mubr.msk.bf16.vlgmr.msra.gmra.mrb[0].mxu0 %vm295_vm1, %v931_v4  ;;  %v935_v8 = vld [vmem:[%s992_s20 + $0x18] sm:$0xff]   ;;  %v937_v10 = vld [vmem:[%s992_s20 + $0x20] sm:$0xff]   ;;  %v939_v12 = vld [vmem:[%s992_s20 + $0x28] sm:$0xff]  }
  0x13   : > { %902 = vmatmul.mubr.msk.bf16.vlgmr.msra.gmra.mrb[0].mxu1 %vm295_vm1, %v932_v5  ;;  %889 = vmatprep.mubr.msk.bf16.mxu0 %vm295_vm1, %v933_v6  ;;  %v936_v9 = vld [vmem:[%s992_s20 + $0x58] sm:$0xff]   ;;  %v938_v11 = vld [vmem:[%s992_s20 + $0x60] sm:$0xff]   ;;  %v940_v13 = vld [vmem:[%s992_s20 + $0x68] sm:$0xff]  }
  0x14   : > { %905 = vmatprep.mubr.msk.bf16.mxu1 %vm295_vm1, %v934_v7  ;;  %v941_v14 = vld [vmem:[%s992_s20 + $0x30] sm:$0xff]   ;;  %v943_v16 = vld [vmem:[%s992_s20 + $0x38] sm:$0xff]  }
  0x15   : > { %v942_v15 = vld [vmem:[%s992_s20 + $0x70] sm:$0xff]   ;;  %v944_v17 = vld [vmem:[%s992_s20 + $0x78] sm:$0xff]  }
  0x1a   : > { %890 = vmatmul.mubr.msk.bf16.gmra.mrb[4].mxu0 %vm295_vm1, %v935_v8 }
  0x1b   : > { %906 = vmatmul.mubr.msk.bf16.gmra.mrb[4].mxu1 %vm295_vm1, %v936_v9  ;;  %893 = vmatprep.mubr.msk.bf16.mxu0 %vm295_vm1, %v937_v10 }
  0x1c   : > { %909 = vmatprep.mubr.msk.bf16.mxu1 %vm295_vm1, %v938_v11 }
  0x22   : > { %894 = vmatmul.mubr.msk.bf16.gmra.mrb[8].mxu0 %vm295_vm1, %v939_v12 }
  0x23   : > { %910 = vmatmul.mubr.msk.bf16.gmra.mrb[8].mxu1 %vm295_vm1, %v940_v13  ;;  %897 = vmatprep.mubr.msk.bf16.mxu0 %vm295_vm1, %v941_v14 }
  0x24   : > { %913 = vmatprep.mubr.msk.bf16.mxu1 %vm295_vm1, %v942_v15 }
  0x2a   : > { %898 = vmatmul.mubr.msk.bf16.gmra.mrb[12].mxu0 %vm295_vm1, %v943_v16 }
  0x2b   : > { %914 = vmatmul.mubr.msk.bf16.gmra.mrb[12].mxu1 %vm295_vm1, %v944_v17 }
  0xe5   : > { %v887_v19 = vpop.f32.mrb[0].mxu0 }
  0xe6   : > { %v391_v20 = vadd.f32 %v887_v19, %v1029_v18  ;;  %v903_v21 = vpop.f32.mrb[0].mxu1  ;;  %v382_v22 = vpop.f32.mrb[1].mxu0 }
  0xe7   : > { %v455_v23 = vadd.f32 %v903_v21, %v1029_v18  ;;  %v383_v24 = vadd.f32 %v1029_v18, %v382_v22  ;;  %v446_v25 = vpop.f32.mrb[1].mxu1  ;;  %v888_v26 = vpop.f32.mrb[2].mxu0 }
  0xe8   : > { %v511_v27 = vmax.f32 %v391_v20, 0.0  ;;  %v447_v28 = vadd.f32 %v1029_v18, %v446_v25  ;;  %v394_v29 = vadd.f32 %v888_v26, %v1029_v18  ;;  %v904_v30 = vpop.f32.mrb[2].mxu1  ;;  %v385_v31 = vpop.f32.mrb[3].mxu0 }
  0xe9   : > { %v527_v32 = vmax.f32 %v455_v23, 0.0  ;;  %v509_v33 = vmax.f32 %v383_v24, 0.0  ;;  %v458_v34 = vadd.f32 %v904_v30, %v1029_v18  ;;  %v386_v35 = vadd.f32 %v1029_v18, %v385_v31  ;;  %v449_v36 = vpop.f32.mrb[3].mxu1 }
  0xea   : > { %v836_v37 = vpack.c.bf16 %v511_v27, %v511_v27  ;;  %v525_v38 = vmax.f32 %v447_v28, 0.0  ;;  %v512_v39 = vmax.f32 %v394_v29, 0.0  ;;  %v450_v40 = vadd.f32 %v1029_v18, %v449_v36 }
  0xeb   : > { %v852_v41 = vpack.c.bf16 %v527_v32, %v527_v32  ;;  %v834_v42 = vpack.c.bf16 %v509_v33, %v509_v33  ;;  %v528_v43 = vmax.f32 %v458_v34, 0.0  ;;  %v510_v44 = vmax.f32 %v386_v35, 0.0 }
  0xec   : > { %672 = vst.msk [vmem:[%s1041_s25 + $0x8] sm:$0xf] %vm669_vm2, %v836_v37  ;;  %v850_v45 = vpack.c.bf16 %v525_v38, %v525_v38  ;;  %v837_v46 = vpack.c.bf16 %v512_v39, %v512_v39  ;;  %v526_v47 = vmax.f32 %v450_v40, 0.0 }
  0xed   : > { %688 = vst.msk [vmem:[%s1041_s25 + $0x48] sm:$0xf] %vm669_vm2, %v852_v41  ;;  %670 = vst.msk [vmem:[%s1041_s25] sm:$0xf] %vm669_vm2, %v834_v42  ;;  %v853_v48 = vpack.c.bf16 %v528_v43, %v528_v43  ;;  %v835_v49 = vpack.c.bf16 %v510_v44, %v510_v44  ;;  %v891_v50 = vpop.f32.mrb[4].mxu0 }
  0xee   : > { %686 = vst.msk [vmem:[%s1041_s25 + $0x40] sm:$0xf] %vm669_vm2, %v850_v45  ;;  %673 = vst.msk [vmem:[%s1041_s25 + $0xc] sm:$0xf] %vm669_vm2, %v837_v46  ;;  %v851_v51 = vpack.c.bf16 %v526_v47, %v526_v47  ;;  %v407_v52 = vadd.f32 %v891_v50, %v1029_v18  ;;  %v907_v53 = vpop.f32.mrb[4].mxu1  ;;  %v398_v54 = vpop.f32.mrb[5].mxu0 }
  0xef   : > { %689 = vst.msk [vmem:[%s1041_s25 + $0x4c] sm:$0xf] %vm669_vm2, %v853_v48  ;;  %671 = vst.msk [vmem:[%s1041_s25 + $0x4] sm:$0xf] %vm669_vm2, %v835_v49  ;;  %v471_v55 = vadd.f32 %v907_v53, %v1029_v18  ;;  %v399_v56 = vadd.f32 %v1029_v18, %v398_v54  ;;  %v462_v57 = vpop.f32.mrb[5].mxu1  ;;  %v892_v58 = vpop.f32.mrb[6].mxu0 }
  0xf0   : > { %687 = vst.msk [vmem:[%s1041_s25 + $0x44] sm:$0xf] %vm669_vm2, %v851_v51  ;;  %v515_v59 = vmax.f32 %v407_v52, 0.0  ;;  %v463_v60 = vadd.f32 %v1029_v18, %v462_v57  ;;  %v410_v61 = vadd.f32 %v892_v58, %v1029_v18  ;;  %v908_v62 = vpop.f32.mrb[6].mxu1  ;;  %v401_v63 = vpop.f32.mrb[7].mxu0 }
  0xf1   : > { %v531_v0 = vmax.f32 %v471_v55, 0.0  ;;  %v513_v1 = vmax.f32 %v399_v56, 0.0  ;;  %v474_v2 = vadd.f32 %v908_v62, %v1029_v18  ;;  %v402_v3 = vadd.f32 %v1029_v18, %v401_v63  ;;  %v465_v4 = vpop.f32.mrb[7].mxu1 }
  0xf2   : > { %v840_v5 = vpack.c.bf16 %v515_v59, %v515_v59  ;;  %v529_v6 = vmax.f32 %v463_v60, 0.0  ;;  %v516_v7 = vmax.f32 %v410_v61, 0.0  ;;  %v466_v8 = vadd.f32 %v1029_v18, %v465_v4 }
  0xf3   : > { %v856_v9 = vpack.c.bf16 %v531_v0, %v531_v0  ;;  %v838_v10 = vpack.c.bf16 %v513_v1, %v513_v1  ;;  %v532_v11 = vmax.f32 %v474_v2, 0.0  ;;  %v514_v12 = vmax.f32 %v402_v3, 0.0 }
  0xf4   : > { %676 = vst.msk [vmem:[%s1041_s25 + $0x18] sm:$0xf] %vm669_vm2, %v840_v5  ;;  %v854_v13 = vpack.c.bf16 %v529_v6, %v529_v6  ;;  %v841_v14 = vpack.c.bf16 %v516_v7, %v516_v7  ;;  %v530_v15 = vmax.f32 %v466_v8, 0.0 }
  0xf5   : > { %692 = vst.msk [vmem:[%s1041_s25 + $0x58] sm:$0xf] %vm669_vm2, %v856_v9  ;;  %674 = vst.msk [vmem:[%s1041_s25 + $0x10] sm:$0xf] %vm669_vm2, %v838_v10  ;;  %v857_v16 = vpack.c.bf16 %v532_v11, %v532_v11  ;;  %v839_v17 = vpack.c.bf16 %v514_v12, %v514_v12  ;;  %v895_v19 = vpop.f32.mrb[8].mxu0 }
  0xf6   : > { %690 = vst.msk [vmem:[%s1041_s25 + $0x50] sm:$0xf] %vm669_vm2, %v854_v13  ;;  %677 = vst.msk [vmem:[%s1041_s25 + $0x1c] sm:$0xf] %vm669_vm2, %v841_v14  ;;  %v855_v20 = vpack.c.bf16 %v530_v15, %v530_v15  ;;  %v423_v21 = vadd.f32 %v895_v19, %v1029_v18  ;;  %v911_v22 = vpop.f32.mrb[8].mxu1  ;;  %v414_v23 = vpop.f32.mrb[9].mxu0 }
  0xf7   : > { %693 = vst.msk [vmem:[%s1041_s25 + $0x5c] sm:$0xf] %vm669_vm2, %v857_v16  ;;  %675 = vst.msk [vmem:[%s1041_s25 + $0x14] sm:$0xf] %vm669_vm2, %v839_v17  ;;  %v487_v24 = vadd.f32 %v911_v22, %v1029_v18  ;;  %v415_v25 = vadd.f32 %v1029_v18, %v414_v23  ;;  %v478_v26 = vpop.f32.mrb[9].mxu1  ;;  %v896_v27 = vpop.f32.mrb[10].mxu0 }
  0xf8   : > { %691 = vst.msk [vmem:[%s1041_s25 + $0x54] sm:$0xf] %vm669_vm2, %v855_v20  ;;  %v519_v28 = vmax.f32 %v423_v21, 0.0  ;;  %v479_v29 = vadd.f32 %v1029_v18, %v478_v26  ;;  %v426_v30 = vadd.f32 %v896_v27, %v1029_v18  ;;  %v912_v31 = vpop.f32.mrb[10].mxu1  ;;  %v417_v32 = vpop.f32.mrb[11].mxu0 }
  0xf9   : > { %v535_v33 = vmax.f32 %v487_v24, 0.0  ;;  %v517_v34 = vmax.f32 %v415_v25, 0.0  ;;  %v490_v35 = vadd.f32 %v912_v31, %v1029_v18  ;;  %v418_v36 = vadd.f32 %v1029_v18, %v417_v32  ;;  %v481_v37 = vpop.f32.mrb[11].mxu1 }
  0xfa   : > { %v844_v38 = vpack.c.bf16 %v519_v28, %v519_v28  ;;  %v533_v39 = vmax.f32 %v479_v29, 0.0  ;;  %v520_v40 = vmax.f32 %v426_v30, 0.0  ;;  %v482_v41 = vadd.f32 %v1029_v18, %v481_v37 }
  0xfb   : > { %v860_v42 = vpack.c.bf16 %v535_v33, %v535_v33  ;;  %v842_v43 = vpack.c.bf16 %v517_v34, %v517_v34  ;;  %v536_v44 = vmax.f32 %v490_v35, 0.0  ;;  %v518_v45 = vmax.f32 %v418_v36, 0.0 }
  0xfc   : > { %680 = vst.msk [vmem:[%s1041_s25 + $0x28] sm:$0xf] %vm669_vm2, %v844_v38  ;;  %v858_v46 = vpack.c.bf16 %v533_v39, %v533_v39  ;;  %v845_v47 = vpack.c.bf16 %v520_v40, %v520_v40  ;;  %v534_v48 = vmax.f32 %v482_v41, 0.0 }
  0xfd   : > { %696 = vst.msk [vmem:[%s1041_s25 + $0x68] sm:$0xf] %vm669_vm2, %v860_v42  ;;  %678 = vst.msk [vmem:[%s1041_s25 + $0x20] sm:$0xf] %vm669_vm2, %v842_v43  ;;  %v861_v49 = vpack.c.bf16 %v536_v44, %v536_v44  ;;  %v843_v50 = vpack.c.bf16 %v518_v45, %v518_v45  ;;  %v899_v51 = vpop.f32.mrb[12].mxu0 }
  0xfe   : > { %694 = vst.msk [vmem:[%s1041_s25 + $0x60] sm:$0xf] %vm669_vm2, %v858_v46  ;;  %681 = vst.msk [vmem:[%s1041_s25 + $0x2c] sm:$0xf] %vm669_vm2, %v845_v47  ;;  %v859_v52 = vpack.c.bf16 %v534_v48, %v534_v48  ;;  %v439_v53 = vadd.f32 %v899_v51, %v1029_v18  ;;  %v915_v54 = vpop.f32.mrb[12].mxu1  ;;  %v430_v55 = vpop.f32.mrb[13].mxu0 }
  0xff   : > { %697 = vst.msk [vmem:[%s1041_s25 + $0x6c] sm:$0xf] %vm669_vm2, %v861_v49  ;;  %679 = vst.msk [vmem:[%s1041_s25 + $0x24] sm:$0xf] %vm669_vm2, %v843_v50  ;;  %v503_v56 = vadd.f32 %v915_v54, %v1029_v18  ;;  %v431_v57 = vadd.f32 %v1029_v18, %v430_v55  ;;  %v494_v58 = vpop.f32.mrb[13].mxu1  ;;  %v900_v59 = vpop.f32.mrb[14].mxu0 }
 0x100   : > { %695 = vst.msk [vmem:[%s1041_s25 + $0x64] sm:$0xf] %vm669_vm2, %v859_v52  ;;  %v523_v60 = vmax.f32 %v439_v53, 0.0  ;;  %v495_v61 = vadd.f32 %v1029_v18, %v494_v58  ;;  %v442_v62 = vadd.f32 %v900_v59, %v1029_v18  ;;  %v916_v63 = vpop.f32.mrb[14].mxu1  ;;  %v433_v0 = vpop.f32.mrb[15].mxu0 }
 0x101   : > { %v539_v1 = vmax.f32 %v503_v56, 0.0  ;;  %v521_v2 = vmax.f32 %v431_v57, 0.0  ;;  %v506_v3 = vadd.f32 %v916_v63, %v1029_v18  ;;  %v434_v4 = vadd.f32 %v1029_v18, %v433_v0  ;;  %v497_v5 = vpop.f32.mrb[15].mxu1 }
 0x102   : > { %v848_v6 = vpack.c.bf16 %v523_v60, %v523_v60  ;;  %v537_v7 = vmax.f32 %v495_v61, 0.0  ;;  %v524_v8 = vmax.f32 %v442_v62, 0.0  ;;  %v498_v9 = vadd.f32 %v1029_v18, %v497_v5 }
 0x103   : > { %v864_v10 = vpack.c.bf16 %v539_v1, %v539_v1  ;;  %v846_v11 = vpack.c.bf16 %v521_v2, %v521_v2  ;;  %v540_v12 = vmax.f32 %v506_v3, 0.0  ;;  %v522_v13 = vmax.f32 %v434_v4, 0.0 }
 0x104   : > { %684 = vst.msk [vmem:[%s1041_s25 + $0x38] sm:$0xf] %vm669_vm2, %v848_v6  ;;  %v862_v14 = vpack.c.bf16 %v537_v7, %v537_v7  ;;  %v849_v15 = vpack.c.bf16 %v524_v8, %v524_v8  ;;  %v538_v16 = vmax.f32 %v498_v9, 0.0 }
 0x105   : > { %700 = vst.msk [vmem:[%s1041_s25 + $0x78] sm:$0xf] %vm669_vm2, %v864_v10  ;;  %682 = vst.msk [vmem:[%s1041_s25 + $0x30] sm:$0xf] %vm669_vm2, %v846_v11  ;;  %v865_v17 = vpack.c.bf16 %v540_v12, %v540_v12  ;;  %v847_v19 = vpack.c.bf16 %v522_v13, %v522_v13 }
 0x106   : > { %698 = vst.msk [vmem:[%s1041_s25 + $0x70] sm:$0xf] %vm669_vm2, %v862_v14  ;;  %685 = vst.msk [vmem:[%s1041_s25 + $0x3c] sm:$0xf] %vm669_vm2, %v849_v15  ;;  %v863_v18 = vpack.c.bf16 %v538_v16, %v538_v16 }
 0x107   : > { %701 = vst.msk [vmem:[%s1041_s25 + $0x7c] sm:$0xf] %vm669_vm2, %v865_v17  ;;  %683 = vst.msk [vmem:[%s1041_s25 + $0x34] sm:$0xf] %vm669_vm2, %v847_v19 }
 0x108   : > { %699 = vst.msk [vmem:[%s1041_s25 + $0x74] sm:$0xf] %vm669_vm2, %v863_v18 }
 0x109 PF: > { %s13_s12 = sadd.s32 1, %s951_s12  }
 0x10a   : > { %p10_p4 = scmp.ge.s32.totalorder %s13_s12, 4  }
 0x10c   :  { %12 = sbr.rel (!%p10_p4) target bundleno = 1 (0x1), region = 62 }

// kernel: _lambda_.69
= control target key start
LH: loop header
LB: loop body
LE: loop exit
PB: predicated region body
PF: predicated region fallthrough
CT: control target
= control target key end

     0   :  { %s976_s12 = smov 0   ;;  %s1140_s0 = inlined_call_operand.vmem [shape: bf16[512,16], index: 0, kind: input, shape index: {}]   ;;  %s1141_s1 = inlined_call_operand.vmem [shape: bf16[16,32], index: 1, kind: input, shape index: {}]   ;;  %s1142_s2 = inlined_call_operand.vmem [shape: f32[1,32], index: 2, kind: input, shape index: {}]   ;;  %s1143_s3 = inlined_call_operand.vmem [shape: bf16[512,32], index: 3, kind: output, shape index: {}]  }
   0x1 LB: > { %s761_s13 = sadd.s32 4294967295, %s954_s12   ;;  %p765_p0 = scmp.ge.s32.totalorder %s954_s12, 1  ;;  %s954_s12 = sphi %s976_s12, %s13_s12  }
   0x2   : > { %p138_p1 = scmp.lt.s32.totalorder %s954_s12, 3 }
   0x4   : > { %p139_p2 = pnand %p765_p0, %p138_p1 }
   0x5   : > { %v931_v0 = vld [vmem:[%s1141_s1] sm:$0xff] (!%p139_p2)   ;;  %s766_s16 = sshll.u32 (!%p139_p2), %s761_s13, 5  ;;  %vm302_vm0 = vcmask (!%p139_p2), 130048   ;;  %vm672_vm1 = vcmask (!%p139_p2), 257024  }
   0x6   : > { %142 = sbr.rel (%p139_p2) target bundleno = 265 (0x109), region = 32  ;;  %p163_p3 = scmp.lt.s32.totalorder (!%p139_p2), %s766_s16, 63  ;;  %887 = vmatprep.subr.bf16.mxu0 (!%p139_p2), %v931_v0  ;;  %921 = vmatprep.subr.bf16.mxu1 (!%p139_p2), %v931_v0  ;;  %v1032_v17 = vld [vmem:[%s1142_s2] ss:$0 sm:$0xff] (!%p139_p2) }
   0x7   : > { %888 = vmatpush3.bf16.msra.mxu0 (!%p139_p2), %v931_v0  ;;  %922 = vmatpush3.bf16.msra.mxu1 (!%p139_p2), %v931_v0 }
   0xd   : > { %s1145_s16 = smov (!%p163_p3, %s766_s16), 63 }
   0xe   : > { %s767_s17 = sshll.u32 %s1145_s16, 2 }
   0xf   : > { %s995_s20 = scalar_lea.vmem %s1140_s0, %s767_s17  ;;  %s1044_s25 = scalar_lea.vmem %s1143_s3, %s767_s17 }
  0x10   : > { %v932_v1 = vld [vmem:[%s995_s20] sm:$0xff]   ;;  %v934_v3 = vld [vmem:[%s995_s20 + $0x8] sm:$0xff]   ;;  %v936_v5 = vld [vmem:[%s995_s20 + $0x10] sm:$0xff]  }
  0x11   : > { %v933_v2 = vld [vmem:[%s995_s20 + $0x40] sm:$0xff]   ;;  %889 = vmatprep.mubr.msk.bf16.mxu0 %vm302_vm0, %v932_v1  ;;  %v935_v4 = vld [vmem:[%s995_s20 + $0x48] sm:$0xff]   ;;  %v937_v6 = vld [vmem:[%s995_s20 + $0x50] sm:$0xff]  }
  0x12   : > { %905 = vmatprep.mubr.msk.bf16.mxu1 %vm302_vm0, %v933_v2  ;;  %890 = vmatmul.mubr.msk.bf16.vlgmr.msra.gmra.mrb[0].mxu0 %vm302_vm0, %v934_v3  ;;  %v938_v7 = vld [vmem:[%s995_s20 + $0x18] sm:$0xff]   ;;  %v940_v9 = vld [vmem:[%s995_s20 + $0x20] sm:$0xff]   ;;  %v942_v11 = vld [vmem:[%s995_s20 + $0x28] sm:$0xff]  }
  0x13   : > { %906 = vmatmul.mubr.msk.bf16.vlgmr.msra.gmra.mrb[0].mxu1 %vm302_vm0, %v935_v4  ;;  %893 = vmatprep.mubr.msk.bf16.mxu0 %vm302_vm0, %v936_v5  ;;  %v939_v8 = vld [vmem:[%s995_s20 + $0x58] sm:$0xff]   ;;  %v941_v10 = vld [vmem:[%s995_s20 + $0x60] sm:$0xff]   ;;  %v943_v12 = vld [vmem:[%s995_s20 + $0x68] sm:$0xff]  }
  0x14   : > { %909 = vmatprep.mubr.msk.bf16.mxu1 %vm302_vm0, %v937_v6  ;;  %v944_v13 = vld [vmem:[%s995_s20 + $0x30] sm:$0xff]   ;;  %v946_v15 = vld [vmem:[%s995_s20 + $0x38] sm:$0xff]  }
  0x15   : > { %v945_v14 = vld [vmem:[%s995_s20 + $0x70] sm:$0xff]   ;;  %v947_v16 = vld [vmem:[%s995_s20 + $0x78] sm:$0xff]  }
  0x1a   : > { %894 = vmatmul.mubr.msk.bf16.gmra.mrb[4].mxu0 %vm302_vm0, %v938_v7 }
  0x1b   : > { %910 = vmatmul.mubr.msk.bf16.gmra.mrb[4].mxu1 %vm302_vm0, %v939_v8  ;;  %897 = vmatprep.mubr.msk.bf16.mxu0 %vm302_vm0, %v940_v9 }
  0x1c   : > { %913 = vmatprep.mubr.msk.bf16.mxu1 %vm302_vm0, %v941_v10 }
  0x22   : > { %898 = vmatmul.mubr.msk.bf16.gmra.mrb[8].mxu0 %vm302_vm0, %v942_v11 }
  0x23   : > { %914 = vmatmul.mubr.msk.bf16.gmra.mrb[8].mxu1 %vm302_vm0, %v943_v12  ;;  %901 = vmatprep.mubr.msk.bf16.mxu0 %vm302_vm0, %v944_v13 }
  0x24   : > { %917 = vmatprep.mubr.msk.bf16.mxu1 %vm302_vm0, %v945_v14 }
  0x2a   : > { %902 = vmatmul.mubr.msk.bf16.gmra.mrb[12].mxu0 %vm302_vm0, %v946_v15 }
  0x2b   : > { %918 = vmatmul.mubr.msk.bf16.gmra.mrb[12].mxu1 %vm302_vm0, %v947_v16 }
  0xe5   : > { %v891_v18 = vpop.f32.mrb[0].mxu0 }
  0xe6   : > { %v394_v19 = vadd.f32 %v891_v18, %v1032_v17  ;;  %v907_v20 = vpop.f32.mrb[0].mxu1  ;;  %v385_v21 = vpop.f32.mrb[1].mxu0 }
  0xe7   : > { %v458_v22 = vadd.f32 %v907_v20, %v1032_v17  ;;  %v386_v23 = vadd.f32 %v1032_v17, %v385_v21  ;;  %v449_v24 = vpop.f32.mrb[1].mxu1  ;;  %v892_v25 = vpop.f32.mrb[2].mxu0 }
  0xe8   : > { %v514_v26 = vmax.f32 %v394_v19, 0.0  ;;  %v450_v27 = vadd.f32 %v1032_v17, %v449_v24  ;;  %v397_v28 = vadd.f32 %v892_v25, %v1032_v17  ;;  %v908_v29 = vpop.f32.mrb[2].mxu1  ;;  %v388_v30 = vpop.f32.mrb[3].mxu0 }
  0xe9   : > { %v530_v31 = vmax.f32 %v458_v22, 0.0  ;;  %v512_v32 = vmax.f32 %v386_v23, 0.0  ;;  %v461_v33 = vadd.f32 %v908_v29, %v1032_v17  ;;  %v389_v34 = vadd.f32 %v1032_v17, %v388_v30  ;;  %v452_v35 = vpop.f32.mrb[3].mxu1 }
  0xea   : > { %v840_v36 = vpack.c.bf16 %v514_v26, %v514_v26  ;;  %v528_v37 = vmax.f32 %v450_v27, 0.0  ;;  %v515_v38 = vmax.f32 %v397_v28, 0.0  ;;  %v453_v39 = vadd.f32 %v1032_v17, %v452_v35 }
  0xeb   : > { %v856_v40 = vpack.c.bf16 %v530_v31, %v530_v31  ;;  %v838_v41 = vpack.c.bf16 %v512_v32, %v512_v32  ;;  %v531_v42 = vmax.f32 %v461_v33, 0.0  ;;  %v513_v43 = vmax.f32 %v389_v34, 0.0 }
  0xec   : > { %675 = vst.msk [vmem:[%s1044_s25 + $0x8] sm:$0xf] %vm672_vm1, %v840_v36  ;;  %v854_v44 = vpack.c.bf16 %v528_v37, %v528_v37  ;;  %v841_v45 = vpack.c.bf16 %v515_v38, %v515_v38  ;;  %v529_v46 = vmax.f32 %v453_v39, 0.0 }
  0xed   : > { %691 = vst.msk [vmem:[%s1044_s25 + $0x48] sm:$0xf] %vm672_vm1, %v856_v40  ;;  %673 = vst.msk [vmem:[%s1044_s25] sm:$0xf] %vm672_vm1, %v838_v41  ;;  %v857_v47 = vpack.c.bf16 %v531_v42, %v531_v42  ;;  %v839_v48 = vpack.c.bf16 %v513_v43, %v513_v43  ;;  %v895_v49 = vpop.f32.mrb[4].mxu0 }
  0xee   : > { %689 = vst.msk [vmem:[%s1044_s25 + $0x40] sm:$0xf] %vm672_vm1, %v854_v44  ;;  %676 = vst.msk [vmem:[%s1044_s25 + $0xc] sm:$0xf] %vm672_vm1, %v841_v45  ;;  %v855_v50 = vpack.c.bf16 %v529_v46, %v529_v46  ;;  %v410_v51 = vadd.f32 %v895_v49, %v1032_v17  ;;  %v911_v52 = vpop.f32.mrb[4].mxu1  ;;  %v401_v53 = vpop.f32.mrb[5].mxu0 }
  0xef   : > { %692 = vst.msk [vmem:[%s1044_s25 + $0x4c] sm:$0xf] %vm672_vm1, %v857_v47  ;;  %674 = vst.msk [vmem:[%s1044_s25 + $0x4] sm:$0xf] %vm672_vm1, %v839_v48  ;;  %v474_v54 = vadd.f32 %v911_v52, %v1032_v17  ;;  %v402_v55 = vadd.f32 %v1032_v17, %v401_v53  ;;  %v465_v56 = vpop.f32.mrb[5].mxu1  ;;  %v896_v57 = vpop.f32.mrb[6].mxu0 }
  0xf0   : > { %690 = vst.msk [vmem:[%s1044_s25 + $0x44] sm:$0xf] %vm672_vm1, %v855_v50  ;;  %v518_v58 = vmax.f32 %v410_v51, 0.0  ;;  %v466_v59 = vadd.f32 %v1032_v17, %v465_v56  ;;  %v413_v60 = vadd.f32 %v896_v57, %v1032_v17  ;;  %v912_v61 = vpop.f32.mrb[6].mxu1  ;;  %v404_v62 = vpop.f32.mrb[7].mxu0 }
  0xf1   : > { %v534_v63 = vmax.f32 %v474_v54, 0.0  ;;  %v516_v0 = vmax.f32 %v402_v55, 0.0  ;;  %v477_v1 = vadd.f32 %v912_v61, %v1032_v17  ;;  %v405_v2 = vadd.f32 %v1032_v17, %v404_v62  ;;  %v468_v3 = vpop.f32.mrb[7].mxu1 }
  0xf2   : > { %v844_v4 = vpack.c.bf16 %v518_v58, %v518_v58  ;;  %v532_v5 = vmax.f32 %v466_v59, 0.0  ;;  %v519_v6 = vmax.f32 %v413_v60, 0.0  ;;  %v469_v7 = vadd.f32 %v1032_v17, %v468_v3 }
  0xf3   : > { %v860_v8 = vpack.c.bf16 %v534_v63, %v534_v63  ;;  %v842_v9 = vpack.c.bf16 %v516_v0, %v516_v0  ;;  %v535_v10 = vmax.f32 %v477_v1, 0.0  ;;  %v517_v11 = vmax.f32 %v405_v2, 0.0 }
  0xf4   : > { %679 = vst.msk [vmem:[%s1044_s25 + $0x18] sm:$0xf] %vm672_vm1, %v844_v4  ;;  %v858_v12 = vpack.c.bf16 %v532_v5, %v532_v5  ;;  %v845_v13 = vpack.c.bf16 %v519_v6, %v519_v6  ;;  %v533_v14 = vmax.f32 %v469_v7, 0.0 }
  0xf5   : > { %695 = vst.msk [vmem:[%s1044_s25 + $0x58] sm:$0xf] %vm672_vm1, %v860_v8  ;;  %677 = vst.msk [vmem:[%s1044_s25 + $0x10] sm:$0xf] %vm672_vm1, %v842_v9  ;;  %v861_v15 = vpack.c.bf16 %v535_v10, %v535_v10  ;;  %v843_v16 = vpack.c.bf16 %v517_v11, %v517_v11  ;;  %v899_v18 = vpop.f32.mrb[8].mxu0 }
  0xf6   : > { %693 = vst.msk [vmem:[%s1044_s25 + $0x50] sm:$0xf] %vm672_vm1, %v858_v12  ;;  %680 = vst.msk [vmem:[%s1044_s25 + $0x1c] sm:$0xf] %vm672_vm1, %v845_v13  ;;  %v859_v19 = vpack.c.bf16 %v533_v14, %v533_v14  ;;  %v426_v20 = vadd.f32 %v899_v18, %v1032_v17  ;;  %v915_v21 = vpop.f32.mrb[8].mxu1  ;;  %v417_v22 = vpop.f32.mrb[9].mxu0 }
  0xf7   : > { %696 = vst.msk [vmem:[%s1044_s25 + $0x5c] sm:$0xf] %vm672_vm1, %v861_v15  ;;  %678 = vst.msk [vmem:[%s1044_s25 + $0x14] sm:$0xf] %vm672_vm1, %v843_v16  ;;  %v490_v23 = vadd.f32 %v915_v21, %v1032_v17  ;;  %v418_v24 = vadd.f32 %v1032_v17, %v417_v22  ;;  %v481_v25 = vpop.f32.mrb[9].mxu1  ;;  %v900_v26 = vpop.f32.mrb[10].mxu0 }
  0xf8   : > { %694 = vst.msk [vmem:[%s1044_s25 + $0x54] sm:$0xf] %vm672_vm1, %v859_v19  ;;  %v522_v27 = vmax.f32 %v426_v20, 0.0  ;;  %v482_v28 = vadd.f32 %v1032_v17, %v481_v25  ;;  %v429_v29 = vadd.f32 %v900_v26, %v1032_v17  ;;  %v916_v30 = vpop.f32.mrb[10].mxu1  ;;  %v420_v31 = vpop.f32.mrb[11].mxu0 }
  0xf9   : > { %v538_v32 = vmax.f32 %v490_v23, 0.0  ;;  %v520_v33 = vmax.f32 %v418_v24, 0.0  ;;  %v493_v34 = vadd.f32 %v916_v30, %v1032_v17  ;;  %v421_v35 = vadd.f32 %v1032_v17, %v420_v31  ;;  %v484_v36 = vpop.f32.mrb[11].mxu1 }
  0xfa   : > { %v848_v37 = vpack.c.bf16 %v522_v27, %v522_v27  ;;  %v536_v38 = vmax.f32 %v482_v28, 0.0  ;;  %v523_v39 = vmax.f32 %v429_v29, 0.0  ;;  %v485_v40 = vadd.f32 %v1032_v17, %v484_v36 }
  0xfb   : > { %v864_v41 = vpack.c.bf16 %v538_v32, %v538_v32  ;;  %v846_v42 = vpack.c.bf16 %v520_v33, %v520_v33  ;;  %v539_v43 = vmax.f32 %v493_v34, 0.0  ;;  %v521_v44 = vmax.f32 %v421_v35, 0.0 }
  0xfc   : > { %683 = vst.msk [vmem:[%s1044_s25 + $0x28] sm:$0xf] %vm672_vm1, %v848_v37  ;;  %v862_v45 = vpack.c.bf16 %v536_v38, %v536_v38  ;;  %v849_v46 = vpack.c.bf16 %v523_v39, %v523_v39  ;;  %v537_v47 = vmax.f32 %v485_v40, 0.0 }
  0xfd   : > { %699 = vst.msk [vmem:[%s1044_s25 + $0x68] sm:$0xf] %vm672_vm1, %v864_v41  ;;  %681 = vst.msk [vmem:[%s1044_s25 + $0x20] sm:$0xf] %vm672_vm1, %v846_v42  ;;  %v865_v48 = vpack.c.bf16 %v539_v43, %v539_v43  ;;  %v847_v49 = vpack.c.bf16 %v521_v44, %v521_v44  ;;  %v903_v50 = vpop.f32.mrb[12].mxu0 }
  0xfe   : > { %697 = vst.msk [vmem:[%s1044_s25 + $0x60] sm:$0xf] %vm672_vm1, %v862_v45  ;;  %684 = vst.msk [vmem:[%s1044_s25 + $0x2c] sm:$0xf] %vm672_vm1, %v849_v46  ;;  %v863_v51 = vpack.c.bf16 %v537_v47, %v537_v47  ;;  %v442_v52 = vadd.f32 %v903_v50, %v1032_v17  ;;  %v919_v53 = vpop.f32.mrb[12].mxu1  ;;  %v433_v54 = vpop.f32.mrb[13].mxu0 }
  0xff   : > { %700 = vst.msk [vmem:[%s1044_s25 + $0x6c] sm:$0xf] %vm672_vm1, %v865_v48  ;;  %682 = vst.msk [vmem:[%s1044_s25 + $0x24] sm:$0xf] %vm672_vm1, %v847_v49  ;;  %v506_v55 = vadd.f32 %v919_v53, %v1032_v17  ;;  %v434_v56 = vadd.f32 %v1032_v17, %v433_v54  ;;  %v497_v57 = vpop.f32.mrb[13].mxu1  ;;  %v904_v58 = vpop.f32.mrb[14].mxu0 }
 0x100   : > { %698 = vst.msk [vmem:[%s1044_s25 + $0x64] sm:$0xf] %vm672_vm1, %v863_v51  ;;  %v526_v59 = vmax.f32 %v442_v52, 0.0  ;;  %v498_v60 = vadd.f32 %v1032_v17, %v497_v57  ;;  %v445_v61 = vadd.f32 %v904_v58, %v1032_v17  ;;  %v920_v62 = vpop.f32.mrb[14].mxu1  ;;  %v436_v63 = vpop.f32.mrb[15].mxu0 }
 0x101   : > { %v542_v0 = vmax.f32 %v506_v55, 0.0  ;;  %v524_v1 = vmax.f32 %v434_v56, 0.0  ;;  %v509_v2 = vadd.f32 %v920_v62, %v1032_v17  ;;  %v437_v3 = vadd.f32 %v1032_v17, %v436_v63  ;;  %v500_v4 = vpop.f32.mrb[15].mxu1 }
 0x102   : > { %v852_v5 = vpack.c.bf16 %v526_v59, %v526_v59  ;;  %v540_v6 = vmax.f32 %v498_v60, 0.0  ;;  %v527_v7 = vmax.f32 %v445_v61, 0.0  ;;  %v501_v8 = vadd.f32 %v1032_v17, %v500_v4 }
 0x103   : > { %v868_v9 = vpack.c.bf16 %v542_v0, %v542_v0  ;;  %v850_v10 = vpack.c.bf16 %v524_v1, %v524_v1  ;;  %v543_v11 = vmax.f32 %v509_v2, 0.0  ;;  %v525_v12 = vmax.f32 %v437_v3, 0.0 }
 0x104   : > { %687 = vst.msk [vmem:[%s1044_s25 + $0x38] sm:$0xf] %vm672_vm1, %v852_v5  ;;  %v866_v13 = vpack.c.bf16 %v540_v6, %v540_v6  ;;  %v853_v14 = vpack.c.bf16 %v527_v7, %v527_v7  ;;  %v541_v15 = vmax.f32 %v501_v8, 0.0 }
 0x105   : > { %703 = vst.msk [vmem:[%s1044_s25 + $0x78] sm:$0xf] %vm672_vm1, %v868_v9  ;;  %685 = vst.msk [vmem:[%s1044_s25 + $0x30] sm:$0xf] %vm672_vm1, %v850_v10  ;;  %v869_v16 = vpack.c.bf16 %v543_v11, %v543_v11  ;;  %v851_v18 = vpack.c.bf16 %v525_v12, %v525_v12 }
 0x106   : > { %701 = vst.msk [vmem:[%s1044_s25 + $0x70] sm:$0xf] %vm672_vm1, %v866_v13  ;;  %688 = vst.msk [vmem:[%s1044_s25 + $0x3c] sm:$0xf] %vm672_vm1, %v853_v14  ;;  %v867_v17 = vpack.c.bf16 %v541_v15, %v541_v15 }
 0x107   : > { %704 = vst.msk [vmem:[%s1044_s25 + $0x7c] sm:$0xf] %vm672_vm1, %v869_v16  ;;  %686 = vst.msk [vmem:[%s1044_s25 + $0x34] sm:$0xf] %vm672_vm1, %v851_v18 }
 0x108   : > { %702 = vst.msk [vmem:[%s1044_s25 + $0x74] sm:$0xf] %vm672_vm1, %v867_v17 }
 0x109 PF: > { %s13_s12 = sadd.s32 1, %s954_s12  }
 0x10a   : > { %p10_p4 = scmp.ge.s32.totalorder %s13_s12, 4  }
 0x10c   :  { %12 = sbr.rel (!%p10_p4) target bundleno = 1 (0x1), region = 62 }

// kernel: _lambda_.70
= control target key start
LH: loop header
LB: loop body
LE: loop exit
PB: predicated region body
PF: predicated region fallthrough
CT: control target
= control target key end

     0   :  { %s1038_s12 = smov 0   ;;  %s1214_s0 = inlined_call_operand.vmem [shape: bf16[2048,72], index: 0, kind: input, shape index: {}]   ;;  %s1215_s1 = inlined_call_operand.vmem [shape: bf16[72,8], index: 1, kind: input, shape index: {}]   ;;  %s1216_s2 = inlined_call_operand.vmem [shape: f32[1,8], index: 2, kind: input, shape index: {}]   ;;  %s1217_s3 = inlined_call_operand.vmem [shape: bf16[2048,8], index: 3, kind: output, shape index: {}]  }
   0x1 LB: > { %s793_s13 = sadd.s32 4294967295, %s1016_s12   ;;  %p797_p0 = scmp.ge.s32.totalorder %s1016_s12, 1  ;;  %s1016_s12 = sphi %s1038_s12, %s13_s12  }
   0x2   : > { %p138_p1 = scmp.lt.s32.totalorder %s1016_s12, 9 }
   0x4   : > { %p139_p2 = pnand %p797_p0, %p138_p1 }
   0x5   : > { %v989_v0 = vld [vmem:[%s1215_s1] sm:$0xff] (!%p139_p2)   ;;  %v990_v1 = vld [vmem:[%s1215_s1 + $0x8] sm:$0xff] (!%p139_p2)   ;;  %s798_s18 = sshll.u32 (!%p139_p2), %s793_s13, 5  ;;  %v991_v2 = vld [vmem:[%s1215_s1 + $0x10] sm:$0xff] (!%p139_p2)   ;;  %vm330_vm0 = vcmask (!%p139_p2), 588800   ;;  %vm379_vm1 = vcmask (!%p139_p2), 1043456  }
   0x6   : > { %142 = sbr.rel (%p139_p2) target bundleno = 272 (0x110), region = 32  ;;  %927 = vmatprep.subr.bf16.mxu0 (!%p139_p2), %v989_v0  ;;  %969 = vmatprep.subr.bf16.mxu1 (!%p139_p2), %v989_v0  ;;  %p163_p3 = scmp.lt.s32.totalorder (!%p139_p2), %s798_s18, 255  ;;  %v992_v3 = vld [vmem:[%s1215_s1 + $0x18] sm:$0xff] (!%p139_p2)   ;;  %v993_v6 = vld [vmem:[%s1215_s1 + $0x20] ss:$0 sps:$4 sm:$0xff] (!%p139_p2)   ;;  %vm704_vm2 = vcmask (!%p139_p2), 60416  }
   0x7   : > { %928 = vmatpush3.bf16.msra.mxu0 (!%p139_p2), %v989_v0  ;;  %974 = vmatpush3.bf16.msra.mxu1 (!%p139_p2), %v989_v0  ;;  %v381_v7 = vsel (!%p139_p2), %vm379_vm1, %v993_v6, 0  ;;  %v1106_v22 = vld [vmem:[%s1216_s2] ss:$0 sm:$0xff] (!%p139_p2) }
   0x8   : > { %929 = vmatprep.subr.bf16.mxu0 (!%p139_p2), %v990_v1  ;;  %970 = vmatprep.subr.bf16.mxu1 (!%p139_p2), %v990_v1 }
   0xb   : > { %930 = vmatpush3.bf16.msra.mxu0 (!%p139_p2), %v990_v1  ;;  %975 = vmatpush3.bf16.msra.mxu1 (!%p139_p2), %v990_v1 }
   0xc   : > { %931 = vmatprep.subr.bf16.mxu0 (!%p139_p2), %v991_v2  ;;  %971 = vmatprep.subr.bf16.mxu1 (!%p139_p2), %v991_v2 }
   0xd   : > { %s1219_s18 = smov (!%p163_p3, %s798_s18), 255 }
   0xe   : > { %s799_s21 = sshll.u32 %s1219_s18, 2 }
   0xf   : > { %s1066_s26 = scalar_lea.vmem %s1214_s0, %s799_s21  ;;  %932 = vmatpush3.bf16.msra.mxu0 %v991_v2  ;;  %976 = vmatpush3.bf16.msra.mxu1 %v991_v2  ;;  %s1119_s6 = scalar_lea.vmem %s1217_s3, %s799_s21 }
  0x10   : > { %v994_v4 = vld [vmem:[%s1066_s26] sm:$0xff]   ;;  %933 = vmatprep.subr.bf16.mxu0 %v992_v3  ;;  %972 = vmatprep.subr.bf16.mxu1 %v992_v3  ;;  %v996_v8 = vld [vmem:[%s1066_s26 + $0x8] sm:$0xff]   ;;  %v998_v10 = vld [vmem:[%s1066_s26 + $0x10] sm:$0xff]  }
  0x11   : > { %v995_v5 = vld [vmem:[%s1066_s26 + $0x40] sm:$0xff]   ;;  %937 = vmatprep.mubr.msk.bf16.mxu0 %vm330_vm0, %v994_v4  ;;  %v997_v9 = vld [vmem:[%s1066_s26 + $0x48] sm:$0xff]   ;;  %v999_v11 = vld [vmem:[%s1066_s26 + $0x50] sm:$0xff]  }
  0x12   : > { %953 = vmatprep.mubr.msk.bf16.mxu1 %vm330_vm0, %v995_v5  ;;  %v1000_v12 = vld [vmem:[%s1066_s26 + $0x18] sm:$0xff]   ;;  %v1002_v14 = vld [vmem:[%s1066_s26 + $0x20] sm:$0xff]   ;;  %v1004_v16 = vld [vmem:[%s1066_s26 + $0x28] sm:$0xff]  }
  0x13   : > { %934 = vmatpush3.bf16.msra.mxu0 %v992_v3  ;;  %977 = vmatpush3.bf16.msra.mxu1 %v992_v3  ;;  %v1001_v13 = vld [vmem:[%s1066_s26 + $0x58] sm:$0xff]   ;;  %v1003_v15 = vld [vmem:[%s1066_s26 + $0x60] sm:$0xff]   ;;  %v1005_v17 = vld [vmem:[%s1066_s26 + $0x68] sm:$0xff]  }
  0x14   : > { %979 = vmatprep.subr.msk.bf16.mxu0 %vm379_vm1, %v993_v6  ;;  %980 = vmatprep.subr.msk.bf16.mxu1 %vm379_vm1, %v993_v6  ;;  %v1006_v18 = vld [vmem:[%s1066_s26 + $0x30] sm:$0xff]   ;;  %v1008_v20 = vld [vmem:[%s1066_s26 + $0x38] sm:$0xff]  }
  0x15   : > { %v1007_v19 = vld [vmem:[%s1066_s26 + $0x70] sm:$0xff]   ;;  %v1009_v21 = vld [vmem:[%s1066_s26 + $0x78] sm:$0xff]  }
  0x17   : > { %936 = vmatpush3.bf16.msra.mxu0 %v381_v7  ;;  %978 = vmatpush3.bf16.msra.mxu1 %v381_v7 }
  0x1a   : > { %938 = vmatmul.mubr.msk.bf16.vlgmr.msra.gmra.mrb[0].mxu0 %vm330_vm0, %v996_v8  ;;  %954 = vmatmul.mubr.msk.bf16.vlgmr.msra.gmra.mrb[0].mxu1 %vm330_vm0, %v997_v9 }
  0x1b   : > { %941 = vmatprep.mubr.msk.bf16.mxu0 %vm330_vm0, %v998_v10  ;;  %957 = vmatprep.mubr.msk.bf16.mxu1 %vm330_vm0, %v999_v11 }
  0x22   : > { %942 = vmatmul.mubr.msk.bf16.gmra.mrb[4].mxu0 %vm330_vm0, %v1000_v12  ;;  %958 = vmatmul.mubr.msk.bf16.gmra.mrb[4].mxu1 %vm330_vm0, %v1001_v13 }
  0x23   : > { %945 = vmatprep.mubr.msk.bf16.mxu0 %vm330_vm0, %v1002_v14  ;;  %961 = vmatprep.mubr.msk.bf16.mxu1 %vm330_vm0, %v1003_v15 }
  0x2a   : > { %946 = vmatmul.mubr.msk.bf16.gmra.mrb[8].mxu0 %vm330_vm0, %v1004_v16  ;;  %962 = vmatmul.mubr.msk.bf16.gmra.mrb[8].mxu1 %vm330_vm0, %v1005_v17 }
  0x2b   : > { %949 = vmatprep.mubr.msk.bf16.mxu0 %vm330_vm0, %v1006_v18  ;;  %965 = vmatprep.mubr.msk.bf16.mxu1 %vm330_vm0, %v1007_v19 }
  0x32   : > { %950 = vmatmul.mubr.msk.bf16.gmra.mrb[12].mxu0 %vm330_vm0, %v1008_v20  ;;  %966 = vmatmul.mubr.msk.bf16.gmra.mrb[12].mxu1 %vm330_vm0, %v1009_v21 }
  0xed   : > { %v939_v23 = vpop.f32.mrb[0].mxu0  ;;  %v955_v24 = vpop.f32.mrb[0].mxu1 }
  0xee   : > { %v426_v25 = vadd.f32 %v939_v23, %v1106_v22  ;;  %v490_v26 = vadd.f32 %v955_v24, %v1106_v22  ;;  %v417_v27 = vpop.f32.mrb[1].mxu0  ;;  %v481_v28 = vpop.f32.mrb[1].mxu1 }
  0xef   : > { %v418_v29 = vadd.f32 %v1106_v22, %v417_v27  ;;  %v482_v30 = vadd.f32 %v1106_v22, %v481_v28  ;;  %v940_v31 = vpop.f32.mrb[2].mxu0  ;;  %v956_v32 = vpop.f32.mrb[2].mxu1 }
  0xf0   : > { %v546_v33 = vmax.f32 %v426_v25, 0.0  ;;  %v562_v34 = vmax.f32 %v490_v26, 0.0  ;;  %v429_v35 = vadd.f32 %v940_v31, %v1106_v22  ;;  %v493_v36 = vadd.f32 %v956_v32, %v1106_v22  ;;  %v420_v37 = vpop.f32.mrb[3].mxu0  ;;  %v484_v38 = vpop.f32.mrb[3].mxu1 }
  0xf1   : > { %v544_v39 = vmax.f32 %v418_v29, 0.0  ;;  %v560_v40 = vmax.f32 %v482_v30, 0.0  ;;  %v421_v41 = vadd.f32 %v1106_v22, %v420_v37  ;;  %v485_v42 = vadd.f32 %v1106_v22, %v484_v38 }
  0xf2   : > { %v876_v43 = vpack.c.bf16 %v546_v33, %v546_v33  ;;  %v892_v44 = vpack.c.bf16 %v562_v34, %v562_v34  ;;  %v547_v45 = vmax.f32 %v429_v35, 0.0  ;;  %v563_v46 = vmax.f32 %v493_v36, 0.0 }
  0xf3   : > { %v874_v47 = vpack.c.bf16 %v544_v39, %v544_v39  ;;  %v890_v48 = vpack.c.bf16 %v560_v40, %v560_v40  ;;  %v545_v49 = vmax.f32 %v421_v41, 0.0  ;;  %v561_v50 = vmax.f32 %v485_v42, 0.0 }
  0xf4   : > { %707 = vst.msk [vmem:[%s1119_s6 + $0x8] sm:$0xf] %vm704_vm2, %v876_v43  ;;  %723 = vst.msk [vmem:[%s1119_s6 + $0x48] sm:$0xf] %vm704_vm2, %v892_v44  ;;  %v877_v51 = vpack.c.bf16 %v547_v45, %v547_v45  ;;  %v893_v52 = vpack.c.bf16 %v563_v46, %v563_v46 }
  0xf5   : > { %705 = vst.msk [vmem:[%s1119_s6] sm:$0xf] %vm704_vm2, %v874_v47  ;;  %721 = vst.msk [vmem:[%s1119_s6 + $0x40] sm:$0xf] %vm704_vm2, %v890_v48  ;;  %v875_v53 = vpack.c.bf16 %v545_v49, %v545_v49  ;;  %v891_v54 = vpack.c.bf16 %v561_v50, %v561_v50  ;;  %v943_v55 = vpop.f32.mrb[4].mxu0  ;;  %v959_v56 = vpop.f32.mrb[4].mxu1 }
  0xf6   : > { %708 = vst.msk [vmem:[%s1119_s6 + $0xc] sm:$0xf] %vm704_vm2, %v877_v51  ;;  %724 = vst.msk [vmem:[%s1119_s6 + $0x4c] sm:$0xf] %vm704_vm2, %v893_v52  ;;  %v442_v57 = vadd.f32 %v943_v55, %v1106_v22  ;;  %v506_v58 = vadd.f32 %v959_v56, %v1106_v22  ;;  %v433_v59 = vpop.f32.mrb[5].mxu0  ;;  %v497_v60 = vpop.f32.mrb[5].mxu1 }
  0xf7   : > { %706 = vst.msk [vmem:[%s1119_s6 + $0x4] sm:$0xf] %vm704_vm2, %v875_v53  ;;  %722 = vst.msk [vmem:[%s1119_s6 + $0x44] sm:$0xf] %vm704_vm2, %v891_v54  ;;  %v434_v61 = vadd.f32 %v1106_v22, %v433_v59  ;;  %v498_v62 = vadd.f32 %v1106_v22, %v497_v60  ;;  %v944_v63 = vpop.f32.mrb[6].mxu0  ;;  %v960_v0 = vpop.f32.mrb[6].mxu1 }
  0xf8   : > { %v550_v1 = vmax.f32 %v442_v57, 0.0  ;;  %v566_v2 = vmax.f32 %v506_v58, 0.0  ;;  %v445_v3 = vadd.f32 %v944_v63, %v1106_v22  ;;  %v509_v4 = vadd.f32 %v960_v0, %v1106_v22  ;;  %v436_v5 = vpop.f32.mrb[7].mxu0  ;;  %v500_v6 = vpop.f32.mrb[7].mxu1 }
  0xf9   : > { %v548_v7 = vmax.f32 %v434_v61, 0.0  ;;  %v564_v8 = vmax.f32 %v498_v62, 0.0  ;;  %v437_v9 = vadd.f32 %v1106_v22, %v436_v5  ;;  %v501_v10 = vadd.f32 %v1106_v22, %v500_v6 }
  0xfa   : > { %v880_v11 = vpack.c.bf16 %v550_v1, %v550_v1  ;;  %v896_v12 = vpack.c.bf16 %v566_v2, %v566_v2  ;;  %v551_v13 = vmax.f32 %v445_v3, 0.0  ;;  %v567_v14 = vmax.f32 %v509_v4, 0.0 }
  0xfb   : > { %v878_v15 = vpack.c.bf16 %v548_v7, %v548_v7  ;;  %v894_v16 = vpack.c.bf16 %v564_v8, %v564_v8  ;;  %v549_v17 = vmax.f32 %v437_v9, 0.0  ;;  %v565_v18 = vmax.f32 %v501_v10, 0.0 }
  0xfc   : > { %711 = vst.msk [vmem:[%s1119_s6 + $0x18] sm:$0xf] %vm704_vm2, %v880_v11  ;;  %727 = vst.msk [vmem:[%s1119_s6 + $0x58] sm:$0xf] %vm704_vm2, %v896_v12  ;;  %v881_v19 = vpack.c.bf16 %v551_v13, %v551_v13  ;;  %v897_v20 = vpack.c.bf16 %v567_v14, %v567_v14 }
  0xfd   : > { %709 = vst.msk [vmem:[%s1119_s6 + $0x10] sm:$0xf] %vm704_vm2, %v878_v15  ;;  %725 = vst.msk [vmem:[%s1119_s6 + $0x50] sm:$0xf] %vm704_vm2, %v894_v16  ;;  %v879_v21 = vpack.c.bf16 %v549_v17, %v549_v17  ;;  %v895_v23 = vpack.c.bf16 %v565_v18, %v565_v18  ;;  %v947_v24 = vpop.f32.mrb[8].mxu0  ;;  %v963_v25 = vpop.f32.mrb[8].mxu1 }
  0xfe   : > { %712 = vst.msk [vmem:[%s1119_s6 + $0x1c] sm:$0xf] %vm704_vm2, %v881_v19  ;;  %728 = vst.msk [vmem:[%s1119_s6 + $0x5c] sm:$0xf] %vm704_vm2, %v897_v20  ;;  %v458_v26 = vadd.f32 %v947_v24, %v1106_v22  ;;  %v522_v27 = vadd.f32 %v963_v25, %v1106_v22  ;;  %v449_v28 = vpop.f32.mrb[9].mxu0  ;;  %v513_v29 = vpop.f32.mrb[9].mxu1 }
  0xff   : > { %710 = vst.msk [vmem:[%s1119_s6 + $0x14] sm:$0xf] %vm704_vm2, %v879_v21  ;;  %726 = vst.msk [vmem:[%s1119_s6 + $0x54] sm:$0xf] %vm704_vm2, %v895_v23  ;;  %v450_v30 = vadd.f32 %v1106_v22, %v449_v28  ;;  %v514_v31 = vadd.f32 %v1106_v22, %v513_v29  ;;  %v948_v32 = vpop.f32.mrb[10].mxu0  ;;  %v964_v33 = vpop.f32.mrb[10].mxu1 }
 0x100   : > { %v554_v34 = vmax.f32 %v458_v26, 0.0  ;;  %v570_v35 = vmax.f32 %v522_v27, 0.0  ;;  %v461_v36 = vadd.f32 %v948_v32, %v1106_v22  ;;  %v525_v37 = vadd.f32 %v964_v33, %v1106_v22  ;;  %v452_v38 = vpop.f32.mrb[11].mxu0  ;;  %v516_v39 = vpop.f32.mrb[11].mxu1 }
 0x101   : > { %v552_v40 = vmax.f32 %v450_v30, 0.0  ;;  %v568_v41 = vmax.f32 %v514_v31, 0.0  ;;  %v453_v42 = vadd.f32 %v1106_v22, %v452_v38  ;;  %v517_v43 = vadd.f32 %v1106_v22, %v516_v39 }
 0x102   : > { %v884_v44 = vpack.c.bf16 %v554_v34, %v554_v34  ;;  %v900_v45 = vpack.c.bf16 %v570_v35, %v570_v35  ;;  %v555_v46 = vmax.f32 %v461_v36, 0.0  ;;  %v571_v47 = vmax.f32 %v525_v37, 0.0 }
 0x103   : > { %v882_v48 = vpack.c.bf16 %v552_v40, %v552_v40  ;;  %v898_v49 = vpack.c.bf16 %v568_v41, %v568_v41  ;;  %v553_v50 = vmax.f32 %v453_v42, 0.0  ;;  %v569_v51 = vmax.f32 %v517_v43, 0.0 }
 0x104   : > { %715 = vst.msk [vmem:[%s1119_s6 + $0x28] sm:$0xf] %vm704_vm2, %v884_v44  ;;  %731 = vst.msk [vmem:[%s1119_s6 + $0x68] sm:$0xf] %vm704_vm2, %v900_v45  ;;  %v885_v52 = vpack.c.bf16 %v555_v46, %v555_v46  ;;  %v901_v53 = vpack.c.bf16 %v571_v47, %v571_v47 }
 0x105   : > { %713 = vst.msk [vmem:[%s1119_s6 + $0x20] sm:$0xf] %vm704_vm2, %v882_v48  ;;  %729 = vst.msk [vmem:[%s1119_s6 + $0x60] sm:$0xf] %vm704_vm2, %v898_v49  ;;  %v883_v54 = vpack.c.bf16 %v553_v50, %v553_v50  ;;  %v899_v55 = vpack.c.bf16 %v569_v51, %v569_v51  ;;  %v951_v56 = vpop.f32.mrb[12].mxu0  ;;  %v967_v57 = vpop.f32.mrb[12].mxu1 }
 0x106   : > { %716 = vst.msk [vmem:[%s1119_s6 + $0x2c] sm:$0xf] %vm704_vm2, %v885_v52  ;;  %732 = vst.msk [vmem:[%s1119_s6 + $0x6c] sm:$0xf] %vm704_vm2, %v901_v53  ;;  %v474_v58 = vadd.f32 %v951_v56, %v1106_v22  ;;  %v538_v59 = vadd.f32 %v967_v57, %v1106_v22  ;;  %v465_v60 = vpop.f32.mrb[13].mxu0  ;;  %v529_v61 = vpop.f32.mrb[13].mxu1 }
 0x107   : > { %714 = vst.msk [vmem:[%s1119_s6 + $0x24] sm:$0xf] %vm704_vm2, %v883_v54  ;;  %730 = vst.msk [vmem:[%s1119_s6 + $0x64] sm:$0xf] %vm704_vm2, %v899_v55  ;;  %v466_v62 = vadd.f32 %v1106_v22, %v465_v60  ;;  %v530_v63 = vadd.f32 %v1106_v22, %v529_v61  ;;  %v952_v0 = vpop.f32.mrb[14].mxu0  ;;  %v968_v1 = vpop.f32.mrb[14].mxu1 }
 0x108   : > { %v558_v2 = vmax.f32 %v474_v58, 0.0  ;;  %v574_v3 = vmax.f32 %v538_v59, 0.0  ;;  %v477_v4 = vadd.f32 %v952_v0, %v1106_v22  ;;  %v541_v5 = vadd.f32 %v968_v1, %v1106_v22  ;;  %v468_v6 = vpop.f32.mrb[15].mxu0  ;;  %v532_v7 = vpop.f32.mrb[15].mxu1 }
 0x109   : > { %v556_v8 = vmax.f32 %v466_v62, 0.0  ;;  %v572_v9 = vmax.f32 %v530_v63, 0.0  ;;  %v469_v10 = vadd.f32 %v1106_v22, %v468_v6  ;;  %v533_v11 = vadd.f32 %v1106_v22, %v532_v7 }
 0x10a   : > { %v888_v12 = vpack.c.bf16 %v558_v2, %v558_v2  ;;  %v904_v13 = vpack.c.bf16 %v574_v3, %v574_v3  ;;  %v559_v14 = vmax.f32 %v477_v4, 0.0  ;;  %v575_v15 = vmax.f32 %v541_v5, 0.0 }
 0x10b   : > { %v886_v16 = vpack.c.bf16 %v556_v8, %v556_v8  ;;  %v902_v17 = vpack.c.bf16 %v572_v9, %v572_v9  ;;  %v557_v18 = vmax.f32 %v469_v10, 0.0  ;;  %v573_v19 = vmax.f32 %v533_v11, 0.0 }
 0x10c   : > { %719 = vst.msk [vmem:[%s1119_s6 + $0x38] sm:$0xf] %vm704_vm2, %v888_v12  ;;  %735 = vst.msk [vmem:[%s1119_s6 + $0x78] sm:$0xf] %vm704_vm2, %v904_v13  ;;  %v889_v20 = vpack.c.bf16 %v559_v14, %v559_v14  ;;  %v905_v21 = vpack.c.bf16 %v575_v15, %v575_v15 }
 0x10d   : > { %717 = vst.msk [vmem:[%s1119_s6 + $0x30] sm:$0xf] %vm704_vm2, %v886_v16  ;;  %733 = vst.msk [vmem:[%s1119_s6 + $0x70] sm:$0xf] %vm704_vm2, %v902_v17  ;;  %v887_v22 = vpack.c.bf16 %v557_v18, %v557_v18  ;;  %v903_v23 = vpack.c.bf16 %v573_v19, %v573_v19 }
 0x10e   : > { %720 = vst.msk [vmem:[%s1119_s6 + $0x3c] sm:$0xf] %vm704_vm2, %v889_v20  ;;  %736 = vst.msk [vmem:[%s1119_s6 + $0x7c] sm:$0xf] %vm704_vm2, %v905_v21 }
 0x10f   : > { %718 = vst.msk [vmem:[%s1119_s6 + $0x34] sm:$0xf] %vm704_vm2, %v887_v22  ;;  %734 = vst.msk [vmem:[%s1119_s6 + $0x74] sm:$0xf] %vm704_vm2, %v903_v23 }
 0x110 PF: > { %s13_s12 = sadd.s32 1, %s1016_s12  }
 0x111   : > { %p10_p4 = scmp.ge.s32.totalorder %s13_s12, 10  }
 0x113   :  { %12 = sbr.rel (!%p10_p4) target bundleno = 1 (0x1), region = 62 }

// kernel: _lambda_.71
= control target key start
LH: loop header
LB: loop body
LE: loop exit
PB: predicated region body
PF: predicated region fallthrough
CT: control target
= control target key end

     0   :  { %s814_s12 = smov 0   ;;  %s987_s0 = inlined_call_operand.vmem [shape: bf16[2048,72], index: 0, kind: input, shape index: {}]   ;;  %s988_s1 = inlined_call_operand.vmem [shape: bf16[72,2], index: 1, kind: input, shape index: {}]   ;;  %s989_s2 = inlined_call_operand.vmem [shape: f32[1,2], index: 2, kind: input, shape index: {}]   ;;  %s990_s3 = inlined_call_operand.vmem [shape: f32[2048,2], index: 3, kind: output, shape index: {}]  }
   0x1 LB: > { %s633_s13 = sadd.s32 4294967295, %s792_s12   ;;  %p637_p0 = scmp.ge.s32.totalorder %s792_s12, 1  ;;  %s792_s12 = sphi %s814_s12, %s13_s12  }
   0x2   : > { %p138_p1 = scmp.lt.s32.totalorder %s792_s12, 9 }
   0x4   : > { %p139_p2 = pnand %p637_p0, %p138_p1 }
   0x5   : > { %v765_v0 = vld [vmem:[%s988_s1] sm:$0xff] (!%p139_p2)   ;;  %v766_v1 = vld [vmem:[%s988_s1 + $0x8] sm:$0xff] (!%p139_p2)   ;;  %s638_s18 = sshll.u32 (!%p139_p2), %s633_s13, 5  ;;  %v767_v2 = vld [vmem:[%s988_s1 + $0x10] sm:$0xff] (!%p139_p2)   ;;  %vm330_vm0 = vcmask (!%p139_p2), 588800   ;;  %vm379_vm1 = vcmask (!%p139_p2), 1043456  }
   0x6   : > { %142 = sbr.rel (%p139_p2) target bundleno = 268 (0x10c), region = 32  ;;  %703 = vmatprep.subr.bf16.mxu0 (!%p139_p2), %v765_v0  ;;  %745 = vmatprep.subr.bf16.mxu1 (!%p139_p2), %v765_v0  ;;  %p163_p3 = scmp.lt.s32.totalorder (!%p139_p2), %s638_s18, 255  ;;  %v768_v3 = vld [vmem:[%s988_s1 + $0x18] sm:$0xff] (!%p139_p2)   ;;  %v769_v6 = vld [vmem:[%s988_s1 + $0x20] ss:$0 sps:$4 sm:$0xff] (!%p139_p2)   ;;  %vm544_vm2 = vcmask (!%p139_p2), 15360  }
   0x7   : > { %704 = vmatpush3.bf16.msra.mxu0 (!%p139_p2), %v765_v0  ;;  %750 = vmatpush3.bf16.msra.mxu1 (!%p139_p2), %v765_v0  ;;  %v381_v7 = vsel (!%p139_p2), %vm379_vm1, %v769_v6, 0  ;;  %v881_v22 = vld [vmem:[%s989_s2] ss:$0 sm:$0xff] (!%p139_p2) }
   0x8   : > { %705 = vmatprep.subr.bf16.mxu0 (!%p139_p2), %v766_v1  ;;  %746 = vmatprep.subr.bf16.mxu1 (!%p139_p2), %v766_v1 }
   0xb   : > { %706 = vmatpush3.bf16.msra.mxu0 (!%p139_p2), %v766_v1  ;;  %751 = vmatpush3.bf16.msra.mxu1 (!%p139_p2), %v766_v1 }
   0xc   : > { %707 = vmatprep.subr.bf16.mxu0 (!%p139_p2), %v767_v2  ;;  %747 = vmatprep.subr.bf16.mxu1 (!%p139_p2), %v767_v2 }
   0xd   : > { %s992_s18 = smov (!%p163_p3, %s638_s18), 255 }
   0xe   : > { %s639_s21 = sshll.u32 %s992_s18, 2  ;;  %s641_s29 = sshll.u32 %s992_s18, 3 }
   0xf   : > { %s840_s26 = scalar_lea.vmem %s987_s0, %s639_s21  ;;  %708 = vmatpush3.bf16.msra.mxu0 %v767_v2  ;;  %752 = vmatpush3.bf16.msra.mxu1 %v767_v2  ;;  %s886_s7 = scalar_lea.vmem %s990_s3, %s641_s29 }
  0x10   : > { %v770_v4 = vld [vmem:[%s840_s26] sm:$0xff]   ;;  %709 = vmatprep.subr.bf16.mxu0 %v768_v3  ;;  %748 = vmatprep.subr.bf16.mxu1 %v768_v3  ;;  %v772_v8 = vld [vmem:[%s840_s26 + $0x8] sm:$0xff]   ;;  %v774_v10 = vld [vmem:[%s840_s26 + $0x10] sm:$0xff]  }
  0x11   : > { %v771_v5 = vld [vmem:[%s840_s26 + $0x40] sm:$0xff]   ;;  %713 = vmatprep.mubr.msk.bf16.mxu0 %vm330_vm0, %v770_v4  ;;  %v773_v9 = vld [vmem:[%s840_s26 + $0x48] sm:$0xff]   ;;  %v775_v11 = vld [vmem:[%s840_s26 + $0x50] sm:$0xff]  }
  0x12   : > { %729 = vmatprep.mubr.msk.bf16.mxu1 %vm330_vm0, %v771_v5  ;;  %v776_v12 = vld [vmem:[%s840_s26 + $0x18] sm:$0xff]   ;;  %v778_v14 = vld [vmem:[%s840_s26 + $0x20] sm:$0xff]   ;;  %v780_v16 = vld [vmem:[%s840_s26 + $0x28] sm:$0xff]  }
  0x13   : > { %710 = vmatpush3.bf16.msra.mxu0 %v768_v3  ;;  %753 = vmatpush3.bf16.msra.mxu1 %v768_v3  ;;  %v777_v13 = vld [vmem:[%s840_s26 + $0x58] sm:$0xff]   ;;  %v779_v15 = vld [vmem:[%s840_s26 + $0x60] sm:$0xff]   ;;  %v781_v17 = vld [vmem:[%s840_s26 + $0x68] sm:$0xff]  }
  0x14   : > { %755 = vmatprep.subr.msk.bf16.mxu0 %vm379_vm1, %v769_v6  ;;  %756 = vmatprep.subr.msk.bf16.mxu1 %vm379_vm1, %v769_v6  ;;  %v782_v18 = vld [vmem:[%s840_s26 + $0x30] sm:$0xff]   ;;  %v784_v20 = vld [vmem:[%s840_s26 + $0x38] sm:$0xff]  }
  0x15   : > { %v783_v19 = vld [vmem:[%s840_s26 + $0x70] sm:$0xff]   ;;  %v785_v21 = vld [vmem:[%s840_s26 + $0x78] sm:$0xff]  }
  0x17   : > { %712 = vmatpush3.bf16.msra.mxu0 %v381_v7  ;;  %754 = vmatpush3.bf16.msra.mxu1 %v381_v7 }
  0x1a   : > { %714 = vmatmul.mubr.msk.bf16.vlgmr.msra.gmra.mrb[0].mxu0 %vm330_vm0, %v772_v8  ;;  %730 = vmatmul.mubr.msk.bf16.vlgmr.msra.gmra.mrb[0].mxu1 %vm330_vm0, %v773_v9 }
  0x1b   : > { %717 = vmatprep.mubr.msk.bf16.mxu0 %vm330_vm0, %v774_v10  ;;  %733 = vmatprep.mubr.msk.bf16.mxu1 %vm330_vm0, %v775_v11 }
  0x22   : > { %718 = vmatmul.mubr.msk.bf16.gmra.mrb[4].mxu0 %vm330_vm0, %v776_v12  ;;  %734 = vmatmul.mubr.msk.bf16.gmra.mrb[4].mxu1 %vm330_vm0, %v777_v13 }
  0x23   : > { %721 = vmatprep.mubr.msk.bf16.mxu0 %vm330_vm0, %v778_v14  ;;  %737 = vmatprep.mubr.msk.bf16.mxu1 %vm330_vm0, %v779_v15 }
  0x2a   : > { %722 = vmatmul.mubr.msk.bf16.gmra.mrb[8].mxu0 %vm330_vm0, %v780_v16  ;;  %738 = vmatmul.mubr.msk.bf16.gmra.mrb[8].mxu1 %vm330_vm0, %v781_v17 }
  0x2b   : > { %725 = vmatprep.mubr.msk.bf16.mxu0 %vm330_vm0, %v782_v18  ;;  %741 = vmatprep.mubr.msk.bf16.mxu1 %vm330_vm0, %v783_v19 }
  0x32   : > { %726 = vmatmul.mubr.msk.bf16.gmra.mrb[12].mxu0 %vm330_vm0, %v784_v20  ;;  %742 = vmatmul.mubr.msk.bf16.gmra.mrb[12].mxu1 %vm330_vm0, %v785_v21 }
  0xed   : > { %v715_v23 = vpop.f32.mrb[0].mxu0  ;;  %v731_v24 = vpop.f32.mrb[0].mxu1 }
  0xee   : > { %v426_v25 = vadd.f32 %v715_v23, %v881_v22  ;;  %v490_v26 = vadd.f32 %v731_v24, %v881_v22  ;;  %v417_v27 = vpop.f32.mrb[1].mxu0  ;;  %v481_v28 = vpop.f32.mrb[1].mxu1 }
  0xef   : > { %v418_v29 = vadd.f32 %v881_v22, %v417_v27  ;;  %v482_v30 = vadd.f32 %v881_v22, %v481_v28  ;;  %v716_v31 = vpop.f32.mrb[2].mxu0  ;;  %v732_v32 = vpop.f32.mrb[2].mxu1 }
  0xf0   : > { %547 = vst.msk [vmem:[%s886_s7 + $0x10] sm:$0xff] %vm544_vm2, %v426_v25  ;;  %563 = vst.msk [vmem:[%s886_s7 + $0x90] sm:$0xff] %vm544_vm2, %v490_v26  ;;  %v429_v33 = vadd.f32 %v716_v31, %v881_v22  ;;  %v493_v34 = vadd.f32 %v732_v32, %v881_v22  ;;  %v420_v35 = vpop.f32.mrb[3].mxu0  ;;  %v484_v36 = vpop.f32.mrb[3].mxu1 }
  0xf1   : > { %545 = vst.msk [vmem:[%s886_s7] sm:$0xff] %vm544_vm2, %v418_v29  ;;  %561 = vst.msk [vmem:[%s886_s7 + $0x80] sm:$0xff] %vm544_vm2, %v482_v30  ;;  %v421_v37 = vadd.f32 %v881_v22, %v420_v35  ;;  %v485_v38 = vadd.f32 %v881_v22, %v484_v36 }
  0xf2   : > { %548 = vst.msk [vmem:[%s886_s7 + $0x18] sm:$0xff] %vm544_vm2, %v429_v33  ;;  %564 = vst.msk [vmem:[%s886_s7 + $0x98] sm:$0xff] %vm544_vm2, %v493_v34 }
  0xf3   : > { %546 = vst.msk [vmem:[%s886_s7 + $0x8] sm:$0xff] %vm544_vm2, %v421_v37  ;;  %562 = vst.msk [vmem:[%s886_s7 + $0x88] sm:$0xff] %vm544_vm2, %v485_v38 }
  0xf5   : > { %v719_v39 = vpop.f32.mrb[4].mxu0  ;;  %v735_v40 = vpop.f32.mrb[4].mxu1 }
  0xf6   : > { %v442_v41 = vadd.f32 %v719_v39, %v881_v22  ;;  %v506_v42 = vadd.f32 %v735_v40, %v881_v22  ;;  %v433_v43 = vpop.f32.mrb[5].mxu0  ;;  %v497_v44 = vpop.f32.mrb[5].mxu1 }
  0xf7   : > { %v434_v45 = vadd.f32 %v881_v22, %v433_v43  ;;  %v498_v46 = vadd.f32 %v881_v22, %v497_v44  ;;  %v720_v47 = vpop.f32.mrb[6].mxu0  ;;  %v736_v48 = vpop.f32.mrb[6].mxu1 }
  0xf8   : > { %551 = vst.msk [vmem:[%s886_s7 + $0x30] sm:$0xff] %vm544_vm2, %v442_v41  ;;  %567 = vst.msk [vmem:[%s886_s7 + $0xb0] sm:$0xff] %vm544_vm2, %v506_v42  ;;  %v445_v49 = vadd.f32 %v720_v47, %v881_v22  ;;  %v509_v50 = vadd.f32 %v736_v48, %v881_v22  ;;  %v436_v51 = vpop.f32.mrb[7].mxu0  ;;  %v500_v52 = vpop.f32.mrb[7].mxu1 }
  0xf9   : > { %549 = vst.msk [vmem:[%s886_s7 + $0x20] sm:$0xff] %vm544_vm2, %v434_v45  ;;  %565 = vst.msk [vmem:[%s886_s7 + $0xa0] sm:$0xff] %vm544_vm2, %v498_v46  ;;  %v437_v53 = vadd.f32 %v881_v22, %v436_v51  ;;  %v501_v54 = vadd.f32 %v881_v22, %v500_v52 }
  0xfa   : > { %552 = vst.msk [vmem:[%s886_s7 + $0x38] sm:$0xff] %vm544_vm2, %v445_v49  ;;  %568 = vst.msk [vmem:[%s886_s7 + $0xb8] sm:$0xff] %vm544_vm2, %v509_v50 }
  0xfb   : > { %550 = vst.msk [vmem:[%s886_s7 + $0x28] sm:$0xff] %vm544_vm2, %v437_v53  ;;  %566 = vst.msk [vmem:[%s886_s7 + $0xa8] sm:$0xff] %vm544_vm2, %v501_v54 }
  0xfd   : > { %v723_v55 = vpop.f32.mrb[8].mxu0  ;;  %v739_v56 = vpop.f32.mrb[8].mxu1 }
  0xfe   : > { %v458_v57 = vadd.f32 %v723_v55, %v881_v22  ;;  %v522_v58 = vadd.f32 %v739_v56, %v881_v22  ;;  %v449_v59 = vpop.f32.mrb[9].mxu0  ;;  %v513_v60 = vpop.f32.mrb[9].mxu1 }
  0xff   : > { %v450_v61 = vadd.f32 %v881_v22, %v449_v59  ;;  %v514_v62 = vadd.f32 %v881_v22, %v513_v60  ;;  %v724_v63 = vpop.f32.mrb[10].mxu0  ;;  %v740_v0 = vpop.f32.mrb[10].mxu1 }
 0x100   : > { %555 = vst.msk [vmem:[%s886_s7 + $0x50] sm:$0xff] %vm544_vm2, %v458_v57  ;;  %571 = vst.msk [vmem:[%s886_s7 + $0xd0] sm:$0xff] %vm544_vm2, %v522_v58  ;;  %v461_v1 = vadd.f32 %v724_v63, %v881_v22  ;;  %v525_v2 = vadd.f32 %v740_v0, %v881_v22  ;;  %v452_v3 = vpop.f32.mrb[11].mxu0  ;;  %v516_v4 = vpop.f32.mrb[11].mxu1 }
 0x101   : > { %553 = vst.msk [vmem:[%s886_s7 + $0x40] sm:$0xff] %vm544_vm2, %v450_v61  ;;  %569 = vst.msk [vmem:[%s886_s7 + $0xc0] sm:$0xff] %vm544_vm2, %v514_v62  ;;  %v453_v5 = vadd.f32 %v881_v22, %v452_v3  ;;  %v517_v6 = vadd.f32 %v881_v22, %v516_v4 }
 0x102   : > { %556 = vst.msk [vmem:[%s886_s7 + $0x58] sm:$0xff] %vm544_vm2, %v461_v1  ;;  %572 = vst.msk [vmem:[%s886_s7 + $0xd8] sm:$0xff] %vm544_vm2, %v525_v2 }
 0x103   : > { %554 = vst.msk [vmem:[%s886_s7 + $0x48] sm:$0xff] %vm544_vm2, %v453_v5  ;;  %570 = vst.msk [vmem:[%s886_s7 + $0xc8] sm:$0xff] %vm544_vm2, %v517_v6 }
 0x105   : > { %v727_v7 = vpop.f32.mrb[12].mxu0  ;;  %v743_v8 = vpop.f32.mrb[12].mxu1 }
 0x106   : > { %v474_v9 = vadd.f32 %v727_v7, %v881_v22  ;;  %v538_v10 = vadd.f32 %v743_v8, %v881_v22  ;;  %v465_v11 = vpop.f32.mrb[13].mxu0  ;;  %v529_v12 = vpop.f32.mrb[13].mxu1 }
 0x107   : > { %v466_v13 = vadd.f32 %v881_v22, %v465_v11  ;;  %v530_v14 = vadd.f32 %v881_v22, %v529_v12  ;;  %v728_v15 = vpop.f32.mrb[14].mxu0  ;;  %v744_v16 = vpop.f32.mrb[14].mxu1 }
 0x108   : > { %559 = vst.msk [vmem:[%s886_s7 + $0x70] sm:$0xff] %vm544_vm2, %v474_v9  ;;  %575 = vst.msk [vmem:[%s886_s7 + $0xf0] sm:$0xff] %vm544_vm2, %v538_v10  ;;  %v477_v17 = vadd.f32 %v728_v15, %v881_v22  ;;  %v541_v18 = vadd.f32 %v744_v16, %v881_v22  ;;  %v468_v19 = vpop.f32.mrb[15].mxu0  ;;  %v532_v20 = vpop.f32.mrb[15].mxu1 }
 0x109   : > { %557 = vst.msk [vmem:[%s886_s7 + $0x60] sm:$0xff] %vm544_vm2, %v466_v13  ;;  %573 = vst.msk [vmem:[%s886_s7 + $0xe0] sm:$0xff] %vm544_vm2, %v530_v14  ;;  %v469_v21 = vadd.f32 %v881_v22, %v468_v19  ;;  %v533_v23 = vadd.f32 %v881_v22, %v532_v20 }
 0x10a   : > { %560 = vst.msk [vmem:[%s886_s7 + $0x78] sm:$0xff] %vm544_vm2, %v477_v17  ;;  %576 = vst.msk [vmem:[%s886_s7 + $0xf8] sm:$0xff] %vm544_vm2, %v541_v18 }
 0x10b   : > { %558 = vst.msk [vmem:[%s886_s7 + $0x68] sm:$0xff] %vm544_vm2, %v469_v21  ;;  %574 = vst.msk [vmem:[%s886_s7 + $0xe8] sm:$0xff] %vm544_vm2, %v533_v23 }
 0x10c PF: > { %s13_s12 = sadd.s32 1, %s792_s12  }
 0x10d   : > { %p10_p4 = scmp.ge.s32.totalorder %s13_s12, 10  }
 0x10f   :  { %12 = sbr.rel (!%p10_p4) target bundleno = 1 (0x1), region = 62 }

</bundles_post_ra>
